<compile_context>
chip_gen: v6e
topology: v6e:2x2x1
jax: 0.10.0
libtpu: 0.0.40
codegen_flags: <defaults>
</compile_context>

<pallas_src>
import functools

import jax
import jax.numpy as jnp
from jax.experimental import pallas as pl
from jax.experimental.pallas import tpu as pltpu


_LN_EPS = 1e-5
_VMEM_LIMIT = 32 * 1024 * 1024  # explicit scoped-VMEM cap; safe on v5e/v6e/v7x


def _residual_layer_norm(x, y, gamma, beta):
    """LayerNorm(x + y) over the last axis, f32 math, PyTorch semantics."""
    z = x + y
    mean = jnp.mean(z, axis=-1, keepdims=True)
    c = z - mean
    var = jnp.mean(c * c, axis=-1, keepdims=True)
    z_norm = c * jax.lax.rsqrt(var + _LN_EPS)
    return z_norm * gamma + beta


# ---------------------------------------------------------------------------
# Fully fused encoder kernel.
# Grid = (batch, layer).  The (S, E) activation is carried across the layer
# axis in VMEM scratch; per-layer weights stream in via their index_map.
# ---------------------------------------------------------------------------
def _encoder_kernel(x_ref, mask_ref, wemb_ref, bemb_ref, pe_ref,
                    wq_ref, bq_ref, wk_ref, bk_ref, wv_ref, bv_ref,
                    wo_ref, bo_ref, ga_ref, ba_ref,
                    w1_ref, b1_ref, w2_ref, b2_ref, gf_ref, bf_ref,
                    o_ref, state_ref, *, num_head, dim_k, dim_v):
    l = pl.program_id(1)

    # --- layer 0: token embedding (nn.Linear) + positional encoding -------
    @pl.when(l == 0)
    def _():
        xin = x_ref[0].astype(jnp.float32)                        # (S, V)
        state_ref[...] = (jnp.dot(xin, wemb_ref[...],
                                  preferred_element_type=jnp.float32)
                          + bemb_ref[...] + pe_ref[...])

    x = state_ref[...]                                            # (S, E) f32
    mask = mask_ref[0]                                            # (S, S)

    # --- Attention_Blosk ----------------------------------------------------
    q = jnp.dot(x, wq_ref[0], preferred_element_type=jnp.float32) + bq_ref[0]
    k = jnp.dot(x, wk_ref[0], preferred_element_type=jnp.float32) + bk_ref[0]
    v = jnp.dot(x, wv_ref[0], preferred_element_type=jnp.float32) + bv_ref[0]

    scale = 1.0 / (dim_k ** 0.5)
    neg_inf = jnp.float32(-1e9)
    heads = []
    for h in range(num_head):                                     # static unroll
        qh = q[:, h * dim_k:(h + 1) * dim_k]                      # (S, Dk)
        kh = k[:, h * dim_k:(h + 1) * dim_k]                      # (S, Dk)
        vh = v[:, h * dim_v:(h + 1) * dim_v]                      # (S, Dv)
        # scores = qh @ kh^T : contract last dims, no explicit transpose
        s = jax.lax.dot_general(qh, kh, (((1,), (1,)), ((), ())),
                                preferred_element_type=jnp.float32) * scale
        s = jnp.where(mask == 0.0, neg_inf, s)
        s = s - jnp.max(s, axis=-1, keepdims=True)
        p = jnp.exp(s)
        p = p / jnp.sum(p, axis=-1, keepdims=True)
        heads.append(jnp.dot(p, vh, preferred_element_type=jnp.float32))
    a = jnp.concatenate(heads, axis=-1)                           # (S, H*Dv)

    y = jnp.dot(a, wo_ref[0], preferred_element_type=jnp.float32) + bo_ref[0]
    # dropout (eval) == identity
    x = _residual_layer_norm(x, y, ga_ref[0], ba_ref[0])

    # --- Feed_Forward_Net ----------------------------------------------------
    hmid = jnp.dot(x, w1_ref[0], preferred_element_type=jnp.float32) + b1_ref[0]
    hmid = jnp.maximum(hmid, 0.0)
    y2 = jnp.dot(hmid, w2_ref[0], preferred_element_type=jnp.float32) + b2_ref[0]
    # dropout (eval) == identity
    x = _residual_layer_norm(x, y2, gf_ref[0], bf_ref[0])

    state_ref[...] = x

    # --- final layer: write the result once, lane-dense -----------------------
    @pl.when(l == pl.num_programs(1) - 1)
    def _():
        o_ref[...] = x[None].astype(o_ref.dtype)


def encoder_forward(x, mask, params, *, num_head, dim_k, dim_v):
    B, S, V = x.shape
    E = params["w_emb"].shape[1]
    layers = params["layers"]
    L = len(layers)
    dqk = num_head * dim_k
    dvh = num_head * dim_v
    mid = layers[0]["w1"].shape[1]

    def stk(name):
        return jnp.stack([lp[name] for lp in layers], axis=0)

    def const_spec(shape):
        nd = len(shape)
        return pl.BlockSpec(shape, lambda b, l: (0,) * nd)

    def per_layer_spec(shape):
        nd = len(shape)
        return pl.BlockSpec((1,) + shape, lambda b, l: (l,) + (0,) * nd)

    kern = functools.partial(_encoder_kernel, num_head=num_head,
                             dim_k=dim_k, dim_v=dim_v)

    return pl.pallas_call(
        kern,
        out_shape=jax.ShapeDtypeStruct((B, S, E), x.dtype),
        grid_spec=pltpu.PrefetchScalarGridSpec(
            num_scalar_prefetch=0,
            grid=(B, L),
            in_specs=[
                pl.BlockSpec((1, S, V), lambda b, l: (b, 0, 0)),   # x (per batch)
                pl.BlockSpec((1, S, S), lambda b, l: (b, 0, 0)),   # mask (per batch)
                const_spec((V, E)),                                # w_emb
                const_spec((1, E)),                                # b_emb
                const_spec((S, E)),                                # pe
                per_layer_spec((E, dqk)), per_layer_spec((1, dqk)),   # wq, bq
                per_layer_spec((E, dqk)), per_layer_spec((1, dqk)),   # wk, bk
                per_layer_spec((E, dvh)), per_layer_spec((1, dvh)),   # wv, bv
                per_layer_spec((dvh, E)), per_layer_spec((1, E)),     # wo, bo
                per_layer_spec((1, E)), per_layer_spec((1, E)),       # gamma_a, beta_a
                per_layer_spec((E, mid)), per_layer_spec((1, mid)),   # w1, b1
                per_layer_spec((mid, E)), per_layer_spec((1, E)),     # w2, b2
                per_layer_spec((1, E)), per_layer_spec((1, E)),       # gamma_f, beta_f
            ],
            out_specs=pl.BlockSpec((1, S, E), lambda b, l: (b, 0, 0)),
            scratch_shapes=[pltpu.VMEM((S, E), jnp.float32)],
        ),
        compiler_params=pltpu.CompilerParams(
            dimension_semantics=("parallel", "arbitrary"),
            vmem_limit_bytes=_VMEM_LIMIT,
        ),
    )(x, mask,
      params["w_emb"], params["b_emb"], params["pe"],
      stk("wq"), stk("bq"), stk("wk"), stk("bk"), stk("wv"), stk("bv"),
      stk("wo"), stk("bo"), stk("gamma_a"), stk("beta_a"),
      stk("w1"), stk("b1"), stk("w2"), stk("b2"), stk("gamma_f"), stk("beta_f"))


# ---------------------------------------------------------------------------
# Parameter construction (matches PyTorch module layouts, stored pre-transposed
# as (in_features, out_features)) and a pure-JAX reference.
# ---------------------------------------------------------------------------
def positional_encoding(seq_len, embed):
    pos = jnp.arange(seq_len, dtype=jnp.float32)[:, None]
    k = jnp.exp(jnp.log(10000.0) * -jnp.arange(0, embed, 2, dtype=jnp.float32) / embed)
    ang = pos * k
    pe = jnp.zeros((seq_len, embed), jnp.float32)
    pe = pe.at[:, 0::2].set(jnp.sin(ang))
    pe = pe.at[:, 1::2].set(jnp.cos(ang))
    return pe


def init_params(key, *, vocab, embed, num_head, dim_k, dim_v, mid, num_layers, seq_len):
    keys = jax.random.split(key, num_layers + 1)
    ke = jax.random.split(keys[0], 2)
    params = {
        "w_emb": jax.random.normal(ke[0], (vocab, embed), jnp.float32) / vocab ** 0.5,
        "b_emb": jax.random.normal(ke[1], (1, embed), jnp.float32) * 0.01,
        "pe": positional_encoding(seq_len, embed),
        "layers": [],
    }
    dqk, dvh = num_head * dim_k, num_head * dim_v
    for l in range(num_layers):
        lk = jax.random.split(keys[l + 1], 12)
        params["layers"].append({
            "wq": jax.random.normal(lk[0], (embed, dqk), jnp.float32) / embed ** 0.5,
            "bq": jax.random.normal(lk[1], (1, dqk), jnp.float32) * 0.01,
            "wk": jax.random.normal(lk[2], (embed, dqk), jnp.float32) / embed ** 0.5,
            "bk": jax.random.normal(lk[3], (1, dqk), jnp.float32) * 0.01,
            "wv": jax.random.normal(lk[4], (embed, dvh), jnp.float32) / embed ** 0.5,
            "bv": jax.random.normal(lk[5], (1, dvh), jnp.float32) * 0.01,
            "wo": jax.random.normal(lk[6], (dvh, embed), jnp.float32) / dvh ** 0.5,
            "bo": jax.random.normal(lk[7], (1, embed), jnp.float32) * 0.01,
            "gamma_a": jnp.ones((1, embed), jnp.float32),
            "beta_a": jnp.zeros((1, embed), jnp.float32),
            "w1": jax.random.normal(lk[8], (embed, mid), jnp.float32) / embed ** 0.5,
            "b1": jax.random.normal(lk[9], (1, mid), jnp.float32) * 0.01,
            "w2": jax.random.normal(lk[10], (mid, embed), jnp.float32) / mid ** 0.5,
            "b2": jax.random.normal(lk[11], (1, embed), jnp.float32) * 0.01,
            "gamma_f": jnp.ones((1, embed), jnp.float32),
            "beta_f": jnp.zeros((1, embed), jnp.float32),
        })
    return params


def _ref_layer_norm(z, gamma, beta):
    mean = jnp.mean(z, axis=-1, keepdims=True)
    var = jnp.mean((z - mean) ** 2, axis=-1, keepdims=True)
    return (z - mean) / jnp.sqrt(var + _LN_EPS) * gamma + beta


def reference_encoder(x, mask, params, *, num_head, dim_k, dim_v):
    B, S, _ = x.shape
    out = x @ params["w_emb"] + params["b_emb"][0]
    out = out + params["pe"][None]
    for lp in params["layers"]:
        q = (out @ lp["wq"] + lp["bq"][0]).reshape(B, S, num_head, dim_k).transpose(0, 2, 1, 3)
        k = (out @ lp["wk"] + lp["bk"][0]).reshape(B, S, num_head, dim_k).transpose(0, 2, 1, 3)
        v = (out @ lp["wv"] + lp["bv"][0]).reshape(B, S, num_head, dim_v).transpose(0, 2, 1, 3)
        s = q @ k.transpose(0, 1, 3, 2) / (dim_k ** 0.5)
        s = jnp.where(mask[:, None, :, :] == 0.0, -1e9, s)
        w = jax.nn.softmax(s, axis=-1)
        a = (w @ v).transpose(0, 2, 1, 3).reshape(B, S, num_head * dim_v)
        out = _ref_layer_norm(out + (a @ lp["wo"] + lp["bo"][0]),
                              lp["gamma_a"][0], lp["beta_a"][0])
        h = jnp.maximum(out @ lp["w1"] + lp["b1"][0], 0.0)
        out = _ref_layer_norm(out + (h @ lp["w2"] + lp["b2"][0]),
                              lp["gamma_f"][0], lp["beta_f"][0])
    return out


if __name__ == "__main__":
    vocab_size = 64
    Embedding_Size = 128          # lane-dense (multiple of 128)
    Num_Head = 4
    Dim_K = Dim_V = 32            # Num_Head * Dim_K = 128
    Mid_Size = 256
    num_layers = 2
    batch, seq = 2, 128           # (S, E) = (128, 128) lane-dense tiles

    key = jax.random.PRNGKey(0)
    kp, kx = jax.random.split(key)
    params = init_params(kp, vocab=vocab_size, embed=Embedding_Size,
                         num_head=Num_Head, dim_k=Dim_K, dim_v=Dim_V,
                         mid=Mid_Size, num_layers=num_layers, seq_len=seq)

    x = jax.random.normal(kx, (batch, seq, vocab_size), jnp.float32)
    mask = jnp.ones((batch, seq, seq), jnp.float32)
    mask = mask.at[1, :, seq - 16:].set(0.0)       # key-padding mask on batch 1

    out = encoder_forward(x, mask, params, num_head=Num_Head,
                          dim_k=Dim_K, dim_v=Dim_V)
    out = jax.block_until_ready(out)

    ref = reference_encoder(x, mask, params, num_head=Num_Head,
                            dim_k=Dim_K, dim_v=Dim_V)
    assert out.shape == (batch, seq, Embedding_Size)
    max_err = float(jnp.max(jnp.abs(out - ref)))
    assert jnp.allclose(out, ref, atol=2e-3, rtol=2e-3), max_err

    print("KERNEL_OK")
</pallas_src>

<mosaic_0001>
module attributes {stable_mosaic.version = 11 : i64} {
  func.func @_encoder_kernel(%arg0: i32, %arg1: i32, %arg2: memref<1x128x64xf32, #tpu.memory_space<vmem>>, %arg3: memref<1x128x128xf32, #tpu.memory_space<vmem>>, %arg4: memref<64x128xf32, #tpu.memory_space<vmem>>, %arg5: memref<1x128xf32, #tpu.memory_space<vmem>>, %arg6: memref<128x128xf32, #tpu.memory_space<vmem>>, %arg7: memref<1x128x128xf32, #tpu.memory_space<vmem>>, %arg8: memref<1x1x128xf32, #tpu.memory_space<vmem>>, %arg9: memref<1x128x128xf32, #tpu.memory_space<vmem>>, %arg10: memref<1x1x128xf32, #tpu.memory_space<vmem>>, %arg11: memref<1x128x128xf32, #tpu.memory_space<vmem>>, %arg12: memref<1x1x128xf32, #tpu.memory_space<vmem>>, %arg13: memref<1x128x128xf32, #tpu.memory_space<vmem>>, %arg14: memref<1x1x128xf32, #tpu.memory_space<vmem>>, %arg15: memref<1x1x128xf32, #tpu.memory_space<vmem>>, %arg16: memref<1x1x128xf32, #tpu.memory_space<vmem>>, %arg17: memref<1x128x256xf32, #tpu.memory_space<vmem>>, %arg18: memref<1x1x256xf32, #tpu.memory_space<vmem>>, %arg19: memref<1x256x128xf32, #tpu.memory_space<vmem>>, %arg20: memref<1x1x128xf32, #tpu.memory_space<vmem>>, %arg21: memref<1x1x128xf32, #tpu.memory_space<vmem>>, %arg22: memref<1x1x128xf32, #tpu.memory_space<vmem>>, %arg23: memref<1x128x128xf32, #tpu.memory_space<vmem>>, %arg24: memref<128x128xf32, #tpu.memory_space<vmem>>) attributes {dimension_semantics = [#tpu.dimension_semantics<parallel>, #tpu.dimension_semantics<arbitrary>], iteration_bounds = array<i64: 2, 2>, scalar_prefetch = 0 : i64, scratch_operands = 1 : i64, tpu.core_type = #tpu.core_type<tc>, window_params = [{transform_indices = @transform_0, window_bounds = array<i64: 1, 128, 64>}, {transform_indices = @transform_1, window_bounds = array<i64: 1, 128, 128>}, {pipeline_mode = #tpu.pipeline_mode<synchronous>, transform_indices = @transform_2, window_bounds = array<i64: 64, 128>}, {pipeline_mode = #tpu.pipeline_mode<synchronous>, transform_indices = @transform_3, window_bounds = array<i64: 1, 128>}, {pipeline_mode = #tpu.pipeline_mode<synchronous>, transform_indices = @transform_4, window_bounds = array<i64: 128, 128>}, {transform_indices = @transform_5, window_bounds = array<i64: 1, 128, 128>}, {transform_indices = @transform_6, window_bounds = array<i64: 1, 1, 128>}, {transform_indices = @transform_7, window_bounds = array<i64: 1, 128, 128>}, {transform_indices = @transform_8, window_bounds = array<i64: 1, 1, 128>}, {transform_indices = @transform_9, window_bounds = array<i64: 1, 128, 128>}, {transform_indices = @transform_10, window_bounds = array<i64: 1, 1, 128>}, {transform_indices = @transform_11, window_bounds = array<i64: 1, 128, 128>}, {transform_indices = @transform_12, window_bounds = array<i64: 1, 1, 128>}, {transform_indices = @transform_13, window_bounds = array<i64: 1, 1, 128>}, {transform_indices = @transform_14, window_bounds = array<i64: 1, 1, 128>}, {transform_indices = @transform_15, window_bounds = array<i64: 1, 128, 256>}, {transform_indices = @transform_16, window_bounds = array<i64: 1, 1, 256>}, {transform_indices = @transform_17, window_bounds = array<i64: 1, 256, 128>}, {transform_indices = @transform_18, window_bounds = array<i64: 1, 1, 128>}, {transform_indices = @transform_19, window_bounds = array<i64: 1, 1, 128>}, {transform_indices = @transform_20, window_bounds = array<i64: 1, 1, 128>}, {transform_indices = @transform_21, window_bounds = array<i64: 1, 128, 128>}]} {
    %c0_i32 = arith.constant 0 : i32
    %0 = arith.cmpi eq, %arg1, %c0_i32 : i32
    %1 = arith.extui %0 : i1 to i32
    %c0_i32_0 = arith.constant 0 : i32
    %2 = arith.cmpi ne, %1, %c0_i32_0 : i32
    scf.if %2 {
      %c0_100 = arith.constant 0 : index
      %c0_101 = arith.constant 0 : index
      %c0_102 = arith.constant 0 : index
      %185 = vector.load %arg2[%c0_100, %c0_101, %c0_102] : memref<1x128x64xf32, #tpu.memory_space<vmem>>, vector<1x128x64xf32>
      %186 = vector.shape_cast %185 : vector<1x128x64xf32> to vector<128x64xf32>
      %c0_103 = arith.constant 0 : index
      %c0_104 = arith.constant 0 : index
      %187 = vector.load %arg4[%c0_103, %c0_104] : memref<64x128xf32, #tpu.memory_space<vmem>>, vector<64x128xf32>
      %cst_105 = arith.constant dense<0.000000e+00> : vector<128x128xf32>
      %188 = tpu.matmul %186, %187, %cst_105 {dimension_numbers = #tpu.dot_dimension_numbers<[1], [0], [0], [1], [0, 0, 1, 1], [], []>} : vector<128x64xf32>, vector<64x128xf32>, vector<128x128xf32> -> vector<128x128xf32>
      %c0_106 = arith.constant 0 : index
      %c0_107 = arith.constant 0 : index
      %189 = vector.load %arg5[%c0_106, %c0_107] : memref<1x128xf32, #tpu.memory_space<vmem>>, vector<1x128xf32>
      %190 = vector.broadcast %189 : vector<1x128xf32> to vector<128x128xf32>
      %191 = arith.addf %188, %190 : vector<128x128xf32>
      %c0_108 = arith.constant 0 : index
      %c0_109 = arith.constant 0 : index
      %192 = vector.load %arg6[%c0_108, %c0_109] : memref<128x128xf32, #tpu.memory_space<vmem>>, vector<128x128xf32>
      %193 = arith.addf %191, %192 : vector<128x128xf32>
      %c0_110 = arith.constant 0 : index
      %c0_111 = arith.constant 0 : index
      %194 = vector.load %arg24[%c0_110, %c0_111] : memref<128x128xf32, #tpu.memory_space<vmem>>, vector<128x128xf32>
      tpu.vector_store %arg24[%c0_110, %c0_111], %193 {strides = array<i32>} : memref<128x128xf32, #tpu.memory_space<vmem>>, vector<128x128xf32>,
    } else {
    }
    %c0 = arith.constant 0 : index
    %c0_1 = arith.constant 0 : index
    %3 = vector.load %arg24[%c0, %c0_1] : memref<128x128xf32, #tpu.memory_space<vmem>>, vector<128x128xf32>
    %c0_2 = arith.constant 0 : index
    %c0_3 = arith.constant 0 : index
    %c0_4 = arith.constant 0 : index
    %4 = vector.load %arg3[%c0_2, %c0_3, %c0_4] : memref<1x128x128xf32, #tpu.memory_space<vmem>>, vector<1x128x128xf32>
    %5 = vector.shape_cast %4 : vector<1x128x128xf32> to vector<128x128xf32>
    %c0_5 = arith.constant 0 : index
    %c0_6 = arith.constant 0 : index
    %c0_7 = arith.constant 0 : index
    %6 = vector.load %arg7[%c0_5, %c0_6, %c0_7] : memref<1x128x128xf32, #tpu.memory_space<vmem>>, vector<1x128x128xf32>
    %7 = vector.shape_cast %6 : vector<1x128x128xf32> to vector<128x128xf32>
    %cst = arith.constant dense<0.000000e+00> : vector<128x128xf32>
    %8 = tpu.matmul %3, %7, %cst {dimension_numbers = #tpu.dot_dimension_numbers<[1], [0], [0], [1], [0, 0, 1, 1], [], []>} : vector<128x128xf32>, vector<128x128xf32>, vector<128x128xf32> -> vector<128x128xf32>
    %c0_8 = arith.constant 0 : index
    %c0_9 = arith.constant 0 : index
    %c0_10 = arith.constant 0 : index
    %9 = vector.load %arg8[%c0_8, %c0_9, %c0_10] : memref<1x1x128xf32, #tpu.memory_space<vmem>>, vector<1x1x128xf32>
    %10 = vector.shape_cast %9 : vector<1x1x128xf32> to vector<1x128xf32>
    %11 = vector.broadcast %10 : vector<1x128xf32> to vector<128x128xf32>
    %12 = arith.addf %8, %11 : vector<128x128xf32>
    %c0_11 = arith.constant 0 : index
    %c0_12 = arith.constant 0 : index
    %c0_13 = arith.constant 0 : index
    %13 = vector.load %arg9[%c0_11, %c0_12, %c0_13] : memref<1x128x128xf32, #tpu.memory_space<vmem>>, vector<1x128x128xf32>
    %14 = vector.shape_cast %13 : vector<1x128x128xf32> to vector<128x128xf32>
    %cst_14 = arith.constant dense<0.000000e+00> : vector<128x128xf32>
    %15 = tpu.matmul %3, %14, %cst_14 {dimension_numbers = #tpu.dot_dimension_numbers<[1], [0], [0], [1], [0, 0, 1, 1], [], []>} : vector<128x128xf32>, vector<128x128xf32>, vector<128x128xf32> -> vector<128x128xf32>
    %c0_15 = arith.constant 0 : index
    %c0_16 = arith.constant 0 : index
    %c0_17 = arith.constant 0 : index
    %16 = vector.load %arg10[%c0_15, %c0_16, %c0_17] : memref<1x1x128xf32, #tpu.memory_space<vmem>>, vector<1x1x128xf32>
    %17 = vector.shape_cast %16 : vector<1x1x128xf32> to vector<1x128xf32>
    %18 = vector.broadcast %17 : vector<1x128xf32> to vector<128x128xf32>
    %19 = arith.addf %15, %18 : vector<128x128xf32>
    %c0_18 = arith.constant 0 : index
    %c0_19 = arith.constant 0 : index
    %c0_20 = arith.constant 0 : index
    %20 = vector.load %arg11[%c0_18, %c0_19, %c0_20] : memref<1x128x128xf32, #tpu.memory_space<vmem>>, vector<1x128x128xf32>
    %21 = vector.shape_cast %20 : vector<1x128x128xf32> to vector<128x128xf32>
    %cst_21 = arith.constant dense<0.000000e+00> : vector<128x128xf32>
    %22 = tpu.matmul %3, %21, %cst_21 {dimension_numbers = #tpu.dot_dimension_numbers<[1], [0], [0], [1], [0, 0, 1, 1], [], []>} : vector<128x128xf32>, vector<128x128xf32>, vector<128x128xf32> -> vector<128x128xf32>
    %c0_22 = arith.constant 0 : index
    %c0_23 = arith.constant 0 : index
    %c0_24 = arith.constant 0 : index
    %23 = vector.load %arg12[%c0_22, %c0_23, %c0_24] : memref<1x1x128xf32, #tpu.memory_space<vmem>>, vector<1x1x128xf32>
    %24 = vector.shape_cast %23 : vector<1x1x128xf32> to vector<1x128xf32>
    %25 = vector.broadcast %24 : vector<1x128xf32> to vector<128x128xf32>
    %26 = arith.addf %22, %25 : vector<128x128xf32>
    %27 = vector.extract_strided_slice %12 {offsets = [0, 0], sizes = [128, 32], strides = [1, 1]} : vector<128x128xf32> to vector<128x32xf32>
    %28 = vector.extract_strided_slice %19 {offsets = [0, 0], sizes = [128, 32], strides = [1, 1]} : vector<128x128xf32> to vector<128x32xf32>
    %29 = vector.extract_strided_slice %26 {offsets = [0, 0], sizes = [128, 32], strides = [1, 1]} : vector<128x128xf32> to vector<128x32xf32>
    %cst_25 = arith.constant dense<0.000000e+00> : vector<128x128xf32>
    %30 = tpu.matmul %27, %28, %cst_25 {dimension_numbers = #tpu.dot_dimension_numbers<[1], [1], [0], [0], [0, 0, 1, 0], [], []>} : vector<128x32xf32>, vector<128x32xf32>, vector<128x128xf32> -> vector<128x128xf32>
    %cst_26 = arith.constant 0.176776692 : f32
    %31 = vector.broadcast %cst_26 : f32 to vector<128x128xf32>
    %32 = arith.mulf %30, %31 : vector<128x128xf32>
    %cst_27 = arith.constant 0.000000e+00 : f32
    %33 = vector.broadcast %cst_27 : f32 to vector<128x128xf32>
    %34 = arith.cmpf oeq, %5, %33 : vector<128x128xf32>
    %cst_28 = arith.constant -1.000000e+09 : f32
    %35 = vector.broadcast %cst_28 : f32 to vector<128x128xf32>
    %36 = arith.select %34, %35, %32 : vector<128x128xi1>, vector<128x128xf32>
    %cst_29 = arith.constant dense<0xFF800000> : vector<128xf32>
    %37 = vector.multi_reduction <maximumf>, %36, %cst_29 [1] : vector<128x128xf32> to vector<128xf32>
    %38 = vector.shape_cast %37 : vector<128xf32> to vector<128x1xf32>
    %39 = vector.broadcast %38 : vector<128x1xf32> to vector<128x128xf32>
    %40 = arith.subf %36, %39 : vector<128x128xf32>
    %41 = math.exp %40 : vector<128x128xf32>
    %cst_30 = arith.constant dense<0.000000e+00> : vector<128xf32>
    %42 = vector.multi_reduction <add>, %41, %cst_30 [1] : vector<128x128xf32> to vector<128xf32>
    %43 = vector.shape_cast %42 : vector<128xf32> to vector<128x1xf32>
    %44 = vector.broadcast %43 : vector<128x1xf32> to vector<128x128xf32>
    %45 = arith.divf %41, %44 : vector<128x128xf32>
    %cst_31 = arith.constant dense<0.000000e+00> : vector<128x32xf32>
    %46 = tpu.matmul %45, %29, %cst_31 {dimension_numbers = #tpu.dot_dimension_numbers<[1], [0], [0], [1], [0, 0, 1, 1], [], []>} : vector<128x128xf32>, vector<128x32xf32>, vector<128x32xf32> -> vector<128x32xf32>
    %47 = vector.extract_strided_slice %12 {offsets = [0, 32], sizes = [128, 32], strides = [1, 1]} : vector<128x128xf32> to vector<128x32xf32>
    %48 = vector.extract_strided_slice %19 {offsets = [0, 32], sizes = [128, 32], strides = [1, 1]} : vector<128x128xf32> to vector<128x32xf32>
    %49 = vector.extract_strided_slice %26 {offsets = [0, 32], sizes = [128, 32], strides = [1, 1]} : vector<128x128xf32> to vector<128x32xf32>
    %cst_32 = arith.constant dense<0.000000e+00> : vector<128x128xf32>
    %50 = tpu.matmul %47, %48, %cst_32 {dimension_numbers = #tpu.dot_dimension_numbers<[1], [1], [0], [0], [0, 0, 1, 0], [], []>} : vector<128x32xf32>, vector<128x32xf32>, vector<128x128xf32> -> vector<128x128xf32>
    %cst_33 = arith.constant 0.176776692 : f32
    %51 = vector.broadcast %cst_33 : f32 to vector<128x128xf32>
    %52 = arith.mulf %50, %51 : vector<128x128xf32>
    %cst_34 = arith.constant 0.000000e+00 : f32
    %53 = vector.broadcast %cst_34 : f32 to vector<128x128xf32>
    %54 = arith.cmpf oeq, %5, %53 : vector<128x128xf32>
    %cst_35 = arith.constant -1.000000e+09 : f32
    %55 = vector.broadcast %cst_35 : f32 to vector<128x128xf32>
    %56 = arith.select %54, %55, %52 : vector<128x128xi1>, vector<128x128xf32>
    %cst_36 = arith.constant dense<0xFF800000> : vector<128xf32>
    %57 = vector.multi_reduction <maximumf>, %56, %cst_36 [1] : vector<128x128xf32> to vector<128xf32>
    %58 = vector.shape_cast %57 : vector<128xf32> to vector<128x1xf32>
    %59 = vector.broadcast %58 : vector<128x1xf32> to vector<128x128xf32>
    %60 = arith.subf %56, %59 : vector<128x128xf32>
    %61 = math.exp %60 : vector<128x128xf32>
    %cst_37 = arith.constant dense<0.000000e+00> : vector<128xf32>
    %62 = vector.multi_reduction <add>, %61, %cst_37 [1] : vector<128x128xf32> to vector<128xf32>
    %63 = vector.shape_cast %62 : vector<128xf32> to vector<128x1xf32>
    %64 = vector.broadcast %63 : vector<128x1xf32> to vector<128x128xf32>
    %65 = arith.divf %61, %64 : vector<128x128xf32>
    %cst_38 = arith.constant dense<0.000000e+00> : vector<128x32xf32>
    %66 = tpu.matmul %65, %49, %cst_38 {dimension_numbers = #tpu.dot_dimension_numbers<[1], [0], [0], [1], [0, 0, 1, 1], [], []>} : vector<128x128xf32>, vector<128x32xf32>, vector<128x32xf32> -> vector<128x32xf32>
    %67 = vector.extract_strided_slice %12 {offsets = [0, 64], sizes = [128, 32], strides = [1, 1]} : vector<128x128xf32> to vector<128x32xf32>
    %68 = vector.extract_strided_slice %19 {offsets = [0, 64], sizes = [128, 32], strides = [1, 1]} : vector<128x128xf32> to vector<128x32xf32>
    %69 = vector.extract_strided_slice %26 {offsets = [0, 64], sizes = [128, 32], strides = [1, 1]} : vector<128x128xf32> to vector<128x32xf32>
    %cst_39 = arith.constant dense<0.000000e+00> : vector<128x128xf32>
    %70 = tpu.matmul %67, %68, %cst_39 {dimension_numbers = #tpu.dot_dimension_numbers<[1], [1], [0], [0], [0, 0, 1, 0], [], []>} : vector<128x32xf32>, vector<128x32xf32>, vector<128x128xf32> -> vector<128x128xf32>
    %cst_40 = arith.constant 0.176776692 : f32
    %71 = vector.broadcast %cst_40 : f32 to vector<128x128xf32>
    %72 = arith.mulf %70, %71 : vector<128x128xf32>
    %cst_41 = arith.constant 0.000000e+00 : f32
    %73 = vector.broadcast %cst_41 : f32 to vector<128x128xf32>
    %74 = arith.cmpf oeq, %5, %73 : vector<128x128xf32>
    %cst_42 = arith.constant -1.000000e+09 : f32
    %75 = vector.broadcast %cst_42 : f32 to vector<128x128xf32>
    %76 = arith.select %74, %75, %72 : vector<128x128xi1>, vector<128x128xf32>
    %cst_43 = arith.constant dense<0xFF800000> : vector<128xf32>
    %77 = vector.multi_reduction <maximumf>, %76, %cst_43 [1] : vector<128x128xf32> to vector<128xf32>
    %78 = vector.shape_cast %77 : vector<128xf32> to vector<128x1xf32>
    %79 = vector.broadcast %78 : vector<128x1xf32> to vector<128x128xf32>
    %80 = arith.subf %76, %79 : vector<128x128xf32>
    %81 = math.exp %80 : vector<128x128xf32>
    %cst_44 = arith.constant dense<0.000000e+00> : vector<128xf32>
    %82 = vector.multi_reduction <add>, %81, %cst_44 [1] : vector<128x128xf32> to vector<128xf32>
    %83 = vector.shape_cast %82 : vector<128xf32> to vector<128x1xf32>
    %84 = vector.broadcast %83 : vector<128x1xf32> to vector<128x128xf32>
    %85 = arith.divf %81, %84 : vector<128x128xf32>
    %cst_45 = arith.constant dense<0.000000e+00> : vector<128x32xf32>
    %86 = tpu.matmul %85, %69, %cst_45 {dimension_numbers = #tpu.dot_dimension_numbers<[1], [0], [0], [1], [0, 0, 1, 1], [], []>} : vector<128x128xf32>, vector<128x32xf32>, vector<128x32xf32> -> vector<128x32xf32>
    %87 = vector.extract_strided_slice %12 {offsets = [0, 96], sizes = [128, 32], strides = [1, 1]} : vector<128x128xf32> to vector<128x32xf32>
    %88 = vector.extract_strided_slice %19 {offsets = [0, 96], sizes = [128, 32], strides = [1, 1]} : vector<128x128xf32> to vector<128x32xf32>
    %89 = vector.extract_strided_slice %26 {offsets = [0, 96], sizes = [128, 32], strides = [1, 1]} : vector<128x128xf32> to vector<128x32xf32>
    %cst_46 = arith.constant dense<0.000000e+00> : vector<128x128xf32>
    %90 = tpu.matmul %87, %88, %cst_46 {dimension_numbers = #tpu.dot_dimension_numbers<[1], [1], [0], [0], [0, 0, 1, 0], [], []>} : vector<128x32xf32>, vector<128x32xf32>, vector<128x128xf32> -> vector<128x128xf32>
    %cst_47 = arith.constant 0.176776692 : f32
    %91 = vector.broadcast %cst_47 : f32 to vector<128x128xf32>
    %92 = arith.mulf %90, %91 : vector<128x128xf32>
    %cst_48 = arith.constant 0.000000e+00 : f32
    %93 = vector.broadcast %cst_48 : f32 to vector<128x128xf32>
    %94 = arith.cmpf oeq, %5, %93 : vector<128x128xf32>
    %cst_49 = arith.constant -1.000000e+09 : f32
    %95 = vector.broadcast %cst_49 : f32 to vector<128x128xf32>
    %96 = arith.select %94, %95, %92 : vector<128x128xi1>, vector<128x128xf32>
    %cst_50 = arith.constant dense<0xFF800000> : vector<128xf32>
    %97 = vector.multi_reduction <maximumf>, %96, %cst_50 [1] : vector<128x128xf32> to vector<128xf32>
    %98 = vector.shape_cast %97 : vector<128xf32> to vector<128x1xf32>
    %99 = vector.broadcast %98 : vector<128x1xf32> to vector<128x128xf32>
    %100 = arith.subf %96, %99 : vector<128x128xf32>
    %101 = math.exp %100 : vector<128x128xf32>
    %cst_51 = arith.constant dense<0.000000e+00> : vector<128xf32>
    %102 = vector.multi_reduction <add>, %101, %cst_51 [1] : vector<128x128xf32> to vector<128xf32>
    %103 = vector.shape_cast %102 : vector<128xf32> to vector<128x1xf32>
    %104 = vector.broadcast %103 : vector<128x1xf32> to vector<128x128xf32>
    %105 = arith.divf %101, %104 : vector<128x128xf32>
    %cst_52 = arith.constant dense<0.000000e+00> : vector<128x32xf32>
    %106 = tpu.matmul %105, %89, %cst_52 {dimension_numbers = #tpu.dot_dimension_numbers<[1], [0], [0], [1], [0, 0, 1, 1], [], []>} : vector<128x128xf32>, vector<128x32xf32>, vector<128x32xf32> -> vector<128x32xf32>
    %107 = tpu.concatenate %46, %66, %86, %106 in 1 : vector<128x32xf32>, vector<128x32xf32>, vector<128x32xf32>, vector<128x32xf32> -> vector<128x128xf32>
    %c0_53 = arith.constant 0 : index
    %c0_54 = arith.constant 0 : index
    %c0_55 = arith.constant 0 : index
    %108 = vector.load %arg13[%c0_53, %c0_54, %c0_55] : memref<1x128x128xf32, #tpu.memory_space<vmem>>, vector<1x128x128xf32>
    %109 = vector.shape_cast %108 : vector<1x128x128xf32> to vector<128x128xf32>
    %cst_56 = arith.constant dense<0.000000e+00> : vector<128x128xf32>
    %110 = tpu.matmul %107, %109, %cst_56 {dimension_numbers = #tpu.dot_dimension_numbers<[1], [0], [0], [1], [0, 0, 1, 1], [], []>} : vector<128x128xf32>, vector<128x128xf32>, vector<128x128xf32> -> vector<128x128xf32>
    %c0_57 = arith.constant 0 : index
    %c0_58 = arith.constant 0 : index
    %c0_59 = arith.constant 0 : index
    %111 = vector.load %arg14[%c0_57, %c0_58, %c0_59] : memref<1x1x128xf32, #tpu.memory_space<vmem>>, vector<1x1x128xf32>
    %112 = vector.shape_cast %111 : vector<1x1x128xf32> to vector<1x128xf32>
    %113 = vector.broadcast %112 : vector<1x128xf32> to vector<128x128xf32>
    %114 = arith.addf %110, %113 : vector<128x128xf32>
    %c0_60 = arith.constant 0 : index
    %c0_61 = arith.constant 0 : index
    %c0_62 = arith.constant 0 : index
    %115 = vector.load %arg15[%c0_60, %c0_61, %c0_62] : memref<1x1x128xf32, #tpu.memory_space<vmem>>, vector<1x1x128xf32>
    %116 = vector.shape_cast %115 : vector<1x1x128xf32> to vector<1x128xf32>
    %c0_63 = arith.constant 0 : index
    %c0_64 = arith.constant 0 : index
    %c0_65 = arith.constant 0 : index
    %117 = vector.load %arg16[%c0_63, %c0_64, %c0_65] : memref<1x1x128xf32, #tpu.memory_space<vmem>>, vector<1x1x128xf32>
    %118 = vector.shape_cast %117 : vector<1x1x128xf32> to vector<1x128xf32>
    %119 = arith.addf %3, %114 : vector<128x128xf32>
    %cst_66 = arith.constant dense<0.000000e+00> : vector<128xf32>
    %120 = vector.multi_reduction <add>, %119, %cst_66 [1] : vector<128x128xf32> to vector<128xf32>
    %121 = vector.shape_cast %120 : vector<128xf32> to vector<128x1xf32>
    %cst_67 = arith.constant 1.280000e+02 : f32
    %122 = vector.broadcast %cst_67 : f32 to vector<128x1xf32>
    %123 = arith.divf %121, %122 : vector<128x1xf32>
    %124 = vector.broadcast %123 : vector<128x1xf32> to vector<128x128xf32>
    %125 = arith.subf %119, %124 : vector<128x128xf32>
    %126 = arith.mulf %125, %125 : vector<128x128xf32>
    %cst_68 = arith.constant dense<0.000000e+00> : vector<128xf32>
    %127 = vector.multi_reduction <add>, %126, %cst_68 [1] : vector<128x128xf32> to vector<128xf32>
    %128 = vector.shape_cast %127 : vector<128xf32> to vector<128x1xf32>
    %cst_69 = arith.constant 1.280000e+02 : f32
    %129 = vector.broadcast %cst_69 : f32 to vector<128x1xf32>
    %130 = arith.divf %128, %129 : vector<128x1xf32>
    %cst_70 = arith.constant 9.99999974E-6 : f32
    %131 = vector.broadcast %cst_70 : f32 to vector<128x1xf32>
    %132 = arith.addf %130, %131 : vector<128x1xf32>
    %133 = math.rsqrt %132 : vector<128x1xf32>
    %134 = vector.broadcast %133 : vector<128x1xf32> to vector<128x128xf32>
    %135 = arith.mulf %125, %134 : vector<128x128xf32>
    %136 = vector.broadcast %116 : vector<1x128xf32> to vector<128x128xf32>
    %137 = arith.mulf %135, %136 : vector<128x128xf32>
    %138 = vector.broadcast %118 : vector<1x128xf32> to vector<128x128xf32>
    %139 = arith.addf %137, %138 : vector<128x128xf32>
    %c0_71 = arith.constant 0 : index
    %c0_72 = arith.constant 0 : index
    %c0_73 = arith.constant 0 : index
    %140 = vector.load %arg17[%c0_71, %c0_72, %c0_73] : memref<1x128x256xf32, #tpu.memory_space<vmem>>, vector<1x128x256xf32>
    %141 = vector.shape_cast %140 : vector<1x128x256xf32> to vector<128x256xf32>
    %cst_74 = arith.constant dense<0.000000e+00> : vector<128x256xf32>
    %142 = tpu.matmul %139, %141, %cst_74 {dimension_numbers = #tpu.dot_dimension_numbers<[1], [0], [0], [1], [0, 0, 1, 1], [], []>} : vector<128x128xf32>, vector<128x256xf32>, vector<128x256xf32> -> vector<128x256xf32>
    %c0_75 = arith.constant 0 : index
    %c0_76 = arith.constant 0 : index
    %c0_77 = arith.constant 0 : index
    %143 = vector.load %arg18[%c0_75, %c0_76, %c0_77] : memref<1x1x256xf32, #tpu.memory_space<vmem>>, vector<1x1x256xf32>
    %144 = vector.shape_cast %143 : vector<1x1x256xf32> to vector<1x256xf32>
    %145 = vector.broadcast %144 : vector<1x256xf32> to vector<128x256xf32>
    %146 = arith.addf %142, %145 : vector<128x256xf32>
    %cst_78 = arith.constant 0.000000e+00 : f32
    %147 = vector.broadcast %cst_78 : f32 to vector<128x256xf32>
    %148 = arith.maximumf %146, %147 : vector<128x256xf32>
    %c0_79 = arith.constant 0 : index
    %c0_80 = arith.constant 0 : index
    %c0_81 = arith.constant 0 : index
    %149 = vector.load %arg19[%c0_79, %c0_80, %c0_81] : memref<1x256x128xf32, #tpu.memory_space<vmem>>, vector<1x256x128xf32>
    %150 = vector.shape_cast %149 : vector<1x256x128xf32> to vector<256x128xf32>
    %cst_82 = arith.constant dense<0.000000e+00> : vector<128x128xf32>
    %151 = tpu.matmul %148, %150, %cst_82 {dimension_numbers = #tpu.dot_dimension_numbers<[1], [0], [0], [1], [0, 0, 1, 1], [], []>} : vector<128x256xf32>, vector<256x128xf32>, vector<128x128xf32> -> vector<128x128xf32>
    %c0_83 = arith.constant 0 : index
    %c0_84 = arith.constant 0 : index
    %c0_85 = arith.constant 0 : index
    %152 = vector.load %arg20[%c0_83, %c0_84, %c0_85] : memref<1x1x128xf32, #tpu.memory_space<vmem>>, vector<1x1x128xf32>
    %153 = vector.shape_cast %152 : vector<1x1x128xf32> to vector<1x128xf32>
    %154 = vector.broadcast %153 : vector<1x128xf32> to vector<128x128xf32>
    %155 = arith.addf %151, %154 : vector<128x128xf32>
    %c0_86 = arith.constant 0 : index
    %c0_87 = arith.constant 0 : index
    %c0_88 = arith.constant 0 : index
    %156 = vector.load %arg21[%c0_86, %c0_87, %c0_88] : memref<1x1x128xf32, #tpu.memory_space<vmem>>, vector<1x1x128xf32>
    %157 = vector.shape_cast %156 : vector<1x1x128xf32> to vector<1x128xf32>
    %c0_89 = arith.constant 0 : index
    %c0_90 = arith.constant 0 : index
    %c0_91 = arith.constant 0 : index
    %158 = vector.load %arg22[%c0_89, %c0_90, %c0_91] : memref<1x1x128xf32, #tpu.memory_space<vmem>>, vector<1x1x128xf32>
    %159 = vector.shape_cast %158 : vector<1x1x128xf32> to vector<1x128xf32>
    %160 = arith.addf %139, %155 : vector<128x128xf32>
    %cst_92 = arith.constant dense<0.000000e+00> : vector<128xf32>
    %161 = vector.multi_reduction <add>, %160, %cst_92 [1] : vector<128x128xf32> to vector<128xf32>
    %162 = vector.shape_cast %161 : vector<128xf32> to vector<128x1xf32>
    %cst_93 = arith.constant 1.280000e+02 : f32
    %163 = vector.broadcast %cst_93 : f32 to vector<128x1xf32>
    %164 = arith.divf %162, %163 : vector<128x1xf32>
    %165 = vector.broadcast %164 : vector<128x1xf32> to vector<128x128xf32>
    %166 = arith.subf %160, %165 : vector<128x128xf32>
    %167 = arith.mulf %166, %166 : vector<128x128xf32>
    %cst_94 = arith.constant dense<0.000000e+00> : vector<128xf32>
    %168 = vector.multi_reduction <add>, %167, %cst_94 [1] : vector<128x128xf32> to vector<128xf32>
    %169 = vector.shape_cast %168 : vector<128xf32> to vector<128x1xf32>
    %cst_95 = arith.constant 1.280000e+02 : f32
    %170 = vector.broadcast %cst_95 : f32 to vector<128x1xf32>
    %171 = arith.divf %169, %170 : vector<128x1xf32>
    %cst_96 = arith.constant 9.99999974E-6 : f32
    %172 = vector.broadcast %cst_96 : f32 to vector<128x1xf32>
    %173 = arith.addf %171, %172 : vector<128x1xf32>
    %174 = math.rsqrt %173 : vector<128x1xf32>
    %175 = vector.broadcast %174 : vector<128x1xf32> to vector<128x128xf32>
    %176 = arith.mulf %166, %175 : vector<128x128xf32>
    %177 = vector.broadcast %157 : vector<1x128xf32> to vector<128x128xf32>
    %178 = arith.mulf %176, %177 : vector<128x128xf32>
    %179 = vector.broadcast %159 : vector<1x128xf32> to vector<128x128xf32>
    %180 = arith.addf %178, %179 : vector<128x128xf32>
    %c0_97 = arith.constant 0 : index
    %c0_98 = arith.constant 0 : index
    %181 = vector.load %arg24[%c0_97, %c0_98] : memref<128x128xf32, #tpu.memory_space<vmem>>, vector<128x128xf32>
    tpu.vector_store %arg24[%c0_97, %c0_98], %180 {strides = array<i32>} : memref<128x128xf32, #tpu.memory_space<vmem>>, vector<128x128xf32>,
    %c1_i32 = arith.constant 1 : i32
    %182 = arith.cmpi eq, %arg1, %c1_i32 : i32
    %183 = arith.extui %182 : i1 to i32
    %c0_i32_99 = arith.constant 0 : i32
    %184 = arith.cmpi ne, %183, %c0_i32_99 : i32
    scf.if %184 {
      %185 = vector.shape_cast %180 : vector<128x128xf32> to vector<1x128x128xf32>
      %c0_100 = arith.constant 0 : index
      %c0_101 = arith.constant 0 : index
      %c0_102 = arith.constant 0 : index
      %186 = vector.load %arg23[%c0_100, %c0_101, %c0_102] : memref<1x128x128xf32, #tpu.memory_space<vmem>>, vector<1x128x128xf32>
      tpu.vector_store %arg23[%c0_100, %c0_101, %c0_102], %185 {strides = array<i32>} : memref<1x128x128xf32, #tpu.memory_space<vmem>>, vector<1x128x128xf32>,
    } else {
    }
    return
  }
  func.func @transform_0(%arg0: i32, %arg1: i32) -> (i32, i32, i32) {
    %c0_i32 = arith.constant 0 : i32
    %c0_i32_0 = arith.constant 0 : i32
    %c0_i32_1 = arith.constant 0 : i32
    return %arg0, %c0_i32, %c0_i32_0 : i32, i32, i32
  }
  func.func @transform_1(%arg0: i32, %arg1: i32) -> (i32, i32, i32) {
    %c0_i32 = arith.constant 0 : i32
    %c0_i32_0 = arith.constant 0 : i32
    %c0_i32_1 = arith.constant 0 : i32
    return %arg0, %c0_i32, %c0_i32_0 : i32, i32, i32
  }
  func.func @transform_2(%arg0: i32, %arg1: i32) -> (i32, i32) {
    %c0_i32 = arith.constant 0 : i32
    %c0_i32_0 = arith.constant 0 : i32
    %c0_i32_1 = arith.constant 0 : i32
    return %c0_i32, %c0_i32_0 : i32, i32
  }
  func.func @transform_3(%arg0: i32, %arg1: i32) -> (i32, i32) {
    %c0_i32 = arith.constant 0 : i32
    %c0_i32_0 = arith.constant 0 : i32
    %c0_i32_1 = arith.constant 0 : i32
    return %c0_i32, %c0_i32_0 : i32, i32
  }
  func.func @transform_4(%arg0: i32, %arg1: i32) -> (i32, i32) {
    %c0_i32 = arith.constant 0 : i32
    %c0_i32_0 = arith.constant 0 : i32
    %c0_i32_1 = arith.constant 0 : i32
    return %c0_i32, %c0_i32_0 : i32, i32
  }
  func.func @transform_5(%arg0: i32, %arg1: i32) -> (i32, i32, i32) {
    %c0_i32 = arith.constant 0 : i32
    %c0_i32_0 = arith.constant 0 : i32
    %c0_i32_1 = arith.constant 0 : i32
    return %arg1, %c0_i32, %c0_i32_0 : i32, i32, i32
  }
  func.func @transform_6(%arg0: i32, %arg1: i32) -> (i32, i32, i32) {
    %c0_i32 = arith.constant 0 : i32
    %c0_i32_0 = arith.constant 0 : i32
    %c0_i32_1 = arith.constant 0 : i32
    return %arg1, %c0_i32, %c0_i32_0 : i32, i32, i32
  }
  func.func @transform_7(%arg0: i32, %arg1: i32) -> (i32, i32, i32) {
    %c0_i32 = arith.constant 0 : i32
    %c0_i32_0 = arith.constant 0 : i32
    %c0_i32_1 = arith.constant 0 : i32
    return %arg1, %c0_i32, %c0_i32_0 : i32, i32, i32
  }
  func.func @transform_8(%arg0: i32, %arg1: i32) -> (i32, i32, i32) {
    %c0_i32 = arith.constant 0 : i32
    %c0_i32_0 = arith.constant 0 : i32
    %c0_i32_1 = arith.constant 0 : i32
    return %arg1, %c0_i32, %c0_i32_0 : i32, i32, i32
  }
  func.func @transform_9(%arg0: i32, %arg1: i32) -> (i32, i32, i32) {
    %c0_i32 = arith.constant 0 : i32
    %c0_i32_0 = arith.constant 0 : i32
    %c0_i32_1 = arith.constant 0 : i32
    return %arg1, %c0_i32, %c0_i32_0 : i32, i32, i32
  }
  func.func @transform_10(%arg0: i32, %arg1: i32) -> (i32, i32, i32) {
    %c0_i32 = arith.constant 0 : i32
    %c0_i32_0 = arith.constant 0 : i32
    %c0_i32_1 = arith.constant 0 : i32
    return %arg1, %c0_i32, %c0_i32_0 : i32, i32, i32
  }
  func.func @transform_11(%arg0: i32, %arg1: i32) -> (i32, i32, i32) {
    %c0_i32 = arith.constant 0 : i32
    %c0_i32_0 = arith.constant 0 : i32
    %c0_i32_1 = arith.constant 0 : i32
    return %arg1, %c0_i32, %c0_i32_0 : i32, i32, i32
  }
  func.func @transform_12(%arg0: i32, %arg1: i32) -> (i32, i32, i32) {
    %c0_i32 = arith.constant 0 : i32
    %c0_i32_0 = arith.constant 0 : i32
    %c0_i32_1 = arith.constant 0 : i32
    return %arg1, %c0_i32, %c0_i32_0 : i32, i32, i32
  }
  func.func @transform_13(%arg0: i32, %arg1: i32) -> (i32, i32, i32) {
    %c0_i32 = arith.constant 0 : i32
    %c0_i32_0 = arith.constant 0 : i32
    %c0_i32_1 = arith.constant 0 : i32
    return %arg1, %c0_i32, %c0_i32_0 : i32, i32, i32
  }
  func.func @transform_14(%arg0: i32, %arg1: i32) -> (i32, i32, i32) {
    %c0_i32 = arith.constant 0 : i32
    %c0_i32_0 = arith.constant 0 : i32
    %c0_i32_1 = arith.constant 0 : i32
    return %arg1, %c0_i32, %c0_i32_0 : i32, i32, i32
  }
  func.func @transform_15(%arg0: i32, %arg1: i32) -> (i32, i32, i32) {
    %c0_i32 = arith.constant 0 : i32
    %c0_i32_0 = arith.constant 0 : i32
    %c0_i32_1 = arith.constant 0 : i32
    return %arg1, %c0_i32, %c0_i32_0 : i32, i32, i32
  }
  func.func @transform_16(%arg0: i32, %arg1: i32) -> (i32, i32, i32) {
    %c0_i32 = arith.constant 0 : i32
    %c0_i32_0 = arith.constant 0 : i32
    %c0_i32_1 = arith.constant 0 : i32
    return %arg1, %c0_i32, %c0_i32_0 : i32, i32, i32
  }
  func.func @transform_17(%arg0: i32, %arg1: i32) -> (i32, i32, i32) {
    %c0_i32 = arith.constant 0 : i32
    %c0_i32_0 = arith.constant 0 : i32
    %c0_i32_1 = arith.constant 0 : i32
    return %arg1, %c0_i32, %c0_i32_0 : i32, i32, i32
  }
  func.func @transform_18(%arg0: i32, %arg1: i32) -> (i32, i32, i32) {
    %c0_i32 = arith.constant 0 : i32
    %c0_i32_0 = arith.constant 0 : i32
    %c0_i32_1 = arith.constant 0 : i32
    return %arg1, %c0_i32, %c0_i32_0 : i32, i32, i32
  }
  func.func @transform_19(%arg0: i32, %arg1: i32) -> (i32, i32, i32) {
    %c0_i32 = arith.constant 0 : i32
    %c0_i32_0 = arith.constant 0 : i32
    %c0_i32_1 = arith.constant 0 : i32
    return %arg1, %c0_i32, %c0_i32_0 : i32, i32, i32
  }
  func.func @transform_20(%arg0: i32, %arg1: i32) -> (i32, i32, i32) {
    %c0_i32 = arith.constant 0 : i32
    %c0_i32_0 = arith.constant 0 : i32
    %c0_i32_1 = arith.constant 0 : i32
    return %arg1, %c0_i32, %c0_i32_0 : i32, i32, i32
  }
  func.func @transform_21(%arg0: i32, %arg1: i32) -> (i32, i32, i32) {
    %c0_i32 = arith.constant 0 : i32
    %c0_i32_0 = arith.constant 0 : i32
    %c0_i32_1 = arith.constant 0 : i32
    return %arg0, %c0_i32, %c0_i32_0 : i32, i32, i32
  }
}

</mosaic_0001>

<bundles_post_ra>
// kernel: tpu_custom_call.1
= control target key start
LH: loop header
LB: loop body
LE: loop exit
PB: predicated region body
PF: predicated region fallthrough
CT: control target
= control target key end

     0   :  { %s11808_s0 = inlined_call_operand.vmem [shape: f32[2,128,64], index: 0, kind: input, shape index: {}]   ;;  %s11809_s1 = inlined_call_operand.vmem [shape: f32[2,128,128], index: 1, kind: input, shape index: {}]   ;;  %s11810_s2 = inlined_call_operand.hbm [shape: f32[64,128], index: 2, kind: input, shape index: {}]   ;;  %s11811_s3 = inlined_call_operand.hbm [shape: f32[1,128], index: 3, kind: input, shape index: {}]   ;;  %s11812_s4 = inlined_call_operand.vmem [shape: f32[128,128], index: 4, kind: input, shape index: {}]   ;;  %s11813_s5 = inlined_call_operand.hbm [shape: f32[2,128,128], index: 5, kind: input, shape index: {}]   ;;  %s11814_s6 = inlined_call_operand.vmem [shape: f32[2,1,128], index: 6, kind: input, shape index: {}]   ;;  %s11815_s7 = inlined_call_operand.hbm [shape: f32[2,128,128], index: 7, kind: input, shape index: {}]   ;;  %s11816_s8 = inlined_call_operand.vmem [shape: f32[2,1,128], index: 8, kind: input, shape index: {}]   ;;  %s11817_s9 = inlined_call_operand.hbm [shape: f32[2,128,128], index: 9, kind: input, shape index: {}]   ;;  %s11818_s10 = inlined_call_operand.vmem [shape: f32[2,1,128], index: 10, kind: input, shape index: {}]   ;;  %s11819_s11 = inlined_call_operand.hbm [shape: f32[2,128,128], index: 11, kind: input, shape index: {}]   ;;  %s11820_s12 = inlined_call_operand.vmem [shape: f32[2,1,128], index: 12, kind: input, shape index: {}]   ;;  %s11821_s13 = inlined_call_operand.vmem [shape: f32[2,1,128], index: 13, kind: input, shape index: {}]   ;;  %s11822_s14 = inlined_call_operand.vmem [shape: f32[2,1,128], index: 14, kind: input, shape index: {}]   ;;  %s11823_s15 = inlined_call_operand.hbm [shape: f32[2,128,256], index: 15, kind: input, shape index: {}]   ;;  %s11824_s16 = inlined_call_operand.vmem [shape: f32[2,1,256], index: 16, kind: input, shape index: {}]   ;;  %s11825_s17 = inlined_call_operand.hbm [shape: f32[2,256,128], index: 17, kind: input, shape index: {}]   ;;  %s11826_s18 = inlined_call_operand.vmem [shape: f32[2,1,128], index: 18, kind: input, shape index: {}]   ;;  %s11827_s19 = inlined_call_operand.vmem [shape: f32[2,1,128], index: 19, kind: input, shape index: {}]   ;;  %s11828_s20 = inlined_call_operand.vmem [shape: f32[2,1,128], index: 20, kind: input, shape index: {}]   ;;  %s11829_s21 = inlined_call_operand.hbm [shape: f32[2,128,128], index: 21, kind: output, shape index: {}]  }
   0x1   :  { %11984 = sst [smem:[#allocation99_spill]] %s11808_s0 }
   0x2   :  { %11985 = sst [smem:[#allocation100_spill]] %s11809_s1 }
   0x3   :  { %11986 = sst [smem:[#allocation101_spill]] %s11810_s2 }
   0x4   :  { %11987 = sst [smem:[#allocation102_spill]] %s11811_s3 }
   0x5   :  { %11988 = sst [smem:[#allocation103_spill]] %s11812_s4 }
   0x6   :  { %11989 = sst [smem:[#allocation104_spill]] %s11813_s5 }
   0x7   :  { %11990 = sst [smem:[#allocation105_spill]] %s11814_s6 }
   0x8   :  { %11991 = sst [smem:[#allocation106_spill]] %s11815_s7 }
   0x9   :  { %11992 = sst [smem:[#allocation107_spill]] %s11816_s8 }
   0xa   :  { %11993 = sst [smem:[#allocation108_spill]] %s11817_s9 }
   0xb   :  { %11994 = sst [smem:[#allocation109_spill]] %s11818_s10 }
   0xc   :  { %11995 = sst [smem:[#allocation110_spill]] %s11819_s11 }
   0xd   :  { %11996 = sst [smem:[#allocation111_spill]] %s11820_s12 }
   0xe   :  { %11997 = sst [smem:[#allocation112_spill]] %s11821_s13 }
   0xf   :  { %11998 = sst [smem:[#allocation113_spill]] %s11822_s14 }
  0x10   :  { %11999 = sst [smem:[#allocation114_spill]] %s11823_s15 }
  0x11   :  { %12000 = sst [smem:[#allocation115_spill]] %s11824_s16 }
  0x12   :  { %12001 = sst [smem:[#allocation116_spill]] %s11825_s17 }
  0x13   :  { %12002 = sst [smem:[#allocation117_spill]] %s11826_s18 }
  0x14   :  { %12003 = sst [smem:[#allocation118_spill]] %s11827_s19 }
  0x15   :  { %12004 = sst [smem:[#allocation119_spill]] %s11828_s20 }
  0x16   :  { %12005 = sst [smem:[#allocation120_spill]] %s11829_s21 }
  0x17   :  { %26 = vsyncpa [#allocation4], 0 }
  0x18   :  { %27 = vsyncpa [#allocation7], 0 }
  0x19   :  { %28 = vsyncpa [#allocation5], 0 }
  0x1a   :  { %30 = vsyncpa [#allocation5 + $0x1], 0  ;;  %s8610_s2 = smov 0   ;;  %s8612_s25 = smov 0  }
  0x1b   :  { %s8614_s26 = smov 0   ;;  %s8616_s27 = smov 0  }
  0x1c   :  { %s8618_s3 = smov 0   ;;  %s8620_s28 = smov 0  }
  0x1d   :  { %s8622_s29 = smov 0   ;;  %s8624_s0 = smov 0  }
  0x1e   :  { %s8626_s4 = smov 0   ;;  %s8628_s30 = smov 0  }
  0x1f   :  { %s8630_s5 = smov 0  }
  0x20 LB: > { %12006 = sst [smem:[#allocation19_spill]] %s8439_s2  ;;  %s8664_s22 = sadd.s32 4294967295, %s8479_s5   ;;  %s8479_s5 = sphi %s8630_s5, %s36_s5   ;;  %s8475_s30 = sphi %s8628_s30, %s12355_s30   ;;  %s8471_s4 = sphi %s8626_s4, %s12354_s4   ;;  %s8467_s0 = sphi %s8624_s0, %s12353_s0   ;;  %s8463_s29 = sphi %s8622_s29, %s12352_s29   ;;  %s8459_s28 = sphi %s8620_s28, %s12358_s28   ;;  %s8455_s3 = sphi %s8618_s3, %s12350_s3   ;;  %s8451_s27 = sphi %s8616_s27, %s12349_s27   ;;  %s8447_s26 = sphi %s8614_s26, %s12357_s26   ;;  %s8443_s25 = sphi %s8612_s25, %s12356_s25   ;;  %s8439_s2 = sphi %s8610_s2, %s12347_s2  }
  0x21   : > { %12007 = sst [smem:[#allocation20_spill]] %s8443_s25  ;;  %s6093_s23 = sadd.s32 4294967294, %s8479_s5  }
  0x22   : > { %12008 = sst [smem:[#allocation21_spill]] %s8455_s3  ;;  %p177_p0 = scmp.ne.s32.totalorder %s8459_s28, %s8455_s3 }
  0x23   : > { %12009 = sst [smem:[#allocation22_spill]] %s8459_s28  ;;  %p178_p1 = scmp.eq.s32.totalorder %s8479_s5, 0 }
  0x24   : > { %12010 = sst [smem:[#allocation23_spill]] %s8463_s29  ;;  %p183_p2 = scmp.ne.s32.totalorder %s8455_s3, %s8451_s27 }
  0x25   : > { %12011 = sst [smem:[#allocation24_spill]] %s8467_s0  ;;  %p11834_p3 = scmp.eq.s32.totalorder %s8664_s22, 0 }
  0x26   : > { %12012 = sst [smem:[#allocation25_spill]] %s8471_s4  ;;  %p8674_p4 = por %p178_p1, %p177_p0 }
  0x27   : > { %12013 = sst [smem:[#allocation26_spill]] %s8475_s30  ;;  %p596_p5 = scmp.ne.s32.totalorder %s8447_s26, %s8443_s25 }
  0x28   : > { %12014 = sst [smem:[#allocation27_spill]] %s8479_s5  ;;  %p8682_p6 = por %p11834_p3, %p183_p2 }
  0x29   : > { %p597_p7 = scmp.eq.s32.totalorder %s8664_s22, 3  ;;  %p602_p8 = scmp.ne.s32.totalorder %s8443_s25, %s8439_s2 }
  0x2a   : > { %s12016_s20 = scalar_select %p8682_p6, 1, 0 }
  0x2b   : > { %p603_p9 = scmp.eq.s32.totalorder %s6093_s23, 3  ;;  %p8689_p10 = por %p597_p7, %p596_p5 }
  0x2c   : > { %12017 = sst [smem:[#allocation28_spill]] %s12016_s20  ;;  %p6094_p11 = scmp.ge.s32.totalorder %s8479_s5, 1 }
  0x2d   : > { %s12018_s27 = scalar_select %p8689_p10, 1, 0 }
  0x2e   : > { %p8694_p12 = por %p603_p9, %p602_p8  ;;  %p610_p13 = scmp.lt.s32.totalorder %s8479_s5, 5 }
  0x2f   : > { %12019 = sst [smem:[#allocation29_spill]] %s12018_s27  ;;  %s8481_s19 = smov [#allocation3]  }
  0x30   : > { %s12020_s24 = scalar_select %p8694_p12, 1, 0 }
  0x31   : > { %p8699_p0 = pnand %p6094_p11, %p610_p13  ;;  %s622_s16 = sshll.u32 %s8481_s19, 4  ;;  %s623_s16 = int_to_ptr.vmem [resolvable:$true] %s622_s16 }
  0x32   : > { %12021 = sst [smem:[#allocation30_spill]] %s12020_s24  ;;  %p7571_p2 = scmp.lt.s32.totalorder %s8479_s5, 4 }
  0x33   : > { %p7539_p1 = pneg %p8699_p0  ;;  %s8142_s2 = scalar_lea.vmem %s623_s16, 1024 }
  0x34   : > { %p8714_p7 = pnand %p7571_p2, %p8674_p4  ;;  %p8143_p9 = scmp.ne.s32.totalorder %s623_s16, %s8142_s2 }
  0x35   : > { %p8708_p5 = pnand %p7539_p1, %p11834_p3  ;;  %p8150_p12 = scmp.lt.s32.totalorder %s623_s16, %s623_s16 }
  0x36   : > { %p8151_p1 = scmp.lt.s32.totalorder %s8142_s2, %s8142_s2 }
  0x37   : > { %p8133_p8 = pneg %p8708_p5 }
  0x38   : > { %p8152_p3 = por %p8151_p1, %p8150_p12 }
  0x39   : > { %p8145_p11 = pnand %p8143_p9, %p8133_p8 }
  0x3b   : > { %p8146_p13 = pneg %p8145_p11 }
  0x3d   : > { %p8153_p10 = pnand %p8152_p3, %p8146_p13 }
  0x3f   : > { %8156 = shalt.err (!%p8153_p10)
}
  0x40   : > { %s11838_s19 = smov 128   ;;  %s11840_s21 = smov 8  }
  0x41   : > { %s12025_s18 = sld [smem:[#allocation101_spill]]  ;;  %s45_s14 = sadd.s32 1, %s8471_s4 }
  0x42   : > { %s48_s13 = sadd.s32 1, %s8475_s30  ;;  %p46_p3 = scmp.ge.s32.totalorder %s45_s14, 2 }
  0x43   : > { %s666_s12 = sand.u32 1, %s8479_s5   ;;  %s11845_s10 = sand.u32 1, %s8459_s28  }
  0x44   : > { %s12360_s14 = smov (%p46_p3, %s45_s14), 0  ;;  %s12362_s13 = smov (!%p46_p3, %s48_s13), %s8475_s30 }
  0x45   : > { %12026 = sst [smem:[#allocation31_spill]] %s12360_s14  ;;  %s167_s8 = ssub.s32 %s8471_s4, %s12360_s14 }
  0x46   : > { %s8742_s6 = sshll.u32 %s11845_s10, 7  ;;  %p50_p4 = scmp.ge.s32.totalorder %s12362_s13, 2 }
  0x47   : > { %7542 = dma.hbm_to_vmem [thread:$0]  (!%p8708_p5), %s12025_s18, 1024, %s623_s16, [#allocation4], %s11838_s19, %s11838_s19, %s11840_s21  }
  0x48   : > { %p168_p10 = scmp.eq.s32.totalorder %s167_s8, 0  ;;  %s8745_s16 = sshll.u32 %s8471_s4, 11 }
  0x49   : > { %s12364_s13 = smov (%p50_p4, %s12362_s13), 0  ;;  %s12028_s18 = sadd.s32 1, %s8459_s28 }
  0x4a   : > { %12027 = sst [smem:[#allocation32_spill]] %s12364_s13  ;;  %s583_s2 = ssub.s32 %s8475_s30, %s12364_s13 }
  0x4b   : > { %s8752_s27 = scalar_select %p168_p10, %s8459_s28, %s12028_s18  }
  0x4c   : > { %s12030_s5 = sld [smem:[#allocation104_spill]]  ;;  %p584_p12 = scmp.eq.s32.totalorder %s583_s2, 0 }
  0x4d   : > { %12029 = sst [smem:[#allocation33_spill]] %s8752_s27  ;;  %s670_s10 = scalar_lea.vmem [#allocation8], %s8742_s6 }
  0x4e   : > { %s677_s29 = sshll.u32 %s670_s10, 4  ;;  %s12031_s0 = sadd.s32 1, %s8447_s26  ;;  %s678_s29 = int_to_ptr.vmem [resolvable:$true] %s677_s29 }
  0x4f   : > { %s8764_s8 = scalar_select %p584_p12, %s8447_s26, %s12031_s0  }
  0x50   : > { %s8766_s25 = scalar_lea.sflag [#allocation4], %s666_s12  ;;  %p8770_p2 = pneg %p8714_p7 }
  0x51   : > { %12032 = sst [smem:[#allocation34_spill]] %s8764_s8  ;;  %s8170_s18 = scalar_lea.vmem %s678_s29, 2048 }
  0x52   : > { %s676_s14 = scalar_lea.hbm %s12030_s5, %s8745_s16  ;;  %p8171_p9 = scmp.ne.s32.totalorder %s678_s29, %s8170_s18 }
  0x53   : > { %s8484_s5 = smov [#allocation8]  }
  0x54   : > { %p8173_p11 = pnand %p8171_p9, %p8770_p2  ;;  %s8175_s19 = sshll.u32 %s8484_s5, 4  ;;  %s8176_s19 = int_to_ptr.vmem [resolvable:$false] %s8175_s19 }
  0x55   : > { %s8177_s10 = scalar_lea.vmem %s8176_s19, 4096  ;;  %p8178_p1 = scmp.lt.s32.totalorder %s678_s29, %s8176_s19 }
  0x56   : > { %p8174_p13 = pneg %p8173_p11  ;;  %p8179_p3 = scmp.lt.s32.totalorder %s8177_s10, %s8170_s18 }
  0x58   : > { %p8180_p4 = por %p8179_p3, %p8178_p1 }
  0x5a   : > { %p8181_p10 = pnand %p8180_p4, %p8174_p13 }
  0x5c   : > { %8184 = shalt.err (!%p8181_p10)
}
  0x5d   : > { %s12034_s12 = smov 8   ;;  %s12035_s0 = smov 128  }
  0x5e   : > { %7549 = dma.hbm_to_vmem [thread:$0]  (!%p8714_p7), %s676_s14, 2048, %s678_s29, %s8766_s25, %s12035_s0, %s12035_s0, %s12034_s12  }
  0x5f   : > { %s12036_s7 = sld [smem:[#allocation106_spill]]  ;;  %s697_s13 = scalar_lea.vmem [#allocation9], %s8742_s6 }
  0x60   : > { %s704_s19 = sshll.u32 %s697_s13, 4  ;;  %s8485_s10 = smov [#allocation9]   ;;  %s705_s19 = int_to_ptr.vmem [resolvable:$true] %s704_s19 }
  0x61   : > { %s8198_s18 = scalar_lea.vmem %s705_s19, 2048  ;;  %s8203_s30 = sshll.u32 %s8485_s10, 4  ;;  %s8204_s30 = int_to_ptr.vmem [resolvable:$false] %s8203_s30 }
  0x62   : > { %p8199_p12 = scmp.ne.s32.totalorder %s705_s19, %s8198_s18  ;;  %s8205_s27 = scalar_lea.vmem %s8204_s30, 4096 }
  0x63   : > { %p8206_p13 = scmp.lt.s32.totalorder %s705_s19, %s8204_s30  ;;  %p8207_p1 = scmp.lt.s32.totalorder %s8205_s27, %s8198_s18 }
  0x64   : > { %p8201_p9 = pnand %p8199_p12, %p8770_p2 }
  0x65   : > { %s703_s5 = scalar_lea.hbm %s12036_s7, %s8745_s16  ;;  %p8208_p3 = por %p8207_p1, %p8206_p13 }
  0x66   : > { %p8202_p11 = pneg %p8201_p9 }
  0x68   : > { %p8209_p4 = pnand %p8208_p3, %p8202_p11 }
  0x6a   : > { %8212 = shalt.err (!%p8209_p4)
}
  0x6b   : > { %7552 = dma.hbm_to_vmem [thread:$0]  (!%p8714_p7), %s703_s5, 2048, %s705_s19, %s8766_s25, %s12035_s0, %s12035_s0, %s12034_s12  }
  0x6c   : > { %s12037_s9 = sld [smem:[#allocation108_spill]]  ;;  %s724_s21 = scalar_lea.vmem [#allocation10], %s8742_s6 }
  0x6d   : > { %s731_s30 = sshll.u32 %s724_s21, 4  ;;  %s8486_s2 = smov [#allocation10]   ;;  %s732_s30 = int_to_ptr.vmem [resolvable:$true] %s731_s30 }
  0x6e   : > { %s8226_s27 = scalar_lea.vmem %s732_s30, 2048  ;;  %s8231_s18 = sshll.u32 %s8486_s2, 4  ;;  %s8232_s18 = int_to_ptr.vmem [resolvable:$false] %s8231_s18 }
  0x6f   : > { %p8227_p10 = scmp.ne.s32.totalorder %s732_s30, %s8226_s27  ;;  %s8233_s10 = scalar_lea.vmem %s8232_s18, 4096 }
  0x70   : > { %p8234_p11 = scmp.lt.s32.totalorder %s732_s30, %s8232_s18  ;;  %p8235_p13 = scmp.lt.s32.totalorder %s8233_s10, %s8226_s27 }
  0x71   : > { %p8229_p12 = pnand %p8227_p10, %p8770_p2 }
  0x72   : > { %s730_s29 = scalar_lea.hbm %s12037_s9, %s8745_s16  ;;  %p8236_p1 = por %p8235_p13, %p8234_p11 }
  0x73   : > { %p8230_p9 = pneg %p8229_p12 }
  0x75   : > { %p8237_p3 = pnand %p8236_p1, %p8230_p9 }
  0x77   : > { %8240 = shalt.err (!%p8237_p3)
}
  0x78   : > { %7555 = dma.hbm_to_vmem [thread:$0]  (!%p8714_p7), %s730_s29, 2048, %s732_s30, %s8766_s25, %s12035_s0, %s12035_s0, %s12034_s12  }
  0x79   : > { %s12038_s11 = sld [smem:[#allocation110_spill]]  ;;  %s751_s14 = scalar_lea.vmem [#allocation11], %s8742_s6 }
  0x7a   : > { %s758_s21 = sshll.u32 %s751_s14, 4  ;;  %s12039_s27 = sand.u32 1, %s8459_s28   ;;  %s759_s21 = int_to_ptr.vmem [resolvable:$true] %s758_s21 }
  0x7b   : > { %s8815_s2 = sshll.u32 %s12039_s27, 8  ;;  %s8254_s18 = scalar_lea.vmem %s759_s21, 2048 }
  0x7c   : > { %p8255_p4 = scmp.ne.s32.totalorder %s759_s21, %s8254_s18  ;;  %s8487_s10 = smov [#allocation11]  }
  0x7d   : > { %s8259_s7 = sshll.u32 %s8487_s10, 4  ;;  %s8260_s7 = int_to_ptr.vmem [resolvable:$false] %s8259_s7 }
  0x7e   : > { %p8257_p10 = pnand %p8255_p4, %p8770_p2  ;;  %s8261_s9 = scalar_lea.vmem %s8260_s7, 4096 }
  0x7f   : > { %s757_s13 = scalar_lea.hbm %s12038_s11, %s8745_s16  ;;  %p8262_p9 = scmp.lt.s32.totalorder %s759_s21, %s8260_s7 }
  0x80   : > { %p8258_p12 = pneg %p8257_p10  ;;  %p8263_p11 = scmp.lt.s32.totalorder %s8261_s9, %s8254_s18 }
  0x82   : > { %p8264_p13 = por %p8263_p11, %p8262_p9 }
  0x84   : > { %p8265_p1 = pnand %p8264_p13, %p8258_p12 }
  0x86   : > { %8268 = shalt.err (!%p8265_p1)
}
  0x87   : > { %7558 = dma.hbm_to_vmem [thread:$0]  (!%p8714_p7), %s757_s13, 2048, %s759_s21, %s8766_s25, %s12035_s0, %s12035_s0, %s12034_s12  }
  0x88   : > { %s6296_s6 = sshll.u32 %s8471_s4, 12  ;;  %s12040_s15 = sld [smem:[#allocation114_spill]] }
  0x89   : > { %s790_s7 = scalar_lea.vmem [#allocation12], %s8815_s2  ;;  %s8488_s19 = smov [#allocation12]  }
  0x8a   : > { %s797_s9 = sshll.u32 %s790_s7, 4  ;;  %s8287_s14 = sshll.u32 %s8488_s19, 4  ;;  %s798_s9 = int_to_ptr.vmem [resolvable:$true] %s797_s9  ;;  %s8288_s14 = int_to_ptr.vmem [resolvable:$false] %s8287_s14 }
  0x8b   : > { %s8282_s5 = scalar_lea.vmem %s798_s9, 4096  ;;  %s8289_s27 = scalar_lea.vmem %s8288_s14, 8192 }
  0x8c   : > { %p8283_p3 = scmp.ne.s32.totalorder %s798_s9, %s8282_s5  ;;  %p8290_p12 = scmp.lt.s32.totalorder %s798_s9, %s8288_s14 }
  0x8d   : > { %p8291_p9 = scmp.lt.s32.totalorder %s8289_s27, %s8282_s5 }
  0x8e   : > { %s796_s30 = scalar_lea.hbm %s12040_s15, %s6296_s6  ;;  %p8285_p4 = pnand %p8283_p3, %p8770_p2 }
  0x8f   : > { %p8292_p11 = por %p8291_p9, %p8290_p12 }
  0x90   : > { %p8286_p10 = pneg %p8285_p4 }
  0x92   : > { %p8293_p13 = pnand %p8292_p11, %p8286_p10 }
  0x94   : > { %8296 = shalt.err (!%p8293_p13)
}
  0x95   : > { %s8489_s13 = smov 256   ;;  %s8490_s21 = smov 16  }
  0x96   : > { %7561 = dma.hbm_to_vmem [thread:$0]  (!%p8714_p7), %s796_s30, 4096, %s798_s9, %s8766_s25, %s8489_s13, %s8489_s13, %s8490_s21  }
  0x97   : > { %s8491_s18 = smov [#allocation6]   ;;  %s12041_s17 = sld [smem:[#allocation116_spill]] }
  0x98   : > { %s636_s10 = sshll.u32 %s8491_s18, 4  ;;  %s637_s10 = int_to_ptr.vmem [resolvable:$true] %s636_s10 }
  0x99   : > { %s8308_s19 = scalar_lea.vmem %s637_s10, 16  ;;  %s8315_s5 = scalar_lea.vmem %s637_s10, 32 }
  0x9a   : > { %p8309_p1 = scmp.ne.s32.totalorder %s637_s10, %s8308_s19  ;;  %p8316_p10 = scmp.lt.s32.totalorder %s637_s10, %s637_s10 }
  0x9b   : > { %p8317_p12 = scmp.lt.s32.totalorder %s8315_s5, %s8308_s19 }
  0x9c   : > { %p8311_p3 = pnand %p8309_p1, %p8133_p8 }
  0x9d   : > { %s8838_s7 = scalar_lea.hbm %s12041_s17, %s6296_s6  ;;  %p8318_p9 = por %p8317_p12, %p8316_p10 }
  0x9e   : > { %p8312_p4 = pneg %p8311_p3 }
  0xa0   : > { %p8319_p11 = pnand %p8318_p9, %p8312_p4 }
  0xa2   : > { %8322 = shalt.err (!%p8319_p11)
}
  0xa3   : > { %s12042_s14 = sld [smem:[#allocation102_spill]]  ;;  %s818_s6 = scalar_lea.vmem [#allocation13], %s8815_s2 }
  0xa4   : > { %s825_s27 = sshll.u32 %s818_s6, 4  ;;  %s8492_s21 = smov [#allocation13]   ;;  %s826_s27 = int_to_ptr.vmem [resolvable:$true] %s825_s27 }
  0xa5   : > { %s8336_s13 = scalar_lea.vmem %s826_s27, 4096  ;;  %s8341_s18 = sshll.u32 %s8492_s21, 4  ;;  %s8342_s18 = int_to_ptr.vmem [resolvable:$false] %s8341_s18 }
  0xa6   : > { %p8337_p8 = scmp.ne.s32.totalorder %s826_s27, %s8336_s13  ;;  %s8343_s16 = scalar_lea.vmem %s8342_s18, 8192 }
  0xa7   : > { %p8344_p3 = scmp.lt.s32.totalorder %s826_s27, %s8342_s18  ;;  %p8345_p4 = scmp.lt.s32.totalorder %s8343_s16, %s8336_s13 }
  0xa8   : > { %p8339_p13 = pnand %p8337_p8, %p8770_p2 }
  0xa9   : > { %7545 = dma.hbm_to_vmem [thread:$0]  (!%p8708_p5), %s12042_s14, 16, %s637_s10, [#allocation7]  }
  0xaa   : > { %p8340_p1 = pneg %p8339_p13  ;;  %p8346_p10 = por %p8345_p4, %p8344_p3 }
  0xac   : > { %p8347_p12 = pnand %p8346_p10, %p8340_p1 }
  0xae   : > { %8350 = shalt.err (!%p8347_p12)
}
  0xaf   : > { %7564 = dma.hbm_to_vmem [thread:$0]  (!%p8714_p7), %s8838_s7, 4096, %s826_s27, %s8766_s25, %s12035_s0, %s12035_s0, %s12034_s12  }
  0xb0   : > { %855 = sbr.rel (%p8699_p0) target bundleno = 4906 (0x132a), region = 104 }
  0xb5   : > { %p12043_p5 = scmp.eq.s32.totalorder %s8664_s22, 0 }
  0xb7   : > { %8422 = dma.done.wait (%p12043_p5), [#allocation4], 1024   ;;  %p12044_p2 = pmov %p12043_p5 }
  0xb9   : > { %8424 = vsyncadd (%p12044_p2), [#allocation4], 4294966272  ;;  %p12045_p9 = pmov %p12044_p2 }
  0xba   : > { %p12046_p11 = pmov %p12044_p2 }
  0xbb   : > { %8426 = dma.done.wait (%p12045_p9), [#allocation7], 16  }
  0xbc   : > { %8428 = vsyncadd (%p12046_p11), [#allocation7], 4294967280  ;;  %s865_s24 = sand.u32 1, %s8664_s22   ;;  %s867_s25 = sand.u32 1, %s8455_s3  }
  0xbd   : > { %s6119_s23 = sshll.u32 %s867_s25, 7  ;;  %s866_s1 = scalar_lea.sflag [#allocation4], %s865_s24 }
  0xbe   : > { %s8870_s12 = scalar_lea.vmem [#allocation8], %s6119_s23 }
  0xbf   : > { %8430 = dma.done.wait (%p8682_p6), %s866_s1, 16384  }
  0xc0   : > { %8432 = vsyncadd (%p8682_p6), %s866_s1, 4294950912  ;;  %s12048_s0 = sld [smem:[#allocation20_spill]]  ;;  %s6123_s29 = sshll.u32 %s867_s25, 8 }
  0xc1   : > { %s12049_s2 = sld [smem:[#allocation24_spill]]  ;;  %s8937_s8 = scalar_lea.vmem [#allocation9], %s6119_s23 }
  0xc2   : > { %s12050_s10 = sld [smem:[#allocation23_spill]]  ;;  %s8943_s25 = scalar_lea.vmem [#allocation12], %s6123_s29 }
  0xc3   : > { %s12051_s14 = sld [smem:[#allocation99_spill]]  ;;  %s8945_s1 = scalar_lea.vmem [#allocation13], %s6123_s29 }
  0xc4   : > { %s12052_s21 = sld [smem:[#allocation100_spill]] }
  0xc5   : > { %s12055_s17 = sld [smem:[#allocation109_spill]] }
  0xc6   : > { %s11854_s7 = sand.u32 1, %s12048_s0   ;;  %s12058_s16 = sld [smem:[#allocation113_spill]] }
  0xc7   : > { %p1039_p0 = scmp.lt.s32.totalorder %s12049_s2, 1  ;;  %s6125_s22 = sshll.u32 %s11854_s7, 7 }
  0xc8   : > { %p1049_p7 = scmp.lt.s32.totalorder %s12050_s10, 1  ;;  %s12059_s7 = sld [smem:[#allocation117_spill]] }
  0xc9   : > { %s12366_s2 = smov (!%p1039_p0, %s12049_s2), 1  ;;  %s8947_s11 = scalar_lea.vmem [#allocation14], %s6125_s22 }
  0xca   : > { %s8883_s19 = scalar_select %p1049_p7, %s12050_s10, 1 }
  0xcb   : > { %s6298_s5 = sshll.u32 %s12366_s2, 7  ;;  %p6131_p6 = scmp.ne.s32.totalorder %s12050_s10, 0 }
  0xcc   : > { %s8888_s6 = scalar_lea.vmem %s12051_s14, %s6298_s5  ;;  %s8893_s18 = scalar_lea.vmem %s12052_s21, %s6298_s5 }
  0xcd   : > { %s1057_s4 = scalar_lea.vmem %s12055_s17, %s8883_s19  ;;  %s1066_s20 = scalar_lea.vmem %s12058_s16, %s8883_s19 }
  0xce   : > { %s6130_s24 = sshll.u32 %s8883_s19, 1  ;;  %s1073_s0 = scalar_lea.vmem %s12059_s7, %s8883_s19 }
  0xcf   : > { %s12060_s17 = sld [smem:[#allocation115_spill]]  ;;  %s8939_s21 = scalar_lea.vmem [#allocation10], %s6119_s23 }
  0xd0   : > { %s12061_s14 = sld [smem:[#allocation118_spill]]  ;;  %s8941_s16 = scalar_lea.vmem [#allocation11], %s6119_s23 }
  0xd1   : > { %s12062_s5 = sld [smem:[#allocation119_spill]] }
  0xd2   : > { %s12063_s29 = sld [smem:[#allocation103_spill]] (!%p6131_p6) }
  0xd3   : > { %1083 = sbr.rel (%p6131_p6) target bundleno = 446 (0x1be), region = 140 }
  0xd5   : > { %s8927_s2 = scalar_lea.vmem %s12060_s17, %s6130_s24 }
  0xd6   : > { %s1076_s28 = scalar_lea.vmem %s12061_s14, %s8883_s19 }
  0xd7   : > { %s1079_s13 = scalar_lea.vmem %s12062_s5, %s8883_s19 }
  0xd8   : > { %v1107_v0 = vld [vmem:[#allocation3 + $0x38] sm:$0xff]  ;;  %v1106_v1 = vld [vmem:[#allocation3 + $0x30] sm:$0xff]  ;;  %v1105_v2 = vld [vmem:[#allocation3 + $0x28] sm:$0xff]  ;;  %vm1115_vm0 = vcmask 523264   ;;  %s12064_s22 = smov %s12063_s29 }
  0xd9   : > { %6789 = vmatprep.subr.mxu0 %v1107_v0  ;;  %7501 = vmatprep.subr.mxu1 %v1107_v0  ;;  %v1104_v3 = vld [vmem:[#allocation3 + $0x20] sm:$0xff]  ;;  %v1103_v4 = vld [vmem:[#allocation3 + $0x18] sm:$0xff]  ;;  %v1102_v5 = vld [vmem:[#allocation3 + $0x10] sm:$0xff] }
  0xda   : > { %6790 = vmatpush3.msra.mxu0 %v1107_v0  ;;  %7509 = vmatpush3.msra.mxu1 %v1107_v0  ;;  %v1101_v6 = vld [vmem:[#allocation3 + $0x8] sm:$0xff]  ;;  %v1100_v7 = vld [vmem:[#allocation3] sm:$0xff]  ;;  %v1086_v12 = vld [vmem:[%s8888_s6 + $0x10] sm:$0xff] }
  0xdb   : > { %6791 = vmatprep.subr.mxu0 %v1106_v1  ;;  %7502 = vmatprep.subr.mxu1 %v1106_v1  ;;  %v1084_v8 = vld [vmem:[%s8888_s6] sm:$0xff]  ;;  %v1085_v10 = vld [vmem:[%s8888_s6 + $0x8] sm:$0xff]  ;;  %v1094_v13 = vld [vmem:[%s8888_s6 + $0x50] sm:$0xff] }
  0xdc   : > { %6792 = vmatpush3.msra.mxu0 %v1106_v1  ;;  %7510 = vmatpush3.msra.mxu1 %v1106_v1  ;;  %v1092_v9 = vld [vmem:[%s8888_s6 + $0x40] sm:$0xff]  ;;  %v1093_v11 = vld [vmem:[%s8888_s6 + $0x48] sm:$0xff]  ;;  %v1087_v14 = vld [vmem:[%s8888_s6 + $0x18] sm:$0xff] }
  0xdd   : > { %6793 = vmatprep.subr.mxu0 %v1105_v2  ;;  %7503 = vmatprep.subr.mxu1 %v1105_v2  ;;  %v1095_v15 = vld [vmem:[%s8888_s6 + $0x58] sm:$0xff]  ;;  %v1088_v16 = vld [vmem:[%s8888_s6 + $0x20] sm:$0xff]  ;;  %v1089_v18 = vld [vmem:[%s8888_s6 + $0x28] sm:$0xff] }
  0xde   : > { %6794 = vmatpush3.msra.mxu0 %v1105_v2  ;;  %7511 = vmatpush3.msra.mxu1 %v1105_v2  ;;  %v1096_v17 = vld [vmem:[%s8888_s6 + $0x60] sm:$0xff]  ;;  %v1097_v19 = vld [vmem:[%s8888_s6 + $0x68] sm:$0xff]  ;;  %v1090_v20 = vld [vmem:[%s8888_s6 + $0x30] sm:$0xff] }
  0xdf   : > { %6795 = vmatprep.subr.mxu0 %v1104_v3  ;;  %7504 = vmatprep.subr.mxu1 %v1104_v3  ;;  %v1098_v21 = vld [vmem:[%s8888_s6 + $0x70] sm:$0xff]  ;;  %v1091_v22 = vld [vmem:[%s8888_s6 + $0x38] sm:$0xff]  ;;  %v8982_v24 = vld [vmem:[#allocation6] ss:$0 sm:$0xff] }
  0xe0   : > { %6796 = vmatpush3.msra.mxu0 %v1104_v3  ;;  %7512 = vmatpush3.msra.mxu1 %v1104_v3  ;;  %v1099_v23 = vld [vmem:[%s8888_s6 + $0x78] sm:$0xff]  ;;  %v1310_v26 = vld [vmem:[%s12063_s29 + $0x8] sm:$0xff]  ;;  %v1309_v32 = vld [vmem:[%s12064_s22] sm:$0xff] }
  0xe1   : > { %6797 = vmatprep.subr.mxu0 %v1103_v4  ;;  %7505 = vmatprep.subr.mxu1 %v1103_v4  ;;  %v1318_v28 = vld [vmem:[%s12064_s22 + $0x48] sm:$0xff]  ;;  %v1317_v34 = vld [vmem:[%s12064_s22 + $0x40] sm:$0xff]  ;;  %v1312_v40 = vld [vmem:[%s12064_s22 + $0x18] sm:$0xff] }
  0xe2   : > { %6798 = vmatpush3.msra.mxu0 %v1103_v4  ;;  %7513 = vmatpush3.msra.mxu1 %v1103_v4  ;;  %v1320_v42 = vld [vmem:[%s12064_s22 + $0x58] sm:$0xff]  ;;  %v1311_v48 = vld [vmem:[%s12064_s22 + $0x10] sm:$0xff]  ;;  %v1314_v56 = vld [vmem:[%s12064_s22 + $0x28] sm:$0xff] }
  0xe3   : > { %6799 = vmatprep.subr.mxu0 %v1102_v5  ;;  %7506 = vmatprep.subr.mxu1 %v1102_v5  ;;  %v1319_v50 = vld [vmem:[%s12064_s22 + $0x50] sm:$0xff]  ;;  %v1322_v58 = vld [vmem:[%s12064_s22 + $0x68] sm:$0xff]  ;;  %v1313_v0 = vld [vmem:[%s12064_s22 + $0x20] sm:$0xff] }
  0xe4   : > { %6800 = vmatpush3.msra.mxu0 %v1102_v5  ;;  %7514 = vmatpush3.msra.mxu1 %v1102_v5  ;;  %v1321_v2 = vld [vmem:[%s12064_s22 + $0x60] sm:$0xff] }
  0xe5   : > { %6801 = vmatprep.subr.mxu0 %v1101_v6  ;;  %7507 = vmatprep.subr.mxu1 %v1101_v6 }
  0xe6   : > { %6802 = vmatpush3.msra.mxu0 %v1101_v6  ;;  %7515 = vmatpush3.msra.mxu1 %v1101_v6 }
  0xe7   : > { %6803 = vmatprep.subr.mxu0 %v1100_v7  ;;  %7508 = vmatprep.subr.mxu1 %v1100_v7 }
  0xe8   : > { %6804 = vmatpush3.msra.mxu0 %v1100_v7  ;;  %7516 = vmatpush3.msra.mxu1 %v1100_v7 }
  0xe9   : > { %6805 = vmatprep.mubr.msk.f32.mxu0 %vm1115_vm0, %v1084_v8  ;;  %6817 = vmatprep.mubr.msk.f32.mxu1 %vm1115_vm0, %v1092_v9  ;;  %v1316_v8 = vld [vmem:[%s12064_s22 + $0x38] sm:$0xff] }
  0xea   : > { %6806 = vmatmul.mubr.msk.f32.vlgmr.msra.gmra.mxu0 %vm1115_vm0, %v1085_v10  ;;  %6818 = vmatmul.mubr.msk.f32.vlgmr.msra.gmra.mxu1 %vm1115_vm0, %v1093_v11  ;;  %v1324_v10 = vld [vmem:[%s12064_s22 + $0x78] sm:$0xff] }
  0xeb   : > { %6808 = vmatprep.mubr.msk.f32.mxu0 %vm1115_vm0, %v1086_v12  ;;  %6820 = vmatprep.mubr.msk.f32.mxu1 %vm1115_vm0, %v1094_v13 }
  0xee   : > { %6809 = vmatmul.mubr.msk.f32.gmra.mxu0 %vm1115_vm0, %v1087_v14  ;;  %6821 = vmatmul.mubr.msk.f32.gmra.mxu1 %vm1115_vm0, %v1095_v15 }
  0xef   : > { %6811 = vmatprep.mubr.msk.f32.mxu0 %vm1115_vm0, %v1088_v16  ;;  %6823 = vmatprep.mubr.msk.f32.mxu1 %vm1115_vm0, %v1096_v17  ;;  %v1315_v16 = vld [vmem:[%s12064_s22 + $0x30] sm:$0xff] }
  0xf2   : > { %6812 = vmatmul.mubr.msk.f32.gmra.mxu0 %vm1115_vm0, %v1089_v18  ;;  %6824 = vmatmul.mubr.msk.f32.gmra.mxu1 %vm1115_vm0, %v1097_v19  ;;  %v1323_v18 = vld [vmem:[%s12064_s22 + $0x70] sm:$0xff] }
  0xf3   : > { %6814 = vmatprep.mubr.msk.f32.mxu0 %vm1115_vm0, %v1090_v20  ;;  %6826 = vmatprep.mubr.msk.f32.mxu1 %vm1115_vm0, %v1098_v21 }
  0xf6   : > { %6815 = vmatmul.mubr.msk.f32.gmra.mxu0 %vm1115_vm0, %v1091_v22  ;;  %6827 = vmatmul.mubr.msk.f32.gmra.mxu1 %vm1115_vm0, %v1099_v23 }
 0x1aa   : > { %v6807_v25 = vpop.f32.mrf.mxu0  ;;  %v6819_v27 = vpop.f32.mrf.mxu1 }
 0x1ab   : > { %v1236_v29 = vadd.f32 %v6807_v25, %v8982_v24  ;;  %v1276_v30 = vadd.f32 %v6819_v27, %v8982_v24 }
 0x1ac   : > { %v1230_v31 = vpop.f32.mrf.mxu0  ;;  %v1270_v33 = vpop.f32.mrf.mxu1 }
 0x1ad   : > { %v1326_v35 = vadd.f32 %v1310_v26, %v1236_v29  ;;  %v1334_v36 = vadd.f32 %v1318_v28, %v1276_v30  ;;  %v1231_v37 = vadd.f32 %v8982_v24, %v1230_v31  ;;  %v1271_v38 = vadd.f32 %v8982_v24, %v1270_v33 }
 0x1ae   : > { %v6810_v39 = vpop.f32.mrf.mxu0  ;;  %v6822_v41 = vpop.f32.mrf.mxu1 }
 0x1af   : > { %1342 = vst [vmem:[#allocation2] sm:$0xff] %v1326_v35  ;;  %1350 = vst [vmem:[#allocation2 + $0x20] sm:$0xff] %v1334_v36  ;;  %v1325_v43 = vadd.f32 %v1309_v32, %v1231_v37  ;;  %v1333_v44 = vadd.f32 %v1317_v34, %v1271_v38  ;;  %v1246_v45 = vadd.f32 %v6810_v39, %v8982_v24 }
 0x1b0   : > { %v1286_v46 = vadd.f32 %v6822_v41, %v8982_v24  ;;  %v1240_v47 = vpop.f32.mrf.mxu0  ;;  %v1280_v49 = vpop.f32.mrf.mxu1 }
 0x1b1   : > { %1341 = vst [vmem:[#allocation2 + $0x30] sm:$0xff] %v1325_v43  ;;  %1349 = vst [vmem:[#allocation2 + $0x40] sm:$0xff] %v1333_v44  ;;  %v1328_v51 = vadd.f32 %v1312_v40, %v1246_v45  ;;  %v1241_v53 = vadd.f32 %v8982_v24, %v1240_v47  ;;  %v1281_v54 = vadd.f32 %v8982_v24, %v1280_v49 }
 0x1b2   : > { %v1336_v52 = vadd.f32 %v1320_v42, %v1286_v46  ;;  %v6813_v55 = vpop.f32.mrf.mxu0  ;;  %v6825_v57 = vpop.f32.mrf.mxu1 }
 0x1b3   : > { %1344 = vst [vmem:[#allocation2 + $0x18] sm:$0xff] %v1328_v51  ;;  %v1327_v59 = vadd.f32 %v1311_v48, %v1241_v53  ;;  %v1335_v60 = vadd.f32 %v1319_v50, %v1281_v54  ;;  %v1256_v61 = vadd.f32 %v6813_v55, %v8982_v24  ;;  %v1296_v62 = vadd.f32 %v6825_v57, %v8982_v24 }
 0x1b4   : > { %1352 = vst [vmem:[#allocation2 + $0x38] sm:$0xff] %v1336_v52  ;;  %v1250_v63 = vpop.f32.mrf.mxu0  ;;  %v1290_v1 = vpop.f32.mrf.mxu1 }
 0x1b5   : > { %1343 = vst [vmem:[#allocation2 + $0x58] sm:$0xff] %v1327_v59  ;;  %1351 = vst [vmem:[#allocation2 + $0x10] sm:$0xff] %v1335_v60  ;;  %v1330_v3 = vadd.f32 %v1314_v56, %v1256_v61  ;;  %v1338_v4 = vadd.f32 %v1322_v58, %v1296_v62  ;;  %v1251_v5 = vadd.f32 %v8982_v24, %v1250_v63 }
 0x1b6   : > { %v1291_v6 = vadd.f32 %v8982_v24, %v1290_v1  ;;  %v6816_v7 = vpop.f32.mrf.mxu0  ;;  %v6828_v9 = vpop.f32.mrf.mxu1 }
 0x1b7   : > { %1346 = vst [vmem:[#allocation2 + $0x68] sm:$0xff] %v1330_v3  ;;  %1354 = vst [vmem:[#allocation2 + $0x70] sm:$0xff] %v1338_v4  ;;  %v1329_v11 = vadd.f32 %v1313_v0, %v1251_v5  ;;  %v1266_v13 = vadd.f32 %v6816_v7, %v8982_v24  ;;  %v1306_v14 = vadd.f32 %v6828_v9, %v8982_v24 }
 0x1b8   : > { %v1337_v12 = vadd.f32 %v1321_v2, %v1291_v6  ;;  %v1260_v15 = vpop.f32.mrf.mxu0  ;;  %v1300_v17 = vpop.f32.mrf.mxu1 }
 0x1b9   : > { %1345 = vst [vmem:[#allocation2 + $0x50] sm:$0xff] %v1329_v11  ;;  %v1332_v19 = vadd.f32 %v1316_v8, %v1266_v13  ;;  %v1340_v20 = vadd.f32 %v1324_v10, %v1306_v14  ;;  %v1261_v21 = vadd.f32 %v8982_v24, %v1260_v15  ;;  %v1301_v22 = vadd.f32 %v8982_v24, %v1300_v17 }
 0x1ba   : > { %1353 = vst [vmem:[#allocation2 + $0x60] sm:$0xff] %v1337_v12 }
 0x1bb   : > { %1348 = vst [vmem:[#allocation2 + $0x48] sm:$0xff] %v1332_v19  ;;  %1356 = vst [vmem:[#allocation2 + $0x28] sm:$0xff] %v1340_v20  ;;  %v1331_v23 = vadd.f32 %v1315_v16, %v1261_v21  ;;  %v1339_v25 = vadd.f32 %v1323_v18, %v1301_v22 }
 0x1bd   : > { %1347 = vst [vmem:[#allocation2 + $0x8] sm:$0xff] %v1331_v23  ;;  %1355 = vst [vmem:[#allocation2 + $0x78] sm:$0xff] %v1339_v25 }
 0x1be PF: > { %v1572_v26 = vld [vmem:[%s8937_s8 + $0x78] sm:$0xff]  ;;  %v1571_v27 = vld [vmem:[%s8937_s8 + $0x70] sm:$0xff]  ;;  %v1570_v28 = vld [vmem:[%s8937_s8 + $0x68] sm:$0xff]  ;;  %vm1893_vm1 = vcmask 261120   ;;  %s12068_s30 = sld [smem:[#allocation107_spill]]  ;;  %s8493_s14 = smov 96  }
 0x1bf   : > { %6885 = vmatprep.subr.mxu1 %v1572_v26  ;;  %v1569_v24 = vld [vmem:[%s8937_s8 + $0x60] sm:$0xff]  ;;  %v9052_v29 = vld [vmem:[#allocation2 + $0x30] sm:$0xff]  ;;  %v1568_v30 = vld [vmem:[%s8937_s8 + $0x58] sm:$0xff]  ;;  %s12328_s10 = sld [smem:[#allocation111_spill]] }
 0x1c0   : > { %6886 = vmatpush3.msra.mxu1 %v1572_v26  ;;  %6917 = vmatprep.mubr.f32.mxu1 %v9052_v29  ;;  %v1567_v31 = vld [vmem:[%s8937_s8 + $0x50] sm:$0xff]  ;;  %v1404_v32 = vld [vmem:[%s8870_s12 + $0x78] sm:$0xff]  ;;  %v1566_v34 = vld [vmem:[%s8937_s8 + $0x48] sm:$0xff]  ;;  %s12330_s7 = sld [smem:[#allocation112_spill]] }
 0x1c1   : > { %6887 = vmatprep.subr.mxu1 %v1571_v27  ;;  %6861 = vmatprep.mubr.f32.mxu0 %v9052_v29  ;;  %v1403_v33 = vld [vmem:[%s8870_s12 + $0x70] sm:$0xff]  ;;  %v1402_v35 = vld [vmem:[%s8870_s12 + $0x68] sm:$0xff]  ;;  %v1565_v36 = vld [vmem:[%s8937_s8 + $0x40] sm:$0xff] }
 0x1c2   : > { %6888 = vmatpush3.msra.mxu1 %v1571_v27  ;;  %6829 = vmatprep.subr.mxu0 %v1404_v32  ;;  %v1401_v37 = vld [vmem:[%s8870_s12 + $0x60] sm:$0xff]  ;;  %v1564_v38 = vld [vmem:[%s8937_s8 + $0x38] sm:$0xff]  ;;  %v1563_v40 = vld [vmem:[%s8937_s8 + $0x30] sm:$0xff] }
 0x1c3   : > { %6889 = vmatprep.subr.mxu1 %v1570_v28  ;;  %6830 = vmatpush3.msra.mxu0 %v1404_v32  ;;  %v1400_v39 = vld [vmem:[%s8870_s12 + $0x58] sm:$0xff]  ;;  %v1399_v41 = vld [vmem:[%s8870_s12 + $0x50] sm:$0xff]  ;;  %v1562_v42 = vld [vmem:[%s8937_s8 + $0x28] sm:$0xff] }
 0x1c4   : > { %6890 = vmatpush3.msra.mxu1 %v1570_v28  ;;  %6831 = vmatprep.subr.mxu0 %v1403_v33  ;;  %v1398_v43 = vld [vmem:[%s8870_s12 + $0x48] sm:$0xff]  ;;  %v1561_v44 = vld [vmem:[%s8937_s8 + $0x20] sm:$0xff]  ;;  %v1560_v46 = vld [vmem:[%s8937_s8 + $0x18] sm:$0xff]  ;;  %s12069_s9 = scalar_lea.vmem %s12068_s30, %s8883_s19 }
 0x1c5   : > { %6891 = vmatprep.subr.mxu1 %v1569_v24  ;;  %6832 = vmatpush3.msra.mxu0 %v1403_v33  ;;  %v1397_v45 = vld [vmem:[%s8870_s12 + $0x40] sm:$0xff]  ;;  %v1396_v47 = vld [vmem:[%s8870_s12 + $0x38] sm:$0xff]  ;;  %v1559_v48 = vld [vmem:[%s8937_s8 + $0x10] sm:$0xff]  ;;  %s12329_s29 = scalar_lea.vmem %s12328_s10, %s8883_s19 }
 0x1c6   : > { %6892 = vmatpush3.msra.mxu1 %v1569_v24  ;;  %6833 = vmatprep.subr.mxu0 %v1402_v35  ;;  %v1395_v49 = vld [vmem:[%s8870_s12 + $0x30] sm:$0xff]  ;;  %v1558_v50 = vld [vmem:[%s8937_s8 + $0x8] sm:$0xff]  ;;  %v1557_v52 = vld [vmem:[%s8937_s8] sm:$0xff] }
 0x1c7   : > { %6893 = vmatprep.subr.mxu1 %v1568_v30  ;;  %6834 = vmatpush3.msra.mxu0 %v1402_v35  ;;  %v1394_v51 = vld [vmem:[%s8870_s12 + $0x28] sm:$0xff]  ;;  %v1393_v53 = vld [vmem:[%s8870_s12 + $0x20] sm:$0xff]  ;;  %v1392_v55 = vld [vmem:[%s8870_s12 + $0x18] sm:$0xff] }
 0x1c8   : > { %6894 = vmatpush3.msra.mxu1 %v1568_v30  ;;  %6835 = vmatprep.subr.mxu0 %v1401_v37  ;;  %v9080_v54 = vld [vmem:[#allocation2] sm:$0xff]  ;;  %v9083_v56 = vld [vmem:[#allocation2 + $0x58] sm:$0xff]  ;;  %v1390_v59 = vld [vmem:[%s8870_s12 + $0x8] sm:$0xff] }
 0x1c9   : > { %6895 = vmatprep.subr.mxu1 %v1567_v31  ;;  %6836 = vmatpush3.msra.mxu0 %v1401_v37  ;;  %v1391_v57 = vld [vmem:[%s8870_s12 + $0x10] sm:$0xff]  ;;  %v1389_v61 = vld [vmem:[%s8870_s12] sm:$0xff]  ;;  %v1740_v0 = vld [vmem:[%s8939_s21 + $0x78] sm:$0xff]  ;;  %s12331_s12 = scalar_lea.vmem %s12330_s7, %s8883_s19 }
 0x1ca   : > { %6896 = vmatpush3.msra.mxu1 %v1567_v31  ;;  %6837 = vmatprep.subr.mxu0 %v1400_v39  ;;  %v9088_v58 = vld [vmem:[#allocation2 + $0x18] sm:$0xff]  ;;  %v9091_v60 = vld [vmem:[#allocation2 + $0x50] sm:$0xff]  ;;  %v9096_v62 = vld [vmem:[#allocation2 + $0x68] sm:$0xff] }
 0x1cb   : > { %6897 = vmatprep.subr.mxu1 %v1566_v34  ;;  %6838 = vmatpush3.msra.mxu0 %v1400_v39  ;;  %v9098_v63 = vld [vmem:[#allocation2 + $0x8] sm:$0xff]  ;;  %v1739_v1 = vld [vmem:[%s8939_s21 + $0x70] sm:$0xff]  ;;  %v9107_v3 = vld [vmem:[#allocation2 + $0x40] sm:$0xff] }
 0x1cc   : > { %6898 = vmatpush3.msra.mxu1 %v1566_v34  ;;  %6839 = vmatprep.subr.mxu0 %v1399_v41  ;;  %v9105_v2 = vld [vmem:[#allocation2 + $0x48] sm:$0xff]  ;;  %v9113_v5 = vld [vmem:[#allocation2 + $0x20] sm:$0xff]  ;;  %v9117_v7 = vld [vmem:[#allocation2 + $0x10] sm:$0xff] }
 0x1cd   : > { %6899 = vmatprep.subr.mxu1 %v1565_v36  ;;  %6840 = vmatpush3.msra.mxu0 %v1399_v41  ;;  %v1738_v4 = vld [vmem:[%s8939_s21 + $0x68] sm:$0xff]  ;;  %v1737_v6 = vld [vmem:[%s8939_s21 + $0x60] sm:$0xff]  ;;  %v1736_v8 = vld [vmem:[%s8939_s21 + $0x58] sm:$0xff] }
 0x1ce   : > { %6900 = vmatpush3.msra.mxu1 %v1565_v36  ;;  %6841 = vmatprep.subr.mxu0 %v1398_v43  ;;  %v9123_v9 = vld [vmem:[#allocation2 + $0x38] sm:$0xff]  ;;  %v9126_v11 = vld [vmem:[#allocation2 + $0x60] sm:$0xff]  ;;  %v1734_v12 = vld [vmem:[%s8939_s21 + $0x48] sm:$0xff] }
 0x1cf   : > { %6901 = vmatprep.subr.mxu1 %v1564_v38  ;;  %6842 = vmatpush3.msra.mxu0 %v1398_v43  ;;  %v1735_v10 = vld [vmem:[%s8939_s21 + $0x50] sm:$0xff]  ;;  %v1733_v14 = vld [vmem:[%s8939_s21 + $0x40] sm:$0xff]  ;;  %v1732_v16 = vld [vmem:[%s8939_s21 + $0x38] sm:$0xff] }
 0x1d0   : > { %6902 = vmatpush3.msra.mxu1 %v1564_v38  ;;  %6843 = vmatprep.subr.mxu0 %v1397_v45  ;;  %v1370_v13 = vld [vmem:[#allocation2 + $0x70] sm:$0xff]  ;;  %v1371_v15 = vld [vmem:[#allocation2 + $0x78] sm:$0xff]  ;;  %v1372_v17 = vld [vmem:[#allocation2 + $0x28] sm:$0xff] }
 0x1d1   : > { %6903 = vmatprep.subr.mxu1 %v1563_v40  ;;  %6844 = vmatpush3.msra.mxu0 %v1397_v45  ;;  %v1731_v18 = vld [vmem:[%s8939_s21 + $0x30] sm:$0xff]  ;;  %v1730_v19 = vld [vmem:[%s8939_s21 + $0x28] sm:$0xff]  ;;  %v1729_v20 = vld [vmem:[%s8939_s21 + $0x20] sm:$0xff] }
 0x1d2   : > { %6904 = vmatpush3.msra.mxu1 %v1563_v40  ;;  %6845 = vmatprep.subr.mxu0 %v1396_v47  ;;  %v1728_v21 = vld [vmem:[%s8939_s21 + $0x18] sm:$0xff]  ;;  %v1727_v22 = vld [vmem:[%s8939_s21 + $0x10] sm:$0xff]  ;;  %v1726_v23 = vld [vmem:[%s8939_s21 + $0x8] sm:$0xff] }
 0x1d3   : > { %6905 = vmatprep.subr.mxu1 %v1562_v42  ;;  %6846 = vmatpush3.msra.mxu0 %v1396_v47  ;;  %v1725_v25 = vld [vmem:[%s8939_s21] sm:$0xff]  ;;  %s12065_s21 = sld [smem:[#allocation105_spill]]  ;;  %v9205_v45 = vld [vmem:[%s12069_s9] ss:$0 sm:$0xff] }
 0x1d4   : > { %6906 = vmatpush3.msra.mxu1 %v1562_v42  ;;  %6847 = vmatprep.subr.mxu0 %v1395_v49 }
 0x1d5   : > { %6907 = vmatprep.subr.mxu1 %v1561_v44  ;;  %6848 = vmatpush3.msra.mxu0 %v1395_v49 }
 0x1d6   : > { %6908 = vmatpush3.msra.mxu1 %v1561_v44  ;;  %6849 = vmatprep.subr.mxu0 %v1394_v51 }
 0x1d7   : > { %6909 = vmatprep.subr.mxu1 %v1560_v46  ;;  %6850 = vmatpush3.msra.mxu0 %v1394_v51 }
 0x1d8   : > { %6910 = vmatpush3.msra.mxu1 %v1560_v46  ;;  %6851 = vmatprep.subr.mxu0 %v1393_v53 }
 0x1d9   : > { %6911 = vmatprep.subr.mxu1 %v1559_v48  ;;  %6852 = vmatpush3.msra.mxu0 %v1393_v53  ;;  %s12066_s6 = scalar_lea.vmem %s12065_s21, %s8883_s19 }
 0x1da   : > { %6912 = vmatpush3.msra.mxu1 %v1559_v48  ;;  %6853 = vmatprep.subr.mxu0 %v1392_v55 }
 0x1db   : > { %6913 = vmatprep.subr.mxu1 %v1558_v50  ;;  %6854 = vmatpush3.msra.mxu0 %v1392_v55 }
 0x1dc   : > { %6914 = vmatpush3.msra.mxu1 %v1558_v50  ;;  %6855 = vmatprep.subr.mxu0 %v1391_v57 }
 0x1dd   : > { %6915 = vmatprep.subr.mxu1 %v1557_v52  ;;  %6856 = vmatpush3.msra.mxu0 %v1391_v57 }
 0x1de   : > { %6916 = vmatpush3.msra.mxu1 %v1557_v52  ;;  %6857 = vmatprep.subr.mxu0 %v1390_v59 }
 0x1df   : > { %6918 = vmatmul.mubr.f32.vlgmr.msra.gmra.mxu1 %v9080_v54  ;;  %6858 = vmatpush3.msra.mxu0 %v1390_v59 }
 0x1e0   : > { %6920 = vmatprep.mubr.f32.mxu1 %v9083_v56  ;;  %6859 = vmatprep.subr.mxu0 %v1389_v61 }
 0x1e1   : > { %6860 = vmatpush3.msra.mxu0 %v1389_v61 }
 0x1e2   : > { %6862 = vmatmul.mubr.f32.vlgmr.msra.gmra.mxu0 %v9080_v54  ;;  %6941 = vmatprep.subr.mxu0 %v1740_v0 }
 0x1e3   : > { %6921 = vmatmul.mubr.f32.gmra.mxu1 %v9088_v58  ;;  %6942 = vmatpush3.msra.mxu0 %v1740_v0 }
 0x1e4   : > { %6923 = vmatprep.mubr.f32.mxu1 %v9091_v60  ;;  %6864 = vmatprep.mubr.f32.mxu0 %v9083_v56 }
 0x1e5   : > { %6943 = vmatprep.subr.mxu0 %v1739_v1 }
 0x1e6   : > { %6944 = vmatpush3.msra.mxu0 %v1739_v1 }
 0x1e7   : > { %6924 = vmatmul.mubr.f32.gmra.mxu1 %v9096_v62  ;;  %6865 = vmatmul.mubr.f32.gmra.mxu0 %v9088_v58 }
 0x1e8   : > { %6926 = vmatprep.mubr.f32.mxu1 %v9098_v63  ;;  %6945 = vmatprep.subr.mxu0 %v1738_v4 }
 0x1e9   : > { %6867 = vmatprep.mubr.f32.mxu0 %v9091_v60  ;;  %6946 = vmatpush3.msra.mxu0 %v1738_v4 }
 0x1ea   : > { %6947 = vmatprep.subr.mxu0 %v1737_v6 }
 0x1eb   : > { %6927 = vmatmul.mubr.f32.gmra.mxu1 %v9105_v2  ;;  %6948 = vmatpush3.msra.mxu0 %v1737_v6 }
 0x1ec   : > { %6929 = vmatprep.mubr.f32.mxu1 %v9107_v3  ;;  %6868 = vmatmul.mubr.f32.gmra.mxu0 %v9096_v62 }
 0x1ed   : > { %6949 = vmatprep.subr.mxu0 %v1736_v8  ;;  %6870 = vmatprep.mubr.f32.mxu0 %v9098_v63 }
 0x1ee   : > { %6950 = vmatpush3.msra.mxu0 %v1736_v8 }
 0x1ef   : > { %6930 = vmatmul.mubr.f32.gmra.mxu1 %v9113_v5  ;;  %6951 = vmatprep.subr.mxu0 %v1735_v10 }
 0x1f0   : > { %6932 = vmatprep.mubr.f32.mxu1 %v9117_v7  ;;  %6952 = vmatpush3.msra.mxu0 %v1735_v10 }
 0x1f1   : > { %6871 = vmatmul.mubr.f32.gmra.mxu0 %v9105_v2  ;;  %6953 = vmatprep.subr.mxu0 %v1734_v12 }
 0x1f2   : > { %6954 = vmatpush3.msra.mxu0 %v1734_v12  ;;  %6873 = vmatprep.mubr.f32.mxu0 %v9107_v3 }
 0x1f3   : > { %6933 = vmatmul.mubr.f32.gmra.mxu1 %v9123_v9  ;;  %6955 = vmatprep.subr.mxu0 %v1733_v14 }
 0x1f4   : > { %6935 = vmatprep.mubr.f32.mxu1 %v9126_v11  ;;  %6956 = vmatpush3.msra.mxu0 %v1733_v14 }
 0x1f5   : > { %6874 = vmatmul.mubr.f32.gmra.mxu0 %v9113_v5  ;;  %6957 = vmatprep.subr.mxu0 %v1732_v16 }
 0x1f6   : > { %6958 = vmatpush3.msra.mxu0 %v1732_v16  ;;  %6876 = vmatprep.mubr.f32.mxu0 %v9117_v7 }
 0x1f7   : > { %6936 = vmatmul.mubr.f32.gmra.mxu1 %v1370_v13  ;;  %6959 = vmatprep.subr.mxu0 %v1731_v18 }
 0x1f8   : > { %6938 = vmatprep.mubr.f32.mxu1 %v1371_v15  ;;  %6960 = vmatpush3.msra.mxu0 %v1731_v18 }
 0x1f9   : > { %6877 = vmatmul.mubr.f32.gmra.mxu0 %v9123_v9  ;;  %6961 = vmatprep.subr.mxu0 %v1730_v19 }
 0x1fa   : > { %6962 = vmatpush3.msra.mxu0 %v1730_v19  ;;  %6879 = vmatprep.mubr.f32.mxu0 %v9126_v11 }
 0x1fb   : > { %6939 = vmatmul.mubr.f32.gmra.mxu1 %v1372_v17  ;;  %6963 = vmatprep.subr.mxu0 %v1729_v20 }
 0x1fc   : > { %6964 = vmatpush3.msra.mxu0 %v1729_v20 }
 0x1fd   : > { %6880 = vmatmul.mubr.f32.gmra.mxu0 %v1370_v13  ;;  %6965 = vmatprep.subr.mxu0 %v1728_v21 }
 0x1fe   : > { %6966 = vmatpush3.msra.mxu0 %v1728_v21  ;;  %6882 = vmatprep.mubr.f32.mxu0 %v1371_v15 }
 0x1ff   : > { %6967 = vmatprep.subr.mxu0 %v1727_v22 }
 0x200   : > { %6968 = vmatpush3.msra.mxu0 %v1727_v22 }
 0x201   : > { %6883 = vmatmul.mubr.f32.gmra.mxu0 %v1372_v17  ;;  %6969 = vmatprep.subr.mxu0 %v1726_v23 }
 0x202   : > { %6970 = vmatpush3.msra.mxu0 %v1726_v23  ;;  %6973 = vmatprep.mubr.f32.mxu0 %v9052_v29  ;;  %v9174_v29 = vld [vmem:[%s12066_s6] ss:$0 sm:$0xff] }
 0x203   : > { %6971 = vmatprep.subr.mxu0 %v1725_v25 }
 0x204   : > { %6972 = vmatpush3.msra.mxu0 %v1725_v25 }
 0x205   : > { %6974 = vmatmul.mubr.f32.vlgmr.msra.gmra.mxu0 %v9080_v54 }
 0x206   : > { %6976 = vmatprep.mubr.f32.mxu0 %v9083_v56 }
 0x209   : > { %6977 = vmatmul.mubr.f32.gmra.mxu0 %v9088_v58 }
 0x20a   : > { %6979 = vmatprep.mubr.f32.mxu0 %v9091_v60 }
 0x20d   : > { %6980 = vmatmul.mubr.f32.gmra.mxu0 %v9096_v62 }
 0x20e   : > { %6982 = vmatprep.mubr.f32.mxu0 %v9098_v63 }
 0x211   : > { %6983 = vmatmul.mubr.f32.gmra.mxu0 %v9105_v2 }
 0x212   : > { %6985 = vmatprep.mubr.f32.mxu0 %v9107_v3 }
 0x215   : > { %6986 = vmatmul.mubr.f32.gmra.mxu0 %v9113_v5 }
 0x216   : > { %6988 = vmatprep.mubr.f32.mxu0 %v9117_v7 }
 0x219   : > { %6989 = vmatmul.mubr.f32.gmra.mxu0 %v9123_v9 }
 0x21a   : > { %6991 = vmatprep.mubr.f32.mxu0 %v9126_v11 }
 0x21d   : > { %6992 = vmatmul.mubr.f32.gmra.mxu0 %v1370_v13 }
 0x21e   : > { %6994 = vmatprep.mubr.f32.mxu0 %v1371_v15 }
 0x221   : > { %6995 = vmatmul.mubr.f32.gmra.mxu0 %v1372_v17 }
 0x29f   : > { %v9161_v26 = vpop.f32.mrf.mxu1 }
 0x2a1   : > { %v9163_v27 = vpop.f32.mrf.mxu1 }
 0x2a2   : > { %v6863_v31 = vpop.f32.mrf.mxu0 }
 0x2a3   : > { %v9165_v28 = vpop.f32.mrf.mxu1  ;;  %v9179_v32 = vadd.f32 %v6863_v31, %v9174_v29 }
 0x2a4   : > { %v1478_v34 = vpop.f32.mrf.mxu0 }
 0x2a5   : > { %v9167_v24 = vpop.f32.mrf.mxu1  ;;  %12067 = vst [vmem:[#allocation35_spill] sm:$0xff] %v9179_v32  ;;  %v9184_v35 = vadd.f32 %v9174_v29, %v1478_v34 }
 0x2a7   : > { %v9176_v30 = vpop.f32.mrf.mxu1  ;;  %v6866_v37 = vpop.f32.mrf.mxu0  ;;  %7029 = vmatprep.mubr.msk.f32.mxu1 %vm1893_vm1, %v9184_v35 }
 0x2a8   : > { %v9193_v39 = vadd.f32 %v6866_v37, %v9174_v29  ;;  %v9339_v37 = vld [vmem:[%s1057_s4] ss:$0 sm:$0xff]  ;;  %s8494_s4 = smov 64  }
 0x2a9   : > { %v9181_v33 = vpop.f32.mrf.mxu1  ;;  %v9195_v40 = vpop.f32.mrf.mxu0 }
 0x2ab   : > { %v9186_v36 = vpop.f32.mrf.mxu1 }
 0x2ac   : > { %v6869_v43 = vpop.f32.mrf.mxu0  ;;  %v9314_v21 = vadd.f32 %v9186_v36, %v9205_v45  ;;  %v9330_v36 = vadd.f32 %v9176_v30, %v9205_v45 }
 0x2ad   : > { %v9190_v38 = vpop.f32.mrf.mxu1  ;;  %v9198_v44 = vadd.f32 %v6869_v43, %v9174_v29 }
 0x2ae   : > { %v9207_v47 = vpop.f32.mrf.mxu0  ;;  %12078 = vst [vmem:[#allocation44_spill] sm:$0xff] %v9314_v21  ;;  %v9322_v25 = vadd.f32 %v9205_v45, %v9190_v38  ;;  %12080 = vst [vmem:[#allocation46_spill] sm:$0xff] %v9330_v36 }
 0x2af   : > { %v6931_v41 = vpop.f32.mrf.mxu1 }
 0x2b0   : > { %v9297_v15 = vadd.f32 %v6931_v41, %v9205_v45  ;;  %12079 = vst [vmem:[#allocation45_spill] sm:$0xff] %v9322_v25 }
 0x2b1   : > { %v1686_v42 = vpop.f32.mrf.mxu1  ;;  %v6872_v50 = vpop.f32.mrf.mxu0 }
 0x2b2   : > { %v9218_v52 = vadd.f32 %v6872_v50, %v9174_v29  ;;  %12076 = vst [vmem:[#allocation42_spill] sm:$0xff] %v9297_v15  ;;  %v9306_v18 = vadd.f32 %v9205_v45, %v1686_v42  ;;  %v9345_v42 = vadd.f32 %v9205_v45, %v9181_v33  ;;  %v9364_v33 = vadd.f32 %v9165_v28, %v9205_v45 }
 0x2b3   : > { %v6934_v46 = vpop.f32.mrf.mxu1  ;;  %v9220_v54 = vpop.f32.mrf.mxu0  ;;  %v9382_v28 = vadd.f32 %v9205_v45, %v9167_v24  ;;  %v9400_v24 = vadd.f32 %v9161_v26, %v9205_v45  ;;  %v9418_v26 = vadd.f32 %v9205_v45, %v9163_v27 }
 0x2b4   : > { %v9210_v48 = vadd.f32 %v6934_v46, %v9205_v45  ;;  %12077 = vst [vmem:[#allocation43_spill] sm:$0xff] %v9306_v18  ;;  %12082 = vst [vmem:[#allocation47_spill] sm:$0xff] %v9345_v42 }
 0x2b5   : > { %v1696_v49 = vpop.f32.mrf.mxu1  ;;  %v6875_v57 = vpop.f32.mrf.mxu0  ;;  %12084 = vst [vmem:[#allocation49_spill] sm:$0xff] %v9364_v33  ;;  %12086 = vst [vmem:[#allocation51_spill] sm:$0xff] %v9382_v28 }
 0x2b6   : > { %12070 = vst [vmem:[#allocation36_spill] sm:$0xff] %v9210_v48  ;;  %v9213_v51 = vadd.f32 %v9205_v45, %v1696_v49  ;;  %2526 = vrot.lane.b32.xlu0 %v9210_v48, %s8493_s14  ;;  %v9233_v59 = vadd.f32 %v6875_v57, %v9174_v29  ;;  %12089 = vst [vmem:[#allocation54_spill] sm:$0xff] %v9400_v24 }
 0x2b7   : > { %v6937_v53 = vpop.f32.mrf.mxu1  ;;  %v9235_v61 = vpop.f32.mrf.mxu0 }
 0x2b8   : > { %12071 = vst [vmem:[#allocation37_spill] sm:$0xff] %v9213_v51  ;;  %v9223_v55 = vadd.f32 %v6937_v53, %v9205_v45  ;;  %2524 = vrot.lane.b32.xlu1 %v9213_v51, %s8493_s14 }
 0x2b9   : > { %v1706_v56 = vpop.f32.mrf.mxu1  ;;  %v6878_v0 = vpop.f32.mrf.mxu0 }
 0x2ba   : > { %12072 = vst [vmem:[#allocation38_spill] sm:$0xff] %v9223_v55  ;;  %v9228_v58 = vadd.f32 %v9205_v45, %v1706_v56  ;;  %2530 = vrot.lane.b32.xlu0 %v9223_v55, %s8493_s14  ;;  %v9250_v2 = vadd.f32 %v6878_v0, %v9174_v29 }
 0x2bb   : > { %v6940_v60 = vpop.f32.mrf.mxu1  ;;  %v9254_v3 = vpop.f32.mrf.mxu0 }
 0x2bc   : > { %12073 = vst [vmem:[#allocation39_spill] sm:$0xff] %v9228_v58  ;;  %v9238_v62 = vadd.f32 %v6940_v60, %v9205_v45  ;;  %2528 = vrot.lane.b32.xlu1 %v9228_v58, %s8493_s14 }
 0x2bd   : > { %v1716_v63 = vpop.f32.mrf.mxu1  ;;  %v6881_v4 = vpop.f32.mrf.mxu0 }
 0x2be   : > { %12074 = vst [vmem:[#allocation40_spill] sm:$0xff] %v9238_v62  ;;  %v9243_v1 = vadd.f32 %v9205_v45, %v1716_v63  ;;  %2534 = vrot.lane.b32.xlu0 %v9238_v62, %s8493_s14  ;;  %6997 = vmatprep.subr.msk.mxu1 %vm1893_vm1, %v9238_v62  ;;  %v9261_v5 = vadd.f32 %v6881_v4, %v9174_v29 }
 0x2bf   : > { %6998 = vmatpush3.xpose.msk.msra.mxu1 %vm1893_vm1, %v9238_v62  ;;  %v9265_v6 = vpop.f32.mrf.mxu0  ;;  %v9442_v45 = vadd.f32 %v9174_v29, %v9195_v40  ;;  %v9462_v40 = vadd.f32 %v9174_v29, %v9207_v47  ;;  %v9482_v47 = vadd.f32 %v9174_v29, %v9220_v54  ;;  %v9503_v54 = vadd.f32 %v9174_v29, %v9254_v3 }
 0x2c0   : > { %12075 = vst [vmem:[#allocation41_spill] sm:$0xff] %v9243_v1  ;;  %6999 = vmatprep.subr.msk.mxu1 %vm1893_vm1, %v9243_v1  ;;  %2532 = vrot.lane.b32.xlu1 %v9243_v1, %s8493_s14 }
 0x2c1   : > { %v6884_v7 = vpop.f32.mrf.mxu0  ;;  %12095 = vst [vmem:[#allocation60_spill] sm:$0xff] %v9442_v45  ;;  %12098 = vst [vmem:[#allocation63_spill] sm:$0xff] %v9462_v40 }
 0x2c2   : > { %v9270_v8 = vadd.f32 %v6884_v7, %v9174_v29  ;;  %12101 = vst [vmem:[#allocation66_spill] sm:$0xff] %v9482_v47  ;;  %12103 = vst [vmem:[#allocation68_spill] sm:$0xff] %v9503_v54 }
 0x2c3   : > { %7000 = vmatpush3.xpose.msk.msra.mxu1 %vm1893_vm1, %v9243_v1  ;;  %v9274_v9 = vpop.f32.mrf.mxu0 }
 0x2c4   : > { %7001 = vmatprep.subr.msk.mxu1 %vm1893_vm1, %v9223_v55  ;;  %v9519_v3 = vadd.f32 %v9174_v29, %v9274_v9 }
 0x2c5   : > { %v9278_v10 = vpop.f32.mrf.mxu0 }
 0x2c6   : > { %12105 = vst [vmem:[#allocation70_spill] sm:$0xff] %v9519_v3 }
 0x2c7   : > { %7002 = vmatpush3.xpose.msk.msra.mxu1 %vm1893_vm1, %v9223_v55  ;;  %v9282_v11 = vpop.f32.mrf.mxu0 }
 0x2c8   : > { %7003 = vmatprep.subr.msk.mxu1 %vm1893_vm1, %v9228_v58 }
 0x2c9   : > { %v9286_v12 = vpop.f32.mrf.mxu0 }
 0x2ca   : > { %v9449_v7 = vadd.f32 %v9286_v12, %v9339_v37  ;;  %v9469_v12 = vadd.f32 %v9278_v10, %v9339_v37  ;;  %v9494_v10 = vadd.f32 %v9174_v29, %v9235_v61  ;;  %v9511_v61 = vadd.f32 %v9174_v29, %v9265_v6  ;;  %v9538_v29 = vld [vmem:[%s8893_s18 + $0x8] sm:$0xff] }
 0x2cb   : > { %7004 = vmatpush3.xpose.msk.msra.mxu1 %vm1893_vm1, %v9228_v58  ;;  %v9290_v13 = vpop.f32.mrf.mxu0  ;;  %12107 = vst [vmem:[#allocation72_spill] sm:$0xff] %v9538_v29  ;;  %vm2152_vm2 = vcmp.eq.f32.partialorder %v9538_v29, 0.0 }
 0x2cc   : > { %7005 = vmatprep.subr.msk.mxu1 %vm1893_vm1, %v9210_v48  ;;  %12096 = vst [vmem:[#allocation61_spill] sm:$0xff] %v9449_v7  ;;  %12099 = vst [vmem:[#allocation64_spill] sm:$0xff] %v9469_v12 }
 0x2cd   : > { %v9294_v14 = vpop.f32.mrf.mxu0  ;;  %12102 = vst [vmem:[#allocation67_spill] sm:$0xff] %v9494_v10  ;;  %12104 = vst [vmem:[#allocation69_spill] sm:$0xff] %v9511_v61 }
 0x2ce   : > { %v9431_v4 = vadd.f32 %v9294_v14, %v9339_v37  ;;  %v9455_v14 = vadd.f32 %v9339_v37, %v9290_v13  ;;  %v9475_v13 = vadd.f32 %v9339_v37, %v9282_v11 }
 0x2cf   : > { %7006 = vmatpush3.xpose.msk.msra.mxu1 %vm1893_vm1, %v9210_v48  ;;  %v9301_v16 = vpop.f32.mrf.mxu0 }
 0x2d0   : > { %7007 = vmatprep.subr.msk.mxu1 %vm1893_vm1, %v9213_v51  ;;  %12093 = vst [vmem:[#allocation58_spill] sm:$0xff] %v9431_v4  ;;  %v9437_v27 = vadd.f32 %v9339_v37, %v9301_v16  ;;  %12097 = vst [vmem:[#allocation62_spill] sm:$0xff] %v9455_v14 }
 0x2d1   : > { %v6984_v17 = vpop.f32.mrf.mxu0  ;;  %12100 = vst [vmem:[#allocation65_spill] sm:$0xff] %v9475_v13 }
 0x2d2   : > { %v9412_v63 = vadd.f32 %v6984_v17, %v9339_v37  ;;  %12094 = vst [vmem:[#allocation59_spill] sm:$0xff] %v9437_v27 }
 0x2d3   : > { %7008 = vmatpush3.xpose.msk.msra.mxu1 %vm1893_vm1, %v9213_v51  ;;  %v1844_v19 = vpop.f32.mrf.mxu0 }
 0x2d4   : > { %7009 = vmatprep.subr.msk.mxu1 %vm1893_vm1, %v9297_v15  ;;  %12091 = vst [vmem:[#allocation56_spill] sm:$0xff] %v9412_v63  ;;  %v9421_v0 = vadd.f32 %v9339_v37, %v1844_v19  ;;  %v9542_v19 = vld [vmem:[%s8893_s18] sm:$0xff] }
 0x2d5   : > { %v6987_v20 = vpop.f32.mrf.mxu0  ;;  %12108 = vst [vmem:[#allocation73_spill] sm:$0xff] %v9542_v19  ;;  %vm2151_vm3 = vcmp.eq.f32.partialorder %v9542_v19, 0.0 }
 0x2d6   : > { %v9394_v57 = vadd.f32 %v6987_v20, %v9339_v37  ;;  %12092 = vst [vmem:[#allocation57_spill] sm:$0xff] %v9421_v0  ;;  %v9545_v20 = vld [vmem:[%s8893_s18 + $0x18] sm:$0xff] }
 0x2d7   : > { %7010 = vmatpush3.xpose.msk.msra.mxu1 %vm1893_vm1, %v9297_v15  ;;  %v1854_v22 = vpop.f32.mrf.mxu0  ;;  %12109 = vst [vmem:[#allocation74_spill] sm:$0xff] %v9545_v20  ;;  %vm2154_vm4 = vcmp.eq.f32.partialorder %v9545_v20, 0.0 }
 0x2d8   : > { %7011 = vmatprep.subr.msk.mxu1 %vm1893_vm1, %v9306_v18  ;;  %12088 = vst [vmem:[#allocation53_spill] sm:$0xff] %v9394_v57  ;;  %v9403_v60 = vadd.f32 %v9339_v37, %v1854_v22 }
 0x2d9   : > { %v6990_v23 = vpop.f32.mrf.mxu0 }
 0x2da   : > { %v9376_v53 = vadd.f32 %v6990_v23, %v9339_v37  ;;  %12090 = vst [vmem:[#allocation55_spill] sm:$0xff] %v9403_v60 }
 0x2db   : > { %7012 = vmatpush3.xpose.msk.msra.mxu1 %vm1893_vm1, %v9306_v18  ;;  %v1864_v31 = vpop.f32.mrf.mxu0 }
 0x2dc   : > { %7013 = vmatprep.subr.msk.mxu1 %vm1893_vm1, %v9314_v21  ;;  %v9385_v56 = vadd.f32 %v9339_v37, %v1864_v31 }
 0x2dd   : > { %v6993_v34 = vpop.f32.mrf.mxu0 }
 0x2de   : > { %v9355_v46 = vadd.f32 %v6993_v34, %v9339_v37  ;;  %12087 = vst [vmem:[#allocation52_spill] sm:$0xff] %v9385_v56  ;;  %v9552_v34 = vld [vmem:[%s8893_s18 + $0x10] sm:$0xff] }
 0x2df   : > { %7014 = vmatpush3.xpose.msk.msra.mxu1 %vm1893_vm1, %v9314_v21  ;;  %v1874_v38 = vpop.f32.mrf.mxu0  ;;  %12110 = vst [vmem:[#allocation75_spill] sm:$0xff] %v9552_v34  ;;  %vm2153_vm5 = vcmp.eq.f32.partialorder %v9552_v34, 0.0 }
 0x2e0   : > { %7015 = vmatprep.subr.msk.mxu1 %vm1893_vm1, %v9322_v25  ;;  %v9367_v50 = vadd.f32 %v9339_v37, %v1874_v38 }
 0x2e1   : > { %v6996_v41 = vpop.f32.mrf.mxu0 }
 0x2e2   : > { %v9348_v30 = vadd.f32 %v6996_v41, %v9339_v37  ;;  %12085 = vst [vmem:[#allocation50_spill] sm:$0xff] %v9367_v50 }
 0x2e3   : > { %7016 = vmatpush3.xpose.msk.msra.mxu1 %vm1893_vm1, %v9322_v25  ;;  %v1884_v43 = vpop.f32.mrf.mxu0 }
 0x2e4   : > { %7017 = vmatprep.subr.msk.mxu1 %vm1893_vm1, %v9330_v36  ;;  %v9358_v49 = vadd.f32 %v9339_v37, %v1884_v43  ;;  %7053 = vmatprep.subr.mxu0 %v9348_v30  ;;  %v9559_v43 = vld [vmem:[%s8893_s18 + $0x20] sm:$0xff] }
 0x2e5   : > { %7054 = vmatpush3.msra.mxu0 %v9348_v30  ;;  %12111 = vst [vmem:[#allocation76_spill] sm:$0xff] %v9559_v43  ;;  %vm2155_vm6 = vcmp.eq.f32.partialorder %v9559_v43, 0.0 }
 0x2e6   : > { %12083 = vst [vmem:[#allocation48_spill] sm:$0xff] %v9358_v49  ;;  %7055 = vmatprep.subr.mxu0 %v9358_v49 }
 0x2e7   : > { %7018 = vmatpush3.xpose.msk.msra.mxu1 %vm1893_vm1, %v9330_v36  ;;  %7056 = vmatpush3.msra.mxu0 %v9358_v49  ;;  %v9656_v49 = vld [vmem:[%s8893_s18 + $0x78] sm:$0xff] }
 0x2e8   : > { %7019 = vmatprep.subr.msk.mxu1 %vm1893_vm1, %v9345_v42  ;;  %7057 = vmatprep.subr.mxu0 %v9355_v46  ;;  %12122 = vst [vmem:[#allocation87_spill] sm:$0xff] %v9656_v49 }
 0x2e9   : > { %7058 = vmatpush3.msra.mxu0 %v9355_v46 }
 0x2ea   : > { %7059 = vmatprep.subr.mxu0 %v9367_v50 }
 0x2eb   : > { %7020 = vmatpush3.xpose.msk.msra.mxu1 %vm1893_vm1, %v9345_v42  ;;  %7060 = vmatpush3.msra.mxu0 %v9367_v50  ;;  %v9653_v50 = vld [vmem:[%s8893_s18 + $0x70] sm:$0xff] }
 0x2ec   : > { %7021 = vmatprep.subr.msk.mxu1 %vm1893_vm1, %v9364_v33  ;;  %7061 = vmatprep.subr.mxu0 %v9376_v53  ;;  %12121 = vst [vmem:[#allocation86_spill] sm:$0xff] %v9653_v50  ;;  %vm2165_vm0 = vcmp.eq.f32.partialorder %v9653_v50, 0.0 }
 0x2ed   : > { %7062 = vmatpush3.msra.mxu0 %v9376_v53 }
 0x2ee   : > { %7063 = vmatprep.subr.mxu0 %v9385_v56 }
 0x2ef   : > { %7022 = vmatpush3.xpose.msk.msra.mxu1 %vm1893_vm1, %v9364_v33  ;;  %7064 = vmatpush3.msra.mxu0 %v9385_v56 }
 0x2f0   : > { %7023 = vmatprep.subr.msk.mxu1 %vm1893_vm1, %v9382_v28  ;;  %7065 = vmatprep.subr.mxu0 %v9394_v57 }
 0x2f1   : > { %7066 = vmatpush3.msra.mxu0 %v9394_v57  ;;  %v9635_v57 = vld [vmem:[%s8893_s18 + $0x60] sm:$0xff] }
 0x2f2   : > { %7067 = vmatprep.subr.mxu0 %v9403_v60  ;;  %12119 = vst [vmem:[#allocation84_spill] sm:$0xff] %v9635_v57  ;;  %vm2163_vm14 = vcmp.eq.f32.partialorder %v9635_v57, 0.0 }
 0x2f3   : > { %7024 = vmatpush3.xpose.msk.msra.mxu1 %vm1893_vm1, %v9382_v28  ;;  %7068 = vmatpush3.msra.mxu0 %v9403_v60 }
 0x2f4   : > { %7025 = vmatprep.subr.msk.mxu1 %vm1893_vm1, %v9400_v24  ;;  %7069 = vmatprep.subr.mxu0 %v9412_v63 }
 0x2f5   : > { %7070 = vmatpush3.msra.mxu0 %v9412_v63 }
 0x2f6   : > { %7071 = vmatprep.subr.mxu0 %v9421_v0 }
 0x2f7   : > { %7026 = vmatpush3.xpose.msk.msra.mxu1 %vm1893_vm1, %v9400_v24  ;;  %7072 = vmatpush3.msra.mxu0 %v9421_v0 }
 0x2f8   : > { %7027 = vmatprep.subr.msk.mxu1 %vm1893_vm1, %v9418_v26  ;;  %7073 = vmatprep.subr.mxu0 %v9431_v4 }
 0x2f9   : > { %7074 = vmatpush3.msra.mxu0 %v9431_v4  ;;  %v9617_v4 = vld [vmem:[%s8893_s18 + $0x50] sm:$0xff] }
 0x2fa   : > { %7075 = vmatprep.subr.mxu0 %v9437_v27  ;;  %12117 = vst [vmem:[#allocation82_spill] sm:$0xff] %v9617_v4  ;;  %vm11904_vm12 = vcmp.eq.f32.partialorder %v9617_v4, 0.0 }
 0x2fb   : > { %7028 = vmatpush3.xpose.msk.msra.mxu1 %vm1893_vm1, %v9418_v26  ;;  %7076 = vmatpush3.msra.mxu0 %v9437_v27 }
 0x2fc   : > { %7077 = vmatprep.subr.mxu0 %v9449_v7 }
 0x2fd   : > { %7078 = vmatpush3.msra.mxu0 %v9449_v7 }
 0x2fe   : > { %7030 = vmatmul.mubr.msk.f32.vlgmr.msra.gmra.mxu1 %vm1893_vm1, %v9179_v32  ;;  %7079 = vmatprep.subr.mxu0 %v9455_v14 }
 0x2ff   : > { %7032 = vmatprep.mubr.msk.f32.mxu1 %vm1893_vm1, %v9442_v45  ;;  %7080 = vmatpush3.msra.mxu0 %v9455_v14 }
 0x300   : > { %7081 = vmatprep.subr.mxu0 %v9469_v12 }
 0x301   : > { %7082 = vmatpush3.msra.mxu0 %v9469_v12  ;;  %v9599_v12 = vld [vmem:[%s8893_s18 + $0x40] sm:$0xff] }
 0x302   : > { %7033 = vmatmul.mubr.msk.f32.gmra.mxu1 %vm1893_vm1, %v9193_v39  ;;  %7083 = vmatprep.subr.mxu0 %v9475_v13  ;;  %12115 = vst [vmem:[#allocation80_spill] sm:$0xff] %v9599_v12  ;;  %vm2159_vm10 = vcmp.eq.f32.partialorder %v9599_v12, 0.0 }
 0x303   : > { %7035 = vmatprep.mubr.msk.f32.mxu1 %vm1893_vm1, %v9462_v40  ;;  %7084 = vmatpush3.msra.mxu0 %v9475_v13 }
 0x306   : > { %7036 = vmatmul.mubr.msk.f32.gmra.mxu1 %vm1893_vm1, %v9198_v44 }
 0x307   : > { %7038 = vmatprep.mubr.msk.f32.mxu1 %vm1893_vm1, %v9482_v47 }
 0x30a   : > { %7039 = vmatmul.mubr.msk.f32.gmra.mxu1 %vm1893_vm1, %v9218_v52 }
 0x30b   : > { %7041 = vmatprep.mubr.msk.f32.mxu1 %vm1893_vm1, %v9494_v10 }
 0x30e   : > { %7042 = vmatmul.mubr.msk.f32.gmra.mxu1 %vm1893_vm1, %v9233_v59 }
 0x30f   : > { %7044 = vmatprep.mubr.msk.f32.mxu1 %vm1893_vm1, %v9503_v54 }
 0x312   : > { %7045 = vmatmul.mubr.msk.f32.gmra.mxu1 %vm1893_vm1, %v9250_v2 }
 0x313   : > { %7047 = vmatprep.mubr.msk.f32.mxu1 %vm1893_vm1, %v9511_v61 }
 0x316   : > { %7048 = vmatmul.mubr.msk.f32.gmra.mxu1 %vm1893_vm1, %v9261_v5 }
 0x317   : > { %7050 = vmatprep.mubr.msk.f32.mxu1 %vm1893_vm1, %v9519_v3 }
 0x31a   : > { %7051 = vmatmul.mubr.msk.f32.gmra.mxu1 %vm1893_vm1, %v9270_v8 }
 0x328   : > { %v9529_v6 = vpop.permute.xlu0 %2526 }
 0x329   : > { %12106 = vst [vmem:[#allocation71_spill] sm:$0xff] %v9529_v6 }
 0x32a   : > { %v9681_v3 = vpop.permute.xlu1 %2524 }
 0x32b   : > { %12123 = vst [vmem:[#allocation88_spill] sm:$0xff] %v9681_v3 }
 0x32c   : > { %v9531_v11 = vpop.permute.xlu0 %2530 }
 0x330   : > { %v9533_v16 = vpop.permute.xlu0 %2534 }
 0x331   : > { %7109 = vmatprep.subr.msk.mxu0 %vm1893_vm1, %v9533_v16 }
 0x3be   : > { %v7031_v9 = vpop.f32.mrf.mxu1 }
 0x3bf   : > { %v2136_v17 = vmul.f32 0.17677669, %v7031_v9  ;;  %v9562_v9 = vld [vmem:[%s8893_s18 + $0x28] sm:$0xff] }
 0x3c0   : > { %v2056_v22 = vpop.f32.mrf.mxu1  ;;  %12112 = vst [vmem:[#allocation77_spill] sm:$0xff] %v9562_v9  ;;  %vm2156_vm7 = vcmp.eq.f32.partialorder %v9562_v9, 0.0 }
 0x3c1   : > { %v2135_v23 = vmul.f32 0.17677669, %v2056_v22  ;;  %v9549_v31 = vsel %vm2152_vm2, -1e+09, %v2136_v17 }
 0x3c2   : > { %2185 = vmax.xlane.f32.xlu0 %v9549_v31  ;;  %v7034_v37 = vpop.f32.mrf.mxu1 }
 0x3c3   : > { %v2138_v38 = vmul.f32 0.17677669, %v7034_v37  ;;  %v9566_v22 = vsel %vm2151_vm3, -1e+09, %v2135_v23 }
 0x3c4   : > { %v2066_v41 = vpop.f32.mrf.mxu1 }
 0x3c5   : > { %v2137_v17 = vmul.f32 0.17677669, %v2066_v41  ;;  %v9570_v29 = vsel %vm2154_vm4, -1e+09, %v2138_v38  ;;  %v9581_v38 = vld [vmem:[%s8893_s18 + $0x30] sm:$0xff]  ;;  %v9584_v41 = vld [vmem:[%s8893_s18 + $0x38] sm:$0xff] }
 0x3c6   : > { %2183 = vmax.xlane.f32.xlu0 %v9566_v22  ;;  %2189 = vmax.xlane.f32.xlu1 %v9570_v29  ;;  %v7037_v37 = vpop.f32.mrf.mxu1  ;;  %12113 = vst [vmem:[#allocation78_spill] sm:$0xff] %v9581_v38  ;;  %12114 = vst [vmem:[#allocation79_spill] sm:$0xff] %v9584_v41  ;;  %vm2157_vm8 = vcmp.eq.f32.partialorder %v9581_v38, 0.0  ;;  %vm2158_vm9 = vcmp.eq.f32.partialorder %v9584_v41, 0.0 }
 0x3c7   : > { %v2140_v51 = vmul.f32 0.17677669, %v7037_v37  ;;  %v9576_v58 = vsel %vm2153_vm5, -1e+09, %v2137_v17 }
 0x3c8   : > { %v2076_v62 = vpop.f32.mrf.mxu1 }
 0x3c9   : > { %v2139_v23 = vmul.f32 0.17677669, %v2076_v62  ;;  %v9593_v34 = vsel %vm2156_vm7, -1e+09, %v2140_v51 }
 0x3ca   : > { %2187 = vmax.xlane.f32.xlu1 %v9576_v58  ;;  %v7040_v20 = vpop.f32.mrf.mxu1 }
 0x3cb   : > { %v2142_v37 = vmul.f32 0.17677669, %v7040_v20  ;;  %v9589_v17 = vsel %vm2155_vm6, -1e+09, %v2139_v23  ;;  %v9602_v20 = vld [vmem:[%s8893_s18 + $0x48] sm:$0xff] }
 0x3cc   : > { %2191 = vmax.xlane.f32.xlu0 %v9589_v17  ;;  %v2086_v19 = vpop.f32.mrf.mxu1  ;;  %12116 = vst [vmem:[#allocation81_spill] sm:$0xff] %v9602_v20  ;;  %vm11945_vm11 = vcmp.eq.f32.partialorder %v9602_v20, 0.0 }
 0x3cd   : > { %v2141_v62 = vmul.f32 0.17677669, %v2086_v19  ;;  %v9611_v9 = vsel %vm2158_vm9, -1e+09, %v2142_v37 }
 0x3ce   : > { %2193 = vmax.xlane.f32.xlu1 %v9593_v34  ;;  %v7043_v23 = vpop.f32.mrf.mxu1 }
 0x3cf   : > { %v2144_v43 = vmul.f32 0.17677669, %v7043_v23  ;;  %v9607_v51 = vsel %vm2157_vm8, -1e+09, %v2141_v62  ;;  %v9620_v23 = vld [vmem:[%s8893_s18 + $0x58] sm:$0xff] }
 0x3d0   : > { %2195 = vmax.xlane.f32.xlu0 %v9607_v51  ;;  %v2096_v7 = vpop.f32.mrf.mxu1  ;;  %12118 = vst [vmem:[#allocation83_spill] sm:$0xff] %v9620_v23  ;;  %vm2162_vm13 = vcmp.eq.f32.partialorder %v9620_v23, 0.0 }
 0x3d1   : > { %v2143_v19 = vmul.f32 0.17677669, %v2096_v7  ;;  %v9629_v41 = vsel %vm11945_vm11, -1e+09, %v2144_v43 }
 0x3d2   : > { %2197 = vmax.xlane.f32.xlu1 %v9611_v9  ;;  %v7046_v62 = vpop.f32.mrf.mxu1 }
 0x3d3   : > { %v2146_v38 = vmul.f32 0.17677669, %v7046_v62  ;;  %v9625_v37 = vsel %vm2159_vm10, -1e+09, %v2143_v19  ;;  %v9638_v62 = vld [vmem:[%s8893_s18 + $0x68] sm:$0xff]  ;;  %s8495_s18 = smov 32  }
 0x3d4   : > { %2199 = vmax.xlane.f32.xlu0 %v9625_v37  ;;  %v2106_v63 = vpop.f32.mrf.mxu1  ;;  %12120 = vst [vmem:[#allocation85_spill] sm:$0xff] %v9638_v62  ;;  %vm2164_vm15 = vcmp.eq.f32.partialorder %v9638_v62, 0.0 }
 0x3d5   : > { %v2145_v7 = vmul.f32 0.17677669, %v2106_v63  ;;  %v9647_v20 = vsel %vm2162_vm13, -1e+09, %v2146_v38 }
 0x3d6   : > { %2201 = vmax.xlane.f32.xlu1 %v9629_v41  ;;  %v7049_v19 = vpop.f32.mrf.mxu1 }
 0x3d7   : > { %v2148_v12 = vmul.f32 0.17677669, %v7049_v19  ;;  %v9643_v43 = vsel %vm11904_vm12, -1e+09, %v2145_v7  ;;  %vm2166_vm12 = vcmp.eq.f32.partialorder %v9656_v49, 0.0  ;;  %v9684_v49 = vpop.permute.xlu1 %2528 }
 0x3d8   : > { %2203 = vmax.xlane.f32.xlu0 %v9643_v43  ;;  %v2116_v56 = vpop.f32.mrf.mxu1  ;;  %12124 = vst [vmem:[#allocation89_spill] sm:$0xff] %v9684_v49 }
 0x3d9   : > { %v2147_v63 = vmul.f32 0.17677669, %v2116_v56  ;;  %v9665_v4 = vsel %vm2164_vm15, -1e+09, %v2148_v12 }
 0x3da   : > { %2205 = vmax.xlane.f32.xlu1 %v9647_v20  ;;  %v7052_v7 = vpop.f32.mrf.mxu1 }
 0x3db   : > { %v2150_v19 = vmul.f32 0.17677669, %v7052_v7  ;;  %v9661_v38 = vsel %vm2163_vm14, -1e+09, %v2147_v63 }
 0x3dc   : > { %2207 = vmax.xlane.f32.xlu0 %v9661_v38  ;;  %v2126_v23 = vpop.f32.mrf.mxu1 }
 0x3dd   : > { %v2149_v56 = vmul.f32 0.17677669, %v2126_v23  ;;  %v2182_v63 = vsel %vm2166_vm12, -1e+09, %v2150_v19  ;;  %v9686_v19 = vpop.permute.xlu1 %2532 }
 0x3de   : > { %2209 = vmax.xlane.f32.xlu1 %v9665_v4 }
 0x3df   : > { %v9673_v7 = vsel %vm2165_vm0, -1e+09, %v2149_v56 }
 0x3e0   : > { %2211 = vmax.xlane.f32.xlu0 %v9673_v7 }
 0x3e2   : > { %2213 = vmax.xlane.f32.xlu1 %v2182_v63 }
 0x3f6   : > { %2522 = vrot.lane.b32.xlu0 %v9297_v15, %s8493_s14 }
 0x44b   : > { %v2186_v12 = vpop.xlane.xlu0 %2185 }
 0x44c   : > { %v2216_v57 = vsub.f32 %v9549_v31, %v2186_v12 }
 0x44e   : > { %v2233_v62 = vmul.f32 1.442695, %v2216_v57 }
 0x44f   : > { %v2184_v23 = vpop.xlane.xlu0 %2183  ;;  %v2190_v54 = vpop.xlane.xlu1 %2189 }
 0x450   : > { %7795 = vpow2.f32 %v2233_v62  ;;  %v2215_v56 = vsub.f32 %v9566_v22, %v2184_v23  ;;  %v2218_v47 = vsub.f32 %v9570_v29, %v2190_v54 }
 0x452   : > { %v2231_v50 = vmul.f32 1.442695, %v2215_v56  ;;  %v2237_v45 = vmul.f32 1.442695, %v2218_v47 }
 0x453   : > { %v2188_v57 = vpop.xlane.xlu1 %2187 }
 0x454   : > { %7797 = vpow2.f32 %v2231_v50  ;;  %v2217_v3 = vsub.f32 %v9576_v58, %v2188_v57 }
 0x455   : > { %v2192_v50 = vpop.xlane.xlu0 %2191  ;;  %7799 = vpow2.f32 %v2237_v45 }
 0x456   : > { %v2219_v47 = vsub.f32 %v9589_v17, %v2192_v50 }
 0x457   : > { %v2194_v31 = vpop.xlane.xlu1 %2193 }
 0x458   : > { %v2220_v49 = vsub.f32 %v9593_v34, %v2194_v31 }
 0x459   : > { %v2196_v12 = vpop.xlane.xlu0 %2195 }
 0x45a   : > { %v2241_v54 = vmul.f32 1.442695, %v2220_v49 }
 0x45b   : > { %v2198_v22 = vpop.xlane.xlu1 %2197 }
 0x45c   : > { %v2222_v58 = vsub.f32 %v9611_v9, %v2198_v22 }
 0x45d   : > { %v9688_v61 = vpop.eup %7795  ;;  %v2200_v56 = vpop.xlane.xlu0 %2199 }
 0x45e   : > { %2265 = vadd.xlane.f32.xlu1 %v9688_v61 }
 0x45f   : > { %v2202_v62 = vpop.xlane.xlu1 %2201 }
 0x461   : > { %v9691_v10 = vpop.eup %7797  ;;  %v2204_v32 = vpop.xlane.xlu0 %2203 }
 0x462   : > { %2263 = vadd.xlane.f32.xlu0 %v9691_v10  ;;  %v2225_v6 = vsub.f32 %v9643_v43, %v2204_v32  ;;  %v2245_v32 = vmul.f32 1.442695, %v2222_v58 }
 0x463   : > { %v2206_v23 = vpop.xlane.xlu1 %2205 }
 0x467   : > { %v2210_v40 = vpop.xlane.xlu1 %2209 }
 0x46f   : > { %2518 = vrot.lane.b32.xlu1 %v9314_v21, %s8493_s14  ;;  %v2235_v21 = vmul.f32 1.442695, %v2217_v3 }
 0x473   : > { %2516 = vrot.lane.b32.xlu1 %v9322_v25, %s8493_s14  ;;  %v2221_v25 = vsub.f32 %v9607_v51, %v2196_v12  ;;  %v2239_v51 = vmul.f32 1.442695, %v2219_v47 }
 0x477   : > { %2514 = vrot.lane.b32.xlu1 %v9330_v36, %s8493_s14  ;;  %v2243_v36 = vmul.f32 1.442695, %v2221_v25  ;;  %v9711_v25 = vpop.eup %7799 }
 0x478   : > { %2520 = vrot.lane.b32.xlu0 %v9306_v18, %s8493_s14  ;;  %v2214_v18 = vpop.xlane.xlu1 %2213 }
 0x479   : > { %7801 = vpow2.f32 %v2243_v36  ;;  %v2230_v15 = vsub.f32 %v2182_v63, %v2214_v18  ;;  %v2224_v36 = vsub.f32 %v9629_v41, %v2202_v62  ;;  %v2228_v41 = vsub.f32 %v9665_v4, %v2210_v40 }
 0x47a   : > { %7803 = vpow2.f32 %v2235_v21 }
 0x47b   : > { %2512 = vrot.lane.b32.xlu1 %v9345_v42, %s8493_s14  ;;  %v2251_v42 = vmul.f32 1.442695, %v2225_v6  ;;  %v2261_v29 = vmul.f32 1.442695, %v2230_v15  ;;  %v2223_v15 = vsub.f32 %v9625_v37, %v2200_v56  ;;  %v2226_v6 = vsub.f32 %v9647_v20, %v2206_v23  ;;  %v2208_v37 = vpop.xlane.xlu0 %2207 }
 0x47c   : > { %v2227_v43 = vsub.f32 %v9661_v38, %v2208_v37  ;;  %v2257_v63 = vmul.f32 1.442695, %v2228_v41 }
 0x47d   : > { %7805 = vpow2.f32 %v2251_v42  ;;  %v2249_v42 = vmul.f32 1.442695, %v2224_v36  ;;  %v2247_v3 = vmul.f32 1.442695, %v2223_v15  ;;  %v2253_v9 = vmul.f32 1.442695, %v2226_v6 }
 0x47e   : > { %7807 = vpow2.f32 %v2241_v54  ;;  %v2255_v57 = vmul.f32 1.442695, %v2227_v43  ;;  %v12131_v15 = vld [vmem:[#allocation60_spill] sm:$0xff]  ;;  %v12132_v6 = vld [vmem:[#allocation63_spill] sm:$0xff] }
 0x47f   : > { %7809 = vpow2.f32 %v2261_v29  ;;  %v2212_v50 = vpop.xlane.xlu0 %2211  ;;  %v12134_v43 = vld [vmem:[#allocation67_spill] sm:$0xff] }
 0x480   : > { %7811 = vpow2.f32 %v2239_v51  ;;  %v2229_v23 = vsub.f32 %v9673_v7, %v2212_v50  ;;  %v12135_v50 = vld [vmem:[#allocation68_spill] sm:$0xff] }
 0x481   : > { %7813 = vpow2.f32 %v2245_v32  ;;  %v12128_v32 = vld [vmem:[#allocation71_spill] sm:$0xff] }
 0x482   : > { %7815 = vpow2.f32 %v2249_v42  ;;  %v2259_v54 = vmul.f32 1.442695, %v2229_v23  ;;  %v12136_v23 = vld [vmem:[#allocation69_spill] sm:$0xff] }
 0x483   : > { %7817 = vpow2.f32 %v2247_v3  ;;  %v2523_v62 = vpop.permute.xlu0 %2522 }
 0x484   : > { %7819 = vpow2.f32 %v2253_v9  ;;  %v12133_v9 = vld [vmem:[#allocation66_spill] sm:$0xff] }
 0x485   : > { %7821 = vpow2.f32 %v2257_v63 }
 0x486   : > { %v9715_v18 = vpop.eup %7801  ;;  %7823 = vpow2.f32 %v2255_v57 }
 0x487   : > { %v9718_v21 = vpop.eup %7803 }
 0x48a   : > { %v9721_v49 = vpop.eup %7805 }
 0x48b   : > { %v9725_v45 = vpop.eup %7807 }
 0x48c   : > { %v9728_v34 = vpop.eup %7809 }
 0x48d   : > { %v9733_v17 = vpop.eup %7811 }
 0x48e   : > { %v9737_v20 = vpop.eup %7813 }
 0x48f   : > { %v9740_v31 = vpop.eup %7815 }
 0x490   : > { %v9743_v4 = vpop.eup %7817 }
 0x491   : > { %v9746_v40 = vpop.eup %7819 }
 0x492   : > { %v9751_v38 = vpop.eup %7821 }
 0x493   : > { %v9756_v22 = vpop.eup %7823 }
 0x497   : > { %2269 = vadd.xlane.f32.xlu0 %v9711_v25 }
 0x49b   : > { %2275 = vadd.xlane.f32.xlu0 %v9715_v18 }
 0x49f   : > { %2267 = vadd.xlane.f32.xlu1 %v9718_v21  ;;  %2283 = vadd.xlane.f32.xlu0 %v9721_v49 }
 0x4a3   : > { %2273 = vadd.xlane.f32.xlu1 %v9725_v45  ;;  %2293 = vadd.xlane.f32.xlu0 %v9728_v34 }
 0x4a7   : > { %2271 = vadd.xlane.f32.xlu1 %v9733_v17 }
 0x4ab   : > { %2277 = vadd.xlane.f32.xlu1 %v9737_v20 }
 0x4af   : > { %2281 = vadd.xlane.f32.xlu1 %v9740_v31 }
 0x4b3   : > { %2279 = vadd.xlane.f32.xlu1 %v9743_v4 }
 0x4b7   : > { %2285 = vadd.xlane.f32.xlu1 %v9746_v40 }
 0x4b9   : > { %2510 = vrot.lane.b32.xlu0 %v9364_v33, %s8493_s14 }
 0x4bb   : > { %2289 = vadd.xlane.f32.xlu1 %v9751_v38 }
 0x4bd   : > { %2478 = vrot.lane.b32.xlu0 %v9193_v39, %s8493_s14 }
 0x4bf   : > { %2287 = vadd.xlane.f32.xlu1 %v9756_v22 }
 0x4c1   : > { %2482 = vrot.lane.b32.xlu0 %v9198_v44, %s8493_s14 }
 0x4c5   : > { %2486 = vrot.lane.b32.xlu0 %v9218_v52, %s8493_s14 }
 0x4c9   : > { %2490 = vrot.lane.b32.xlu0 %v9233_v59, %s8493_s14 }
 0x4cd   : > { %2494 = vrot.lane.b32.xlu0 %v9250_v2, %s8493_s14 }
 0x4d0   : > { %2508 = vrot.lane.b32.xlu1 %v9382_v28, %s8493_s14 }
 0x4d1   : > { %2498 = vrot.lane.b32.xlu0 %v9261_v5, %s8493_s14 }
 0x4d4   : > { %2506 = vrot.lane.b32.xlu1 %v9400_v24, %s8493_s14 }
 0x4d5   : > { %2502 = vrot.lane.b32.xlu0 %v9270_v8, %s8493_s14 }
 0x4d8   : > { %2504 = vrot.lane.b32.xlu1 %v9418_v26, %s8493_s14 }
 0x4d9   : > { %2967 = vrot.lane.b32.xlu0 %v9348_v30, %s8493_s14 }
 0x4dc   : > { %2472 = vrot.lane.b32.xlu1 %v9184_v35, %s8493_s14 }
 0x4dd   : > { %2963 = vrot.lane.b32.xlu0 %v9355_v46, %s8493_s14 }
 0x4e1   : > { %2959 = vrot.lane.b32.xlu0 %v9376_v53, %s8493_s14 }
 0x4e5   : > { %2953 = vrot.lane.b32.xlu0 %v9403_v60, %s8493_s14 }
 0x4e7   : > { %v2266_v12 = vpop.xlane.xlu1 %2265 }
 0x4e8   : > { %7825 = vrcp.f32 %v2266_v12 }
 0x4e9   : > { %2949 = vrot.lane.b32.xlu0 %v9421_v0, %s8493_s14 }
 0x4eb   : > { %v2264_v56 = vpop.xlane.xlu0 %2263  ;;  %v2519_v36 = vpop.permute.xlu1 %2518 }
 0x4ec   : > { %7827 = vrcp.f32 %v2264_v56 }
 0x4ed   : > { %2945 = vrot.lane.b32.xlu0 %v9437_v27, %s8493_s14  ;;  %7829 = vpow2.f32 %v2259_v54 }
 0x4ef   : > { %v2521_v42 = vpop.permute.xlu0 %2520  ;;  %v2517_v3 = vpop.permute.xlu1 %2516 }
 0x4f1   : > { %2941 = vrot.lane.b32.xlu0 %v9455_v14, %s8493_s14 }
 0x4f3   : > { %v2515_v41 = vpop.permute.xlu1 %2514 }
 0x4f5   : > { %2937 = vrot.lane.b32.xlu0 %v9475_v13, %s8493_s14  ;;  %v7826_v47 = vpop.eup %7825 }
 0x4f6   : > { %v2298_v51 = vmul.f32 %v7826_v47, %v9688_v61  ;;  %v12126_v61 = vld [vmem:[#allocation89_spill] sm:$0xff]  ;;  %v12137_v47 = vld [vmem:[#allocation70_spill] sm:$0xff] }
 0x4f7   : > { %v2513_v63 = vpop.permute.xlu1 %2512 }
 0x4f9   : > { %v7828_v29 = vpop.eup %7827  ;;  %3190 = vrot.lane.b32.xlu0 %v9243_v1, %s8494_s4 }
 0x4fa   : > { %v2296_v7 = vmul.f32 %v7828_v29, %v9691_v10  ;;  %v9804_v58 = vpop.eup %7829  ;;  %v12125_v10 = vld [vmem:[#allocation42_spill] sm:$0xff] }
 0x4fc   : > { %7085 = vmatprep.mubr.f32.mxu0 %v2296_v7 }
 0x4fd   : > { %3188 = vrot.lane.b32.xlu0 %v9223_v55, %s8494_s4  ;;  %7086 = vmatmul.mubr.f32.vlgmr.msra.gmra.mxu0 %v2298_v51  ;;  %v12138_v51 = vld [vmem:[#allocation48_spill] sm:$0xff] }
 0x4fe   : > { %7110 = vmatpush3.xpose.msk.msra.mxu0 %vm1893_vm1, %v9533_v16  ;;  %v12127_v16 = vld [vmem:[#allocation44_spill] sm:$0xff] }
 0x4ff   : > { %7111 = vmatprep.subr.msk.mxu0 %vm1893_vm1, %v9686_v19 }
 0x500   : > { %2291 = vadd.xlane.f32.xlu1 %v9804_v58 }
 0x501   : > { %3184 = vrot.lane.b32.xlu0 %v9210_v48, %s8494_s4  ;;  %v12146_v48 = vld [vmem:[#allocation40_spill] sm:$0xff] }
 0x502   : > { %7112 = vmatpush3.xpose.msk.msra.mxu0 %vm1893_vm1, %v9686_v19  ;;  %v12129_v19 = vld [vmem:[#allocation88_spill] sm:$0xff] }
 0x503   : > { %7113 = vmatprep.subr.msk.mxu0 %vm1893_vm1, %v9531_v11 }
 0x505   : > { %3180 = vrot.lane.b32.xlu0 %v12125_v10, %s8494_s4 }
 0x506   : > { %7114 = vmatpush3.xpose.msk.msra.mxu0 %vm1893_vm1, %v9531_v11  ;;  %v12130_v11 = vld [vmem:[#allocation35_spill] sm:$0xff] }
 0x507   : > { %7115 = vmatprep.subr.msk.mxu0 %vm1893_vm1, %v12126_v61 }
 0x509   : > { %3176 = vrot.lane.b32.xlu0 %v12127_v16, %s8494_s4 }
 0x50a   : > { %7116 = vmatpush3.xpose.msk.msra.mxu0 %vm1893_vm1, %v12126_v61 }
 0x50b   : > { %7117 = vmatprep.subr.msk.mxu0 %vm1893_vm1, %v12128_v32 }
 0x50e   : > { %7118 = vmatpush3.xpose.msk.msra.mxu0 %vm1893_vm1, %v12128_v32 }
 0x50f   : > { %7119 = vmatprep.subr.msk.mxu0 %vm1893_vm1, %v12129_v19 }
 0x511   : > { %2474 = vrot.lane.b32.xlu1 %v12130_v11, %s8493_s14 }
 0x512   : > { %7120 = vmatpush3.xpose.msk.msra.mxu0 %vm1893_vm1, %v12129_v19 }
 0x513   : > { %7121 = vmatprep.subr.msk.mxu0 %vm1893_vm1, %v2523_v62 }
 0x515   : > { %2476 = vrot.lane.b32.xlu1 %v12131_v15, %s8493_s14 }
 0x516   : > { %7122 = vmatpush3.xpose.msk.msra.mxu0 %vm1893_vm1, %v2523_v62 }
 0x517   : > { %7123 = vmatprep.subr.msk.mxu0 %vm1893_vm1, %v2521_v42 }
 0x519   : > { %2480 = vrot.lane.b32.xlu1 %v12132_v6, %s8493_s14 }
 0x51a   : > { %7124 = vmatpush3.xpose.msk.msra.mxu0 %vm1893_vm1, %v2521_v42 }
 0x51b   : > { %7125 = vmatprep.subr.msk.mxu0 %vm1893_vm1, %v2519_v36 }
 0x51d   : > { %2484 = vrot.lane.b32.xlu1 %v12133_v9, %s8493_s14 }
 0x51e   : > { %7126 = vmatpush3.xpose.msk.msra.mxu0 %vm1893_vm1, %v2519_v36  ;;  %v12139_v36 = vld [vmem:[#allocation50_spill] sm:$0xff] }
 0x51f   : > { %7127 = vmatprep.subr.msk.mxu0 %vm1893_vm1, %v2517_v3 }
 0x520   : > { %v2270_v37 = vpop.xlane.xlu0 %2269 }
 0x521   : > { %2488 = vrot.lane.b32.xlu1 %v12134_v43, %s8493_s14  ;;  %7831 = vrcp.f32 %v2270_v37 }
 0x522   : > { %7128 = vmatpush3.xpose.msk.msra.mxu0 %vm1893_vm1, %v2517_v3 }
 0x523   : > { %7129 = vmatprep.subr.msk.mxu0 %vm1893_vm1, %v2515_v41 }
 0x524   : > { %v2276_v57 = vpop.xlane.xlu0 %2275 }
 0x525   : > { %2492 = vrot.lane.b32.xlu1 %v12135_v50, %s8493_s14 }
 0x526   : > { %7130 = vmatpush3.xpose.msk.msra.mxu0 %vm1893_vm1, %v2515_v41 }
 0x527   : > { %7131 = vmatprep.subr.msk.mxu0 %vm1893_vm1, %v2513_v63 }
 0x528   : > { %v2268_v62 = vpop.xlane.xlu1 %2267  ;;  %v2284_v12 = vpop.xlane.xlu0 %2283 }
 0x529   : > { %7833 = vrcp.f32 %v2268_v62  ;;  %2496 = vrot.lane.b32.xlu1 %v12136_v23, %s8493_s14 }
 0x52a   : > { %7132 = vmatpush3.xpose.msk.msra.mxu0 %vm1893_vm1, %v2513_v63  ;;  %7835 = vrcp.f32 %v2276_v57  ;;  %v12140_v57 = vld [vmem:[#allocation52_spill] sm:$0xff] }
 0x52c   : > { %v2274_v56 = vpop.xlane.xlu1 %2273  ;;  %v9859_v54 = vpop.xlane.xlu0 %2293 }
 0x52d   : > { %2500 = vrot.lane.b32.xlu1 %v12137_v47, %s8493_s14  ;;  %7837 = vrcp.f32 %v2274_v56 }
 0x52e   : > { %v7832_v19 = vpop.eup %7831 }
 0x52f   : > { %v2302_v63 = vmul.f32 %v7832_v19, %v9711_v25 }
 0x530   : > { %v2272_v29 = vpop.xlane.xlu1 %2271  ;;  %v2511_v7 = vpop.permute.xlu0 %2510 }
 0x531   : > { %7839 = vrcp.f32 %v2272_v29  ;;  %2965 = vrot.lane.b32.xlu1 %v12138_v51, %s8493_s14  ;;  %7133 = vmatprep.subr.msk.mxu0 %vm1893_vm1, %v2511_v7 }
 0x532   : > { %7134 = vmatpush3.xpose.msk.msra.mxu0 %vm1893_vm1, %v2511_v7 }
 0x534   : > { %v2278_v61 = vpop.xlane.xlu1 %2277  ;;  %v9867_v32 = vpop.permute.xlu0 %2478 }
 0x535   : > { %7841 = vrcp.f32 %v2278_v61  ;;  %2961 = vrot.lane.b32.xlu1 %v12139_v36, %s8493_s14 }
 0x536   : > { %v7834_v42 = vpop.eup %7833  ;;  %7843 = vrcp.f32 %v2284_v12  ;;  %v12142_v12 = vld [vmem:[#allocation56_spill] sm:$0xff] }
 0x537   : > { %v2300_v3 = vmul.f32 %v7834_v42, %v9718_v21  ;;  %v7836_v62 = vpop.eup %7835  ;;  %v12141_v21 = vld [vmem:[#allocation53_spill] sm:$0xff] }
 0x538   : > { %v2282_v41 = vpop.xlane.xlu1 %2281  ;;  %v9872_v37 = vpop.permute.xlu0 %2482 }
 0x539   : > { %2957 = vrot.lane.b32.xlu1 %v12140_v57, %s8493_s14  ;;  %7088 = vmatprep.mubr.f32.mxu0 %v2300_v3  ;;  %7845 = vrcp.f32 %v2282_v41  ;;  %v2308_v41 = vmul.f32 %v7836_v62, %v9715_v18  ;;  %v12144_v18 = vld [vmem:[#allocation61_spill] sm:$0xff] }
 0x53a   : > { %7089 = vmatmul.mubr.f32.gmra.mxu0 %v2302_v63  ;;  %v7838_v7 = vpop.eup %7837 }
 0x53b   : > { %v2306_v3 = vmul.f32 %v7838_v7, %v9725_v45 }
 0x53c   : > { %v2280_v56 = vpop.xlane.xlu1 %2279  ;;  %v9877_v29 = vpop.permute.xlu0 %2486 }
 0x53d   : > { %7847 = vrcp.f32 %v2280_v56  ;;  %2955 = vrot.lane.b32.xlu1 %v12141_v21, %s8493_s14 }
 0x53e   : > { %v7840_v61 = vpop.eup %7839 }
 0x53f   : > { %v2304_v42 = vmul.f32 %v7840_v61, %v9733_v17  ;;  %v12143_v17 = vld [vmem:[#allocation58_spill] sm:$0xff] }
 0x540   : > { %v2286_v25 = vpop.xlane.xlu1 %2285  ;;  %v9882_v19 = vpop.permute.xlu0 %2490 }
 0x541   : > { %7849 = vrcp.f32 %v2286_v25  ;;  %2951 = vrot.lane.b32.xlu1 %v12142_v12, %s8493_s14  ;;  %7091 = vmatprep.mubr.f32.mxu0 %v2304_v42 }
 0x542   : > { %v7842_v63 = vpop.eup %7841  ;;  %7092 = vmatmul.mubr.f32.gmra.mxu0 %v2306_v3 }
 0x543   : > { %7094 = vmatprep.mubr.f32.mxu0 %v2308_v41  ;;  %v2310_v56 = vmul.f32 %v7842_v63, %v9737_v20  ;;  %v7844_v45 = vpop.eup %7843  ;;  %v12145_v63 = vld [vmem:[#allocation64_spill] sm:$0xff] }
 0x544   : > { %v2290_v16 = vpop.xlane.xlu1 %2289  ;;  %v9889_v10 = vpop.permute.xlu0 %2494 }
 0x545   : > { %2947 = vrot.lane.b32.xlu1 %v12143_v17, %s8493_s14  ;;  %7851 = vrcp.f32 %v2290_v16  ;;  %v2316_v16 = vmul.f32 %v7844_v45, %v9721_v49  ;;  %v12147_v45 = vld [vmem:[#allocation39_spill] sm:$0xff] }
 0x546   : > { %7095 = vmatmul.mubr.f32.gmra.mxu0 %v2310_v56  ;;  %v7846_v42 = vpop.eup %7845 }
 0x547   : > { %v2314_v41 = vmul.f32 %v7846_v42, %v9740_v31 }
 0x548   : > { %v2288_v7 = vpop.xlane.xlu1 %2287  ;;  %v9893_v61 = vpop.permute.xlu0 %2498 }
 0x549   : > { %7853 = vrcp.f32 %v2288_v7  ;;  %2943 = vrot.lane.b32.xlu1 %v12144_v18, %s8493_s14 }
 0x54a   : > { %v7848_v62 = vpop.eup %7847  ;;  %7855 = vrcp.f32 %v9859_v54 }
 0x54b   : > { %v2312_v20 = vmul.f32 %v7848_v62, %v9743_v4 }
 0x54c   : > { %v2509_v25 = vpop.permute.xlu1 %2508  ;;  %v9898_v3 = vpop.permute.xlu0 %2502 }
 0x54d   : > { %2939 = vrot.lane.b32.xlu1 %v12145_v63, %s8493_s14  ;;  %7097 = vmatprep.mubr.f32.mxu0 %v2312_v20 }
 0x54e   : > { %v7850_v56 = vpop.eup %7849  ;;  %7135 = vmatprep.subr.msk.mxu0 %vm1893_vm1, %v2509_v25  ;;  %7098 = vmatmul.mubr.f32.gmra.mxu0 %v2314_v41  ;;  %v12149_v41 = vld [vmem:[#allocation43_spill] sm:$0xff] }
 0x54f   : > { %7136 = vmatpush3.xpose.msk.msra.mxu0 %vm1893_vm1, %v2509_v25  ;;  %7100 = vmatprep.mubr.f32.mxu0 %v2316_v16  ;;  %v2318_v4 = vmul.f32 %v7850_v56, %v9746_v40  ;;  %v12148_v25 = vld [vmem:[#allocation37_spill] sm:$0xff] }
 0x550   : > { %v2507_v7 = vpop.permute.xlu1 %2506  ;;  %v2968_v62 = vpop.permute.xlu0 %2967 }
 0x551   : > { %3192 = vrot.lane.b32.xlu1 %v12146_v48, %s8494_s4  ;;  %7137 = vmatprep.subr.msk.mxu0 %vm1893_vm1, %v2507_v7 }
 0x552   : > { %7101 = vmatmul.mubr.f32.gmra.mxu0 %v2318_v4  ;;  %7165 = vmatprep.subr.mxu1 %v2968_v62  ;;  %v7852_v31 = vpop.eup %7851 }
 0x553   : > { %7138 = vmatpush3.xpose.msk.msra.mxu0 %vm1893_vm1, %v2507_v7  ;;  %7166 = vmatpush3.msra.mxu1 %v2968_v62  ;;  %v2322_v20 = vmul.f32 %v7852_v31, %v9751_v38 }
 0x554   : > { %v2505_v49 = vpop.permute.xlu1 %2504 }
 0x555   : > { %3186 = vrot.lane.b32.xlu1 %v12147_v45, %s8494_s4  ;;  %7139 = vmatprep.subr.msk.mxu0 %vm1893_vm1, %v2505_v49 }
 0x556   : > { %v7854_v40 = vpop.eup %7853 }
 0x557   : > { %7140 = vmatpush3.xpose.msk.msra.mxu0 %vm1893_vm1, %v2505_v49  ;;  %v2320_v42 = vmul.f32 %v7854_v40, %v9756_v22  ;;  %v7856_v49 = vpop.eup %7855 }
 0x558   : > { %v2473_v16 = vpop.permute.xlu1 %2472  ;;  %v2326_v40 = vmul.f32 %v7856_v49, %v9728_v34 }
 0x559   : > { %3182 = vrot.lane.b32.xlu1 %v12148_v25, %s8494_s4  ;;  %7103 = vmatprep.mubr.f32.mxu0 %v2320_v42 }
 0x55a   : > { %7104 = vmatmul.mubr.f32.gmra.mxu0 %v2322_v20 }
 0x55d   : > { %3178 = vrot.lane.b32.xlu1 %v12149_v41, %s8494_s4 }
 0x589   : > { %v2292_v56 = vpop.xlane.xlu1 %2291 }
 0x58a   : > { %7857 = vrcp.f32 %v2292_v56 }
 0x58d   : > { %v2475_v4 = vpop.permute.xlu1 %2474 }
 0x591   : > { %v2477_v7 = vpop.permute.xlu1 %2476 }
 0x595   : > { %v2481_v62 = vpop.permute.xlu1 %2480 }
 0x597   : > { %v7858_v22 = vpop.eup %7857 }
 0x598   : > { %v2324_v38 = vmul.f32 %v7858_v22, %v9804_v58  ;;  %v2964_v58 = vpop.permute.xlu0 %2963 }
 0x599   : > { %v2485_v31 = vpop.permute.xlu1 %2484 }
 0x59a   : > { %7106 = vmatprep.mubr.f32.mxu0 %v2324_v38 }
 0x59b   : > { %7107 = vmatmul.mubr.f32.gmra.mxu0 %v2326_v40 }
 0x59c   : > { %7141 = vmatprep.mubr.msk.f32.mxu0 %vm1893_vm1, %v2473_v16  ;;  %v2960_v16 = vpop.permute.xlu0 %2959 }
 0x59d   : > { %v2489_v42 = vpop.permute.xlu1 %2488 }
 0x59f   : > { %7142 = vmatmul.mubr.msk.f32.vlgmr.msra.gmra.mxu0 %vm1893_vm1, %v2475_v4 }
 0x5a0   : > { %7144 = vmatprep.mubr.msk.f32.mxu0 %vm1893_vm1, %v2477_v7 }
 0x5a1   : > { %v2493_v54 = vpop.permute.xlu1 %2492 }
 0x5a3   : > { %7145 = vmatmul.mubr.msk.f32.gmra.mxu0 %vm1893_vm1, %v9867_v32 }
 0x5a4   : > { %7147 = vmatprep.mubr.msk.f32.mxu0 %vm1893_vm1, %v2481_v62 }
 0x5a5   : > { %v2497_v20 = vpop.permute.xlu1 %2496 }
 0x5a7   : > { %7148 = vmatmul.mubr.msk.f32.gmra.mxu0 %vm1893_vm1, %v9872_v37  ;;  %v2954_v37 = vpop.permute.xlu0 %2953 }
 0x5a8   : > { %7150 = vmatprep.mubr.msk.f32.mxu0 %vm1893_vm1, %v2485_v31 }
 0x5a9   : > { %v2501_v34 = vpop.permute.xlu1 %2500 }
 0x5ab   : > { %7151 = vmatmul.mubr.msk.f32.gmra.mxu0 %vm1893_vm1, %v9877_v29 }
 0x5ac   : > { %7153 = vmatprep.mubr.msk.f32.mxu0 %vm1893_vm1, %v2489_v42 }
 0x5ad   : > { %v2966_v56 = vpop.permute.xlu1 %2965 }
 0x5ae   : > { %7167 = vmatprep.subr.mxu1 %v2966_v56 }
 0x5af   : > { %7154 = vmatmul.mubr.msk.f32.gmra.mxu0 %vm1893_vm1, %v9882_v19  ;;  %7168 = vmatpush3.msra.mxu1 %v2966_v56  ;;  %v2950_v19 = vpop.permute.xlu0 %2949 }
 0x5b0   : > { %7156 = vmatprep.mubr.msk.f32.mxu0 %vm1893_vm1, %v2493_v54  ;;  %7169 = vmatprep.subr.mxu1 %v2964_v58 }
 0x5b1   : > { %v2962_v32 = vpop.permute.xlu1 %2961  ;;  %7170 = vmatpush3.msra.mxu1 %v2964_v58 }
 0x5b2   : > { %7171 = vmatprep.subr.mxu1 %v2962_v32 }
 0x5b3   : > { %7157 = vmatmul.mubr.msk.f32.gmra.mxu0 %vm1893_vm1, %v9889_v10  ;;  %7172 = vmatpush3.msra.mxu1 %v2962_v32  ;;  %v2946_v7 = vpop.permute.xlu0 %2945 }
 0x5b4   : > { %7159 = vmatprep.mubr.msk.f32.mxu0 %vm1893_vm1, %v2497_v20  ;;  %7173 = vmatprep.subr.mxu1 %v2960_v16 }
 0x5b5   : > { %v2958_v29 = vpop.permute.xlu1 %2957  ;;  %7174 = vmatpush3.msra.mxu1 %v2960_v16 }
 0x5b6   : > { %7175 = vmatprep.subr.mxu1 %v2958_v29 }
 0x5b7   : > { %7160 = vmatmul.mubr.msk.f32.gmra.mxu0 %vm1893_vm1, %v9893_v61  ;;  %7176 = vmatpush3.msra.mxu1 %v2958_v29  ;;  %v2942_v61 = vpop.permute.xlu0 %2941 }
 0x5b8   : > { %7162 = vmatprep.mubr.msk.f32.mxu0 %vm1893_vm1, %v2501_v34 }
 0x5b9   : > { %v2956_v4 = vpop.permute.xlu1 %2955 }
 0x5ba   : > { %7177 = vmatprep.subr.mxu1 %v2956_v4 }
 0x5bb   : > { %7163 = vmatmul.mubr.msk.f32.gmra.mxu0 %vm1893_vm1, %v9898_v3  ;;  %7178 = vmatpush3.msra.mxu1 %v2956_v4  ;;  %v2938_v22 = vpop.permute.xlu0 %2937 }
 0x5bc   : > { %7179 = vmatprep.subr.mxu1 %v2954_v37 }
 0x5bd   : > { %v2952_v10 = vpop.permute.xlu1 %2951  ;;  %7180 = vmatpush3.msra.mxu1 %v2954_v37  ;;  %v9951_v31 = vpop.f32.mrf.mxu0 }
 0x5be   : > { %7181 = vmatprep.subr.mxu1 %v2952_v10  ;;  %12150 = vst [vmem:[#allocation89_spill] sm:$0xff] %v9951_v31 }
 0x5bf   : > { %7182 = vmatpush3.msra.mxu1 %v2952_v10  ;;  %v9953_v40 = vpop.f32.mrf.mxu0 }
 0x5c0   : > { %7183 = vmatprep.subr.mxu1 %v2950_v19  ;;  %12151 = vst [vmem:[#allocation71_spill] sm:$0xff] %v9953_v40 }
 0x5c1   : > { %v2948_v62 = vpop.permute.xlu1 %2947  ;;  %7184 = vmatpush3.msra.mxu1 %v2950_v19 }
 0x5c2   : > { %7185 = vmatprep.subr.mxu1 %v2948_v62 }
 0x5c3   : > { %7186 = vmatpush3.msra.mxu1 %v2948_v62 }
 0x5c4   : > { %7187 = vmatprep.subr.mxu1 %v2946_v7 }
 0x5c5   : > { %v2944_v49 = vpop.permute.xlu1 %2943  ;;  %7188 = vmatpush3.msra.mxu1 %v2946_v7 }
 0x5c6   : > { %7189 = vmatprep.subr.mxu1 %v2944_v49 }
 0x5c7   : > { %7190 = vmatpush3.msra.mxu1 %v2944_v49 }
 0x5c8   : > { %7191 = vmatprep.subr.mxu1 %v2942_v61 }
 0x5c9   : > { %v2940_v3 = vpop.permute.xlu1 %2939  ;;  %7192 = vmatpush3.msra.mxu1 %v2942_v61 }
 0x5ca   : > { %7193 = vmatprep.subr.mxu1 %v2940_v3 }
 0x5cb   : > { %7194 = vmatpush3.msra.mxu1 %v2940_v3 }
 0x5cc   : > { %7195 = vmatprep.subr.mxu1 %v2938_v22 }
 0x5cd   : > { %v9947_v38 = vpop.permute.xlu1 %3192  ;;  %7196 = vmatpush3.msra.mxu1 %v2938_v22 }
 0x5ce   : > { %7221 = vmatprep.subr.msk.mxu1 %vm1893_vm1, %v9947_v38 }
 0x5fa   : > { %v9955_v42 = vpop.f32.mrf.mxu0 }
 0x5fb   : > { %12152 = vst [vmem:[#allocation88_spill] sm:$0xff] %v9955_v42 }
 0x5fc   : > { %v9957_v54 = vpop.f32.mrf.mxu0 }
 0x5fd   : > { %12153 = vst [vmem:[#allocation35_spill] sm:$0xff] %v9957_v54 }
 0x602   : > { %v9959_v20 = vpop.f32.mrf.mxu0 }
 0x603   : > { %12154 = vst [vmem:[#allocation60_spill] sm:$0xff] %v9959_v20 }
 0x604   : > { %v9961_v58 = vpop.f32.mrf.mxu0 }
 0x605   : > { %12155 = vst [vmem:[#allocation63_spill] sm:$0xff] %v9961_v58 }
 0x606   : > { %v9963_v34 = vpop.f32.mrf.mxu0 }
 0x607   : > { %12156 = vst [vmem:[#allocation66_spill] sm:$0xff] %v9963_v34 }
 0x608   : > { %v9965_v16 = vpop.f32.mrf.mxu0 }
 0x609   : > { %12157 = vst [vmem:[#allocation67_spill] sm:$0xff] %v9965_v16 }
 0x60e   : > { %v9967_v56 = vpop.f32.mrf.mxu0 }
 0x60f   : > { %12158 = vst [vmem:[#allocation68_spill] sm:$0xff] %v9967_v56 }
 0x610   : > { %v9969_v32 = vpop.f32.mrf.mxu0 }
 0x611   : > { %12159 = vst [vmem:[#allocation69_spill] sm:$0xff] %v9969_v32 }
 0x612   : > { %v9971_v37 = vpop.f32.mrf.mxu0 }
 0x613   : > { %12160 = vst [vmem:[#allocation70_spill] sm:$0xff] %v9971_v37 }
 0x614   : > { %v9973_v29 = vpop.f32.mrf.mxu0 }
 0x615   : > { %12161 = vst [vmem:[#allocation48_spill] sm:$0xff] %v9973_v29 }
 0x61a   : > { %v9975_v19 = vpop.f32.mrf.mxu0 }
 0x61b   : > { %12162 = vst [vmem:[#allocation50_spill] sm:$0xff] %v9975_v19  ;;  %v12170_v19 = vld [vmem:[#allocation47_spill] sm:$0xff] }
 0x61c   : > { %v9977_v4 = vpop.f32.mrf.mxu0 }
 0x61d   : > { %12163 = vst [vmem:[#allocation90_spill] sm:$0xff] %v9977_v4 }
 0x65b   : > { %v9979_v10 = vpop.f32.mrf.mxu0 }
 0x65c   : > { %12164 = vst [vmem:[#allocation91_spill] sm:$0xff] %v9979_v10  ;;  %v12168_v10 = vld [vmem:[#allocation45_spill] sm:$0xff] }
 0x65d   : > { %v9981_v7 = vpop.f32.mrf.mxu0 }
 0x65e   : > { %12165 = vst [vmem:[#allocation92_spill] sm:$0xff] %v9981_v7 }
 0x65f   : > { %v7143_v62 = vpop.f32.mrf.mxu0 }
 0x660   : > { %v2746_v61 = vmul.f32 0.17677669, %v7143_v62  ;;  %v12169_v62 = vld [vmem:[#allocation46_spill] sm:$0xff] }
 0x661   : > { %v2666_v49 = vpop.f32.mrf.mxu0 }
 0x662   : > { %v2745_v3 = vmul.f32 0.17677669, %v2666_v49  ;;  %v9985_v56 = vsel %vm2152_vm2, -1e+09, %v2746_v61 }
 0x663   : > { %2779 = vmax.xlane.f32.xlu0 %v9985_v56  ;;  %v7146_v7 = vpop.f32.mrf.mxu0 }
 0x664   : > { %v9990_v29 = vsel %vm2151_vm3, -1e+09, %v2745_v3  ;;  %v2748_v20 = vmul.f32 0.17677669, %v7146_v7 }
 0x665   : > { %2777 = vmax.xlane.f32.xlu1 %v9990_v29  ;;  %v2676_v49 = vpop.f32.mrf.mxu0 }
 0x666   : > { %v2747_v58 = vmul.f32 0.17677669, %v2676_v49  ;;  %v10001_v31 = vsel %vm2154_vm4, -1e+09, %v2748_v20 }
 0x667   : > { %v7149_v61 = vpop.f32.mrf.mxu0 }
 0x668   : > { %v2750_v54 = vmul.f32 0.17677669, %v7149_v61 }
 0x669   : > { %v2686_v4 = vpop.f32.mrf.mxu0 }
 0x66a   : > { %v10011_v7 = vsel %vm2156_vm7, -1e+09, %v2750_v54 }
 0x66b   : > { %v7152_v32 = vpop.f32.mrf.mxu0 }
 0x66c   : > { %v2752_v22 = vmul.f32 0.17677669, %v7152_v32 }
 0x66d   : > { %v2696_v34 = vpop.f32.mrf.mxu0 }
 0x66e   : > { %v2751_v49 = vmul.f32 0.17677669, %v2696_v34  ;;  %v10021_v40 = vsel %vm2158_vm9, -1e+09, %v2752_v22 }
 0x66f   : > { %v7155_v16 = vpop.f32.mrf.mxu0 }
 0x670   : > { %v10026_v41 = vsel %vm2157_vm8, -1e+09, %v2751_v49 }
 0x671   : > { %v2706_v3 = vpop.f32.mrf.mxu0 }
 0x672   : > { %v2753_v32 = vmul.f32 0.17677669, %v2706_v3 }
 0x673   : > { %v7158_v42 = vpop.f32.mrf.mxu0 }
 0x675   : > { %v2716_v37 = vpop.f32.mrf.mxu0 }
 0x676   : > { %3174 = vrot.lane.b32.xlu1 %v12168_v10, %s8494_s4  ;;  %v10036_v10 = vsel %vm2159_vm10, -1e+09, %v2753_v32 }
 0x679   : > { %3172 = vrot.lane.b32.xlu0 %v12169_v62, %s8494_s4  ;;  %v2749_v62 = vmul.f32 0.17677669, %v2686_v4  ;;  %v7161_v4 = vpop.f32.mrf.mxu0 }
 0x67a   : > { %v2758_v49 = vmul.f32 0.17677669, %v7161_v4 }
 0x67b   : > { %v10016_v61 = vsel %vm2155_vm6, -1e+09, %v2749_v62  ;;  %v2726_v34 = vpop.f32.mrf.mxu0  ;;  %v2756_v62 = vmul.f32 0.17677669, %v7158_v42 }
 0x67c   : > { %v2757_v42 = vmul.f32 0.17677669, %v2726_v34  ;;  %v10051_v55 = vsel %vm2164_vm15, -1e+09, %v2758_v49  ;;  %v10071_v49 = vpop.permute.xlu0 %3190  ;;  %v10077_v34 = vpop.permute.xlu1 %3186 }
 0x67d   : > { %3170 = vrot.lane.b32.xlu0 %v12170_v19, %s8494_s4  ;;  %v10006_v19 = vsel %vm2153_vm5, -1e+09, %v2747_v58  ;;  %v2754_v58 = vmul.f32 0.17677669, %v7155_v16  ;;  %v2755_v16 = vmul.f32 0.17677669, %v2716_v37  ;;  %v7164_v3 = vpop.f32.mrf.mxu0 }
 0x67e   : > { %v10041_v45 = vsel %vm2162_vm13, -1e+09, %v2756_v62  ;;  %v2760_v32 = vmul.f32 0.17677669, %v7164_v3  ;;  %v10056_v54 = vsel %vm2163_vm14, -1e+09, %v2757_v42 }
 0x67f   : > { %v10031_v25 = vsel %vm11945_vm11, -1e+09, %v2754_v58  ;;  %v12180_v58 = vld [vmem:[#allocation82_spill] sm:$0xff]  ;;  %v2736_v37 = vpop.f32.mrf.mxu0 }
 0x680   : > { %vm12181_vm11 = vcmp.eq.f32.partialorder %v12180_v58, 0.0  ;;  %v2759_v4 = vmul.f32 0.17677669, %v2736_v37  ;;  %v10073_v42 = vpop.permute.xlu0 %3188  ;;  %v10081_v62 = vpop.permute.xlu1 %3182 }
 0x681   : > { %v10046_v20 = vsel %vm12181_vm11, -1e+09, %v2755_v16  ;;  %v10061_v16 = vsel %vm2166_vm12, -1e+09, %v2760_v32 }
 0x682   : > { %v10066_v22 = vsel %vm2165_vm0, -1e+09, %v2759_v4 }
 0x684   : > { %v10075_v37 = vpop.permute.xlu0 %3184  ;;  %v10085_v4 = vpop.permute.xlu1 %3178 }
 0x688   : > { %v10079_v32 = vpop.permute.xlu0 %3180 }
 0x68c   : > { %v10083_v3 = vpop.permute.xlu0 %3176 }
 0x69a   : > { %2783 = vmax.xlane.f32.xlu1 %v10001_v31 }
 0x69c   : > { %2781 = vmax.xlane.f32.xlu0 %v10006_v19 }
 0x69e   : > { %2787 = vmax.xlane.f32.xlu1 %v10011_v7 }
 0x6a0   : > { %2785 = vmax.xlane.f32.xlu0 %v10016_v61 }
 0x6a2   : > { %2791 = vmax.xlane.f32.xlu1 %v10021_v40 }
 0x6a4   : > { %2789 = vmax.xlane.f32.xlu0 %v10026_v41 }
 0x6a6   : > { %2795 = vmax.xlane.f32.xlu1 %v10031_v25 }
 0x6a8   : > { %2793 = vmax.xlane.f32.xlu0 %v10036_v10 }
 0x6aa   : > { %2799 = vmax.xlane.f32.xlu1 %v10041_v45 }
 0x6ac   : > { %2797 = vmax.xlane.f32.xlu0 %v10046_v20 }
 0x6ae   : > { %2803 = vmax.xlane.f32.xlu1 %v10051_v55 }
 0x6b0   : > { %2801 = vmax.xlane.f32.xlu0 %v10056_v54 }
 0x6b2   : > { %2807 = vmax.xlane.f32.xlu1 %v10061_v16 }
 0x6b4   : > { %2805 = vmax.xlane.f32.xlu0 %v10066_v22 }
 0x6ca   : > { %3168 = vrot.lane.b32.xlu0 %v9364_v33, %s8494_s4 }
 0x6ec   : > { %v2780_v58 = vpop.xlane.xlu0 %2779 }
 0x6ed   : > { %v2810_v48 = vsub.f32 %v9985_v56, %v2780_v58 }
 0x6ee   : > { %v2778_v33 = vpop.xlane.xlu1 %2777 }
 0x6ef   : > { %v2827_v1 = vmul.f32 1.442695, %v2810_v48  ;;  %v2809_v63 = vsub.f32 %v9990_v29, %v2778_v33 }
 0x6f0   : > { %v10095_v17 = vpop.permute.xlu0 %3172 }
 0x6f1   : > { %7859 = vpow2.f32 %v2827_v1  ;;  %v2825_v13 = vmul.f32 1.442695, %v2809_v63  ;;  %12186 = vst [vmem:[#allocation93_spill] sm:$0xff] %v10095_v17 }
 0x6f2   : > { %v10097_v27 = vpop.permute.xlu1 %3174 }
 0x6f3   : > { %7861 = vpow2.f32 %v2825_v13 }
 0x6f4   : > { %v10099_v56 = vpop.permute.xlu0 %3170 }
 0x6f5   : > { %12187 = vst [vmem:[#allocation94_spill] sm:$0xff] %v10099_v56 }
 0x6fe   : > { %v10089_v18 = vpop.eup %7859 }
 0x6ff   : > { %2859 = vadd.xlane.f32.xlu0 %v10089_v18 }
 0x700   : > { %v10092_v14 = vpop.eup %7861 }
 0x701   : > { %2857 = vadd.xlane.f32.xlu1 %v10092_v14 }
 0x723   : > { %v2784_v48 = vpop.xlane.xlu1 %2783 }
 0x724   : > { %v2812_v33 = vsub.f32 %v10001_v31, %v2784_v48 }
 0x725   : > { %v2782_v1 = vpop.xlane.xlu0 %2781 }
 0x726   : > { %v2831_v63 = vmul.f32 1.442695, %v2812_v33  ;;  %v2811_v13 = vsub.f32 %v10006_v19, %v2782_v1 }
 0x727   : > { %v2788_v29 = vpop.xlane.xlu1 %2787 }
 0x728   : > { %7863 = vpow2.f32 %v2831_v63  ;;  %v2829_v58 = vmul.f32 1.442695, %v2811_v13  ;;  %v2814_v12 = vsub.f32 %v10011_v7, %v2788_v29 }
 0x729   : > { %v2786_v0 = vpop.xlane.xlu0 %2785 }
 0x72a   : > { %7865 = vpow2.f32 %v2829_v58  ;;  %v2835_v21 = vmul.f32 1.442695, %v2814_v12  ;;  %v2813_v60 = vsub.f32 %v10016_v61, %v2786_v0 }
 0x72b   : > { %v2792_v57 = vpop.xlane.xlu1 %2791 }
 0x72c   : > { %v2833_v17 = vmul.f32 1.442695, %v2813_v60  ;;  %7867 = vpow2.f32 %v2835_v21  ;;  %v2816_v31 = vsub.f32 %v10021_v40, %v2792_v57 }
 0x72d   : > { %v2790_v56 = vpop.xlane.xlu0 %2789 }
 0x72e   : > { %v2815_v48 = vsub.f32 %v10026_v41, %v2790_v56  ;;  %7869 = vpow2.f32 %v2833_v17  ;;  %v2839_v19 = vmul.f32 1.442695, %v2816_v31 }
 0x72f   : > { %v2796_v17 = vpop.xlane.xlu1 %2795 }
 0x730   : > { %v2837_v33 = vmul.f32 1.442695, %v2815_v48  ;;  %v2818_v63 = vsub.f32 %v10031_v25, %v2796_v17 }
 0x731   : > { %v2794_v41 = vpop.xlane.xlu0 %2793 }
 0x732   : > { %7871 = vpow2.f32 %v2837_v33  ;;  %v2843_v31 = vmul.f32 1.442695, %v2818_v63  ;;  %v2817_v48 = vsub.f32 %v10036_v10, %v2794_v41 }
 0x733   : > { %7873 = vpow2.f32 %v2839_v19  ;;  %v2800_v40 = vpop.xlane.xlu1 %2799 }
 0x735   : > { %v10107_v1 = vpop.eup %7863  ;;  %v2798_v7 = vpop.xlane.xlu0 %2797 }
 0x736   : > { %2863 = vadd.xlane.f32.xlu0 %v10107_v1  ;;  %v2819_v56 = vsub.f32 %v10046_v20, %v2798_v7 }
 0x737   : > { %v10110_v12 = vpop.eup %7865  ;;  %v2804_v61 = vpop.xlane.xlu1 %2803 }
 0x738   : > { %2861 = vadd.xlane.f32.xlu1 %v10110_v12  ;;  %v2845_v13 = vmul.f32 1.442695, %v2819_v56  ;;  %v2822_v29 = vsub.f32 %v10051_v55, %v2804_v61 }
 0x739   : > { %v10113_v60 = vpop.eup %7867 }
 0x73a   : > { %7875 = vpow2.f32 %v2845_v13  ;;  %v2851_v33 = vmul.f32 1.442695, %v2822_v29 }
 0x73b   : > { %v10116_v0 = vpop.eup %7869  ;;  %v2808_v58 = vpop.xlane.xlu1 %2807  ;;  %7877 = vpow2.f32 %v2843_v31 }
 0x73c   : > { %2867 = vadd.xlane.f32.xlu1 %v10113_v60  ;;  %v2824_v19 = vsub.f32 %v10061_v16, %v2808_v58  ;;  %7879 = vpow2.f32 %v2851_v33 }
 0x73e   : > { %v2855_v20 = vmul.f32 1.442695, %v2824_v19 }
 0x73f   : > { %v10118_v57 = vpop.eup %7871 }
 0x740   : > { %2865 = vadd.xlane.f32.xlu1 %v10116_v0  ;;  %2869 = vadd.xlane.f32.xlu0 %v10118_v57  ;;  %v10122_v21 = vpop.eup %7873 }
 0x741   : > { %12188 = vst [vmem:[#allocation95_spill] sm:$0xff] %v10122_v21 }
 0x744   : > { %2871 = vadd.xlane.f32.xlu1 %v10122_v21  ;;  %v2820_v21 = vsub.f32 %v10041_v45, %v2800_v40 }
 0x746   : > { %v2847_v25 = vmul.f32 1.442695, %v2820_v21 }
 0x747   : > { %v10137_v41 = vpop.eup %7875 }
 0x748   : > { %v10140_v16 = vpop.eup %7877 }
 0x749   : > { %v10142_v40 = vpop.eup %7879 }
 0x755   : > { %3164 = vrot.lane.b32.xlu1 %v9400_v24, %s8494_s4  ;;  %v2802_v24 = vpop.xlane.xlu0 %2801 }
 0x756   : > { %3166 = vrot.lane.b32.xlu0 %v9382_v28, %s8494_s4  ;;  %v2841_v28 = vmul.f32 1.442695, %v2817_v48  ;;  %v2821_v17 = vsub.f32 %v10056_v54, %v2802_v24  ;;  %v12196_v48 = vld [vmem:[#allocation59_spill] sm:$0xff] }
 0x758   : > { %7881 = vpow2.f32 %v2841_v28  ;;  %v2849_v7 = vmul.f32 1.442695, %v2821_v17 }
 0x759   : > { %7883 = vpow2.f32 %v2855_v20  ;;  %v2806_v55 = vpop.xlane.xlu0 %2805 }
 0x75a   : > { %7885 = vpow2.f32 %v2847_v25  ;;  %v2823_v10 = vsub.f32 %v10066_v22, %v2806_v55  ;;  %v12197_v25 = vld [vmem:[#allocation58_spill] sm:$0xff] }
 0x75b   : > { %7887 = vpow2.f32 %v2849_v7  ;;  %v12198_v55 = vld [vmem:[#allocation62_spill] sm:$0xff] }
 0x75c   : > { %v2853_v45 = vmul.f32 1.442695, %v2823_v10 }
 0x75d   : > { %v10157_v21 = vpop.permute.xlu0 %3168 }
 0x75e   : > { %7889 = vpow2.f32 %v2853_v45  ;;  %v12199_v45 = vld [vmem:[#allocation61_spill] sm:$0xff] }
 0x765   : > { %v10146_v28 = vpop.eup %7881 }
 0x766   : > { %v10148_v24 = vpop.eup %7883 }
 0x767   : > { %v10152_v54 = vpop.eup %7885 }
 0x768   : > { %v10155_v22 = vpop.eup %7887 }
 0x76b   : > { %v10160_v61 = vpop.eup %7889 }
 0x775   : > { %2877 = vadd.xlane.f32.xlu0 %v10137_v41 }
 0x779   : > { %2875 = vadd.xlane.f32.xlu1 %v10140_v16  ;;  %2883 = vadd.xlane.f32.xlu0 %v10142_v40 }
 0x77d   : > { %2873 = vadd.xlane.f32.xlu1 %v10146_v28  ;;  %2887 = vadd.xlane.f32.xlu0 %v10148_v24 }
 0x781   : > { %2879 = vadd.xlane.f32.xlu1 %v10152_v54 }
 0x785   : > { %2881 = vadd.xlane.f32.xlu1 %v10155_v22 }
 0x788   : > { %v2860_v56 = vpop.xlane.xlu0 %2859 }
 0x789   : > { %2885 = vadd.xlane.f32.xlu1 %v10160_v61  ;;  %7891 = vrcp.f32 %v2860_v56  ;;  %v12200_v56 = vld [vmem:[#allocation65_spill] sm:$0xff] }
 0x78a   : > { %v2858_v63 = vpop.xlane.xlu1 %2857 }
 0x78b   : > { %7893 = vrcp.f32 %v2858_v63 }
 0x793   : > { %3162 = vrot.lane.b32.xlu0 %v9418_v26, %s8494_s4 }
 0x796   : > { %v7892_v13 = vpop.eup %7891 }
 0x797   : > { %3132 = vrot.lane.b32.xlu0 %v12130_v11, %s8494_s4  ;;  %v2892_v31 = vmul.f32 %v7892_v13, %v10089_v18 }
 0x798   : > { %v7894_v29 = vpop.eup %7893 }
 0x799   : > { %v2890_v58 = vmul.f32 %v7894_v29, %v10092_v14  ;;  %v12202_v29 = vld [vmem:[#allocation41_spill] sm:$0xff] }
 0x79a   : > { %3130 = vrot.lane.b32.xlu1 %v9184_v35, %s8494_s4 }
 0x79b   : > { %7197 = vmatprep.mubr.f32.mxu1 %v2890_v58  ;;  %3136 = vrot.lane.b32.xlu0 %v9193_v39, %s8494_s4 }
 0x79c   : > { %7198 = vmatmul.mubr.f32.vlgmr.msra.gmra.mxu1 %v2892_v31 }
 0x79d   : > { %7222 = vmatpush3.xpose.msk.msra.mxu1 %vm1893_vm1, %v9947_v38  ;;  %v12189_v38 = vld [vmem:[#allocation93_spill] sm:$0xff] }
 0x79e   : > { %7223 = vmatprep.subr.msk.mxu1 %vm1893_vm1, %v10071_v49  ;;  %3134 = vrot.lane.b32.xlu1 %v12131_v15, %s8494_s4 }
 0x79f   : > { %3140 = vrot.lane.b32.xlu0 %v9198_v44, %s8494_s4 }
 0x7a1   : > { %7224 = vmatpush3.xpose.msk.msra.mxu1 %vm1893_vm1, %v10071_v49  ;;  %v12192_v49 = vld [vmem:[#allocation94_spill] sm:$0xff] }
 0x7a2   : > { %7225 = vmatprep.subr.msk.mxu1 %vm1893_vm1, %v10073_v42  ;;  %3138 = vrot.lane.b32.xlu1 %v12132_v6, %s8494_s4 }
 0x7a3   : > { %3144 = vrot.lane.b32.xlu0 %v9218_v52, %s8494_s4 }
 0x7a5   : > { %7226 = vmatpush3.xpose.msk.msra.mxu1 %vm1893_vm1, %v10073_v42  ;;  %v12194_v42 = vld [vmem:[#allocation57_spill] sm:$0xff] }
 0x7a6   : > { %7227 = vmatprep.subr.msk.mxu1 %vm1893_vm1, %v10077_v34  ;;  %3142 = vrot.lane.b32.xlu1 %v12133_v9, %s8494_s4 }
 0x7a7   : > { %3148 = vrot.lane.b32.xlu0 %v9233_v59, %s8494_s4 }
 0x7a9   : > { %7228 = vmatpush3.xpose.msk.msra.mxu1 %vm1893_vm1, %v10077_v34  ;;  %v12191_v34 = vld [vmem:[#allocation55_spill] sm:$0xff] }
 0x7aa   : > { %7229 = vmatprep.subr.msk.mxu1 %vm1893_vm1, %v10075_v37  ;;  %3146 = vrot.lane.b32.xlu1 %v12134_v43, %s8494_s4 }
 0x7ab   : > { %3152 = vrot.lane.b32.xlu0 %v9250_v2, %s8494_s4 }
 0x7ad   : > { %7230 = vmatpush3.xpose.msk.msra.mxu1 %vm1893_vm1, %v10075_v37 }
 0x7ae   : > { %7231 = vmatprep.subr.msk.mxu1 %vm1893_vm1, %v10081_v62  ;;  %3150 = vrot.lane.b32.xlu1 %v12135_v50, %s8494_s4 }
 0x7af   : > { %3156 = vrot.lane.b32.xlu0 %v9261_v5, %s8494_s4 }
 0x7b1   : > { %7232 = vmatpush3.xpose.msk.msra.mxu1 %vm1893_vm1, %v10081_v62  ;;  %v12190_v62 = vld [vmem:[#allocation52_spill] sm:$0xff] }
 0x7b2   : > { %7233 = vmatprep.subr.msk.mxu1 %vm1893_vm1, %v10079_v32  ;;  %3154 = vrot.lane.b32.xlu1 %v12136_v23, %s8494_s4 }
 0x7b3   : > { %3160 = vrot.lane.b32.xlu0 %v9270_v8, %s8494_s4 }
 0x7b5   : > { %7234 = vmatpush3.xpose.msk.msra.mxu1 %vm1893_vm1, %v10079_v32 }
 0x7b6   : > { %7235 = vmatprep.subr.msk.mxu1 %vm1893_vm1, %v10085_v4  ;;  %3158 = vrot.lane.b32.xlu1 %v12137_v47, %s8494_s4 }
 0x7b7   : > { %3609 = vrot.lane.b32.xlu0 %v9348_v30, %s8494_s4 }
 0x7b9   : > { %7236 = vmatpush3.xpose.msk.msra.mxu1 %vm1893_vm1, %v10085_v4  ;;  %v12195_v4 = vld [vmem:[#allocation56_spill] sm:$0xff] }
 0x7ba   : > { %7237 = vmatprep.subr.msk.mxu1 %vm1893_vm1, %v10083_v3  ;;  %3607 = vrot.lane.b32.xlu1 %v12138_v51, %s8494_s4 }
 0x7bb   : > { %3605 = vrot.lane.b32.xlu0 %v9355_v46, %s8494_s4 }
 0x7bd   : > { %7238 = vmatpush3.xpose.msk.msra.mxu1 %vm1893_vm1, %v10083_v3 }
 0x7be   : > { %7239 = vmatprep.subr.msk.mxu1 %vm1893_vm1, %v10097_v27  ;;  %3603 = vrot.lane.b32.xlu1 %v12139_v36, %s8494_s4 }
 0x7bf   : > { %3601 = vrot.lane.b32.xlu0 %v9376_v53, %s8494_s4  ;;  %v2864_v14 = vpop.xlane.xlu0 %2863 }
 0x7c0   : > { %7895 = vrcp.f32 %v2864_v14  ;;  %v12203_v14 = vld [vmem:[#allocation40_spill] sm:$0xff] }
 0x7c1   : > { %7240 = vmatpush3.xpose.msk.msra.mxu1 %vm1893_vm1, %v10097_v27  ;;  %v2862_v18 = vpop.xlane.xlu1 %2861  ;;  %v12193_v27 = vld [vmem:[#allocation53_spill] sm:$0xff] }
 0x7c2   : > { %7897 = vrcp.f32 %v2862_v18  ;;  %7241 = vmatprep.subr.msk.mxu1 %vm1893_vm1, %v12189_v38  ;;  %3599 = vrot.lane.b32.xlu1 %v12190_v62, %s8494_s4 }
 0x7c3   : > { %3595 = vrot.lane.b32.xlu0 %v12191_v34, %s8494_s4 }
 0x7c5   : > { %7242 = vmatpush3.xpose.msk.msra.mxu1 %vm1893_vm1, %v12189_v38  ;;  %v2868_v3 = vpop.xlane.xlu1 %2867 }
 0x7c6   : > { %7243 = vmatprep.subr.msk.mxu1 %vm1893_vm1, %v12192_v49  ;;  %3597 = vrot.lane.b32.xlu1 %v12193_v27, %s8494_s4  ;;  %7899 = vrcp.f32 %v2868_v3  ;;  %v12204_v3 = vld [vmem:[#allocation38_spill] sm:$0xff] }
 0x7c7   : > { %3591 = vrot.lane.b32.xlu0 %v12194_v42, %s8494_s4 }
 0x7c9   : > { %7244 = vmatpush3.xpose.msk.msra.mxu1 %vm1893_vm1, %v12192_v49  ;;  %v2866_v37 = vpop.xlane.xlu1 %2865  ;;  %v2870_v32 = vpop.xlane.xlu0 %2869  ;;  %v12205_v49 = vld [vmem:[#allocation95_spill] sm:$0xff] }
 0x7ca   : > { %7901 = vrcp.f32 %v2866_v37  ;;  %7245 = vmatprep.subr.msk.mxu1 %vm1893_vm1, %v10157_v21  ;;  %3593 = vrot.lane.b32.xlu1 %v12195_v4, %s8494_s4 }
 0x7cb   : > { %7903 = vrcp.f32 %v2870_v32  ;;  %3587 = vrot.lane.b32.xlu0 %v12196_v48, %s8494_s4  ;;  %v12206_v32 = vld [vmem:[#allocation39_spill] sm:$0xff] }
 0x7cd   : > { %7246 = vmatpush3.xpose.msk.msra.mxu1 %vm1893_vm1, %v10157_v21  ;;  %v2872_v33 = vpop.xlane.xlu1 %2871  ;;  %v3167_v19 = vpop.permute.xlu0 %3166 }
 0x7ce   : > { %v7896_v20 = vpop.eup %7895  ;;  %7905 = vrcp.f32 %v2872_v33  ;;  %3589 = vrot.lane.b32.xlu1 %v12197_v25, %s8494_s4  ;;  %7247 = vmatprep.subr.msk.mxu1 %vm1893_vm1, %v3167_v19  ;;  %v12210_v33 = vld [vmem:[#allocation43_spill] sm:$0xff] }
 0x7cf   : > { %v7898_v17 = vpop.eup %7897  ;;  %3583 = vrot.lane.b32.xlu0 %v12198_v55, %s8494_s4  ;;  %v2896_v21 = vmul.f32 %v7896_v20, %v10107_v1 }
 0x7d0   : > { %v2894_v7 = vmul.f32 %v7898_v17, %v10110_v12  ;;  %v12201_v12 = vld [vmem:[#allocation64_spill] sm:$0xff] }
 0x7d1   : > { %7248 = vmatpush3.xpose.msk.msra.mxu1 %vm1893_vm1, %v3167_v19  ;;  %v3165_v10 = vpop.permute.xlu1 %3164  ;;  %v12211_v19 = vld [vmem:[#allocation44_spill] sm:$0xff] }
 0x7d2   : > { %3585 = vrot.lane.b32.xlu1 %v12199_v45, %s8494_s4  ;;  %7200 = vmatprep.mubr.f32.mxu1 %v2894_v7 }
 0x7d3   : > { %7249 = vmatprep.subr.msk.mxu1 %vm1893_vm1, %v3165_v10  ;;  %3579 = vrot.lane.b32.xlu0 %v12200_v56, %s8494_s4  ;;  %v7900_v63 = vpop.eup %7899 }
 0x7d4   : > { %7201 = vmatmul.mubr.f32.gmra.mxu1 %v2896_v21  ;;  %v2900_v31 = vmul.f32 %v7900_v63, %v10113_v60  ;;  %v12208_v60 = vld [vmem:[#allocation37_spill] sm:$0xff] }
 0x7d5   : > { %7250 = vmatpush3.xpose.msk.msra.mxu1 %vm1893_vm1, %v3165_v10 }
 0x7d6   : > { %3581 = vrot.lane.b32.xlu1 %v12201_v12, %s8494_s4 }
 0x7d7   : > { %v7902_v13 = vpop.eup %7901  ;;  %3832 = vrot.lane.b32.xlu0 %v12202_v29, %s8495_s18 }
 0x7d8   : > { %v7904_v58 = vpop.eup %7903  ;;  %v2898_v1 = vmul.f32 %v7902_v13, %v10116_v0  ;;  %v12207_v0 = vld [vmem:[#allocation36_spill] sm:$0xff] }
 0x7d9   : > { %v2902_v18 = vmul.f32 %v7904_v58, %v10118_v57  ;;  %v12209_v57 = vld [vmem:[#allocation42_spill] sm:$0xff] }
 0x7da   : > { %3834 = vrot.lane.b32.xlu1 %v12203_v14, %s8495_s18  ;;  %7203 = vmatprep.mubr.f32.mxu1 %v2898_v1 }
 0x7db   : > { %v7906_v38 = vpop.eup %7905  ;;  %3830 = vrot.lane.b32.xlu0 %v12204_v3, %s8495_s18  ;;  %7204 = vmatmul.mubr.f32.gmra.mxu1 %v2900_v31 }
 0x7dc   : > { %7206 = vmatprep.mubr.f32.mxu1 %v2902_v18  ;;  %v2904_v37 = vmul.f32 %v7906_v38, %v12205_v49 }
 0x7de   : > { %3828 = vrot.lane.b32.xlu1 %v12206_v32, %s8495_s18 }
 0x7df   : > { %3826 = vrot.lane.b32.xlu0 %v12207_v0, %s8495_s18  ;;  %7207 = vmatmul.mubr.f32.gmra.mxu1 %v2904_v37 }
 0x7e2   : > { %3824 = vrot.lane.b32.xlu1 %v12208_v60, %s8495_s18 }
 0x7e3   : > { %3822 = vrot.lane.b32.xlu0 %v12209_v57, %s8495_s18 }
 0x7e6   : > { %3820 = vrot.lane.b32.xlu1 %v12210_v33, %s8495_s18 }
 0x7e7   : > { %3818 = vrot.lane.b32.xlu0 %v12211_v19, %s8495_s18 }
 0x7fe   : > { %v2878_v20 = vpop.xlane.xlu0 %2877 }
 0x7ff   : > { %7907 = vrcp.f32 %v2878_v20 }
 0x802   : > { %v2876_v17 = vpop.xlane.xlu1 %2875  ;;  %v2884_v7 = vpop.xlane.xlu0 %2883 }
 0x803   : > { %7909 = vrcp.f32 %v2876_v17 }
 0x806   : > { %v2874_v10 = vpop.xlane.xlu1 %2873  ;;  %v2888_v21 = vpop.xlane.xlu0 %2887 }
 0x807   : > { %7911 = vrcp.f32 %v2874_v10 }
 0x80a   : > { %v2880_v63 = vpop.xlane.xlu1 %2879  ;;  %v3163_v13 = vpop.permute.xlu0 %3162 }
 0x80b   : > { %7913 = vrcp.f32 %v2880_v63  ;;  %7251 = vmatprep.subr.msk.mxu1 %vm1893_vm1, %v3163_v13 }
 0x80c   : > { %7252 = vmatpush3.xpose.msk.msra.mxu1 %vm1893_vm1, %v3163_v13  ;;  %7915 = vrcp.f32 %v2884_v7  ;;  %v7908_v1 = vpop.eup %7907 }
 0x80d   : > { %v2910_v0 = vmul.f32 %v7908_v1, %v10137_v41 }
 0x80e   : > { %v2882_v29 = vpop.xlane.xlu1 %2881  ;;  %v3133_v58 = vpop.permute.xlu0 %3132 }
 0x80f   : > { %7917 = vrcp.f32 %v2882_v29 }
 0x810   : > { %7919 = vrcp.f32 %v2888_v21  ;;  %v7910_v18 = vpop.eup %7909 }
 0x811   : > { %v2908_v32 = vmul.f32 %v7910_v18, %v10140_v16 }
 0x812   : > { %v2886_v31 = vpop.xlane.xlu1 %2885  ;;  %v3137_v14 = vpop.permute.xlu0 %3136 }
 0x813   : > { %7921 = vrcp.f32 %v2886_v31 }
 0x814   : > { %v7912_v38 = vpop.eup %7911 }
 0x815   : > { %v2906_v3 = vmul.f32 %v7912_v38, %v10146_v28 }
 0x816   : > { %v3131_v49 = vpop.permute.xlu1 %3130  ;;  %v3141_v37 = vpop.permute.xlu0 %3140 }
 0x817   : > { %7209 = vmatprep.mubr.f32.mxu1 %v2906_v3 }
 0x818   : > { %v7914_v60 = vpop.eup %7913  ;;  %7210 = vmatmul.mubr.f32.gmra.mxu1 %v2908_v32 }
 0x819   : > { %7212 = vmatprep.mubr.f32.mxu1 %v2910_v0  ;;  %v2912_v57 = vmul.f32 %v7914_v60, %v10152_v54  ;;  %v7916_v20 = vpop.eup %7915 }
 0x81a   : > { %v3135_v33 = vpop.permute.xlu1 %3134  ;;  %v3145_v19 = vpop.permute.xlu0 %3144  ;;  %v2916_v21 = vmul.f32 %v7916_v20, %v10142_v40 }
 0x81c   : > { %v7918_v17 = vpop.eup %7917  ;;  %7213 = vmatmul.mubr.f32.gmra.mxu1 %v2912_v57 }
 0x81d   : > { %v2914_v7 = vmul.f32 %v7918_v17, %v10155_v22  ;;  %v7920_v16 = vpop.eup %7919 }
 0x81e   : > { %v3139_v28 = vpop.permute.xlu1 %3138  ;;  %v3149_v10 = vpop.permute.xlu0 %3148  ;;  %v2920_v54 = vmul.f32 %v7920_v16, %v10148_v24 }
 0x81f   : > { %7215 = vmatprep.mubr.f32.mxu1 %v2914_v7 }
 0x820   : > { %v7922_v63 = vpop.eup %7921  ;;  %7216 = vmatmul.mubr.f32.gmra.mxu1 %v2916_v21 }
 0x821   : > { %v2918_v41 = vmul.f32 %v7922_v63, %v10160_v61 }
 0x822   : > { %v3143_v13 = vpop.permute.xlu1 %3142  ;;  %v3153_v29 = vpop.permute.xlu0 %3152 }
 0x823   : > { %7218 = vmatprep.mubr.f32.mxu1 %v2918_v41 }
 0x824   : > { %7219 = vmatmul.mubr.f32.gmra.mxu1 %v2920_v54 }
 0x825   : > { %7253 = vmatprep.mubr.msk.f32.mxu1 %vm1893_vm1, %v3131_v49 }
 0x826   : > { %v3147_v1 = vpop.permute.xlu1 %3146  ;;  %v3157_v22 = vpop.permute.xlu0 %3156 }
 0x828   : > { %7254 = vmatmul.mubr.msk.f32.vlgmr.msra.gmra.mxu1 %vm1893_vm1, %v3133_v58 }
 0x829   : > { %7256 = vmatprep.mubr.msk.f32.mxu1 %vm1893_vm1, %v3135_v33 }
 0x82a   : > { %v3151_v40 = vpop.permute.xlu1 %3150  ;;  %v3161_v31 = vpop.permute.xlu0 %3160 }
 0x82c   : > { %7257 = vmatmul.mubr.msk.f32.gmra.mxu1 %vm1893_vm1, %v3137_v14 }
 0x82d   : > { %7259 = vmatprep.mubr.msk.f32.mxu1 %vm1893_vm1, %v3139_v28 }
 0x82e   : > { %v3155_v61 = vpop.permute.xlu1 %3154  ;;  %v3610_v18 = vpop.permute.xlu0 %3609 }
 0x82f   : > { %7277 = vmatprep.subr.mxu0 %v3610_v18 }
 0x830   : > { %7260 = vmatmul.mubr.msk.f32.gmra.mxu1 %vm1893_vm1, %v3141_v37  ;;  %7278 = vmatpush3.msra.mxu0 %v3610_v18 }
 0x831   : > { %7262 = vmatprep.mubr.msk.f32.mxu1 %vm1893_vm1, %v3143_v13 }
 0x832   : > { %v3159_v24 = vpop.permute.xlu1 %3158  ;;  %v3606_v38 = vpop.permute.xlu0 %3605 }
 0x834   : > { %7263 = vmatmul.mubr.msk.f32.gmra.mxu1 %vm1893_vm1, %v3145_v19 }
 0x835   : > { %7265 = vmatprep.mubr.msk.f32.mxu1 %vm1893_vm1, %v3147_v1 }
 0x836   : > { %v3608_v58 = vpop.permute.xlu1 %3607  ;;  %v3602_v3 = vpop.permute.xlu0 %3601 }
 0x837   : > { %7279 = vmatprep.subr.mxu0 %v3608_v58 }
 0x838   : > { %7266 = vmatmul.mubr.msk.f32.gmra.mxu1 %vm1893_vm1, %v3149_v10  ;;  %7280 = vmatpush3.msra.mxu0 %v3608_v58 }
 0x839   : > { %7268 = vmatprep.mubr.msk.f32.mxu1 %vm1893_vm1, %v3151_v40  ;;  %7281 = vmatprep.subr.mxu0 %v3606_v38 }
 0x83a   : > { %v3604_v14 = vpop.permute.xlu1 %3603  ;;  %7282 = vmatpush3.msra.mxu0 %v3606_v38  ;;  %v3596_v49 = vpop.permute.xlu0 %3595 }
 0x83b   : > { %7283 = vmatprep.subr.mxu0 %v3604_v14 }
 0x83c   : > { %7269 = vmatmul.mubr.msk.f32.gmra.mxu1 %vm1893_vm1, %v3153_v29  ;;  %7284 = vmatpush3.msra.mxu0 %v3604_v14 }
 0x83d   : > { %7271 = vmatprep.mubr.msk.f32.mxu1 %vm1893_vm1, %v3155_v61  ;;  %7285 = vmatprep.subr.mxu0 %v3602_v3 }
 0x83e   : > { %v3600_v37 = vpop.permute.xlu1 %3599  ;;  %7286 = vmatpush3.msra.mxu0 %v3602_v3  ;;  %v3592_v32 = vpop.permute.xlu0 %3591 }
 0x83f   : > { %7287 = vmatprep.subr.mxu0 %v3600_v37 }
 0x840   : > { %7272 = vmatmul.mubr.msk.f32.gmra.mxu1 %vm1893_vm1, %v3157_v22  ;;  %7288 = vmatpush3.msra.mxu0 %v3600_v37 }
 0x841   : > { %7274 = vmatprep.mubr.msk.f32.mxu1 %vm1893_vm1, %v3159_v24  ;;  %v12230_v24 = vld [vmem:[#allocation45_spill] sm:$0xff] }
 0x842   : > { %v3598_v0 = vpop.permute.xlu1 %3597  ;;  %v3588_v57 = vpop.permute.xlu0 %3587 }
 0x843   : > { %7289 = vmatprep.subr.mxu0 %v3598_v0 }
 0x844   : > { %7275 = vmatmul.mubr.msk.f32.gmra.mxu1 %vm1893_vm1, %v3161_v31  ;;  %7290 = vmatpush3.msra.mxu0 %v3598_v0  ;;  %v12232_v31 = vld [vmem:[#allocation47_spill] sm:$0xff] }
 0x845   : > { %7291 = vmatprep.subr.mxu0 %v3596_v49 }
 0x846   : > { %v3594_v60 = vpop.permute.xlu1 %3593  ;;  %7292 = vmatpush3.msra.mxu0 %v3596_v49  ;;  %v3584_v19 = vpop.permute.xlu0 %3583 }
 0x847   : > { %7293 = vmatprep.subr.mxu0 %v3594_v60 }
 0x848   : > { %7294 = vmatpush3.msra.mxu0 %v3594_v60 }
 0x849   : > { %7295 = vmatprep.subr.mxu0 %v3592_v32 }
 0x84a   : > { %v3590_v33 = vpop.permute.xlu1 %3589  ;;  %7296 = vmatpush3.msra.mxu0 %v3592_v32  ;;  %v3580_v7 = vpop.permute.xlu0 %3579 }
 0x84b   : > { %7297 = vmatprep.subr.mxu0 %v3590_v33 }
 0x84c   : > { %7298 = vmatpush3.msra.mxu0 %v3590_v33 }
 0x84d   : > { %7299 = vmatprep.subr.mxu0 %v3588_v57 }
 0x84e   : > { %v3586_v20 = vpop.permute.xlu1 %3585  ;;  %7300 = vmatpush3.msra.mxu0 %v3588_v57 }
 0x84f   : > { %7301 = vmatprep.subr.mxu0 %v3586_v20 }
 0x850   : > { %7302 = vmatpush3.msra.mxu0 %v3586_v20 }
 0x851   : > { %7303 = vmatprep.subr.mxu0 %v3584_v19 }
 0x852   : > { %v3582_v17 = vpop.permute.xlu1 %3581  ;;  %7304 = vmatpush3.msra.mxu0 %v3584_v19 }
 0x853   : > { %7305 = vmatprep.subr.mxu0 %v3582_v17 }
 0x854   : > { %7306 = vmatpush3.msra.mxu0 %v3582_v17 }
 0x855   : > { %7307 = vmatprep.subr.mxu0 %v3580_v7 }
 0x856   : > { %v10335_v28 = vpop.permute.xlu1 %3834  ;;  %7308 = vmatpush3.msra.mxu0 %v3580_v7 }
 0x857   : > { %7333 = vmatprep.subr.msk.mxu0 %vm1893_vm1, %v10335_v28 }
 0x85c   : > { %v10339_v10 = vpop.f32.mrf.mxu1 }
 0x85d   : > { %12212 = vst [vmem:[#allocation93_spill] sm:$0xff] %v10339_v10 }
 0x85e   : > { %v10341_v21 = vpop.f32.mrf.mxu1 }
 0x85f   : > { %12213 = vst [vmem:[#allocation52_spill] sm:$0xff] %v10341_v21 }
 0x894   : > { %v10345_v63 = vpop.f32.mrf.mxu1 }
 0x895   : > { %12214 = vst [vmem:[#allocation94_spill] sm:$0xff] %v10345_v63  ;;  %v12239_v63 = vld [vmem:[#allocation81_spill] sm:$0xff] }
 0x896   : > { %v10347_v41 = vpop.f32.mrf.mxu1  ;;  %vm12240_vm11 = vcmp.eq.f32.partialorder %v12239_v63, 0.0 }
 0x897   : > { %12215 = vst [vmem:[#allocation41_spill] sm:$0xff] %v10347_v41 }
 0x89b   : > { %v10351_v29 = vpop.f32.mrf.mxu1 }
 0x89c   : > { %12216 = vst [vmem:[#allocation40_spill] sm:$0xff] %v10351_v29 }
 0x89d   : > { %v10353_v54 = vpop.f32.mrf.mxu1 }
 0x89e   : > { %12217 = vst [vmem:[#allocation38_spill] sm:$0xff] %v10353_v54 }
 0x89f   : > { %v10357_v22 = vpop.f32.mrf.mxu1 }
 0x8a0   : > { %12218 = vst [vmem:[#allocation95_spill] sm:$0xff] %v10357_v22 }
 0x8a1   : > { %v10359_v40 = vpop.f32.mrf.mxu1 }
 0x8a2   : > { %12219 = vst [vmem:[#allocation39_spill] sm:$0xff] %v10359_v40 }
 0x8d8   : > { %v10363_v61 = vpop.f32.mrf.mxu1 }
 0x8d9   : > { %12220 = vst [vmem:[#allocation36_spill] sm:$0xff] %v10363_v61 }
 0x8da   : > { %v10365_v18 = vpop.f32.mrf.mxu1 }
 0x8db   : > { %12221 = vst [vmem:[#allocation37_spill] sm:$0xff] %v10365_v18 }
 0x8dc   : > { %v10369_v38 = vpop.f32.mrf.mxu1 }
 0x8dd   : > { %12222 = vst [vmem:[#allocation42_spill] sm:$0xff] %v10369_v38 }
 0x8de   : > { %v10371_v58 = vpop.f32.mrf.mxu1 }
 0x8df   : > { %12223 = vst [vmem:[#allocation43_spill] sm:$0xff] %v10371_v58 }
 0x8e0   : > { %v10375_v14 = vpop.f32.mrf.mxu1 }
 0x8e1   : > { %12224 = vst [vmem:[#allocation44_spill] sm:$0xff] %v10375_v14 }
 0x8e2   : > { %v10377_v49 = vpop.f32.mrf.mxu1 }
 0x8e3   : > { %12225 = vst [vmem:[#allocation96_spill] sm:$0xff] %v10377_v49 }
 0x8e4   : > { %v10381_v32 = vpop.f32.mrf.mxu1 }
 0x8e5   : > { %12226 = vst [vmem:[#allocation97_spill] sm:$0xff] %v10381_v32 }
 0x8e6   : > { %v10383_v0 = vpop.f32.mrf.mxu1 }
 0x8e7   : > { %12227 = vst [vmem:[#allocation98_spill] sm:$0xff] %v10383_v0 }
 0x8e8   : > { %v7255_v57 = vpop.f32.mrf.mxu1 }
 0x8e9   : > { %v3404_v33 = vmul.f32 0.17677669, %v7255_v57  ;;  %v12231_v57 = vld [vmem:[#allocation46_spill] sm:$0xff] }
 0x8ea   : > { %v3324_v19 = vpop.f32.mrf.mxu1 }
 0x8eb   : > { %v3403_v20 = vmul.f32 0.17677669, %v3324_v19  ;;  %v10389_v7 = vsel %vm2152_vm2, -1e+09, %v3404_v33 }
 0x8ec   : > { %3437 = vmax.xlane.f32.xlu0 %v10389_v7  ;;  %v7258_v60 = vpop.f32.mrf.mxu1 }
 0x8ed   : > { %v10394_v37 = vsel %vm2151_vm3, -1e+09, %v3403_v20  ;;  %v3406_v32 = vmul.f32 0.17677669, %v7258_v60 }
 0x8ee   : > { %3435 = vmax.xlane.f32.xlu1 %v10394_v37  ;;  %v3334_v19 = vpop.f32.mrf.mxu1 }
 0x8ef   : > { %v3405_v49 = vmul.f32 0.17677669, %v3334_v19 }
 0x8f0   : > { %v7261_v33 = vpop.f32.mrf.mxu1 }
 0x8f1   : > { %v3408_v58 = vmul.f32 0.17677669, %v7261_v33 }
 0x8f2   : > { %v3344_v1 = vpop.f32.mrf.mxu1 }
 0x8f3   : > { %v10415_v60 = vsel %vm2156_vm7, -1e+09, %v3408_v58 }
 0x8f4   : > { %v7264_v13 = vpop.f32.mrf.mxu1 }
 0x8f5   : > { %v3410_v40 = vmul.f32 0.17677669, %v7264_v13 }
 0x8f6   : > { %v3354_v16 = vpop.f32.mrf.mxu1 }
 0x8f7   : > { %v3409_v19 = vmul.f32 0.17677669, %v3354_v16  ;;  %v10425_v29 = vsel %vm2158_vm9, -1e+09, %v3410_v40 }
 0x8f8   : > { %v7267_v0 = vpop.f32.mrf.mxu1 }
 0x8f9   : > { %v10430_v41 = vsel %vm2157_vm8, -1e+09, %v3409_v19 }
 0x8fa   : > { %v3364_v20 = vpop.f32.mrf.mxu1 }
 0x8fb   : > { %v3411_v13 = vmul.f32 0.17677669, %v3364_v20 }
 0x8fc   : > { %v7270_v14 = vpop.f32.mrf.mxu1 }
 0x8fd   : > { %v10440_v10 = vsel %vm2159_vm10, -1e+09, %v3411_v13 }
 0x8fe   : > { %v3374_v61 = vpop.f32.mrf.mxu1 }
 0x8ff   : > { %3816 = vrot.lane.b32.xlu1 %v12230_v24, %s8495_s18  ;;  %v10405_v24 = vsel %vm2154_vm4, -1e+09, %v3406_v32 }
 0x902   : > { %3814 = vrot.lane.b32.xlu0 %v12231_v57, %s8495_s18  ;;  %v3407_v57 = vmul.f32 0.17677669, %v3344_v1  ;;  %v7273_v1 = vpop.f32.mrf.mxu1 }
 0x903   : > { %v3416_v19 = vmul.f32 0.17677669, %v7273_v1 }
 0x904   : > { %v10420_v33 = vsel %vm2155_vm6, -1e+09, %v3407_v57  ;;  %v3384_v16 = vpop.f32.mrf.mxu1  ;;  %v3414_v57 = vmul.f32 0.17677669, %v7270_v14 }
 0x905   : > { %v3415_v14 = vmul.f32 0.17677669, %v3384_v16  ;;  %v10455_v40 = vsel %vm2164_vm15, -1e+09, %v3416_v19  ;;  %v12249_v19 = vld [vmem:[#allocation49_spill] sm:$0xff]  ;;  %v10481_v16 = vpop.permute.xlu1 %3828 }
 0x906   : > { %3812 = vrot.lane.b32.xlu0 %v12232_v31, %s8495_s18  ;;  %v10410_v31 = vsel %vm2153_vm5, -1e+09, %v3405_v49  ;;  %v3412_v49 = vmul.f32 0.17677669, %v7267_v0  ;;  %v3413_v0 = vmul.f32 0.17677669, %v3374_v61  ;;  %v7276_v20 = vpop.f32.mrf.mxu1 }
 0x907   : > { %v10445_v56 = vsel %vm2162_vm13, -1e+09, %v3414_v57  ;;  %v3418_v13 = vmul.f32 0.17677669, %v7276_v20  ;;  %v10460_v12 = vsel %vm2163_vm14, -1e+09, %v3415_v14 }
 0x908   : > { %v10435_v21 = vsel %vm12240_vm11, -1e+09, %v3412_v49  ;;  %v12243_v49 = vld [vmem:[#allocation82_spill] sm:$0xff]  ;;  %v3394_v61 = vpop.f32.mrf.mxu1 }
 0x909   : > { %vm12244_vm11 = vcmp.eq.f32.partialorder %v12243_v49, 0.0  ;;  %v3417_v1 = vmul.f32 0.17677669, %v3394_v61  ;;  %v10475_v61 = vpop.permute.xlu0 %3832  ;;  %v10485_v49 = vpop.permute.xlu1 %3824 }
 0x90a   : > { %v10450_v55 = vsel %vm12244_vm11, -1e+09, %v3413_v0  ;;  %v10465_v0 = vsel %vm2166_vm12, -1e+09, %v3418_v13 }
 0x90b   : > { %v10470_v45 = vsel %vm2165_vm0, -1e+09, %v3417_v1 }
 0x90d   : > { %v10477_v14 = vpop.permute.xlu0 %3830  ;;  %v10489_v1 = vpop.permute.xlu1 %3820 }
 0x911   : > { %v10479_v57 = vpop.permute.xlu0 %3826 }
 0x915   : > { %v10483_v13 = vpop.permute.xlu0 %3822 }
 0x919   : > { %v10487_v20 = vpop.permute.xlu0 %3818 }
 0x923   : > { %3441 = vmax.xlane.f32.xlu1 %v10405_v24 }
 0x925   : > { %3439 = vmax.xlane.f32.xlu0 %v10410_v31 }
 0x927   : > { %3445 = vmax.xlane.f32.xlu1 %v10415_v60 }
 0x929   : > { %3443 = vmax.xlane.f32.xlu0 %v10420_v33 }
 0x92b   : > { %3449 = vmax.xlane.f32.xlu1 %v10425_v29 }
 0x92d   : > { %3447 = vmax.xlane.f32.xlu0 %v10430_v41 }
 0x92f   : > { %3453 = vmax.xlane.f32.xlu1 %v10435_v21 }
 0x931   : > { %3451 = vmax.xlane.f32.xlu0 %v10440_v10 }
 0x933   : > { %3457 = vmax.xlane.f32.xlu1 %v10445_v56 }
 0x935   : > { %3455 = vmax.xlane.f32.xlu0 %v10450_v55 }
 0x937   : > { %3461 = vmax.xlane.f32.xlu1 %v10455_v40 }
 0x939   : > { %3459 = vmax.xlane.f32.xlu0 %v10460_v12 }
 0x93b   : > { %3465 = vmax.xlane.f32.xlu1 %v10465_v0 }
 0x93d   : > { %3463 = vmax.xlane.f32.xlu0 %v10470_v45 }
 0x953   : > { %3810 = vrot.lane.b32.xlu0 %v12249_v19, %s8495_s18 }
 0x975   : > { %v3438_v63 = vpop.xlane.xlu0 %3437 }
 0x976   : > { %v3468_v58 = vsub.f32 %v10389_v7, %v3438_v63 }
 0x977   : > { %v3436_v19 = vpop.xlane.xlu1 %3435 }
 0x978   : > { %v3485_v54 = vmul.f32 1.442695, %v3468_v58  ;;  %v3467_v32 = vsub.f32 %v10394_v37, %v3436_v19 }
 0x979   : > { %v10499_v3 = vpop.permute.xlu0 %3814 }
 0x97a   : > { %7923 = vpow2.f32 %v3485_v54  ;;  %v3483_v22 = vmul.f32 1.442695, %v3467_v32 }
 0x97b   : > { %v10501_v17 = vpop.permute.xlu1 %3816 }
 0x97c   : > { %7925 = vpow2.f32 %v3483_v22 }
 0x97d   : > { %v10503_v63 = vpop.permute.xlu0 %3812 }
 0x97e   : > { %12250 = vst [vmem:[#allocation45_spill] sm:$0xff] %v10503_v63 }
 0x987   : > { %v10493_v18 = vpop.eup %7923 }
 0x988   : > { %3517 = vadd.xlane.f32.xlu0 %v10493_v18 }
 0x989   : > { %v10496_v38 = vpop.eup %7925 }
 0x98a   : > { %3515 = vadd.xlane.f32.xlu1 %v10496_v38 }
 0x9ac   : > { %v3442_v7 = vpop.xlane.xlu1 %3441 }
 0x9ad   : > { %v3470_v37 = vsub.f32 %v10405_v24, %v3442_v7 }
 0x9ae   : > { %v3440_v54 = vpop.xlane.xlu0 %3439 }
 0x9af   : > { %v3489_v32 = vmul.f32 1.442695, %v3470_v37  ;;  %v3469_v22 = vsub.f32 %v10410_v31, %v3440_v54 }
 0x9b0   : > { %v3446_v58 = vpop.xlane.xlu1 %3445 }
 0x9b1   : > { %7927 = vpow2.f32 %v3489_v32  ;;  %v3487_v19 = vmul.f32 1.442695, %v3469_v22  ;;  %v3472_v48 = vsub.f32 %v10415_v60, %v3446_v58  ;;  %v12255_v60 = vld [vmem:[#allocation51_spill] sm:$0xff] }
 0x9b2   : > { %v3444_v25 = vpop.xlane.xlu0 %3443 }
 0x9b3   : > { %7929 = vpow2.f32 %v3487_v19  ;;  %v3493_v4 = vmul.f32 1.442695, %v3472_v48  ;;  %v3471_v42 = vsub.f32 %v10420_v33, %v3444_v25 }
 0x9b4   : > { %v3450_v34 = vpop.xlane.xlu1 %3449 }
 0x9b5   : > { %v3491_v27 = vmul.f32 1.442695, %v3471_v42  ;;  %7931 = vpow2.f32 %v3493_v4  ;;  %v3474_v24 = vsub.f32 %v10425_v29, %v3450_v34 }
 0x9b6   : > { %v3448_v63 = vpop.xlane.xlu0 %3447 }
 0x9b7   : > { %v3473_v7 = vsub.f32 %v10430_v41, %v3448_v63  ;;  %7933 = vpow2.f32 %v3491_v27  ;;  %v3497_v31 = vmul.f32 1.442695, %v3474_v24  ;;  %v12254_v41 = vld [vmem:[#allocation54_spill] sm:$0xff] }
 0x9b8   : > { %v3454_v25 = vpop.xlane.xlu1 %3453 }
 0x9b9   : > { %v3495_v37 = vmul.f32 1.442695, %v3473_v7  ;;  %v3476_v58 = vsub.f32 %v10435_v21, %v3454_v25 }
 0x9ba   : > { %v3452_v29 = vpop.xlane.xlu0 %3451 }
 0x9bb   : > { %7935 = vpow2.f32 %v3495_v37  ;;  %v3501_v37 = vmul.f32 1.442695, %v3476_v58 }
 0x9bc   : > { %7937 = vpow2.f32 %v3497_v31  ;;  %v3458_v33 = vpop.xlane.xlu1 %3457  ;;  %v3475_v31 = vsub.f32 %v10440_v10, %v3452_v29 }
 0x9be   : > { %v10511_v54 = vpop.eup %7927  ;;  %v3456_v63 = vpop.xlane.xlu0 %3455 }
 0x9bf   : > { %3521 = vadd.xlane.f32.xlu0 %v10511_v54  ;;  %v3477_v22 = vsub.f32 %v10450_v55, %v3456_v63 }
 0x9c0   : > { %v10514_v48 = vpop.eup %7929  ;;  %v3462_v32 = vpop.xlane.xlu1 %3461 }
 0x9c1   : > { %3519 = vadd.xlane.f32.xlu1 %v10514_v48  ;;  %v3503_v19 = vmul.f32 1.442695, %v3477_v22  ;;  %v3480_v24 = vsub.f32 %v10455_v40, %v3462_v32 }
 0x9c2   : > { %v10517_v42 = vpop.eup %7931 }
 0x9c3   : > { %12251 = vst [vmem:[#allocation46_spill] sm:$0xff] %v10517_v42  ;;  %7939 = vpow2.f32 %v3503_v19 }
 0x9c4   : > { %v10520_v34 = vpop.eup %7933  ;;  %v3466_v7 = vpop.xlane.xlu1 %3465  ;;  %7941 = vpow2.f32 %v3501_v37 }
 0x9c5   : > { %3525 = vadd.xlane.f32.xlu1 %v10517_v42  ;;  %v3478_v42 = vsub.f32 %v10445_v56, %v3458_v33 }
 0x9c7   : > { %v3505_v21 = vmul.f32 1.442695, %v3478_v42 }
 0x9c8   : > { %v10522_v4 = vpop.eup %7935 }
 0x9c9   : > { %12252 = vst [vmem:[#allocation47_spill] sm:$0xff] %v10522_v4  ;;  %3523 = vadd.xlane.f32.xlu1 %v10520_v34  ;;  %3527 = vadd.xlane.f32.xlu0 %v10522_v4  ;;  %v10526_v27 = vpop.eup %7937  ;;  %v3460_v4 = vpop.xlane.xlu0 %3459 }
 0x9ca   : > { %12253 = vst [vmem:[#allocation49_spill] sm:$0xff] %v10526_v27  ;;  %v3479_v25 = vsub.f32 %v10460_v12, %v3460_v4 }
 0x9cc   : > { %v3507_v63 = vmul.f32 1.442695, %v3479_v25 }
 0x9cd   : > { %3529 = vadd.xlane.f32.xlu1 %v10526_v27  ;;  %v3482_v27 = vsub.f32 %v10465_v0, %v3466_v7  ;;  %v3464_v40 = vpop.xlane.xlu0 %3463 }
 0x9ce   : > { %v3481_v10 = vsub.f32 %v10470_v45, %v3464_v40 }
 0x9cf   : > { %v3513_v55 = vmul.f32 1.442695, %v3482_v27 }
 0x9d0   : > { %v10541_v29 = vpop.eup %7939  ;;  %v3511_v56 = vmul.f32 1.442695, %v3481_v10 }
 0x9d1   : > { %v10544_v0 = vpop.eup %7941  ;;  %v10561_v27 = vpop.permute.xlu0 %3810 }
 0x9de   : > { %3806 = vrot.lane.b32.xlu1 %v12254_v41, %s8495_s18  ;;  %v3509_v41 = vmul.f32 1.442695, %v3480_v24 }
 0x9df   : > { %3808 = vrot.lane.b32.xlu0 %v12255_v60, %s8495_s18  ;;  %v3499_v60 = vmul.f32 1.442695, %v3475_v31 }
 0x9e0   : > { %7943 = vpow2.f32 %v3509_v41 }
 0x9e1   : > { %7945 = vpow2.f32 %v3499_v60 }
 0x9e2   : > { %7947 = vpow2.f32 %v3513_v55 }
 0x9e3   : > { %7949 = vpow2.f32 %v3505_v21 }
 0x9e4   : > { %7951 = vpow2.f32 %v3507_v63 }
 0x9e5   : > { %7953 = vpow2.f32 %v3511_v56 }
 0x9ed   : > { %v10546_v33 = vpop.eup %7943 }
 0x9ee   : > { %v10550_v12 = vpop.eup %7945 }
 0x9ef   : > { %v10552_v42 = vpop.eup %7947 }
 0x9f0   : > { %v10556_v45 = vpop.eup %7949 }
 0x9f1   : > { %v10559_v4 = vpop.eup %7951 }
 0x9f2   : > { %v10564_v32 = vpop.eup %7953 }
 0x9fe   : > { %3535 = vadd.xlane.f32.xlu0 %v10541_v29 }
 0xa02   : > { %3533 = vadd.xlane.f32.xlu1 %v10544_v0  ;;  %3541 = vadd.xlane.f32.xlu0 %v10546_v33 }
 0xa06   : > { %3531 = vadd.xlane.f32.xlu1 %v10550_v12  ;;  %3545 = vadd.xlane.f32.xlu0 %v10552_v42 }
 0xa0a   : > { %3537 = vadd.xlane.f32.xlu1 %v10556_v45 }
 0xa0e   : > { %3539 = vadd.xlane.f32.xlu1 %v10559_v4 }
 0xa11   : > { %v3518_v22 = vpop.xlane.xlu0 %3517 }
 0xa12   : > { %3543 = vadd.xlane.f32.xlu1 %v10564_v32  ;;  %7955 = vrcp.f32 %v3518_v22 }
 0xa13   : > { %v3516_v58 = vpop.xlane.xlu1 %3515 }
 0xa14   : > { %7957 = vrcp.f32 %v3516_v58 }
 0xa1c   : > { %3804 = vrot.lane.b32.xlu0 %v9418_v26, %s8495_s18 }
 0xa1f   : > { %v7956_v19 = vpop.eup %7955 }
 0xa20   : > { %3774 = vrot.lane.b32.xlu0 %v12130_v11, %s8495_s18  ;;  %v3550_v37 = vmul.f32 %v7956_v19, %v10493_v18 }
 0xa21   : > { %v7958_v24 = vpop.eup %7957 }
 0xa22   : > { %v3548_v7 = vmul.f32 %v7958_v24, %v10496_v38  ;;  %v12264_v38 = vld [vmem:[#allocation47_spill] sm:$0xff] }
 0xa23   : > { %3772 = vrot.lane.b32.xlu1 %v9184_v35, %s8495_s18 }
 0xa24   : > { %7309 = vmatprep.mubr.f32.mxu0 %v3548_v7  ;;  %3778 = vrot.lane.b32.xlu0 %v9193_v39, %s8495_s18 }
 0xa25   : > { %7310 = vmatmul.mubr.f32.vlgmr.msra.gmra.mxu0 %v3550_v37 }
 0xa26   : > { %7334 = vmatpush3.xpose.msk.msra.mxu0 %vm1893_vm1, %v10335_v28  ;;  %v12263_v28 = vld [vmem:[#allocation46_spill] sm:$0xff] }
 0xa27   : > { %7335 = vmatprep.subr.msk.mxu0 %vm1893_vm1, %v10475_v61  ;;  %3776 = vrot.lane.b32.xlu1 %v12131_v15, %s8495_s18 }
 0xa28   : > { %3782 = vrot.lane.b32.xlu0 %v9198_v44, %s8495_s18  ;;  %v12256_v44 = vld [vmem:[#allocation53_spill] sm:$0xff] }
 0xa2a   : > { %7336 = vmatpush3.xpose.msk.msra.mxu0 %vm1893_vm1, %v10475_v61 }
 0xa2b   : > { %7337 = vmatprep.subr.msk.mxu0 %vm1893_vm1, %v10477_v14  ;;  %3780 = vrot.lane.b32.xlu1 %v12132_v6, %s8495_s18  ;;  %v12262_v6 = vld [vmem:[#allocation59_spill] sm:$0xff] }
 0xa2c   : > { %3786 = vrot.lane.b32.xlu0 %v9218_v52, %s8495_s18 }
 0xa2e   : > { %7338 = vmatpush3.xpose.msk.msra.mxu0 %vm1893_vm1, %v10477_v14 }
 0xa2f   : > { %7339 = vmatprep.subr.msk.mxu0 %vm1893_vm1, %v10481_v16  ;;  %3784 = vrot.lane.b32.xlu1 %v12133_v9, %s8495_s18 }
 0xa30   : > { %3790 = vrot.lane.b32.xlu0 %v9233_v59, %s8495_s18  ;;  %v12257_v59 = vld [vmem:[#allocation45_spill] sm:$0xff] }
 0xa32   : > { %7340 = vmatpush3.xpose.msk.msra.mxu0 %vm1893_vm1, %v10481_v16 }
 0xa33   : > { %7341 = vmatprep.subr.msk.mxu0 %vm1893_vm1, %v10479_v57  ;;  %3788 = vrot.lane.b32.xlu1 %v12134_v43, %s8495_s18 }
 0xa34   : > { %3794 = vrot.lane.b32.xlu0 %v9250_v2, %s8495_s18  ;;  %v12258_v2 = vld [vmem:[#allocation55_spill] sm:$0xff] }
 0xa36   : > { %7342 = vmatpush3.xpose.msk.msra.mxu0 %vm1893_vm1, %v10479_v57 }
 0xa37   : > { %7343 = vmatprep.subr.msk.mxu0 %vm1893_vm1, %v10485_v49  ;;  %3792 = vrot.lane.b32.xlu1 %v12135_v50, %s8495_s18 }
 0xa38   : > { %3798 = vrot.lane.b32.xlu0 %v9261_v5, %s8495_s18  ;;  %v12259_v5 = vld [vmem:[#allocation57_spill] sm:$0xff] }
 0xa3a   : > { %7344 = vmatpush3.xpose.msk.msra.mxu0 %vm1893_vm1, %v10485_v49  ;;  %v12265_v49 = vld [vmem:[#allocation49_spill] sm:$0xff] }
 0xa3b   : > { %7345 = vmatprep.subr.msk.mxu0 %vm1893_vm1, %v10483_v13  ;;  %3796 = vrot.lane.b32.xlu1 %v12136_v23, %s8495_s18 }
 0xa3c   : > { %3802 = vrot.lane.b32.xlu0 %v9270_v8, %s8495_s18 }
 0xa3e   : > { %7346 = vmatpush3.xpose.msk.msra.mxu0 %vm1893_vm1, %v10483_v13 }
 0xa3f   : > { %7347 = vmatprep.subr.msk.mxu0 %vm1893_vm1, %v10489_v1  ;;  %3800 = vrot.lane.b32.xlu1 %v12137_v47, %s8495_s18 }
 0xa40   : > { %4251 = vrot.lane.b32.xlu0 %v9348_v30, %s8495_s18 }
 0xa42   : > { %7348 = vmatpush3.xpose.msk.msra.mxu0 %vm1893_vm1, %v10489_v1 }
 0xa43   : > { %7349 = vmatprep.subr.msk.mxu0 %vm1893_vm1, %v10487_v20  ;;  %4249 = vrot.lane.b32.xlu1 %v12138_v51, %s8495_s18 }
 0xa44   : > { %4247 = vrot.lane.b32.xlu0 %v9355_v46, %s8495_s18  ;;  %v12260_v46 = vld [vmem:[#allocation56_spill] sm:$0xff] }
 0xa46   : > { %7350 = vmatpush3.xpose.msk.msra.mxu0 %vm1893_vm1, %v10487_v20 }
 0xa47   : > { %7351 = vmatprep.subr.msk.mxu0 %vm1893_vm1, %v10501_v17  ;;  %4245 = vrot.lane.b32.xlu1 %v12139_v36, %s8495_s18 }
 0xa48   : > { %4241 = vrot.lane.b32.xlu0 %v12190_v62, %s8495_s18  ;;  %v3522_v35 = vpop.xlane.xlu0 %3521 }
 0xa49   : > { %7959 = vrcp.f32 %v3522_v35 }
 0xa4a   : > { %7352 = vmatpush3.xpose.msk.msra.mxu0 %vm1893_vm1, %v10501_v17  ;;  %v3520_v39 = vpop.xlane.xlu1 %3519 }
 0xa4b   : > { %7961 = vrcp.f32 %v3520_v39  ;;  %7353 = vmatprep.subr.msk.mxu0 %vm1893_vm1, %v10499_v3  ;;  %4243 = vrot.lane.b32.xlu1 %v9376_v53, %s8495_s18  ;;  %v12261_v53 = vld [vmem:[#allocation58_spill] sm:$0xff] }
 0xa4c   : > { %4239 = vrot.lane.b32.xlu0 %v12256_v44, %s8495_s18 }
 0xa4e   : > { %7354 = vmatpush3.xpose.msk.msra.mxu0 %vm1893_vm1, %v10499_v3  ;;  %v3526_v52 = vpop.xlane.xlu1 %3525 }
 0xa4f   : > { %7355 = vmatprep.subr.msk.mxu0 %vm1893_vm1, %v12257_v59  ;;  %4237 = vrot.lane.b32.xlu1 %v12258_v2, %s8495_s18  ;;  %7963 = vrcp.f32 %v3526_v52 }
 0xa50   : > { %4233 = vrot.lane.b32.xlu0 %v12259_v5, %s8495_s18 }
 0xa52   : > { %7356 = vmatpush3.xpose.msk.msra.mxu0 %vm1893_vm1, %v12257_v59  ;;  %v3524_v8 = vpop.xlane.xlu1 %3523  ;;  %v3528_v30 = vpop.xlane.xlu0 %3527 }
 0xa53   : > { %7965 = vrcp.f32 %v3524_v8  ;;  %7357 = vmatprep.subr.msk.mxu0 %vm1893_vm1, %v10561_v27  ;;  %4235 = vrot.lane.b32.xlu1 %v12260_v46, %s8495_s18 }
 0xa54   : > { %7967 = vrcp.f32 %v3528_v30  ;;  %4231 = vrot.lane.b32.xlu0 %v12261_v53, %s8495_s18 }
 0xa56   : > { %7358 = vmatpush3.xpose.msk.msra.mxu0 %vm1893_vm1, %v10561_v27  ;;  %v3530_v26 = vpop.xlane.xlu1 %3529  ;;  %v3809_v11 = vpop.permute.xlu0 %3808 }
 0xa57   : > { %v7960_v15 = vpop.eup %7959  ;;  %7969 = vrcp.f32 %v3530_v26  ;;  %4229 = vrot.lane.b32.xlu1 %v12262_v6, %s8495_s18  ;;  %7359 = vmatprep.subr.msk.mxu0 %vm1893_vm1, %v3809_v11 }
 0xa58   : > { %v7962_v9 = vpop.eup %7961  ;;  %v3554_v23 = vmul.f32 %v7960_v15, %v10511_v54 }
 0xa59   : > { %v3552_v43 = vmul.f32 %v7962_v9, %v10514_v48 }
 0xa5a   : > { %7360 = vmatpush3.xpose.msk.msra.mxu0 %vm1893_vm1, %v3809_v11  ;;  %v3807_v50 = vpop.permute.xlu1 %3806 }
 0xa5b   : > { %7312 = vmatprep.mubr.f32.mxu0 %v3552_v43  ;;  %7361 = vmatprep.subr.msk.mxu0 %vm1893_vm1, %v3807_v50 }
 0xa5c   : > { %7313 = vmatmul.mubr.f32.gmra.mxu0 %v3554_v23  ;;  %v7964_v47 = vpop.eup %7963 }
 0xa5d   : > { %v3558_v18 = vmul.f32 %v7964_v47, %v12263_v28 }
 0xa5e   : > { %7362 = vmatpush3.xpose.msk.msra.mxu0 %vm1893_vm1, %v3807_v50 }
 0xa60   : > { %v7966_v51 = vpop.eup %7965 }
 0xa61   : > { %v7968_v36 = vpop.eup %7967  ;;  %v3556_v62 = vmul.f32 %v7966_v51, %v10520_v34 }
 0xa62   : > { %v3560_v3 = vmul.f32 %v7968_v36, %v12264_v38 }
 0xa63   : > { %7315 = vmatprep.mubr.f32.mxu0 %v3556_v62 }
 0xa64   : > { %v7970_v17 = vpop.eup %7969  ;;  %7316 = vmatmul.mubr.f32.gmra.mxu0 %v3558_v18 }
 0xa65   : > { %7318 = vmatprep.mubr.f32.mxu0 %v3560_v3  ;;  %v3562_v57 = vmul.f32 %v7970_v17, %v12265_v49 }
 0xa68   : > { %7319 = vmatmul.mubr.f32.gmra.mxu0 %v3562_v57 }
 0xa87   : > { %v3536_v16 = vpop.xlane.xlu0 %3535 }
 0xa88   : > { %7971 = vrcp.f32 %v3536_v16 }
 0xa8b   : > { %v3534_v20 = vpop.xlane.xlu1 %3533  ;;  %v3542_v61 = vpop.xlane.xlu0 %3541 }
 0xa8c   : > { %7973 = vrcp.f32 %v3534_v20 }
 0xa8f   : > { %v3532_v14 = vpop.xlane.xlu1 %3531  ;;  %v3546_v13 = vpop.xlane.xlu0 %3545 }
 0xa90   : > { %7975 = vrcp.f32 %v3532_v14 }
 0xa93   : > { %v3538_v1 = vpop.xlane.xlu1 %3537  ;;  %v3805_v54 = vpop.permute.xlu0 %3804 }
 0xa94   : > { %7977 = vrcp.f32 %v3538_v1  ;;  %7363 = vmatprep.subr.msk.mxu0 %vm1893_vm1, %v3805_v54 }
 0xa95   : > { %7364 = vmatpush3.xpose.msk.msra.mxu0 %vm1893_vm1, %v3805_v54  ;;  %7979 = vrcp.f32 %v3542_v61  ;;  %v7972_v31 = vpop.eup %7971 }
 0xa96   : > { %v3568_v56 = vmul.f32 %v7972_v31, %v10541_v29 }
 0xa97   : > { %v3540_v48 = vpop.xlane.xlu1 %3539  ;;  %v3775_v34 = vpop.permute.xlu0 %3774 }
 0xa98   : > { %7981 = vrcp.f32 %v3540_v48 }
 0xa99   : > { %7983 = vrcp.f32 %v3546_v13  ;;  %v7974_v55 = vpop.eup %7973 }
 0xa9a   : > { %v3566_v10 = vmul.f32 %v7974_v55, %v10544_v0 }
 0xa9b   : > { %v3544_v41 = vpop.xlane.xlu1 %3543  ;;  %v3779_v60 = vpop.permute.xlu0 %3778 }
 0xa9c   : > { %7985 = vrcp.f32 %v3544_v41 }
 0xa9d   : > { %v7976_v21 = vpop.eup %7975 }
 0xa9e   : > { %v3564_v25 = vmul.f32 %v7976_v21, %v10550_v12 }
 0xa9f   : > { %v3773_v40 = vpop.permute.xlu1 %3772  ;;  %v3783_v63 = vpop.permute.xlu0 %3782 }
 0xaa0   : > { %7321 = vmatprep.mubr.f32.mxu0 %v3564_v25 }
 0xaa1   : > { %v7978_v27 = vpop.eup %7977  ;;  %7322 = vmatmul.mubr.f32.gmra.mxu0 %v3566_v10 }
 0xaa2   : > { %7324 = vmatprep.mubr.f32.mxu0 %v3568_v56  ;;  %v3570_v22 = vmul.f32 %v7978_v27, %v10556_v45  ;;  %v7980_v24 = vpop.eup %7979 }
 0xaa3   : > { %v3777_v58 = vpop.permute.xlu1 %3776  ;;  %v3787_v19 = vpop.permute.xlu0 %3786  ;;  %v3574_v39 = vmul.f32 %v7980_v24, %v10546_v33 }
 0xaa5   : > { %v7982_v7 = vpop.eup %7981  ;;  %7325 = vmatmul.mubr.f32.gmra.mxu0 %v3570_v22 }
 0xaa6   : > { %v3572_v37 = vmul.f32 %v7982_v7, %v10559_v4  ;;  %v7984_v0 = vpop.eup %7983 }
 0xaa7   : > { %v3781_v12 = vpop.permute.xlu1 %3780  ;;  %v3791_v35 = vpop.permute.xlu0 %3790  ;;  %v3578_v45 = vmul.f32 %v7984_v0, %v10552_v42 }
 0xaa8   : > { %7327 = vmatprep.mubr.f32.mxu0 %v3572_v37 }
 0xaa9   : > { %v7986_v44 = vpop.eup %7985  ;;  %7328 = vmatmul.mubr.f32.gmra.mxu0 %v3574_v39 }
 0xaaa   : > { %v3576_v29 = vmul.f32 %v7986_v44, %v10564_v32 }
 0xaab   : > { %v3785_v52 = vpop.permute.xlu1 %3784  ;;  %v3795_v59 = vpop.permute.xlu0 %3794 }
 0xaac   : > { %7330 = vmatprep.mubr.f32.mxu0 %v3576_v29 }
 0xaad   : > { %7331 = vmatmul.mubr.f32.gmra.mxu0 %v3578_v45 }
 0xaae   : > { %7365 = vmatprep.mubr.msk.f32.mxu0 %vm1893_vm1, %v3773_v40 }
 0xaaf   : > { %v3789_v2 = vpop.permute.xlu1 %3788  ;;  %v3799_v4 = vpop.permute.xlu0 %3798 }
 0xab1   : > { %7366 = vmatmul.mubr.msk.f32.vlgmr.msra.gmra.mxu0 %vm1893_vm1, %v3775_v34 }
 0xab2   : > { %7368 = vmatprep.mubr.msk.f32.mxu0 %vm1893_vm1, %v3777_v58 }
 0xab3   : > { %v3793_v33 = vpop.permute.xlu1 %3792  ;;  %v3803_v5 = vpop.permute.xlu0 %3802 }
 0xab5   : > { %7369 = vmatmul.mubr.msk.f32.gmra.mxu0 %vm1893_vm1, %v3779_v60 }
 0xab6   : > { %7371 = vmatprep.mubr.msk.f32.mxu0 %vm1893_vm1, %v3781_v12 }
 0xab7   : > { %v3797_v32 = vpop.permute.xlu1 %3796  ;;  %v4252_v8 = vpop.permute.xlu0 %4251 }
 0xab8   : > { %7389 = vmatprep.subr.mxu1 %v4252_v8 }
 0xab9   : > { %7372 = vmatmul.mubr.msk.f32.gmra.mxu0 %vm1893_vm1, %v3783_v63  ;;  %7390 = vmatpush3.msra.mxu1 %v4252_v8 }
 0xaba   : > { %7374 = vmatprep.mubr.msk.f32.mxu0 %vm1893_vm1, %v3785_v52 }
 0xabb   : > { %v3801_v42 = vpop.permute.xlu1 %3800  ;;  %v4248_v30 = vpop.permute.xlu0 %4247 }
 0xabd   : > { %7375 = vmatmul.mubr.msk.f32.gmra.mxu0 %vm1893_vm1, %v3787_v19 }
 0xabe   : > { %7377 = vmatprep.mubr.msk.f32.mxu0 %vm1893_vm1, %v3789_v2 }
 0xabf   : > { %v4250_v46 = vpop.permute.xlu1 %4249  ;;  %v4242_v53 = vpop.permute.xlu0 %4241 }
 0xac0   : > { %7391 = vmatprep.subr.mxu1 %v4250_v46 }
 0xac1   : > { %7378 = vmatmul.mubr.msk.f32.gmra.mxu0 %vm1893_vm1, %v3791_v35  ;;  %7392 = vmatpush3.msra.mxu1 %v4250_v46 }
 0xac2   : > { %7380 = vmatprep.mubr.msk.f32.mxu0 %vm1893_vm1, %v3793_v33  ;;  %7393 = vmatprep.subr.mxu1 %v4248_v30 }
 0xac3   : > { %v4246_v26 = vpop.permute.xlu1 %4245  ;;  %7394 = vmatpush3.msra.mxu1 %v4248_v30  ;;  %v4240_v11 = vpop.permute.xlu0 %4239 }
 0xac4   : > { %7395 = vmatprep.subr.mxu1 %v4246_v26 }
 0xac5   : > { %7381 = vmatmul.mubr.msk.f32.gmra.mxu0 %vm1893_vm1, %v3795_v59  ;;  %7396 = vmatpush3.msra.mxu1 %v4246_v26 }
 0xac6   : > { %7383 = vmatprep.mubr.msk.f32.mxu0 %vm1893_vm1, %v3797_v32 }
 0xac7   : > { %v4244_v15 = vpop.permute.xlu1 %4243  ;;  %v4234_v9 = vpop.permute.xlu0 %4233 }
 0xac8   : > { %7397 = vmatprep.subr.mxu1 %v4244_v15 }
 0xac9   : > { %7384 = vmatmul.mubr.msk.f32.gmra.mxu0 %vm1893_vm1, %v3799_v4  ;;  %7398 = vmatpush3.msra.mxu1 %v4244_v15 }
 0xaca   : > { %7386 = vmatprep.mubr.msk.f32.mxu0 %vm1893_vm1, %v3801_v42  ;;  %7399 = vmatprep.subr.mxu1 %v4242_v53 }
 0xacb   : > { %v4238_v6 = vpop.permute.xlu1 %4237  ;;  %7400 = vmatpush3.msra.mxu1 %v4242_v53  ;;  %v4232_v50 = vpop.permute.xlu0 %4231 }
 0xacc   : > { %7401 = vmatprep.subr.mxu1 %v4240_v11 }
 0xacd   : > { %7387 = vmatmul.mubr.msk.f32.gmra.mxu0 %vm1893_vm1, %v3803_v5  ;;  %7402 = vmatpush3.msra.mxu1 %v4240_v11 }
 0xace   : > { %7403 = vmatprep.subr.mxu1 %v4238_v6 }
 0xacf   : > { %v4236_v43 = vpop.permute.xlu1 %4235  ;;  %7404 = vmatpush3.msra.mxu1 %v4238_v6 }
 0xad0   : > { %7405 = vmatprep.subr.mxu1 %v4236_v43 }
 0xad1   : > { %7406 = vmatpush3.msra.mxu1 %v4236_v43 }
 0xad2   : > { %7407 = vmatprep.subr.mxu1 %v4234_v9 }
 0xad3   : > { %7408 = vmatpush3.msra.mxu1 %v4234_v9  ;;  %v4230_v23 = vpop.permute.xlu1 %4229 }
 0xad4   : > { %7409 = vmatprep.subr.mxu1 %v4232_v50 }
 0xad5   : > { %7410 = vmatpush3.msra.mxu1 %v4232_v50  ;;  %v12274_v50 = vld [vmem:[#allocation81_spill] sm:$0xff] }
 0xad6   : > { %7411 = vmatprep.subr.mxu1 %v4230_v23 }
 0xad7   : > { %7412 = vmatpush3.msra.mxu1 %v4230_v23 }
 0xae5   : > { %v10713_v47 = vpop.f32.mrf.mxu0 }
 0xae7   : > { %v10715_v51 = vpop.f32.mrf.mxu0 }
 0xae8   : > { %v7680_v36 = vpack.i.bf16 %v10713_v47, %v10715_v51 }
 0xb1c   : > { %v10719_v62 = vpop.f32.mrf.mxu0 }
 0xb1e   : > { %v10721_v28 = vpop.f32.mrf.mxu0 }
 0xb1f   : > { %v7695_v18 = vpack.i.bf16 %v10719_v62, %v10721_v28  ;;  %v12298_v62 = vld [vmem:[#allocation39_spill] sm:$0xff] }
 0xb24   : > { %v10725_v38 = vpop.f32.mrf.mxu0 }
 0xb26   : > { %v10727_v3 = vpop.f32.mrf.mxu0 }
 0xb27   : > { %v7710_v17 = vpack.i.bf16 %v10725_v38, %v10727_v3  ;;  %v12300_v38 = vld [vmem:[#allocation36_spill] sm:$0xff]  ;;  %v12301_v3 = vld [vmem:[#allocation37_spill] sm:$0xff] }
 0xb28   : > { %v10731_v49 = vpop.f32.mrf.mxu0 }
 0xb2a   : > { %v10733_v57 = vpop.f32.mrf.mxu0 }
 0xb2b   : > { %v7725_v16 = vpack.i.bf16 %v10731_v49, %v10733_v57 }
 0xb61   : > { %v10737_v20 = vpop.f32.mrf.mxu0 }
 0xb63   : > { %v10739_v61 = vpop.f32.mrf.mxu0 }
 0xb64   : > { %v7740_v14 = vpack.i.bf16 %v10737_v20, %v10739_v61 }
 0xb65   : > { %v10743_v13 = vpop.f32.mrf.mxu0 }
 0xb67   : > { %v10745_v1 = vpop.f32.mrf.mxu0 }
 0xb68   : > { %v7755_v54 = vpack.i.bf16 %v10743_v13, %v10745_v1  ;;  %v12310_v13 = vld [vmem:[#allocation98_spill] sm:$0xff] }
 0xb69   : > { %v10749_v48 = vpop.f32.mrf.mxu0 }
 0xb6b   : > { %v10751_v34 = vpop.f32.mrf.mxu0 }
 0xb6c   : > { %v7770_v31 = vpack.i.bf16 %v10749_v48, %v10751_v34 }
 0xb6d   : > { %v10755_v41 = vpop.f32.mrf.mxu0 }
 0xb6f   : > { %v10757_v60 = vpop.f32.mrf.mxu0 }
 0xb70   : > { %v7785_v55 = vpack.i.bf16 %v10755_v41, %v10757_v60 }
 0xb71   : > { %v7367_v21 = vpop.f32.mrf.mxu0 }
 0xb72   : > { %v4046_v25 = vmul.f32 0.17677669, %v7367_v21 }
 0xb73   : > { %v3966_v40 = vpop.f32.mrf.mxu0 }
 0xb74   : > { %v4045_v63 = vmul.f32 0.17677669, %v3966_v40  ;;  %v10763_v56 = vsel %vm2152_vm2, -1e+09, %v4046_v25  ;;  %vm12275_vm2 = vcmp.eq.f32.partialorder %v12274_v50, 0.0 }
 0xb75   : > { %4079 = vmax.xlane.f32.xlu0 %v10763_v56  ;;  %v7370_v27 = vpop.f32.mrf.mxu0 }
 0xb76   : > { %v4048_v22 = vmul.f32 0.17677669, %v7370_v27  ;;  %v10768_v19 = vsel %vm2151_vm3, -1e+09, %v4045_v63  ;;  %vm12279_vm3 = vmmov %vm12244_vm11 }
 0xb77   : > { %4077 = vmax.xlane.f32.xlu1 %v10768_v19  ;;  %v3976_v24 = vpop.f32.mrf.mxu0 }
 0xb78   : > { %v4047_v7 = vmul.f32 0.17677669, %v3976_v24  ;;  %v10773_v39 = vsel %vm2154_vm4, -1e+09, %v4048_v22  ;;  %v12280_v24 = vld [vmem:[#allocation61_spill] sm:$0xff]  ;;  %vm4622_vm4 = vcmask 523264  }
 0xb79   : > { %v7373_v37 = vpop.f32.mrf.mxu0 }
 0xb7a   : > { %v4050_v12 = vmul.f32 0.17677669, %v7373_v37  ;;  %v10777_v44 = vsel %vm2153_vm5, -1e+09, %v4047_v7  ;;  %v12281_v7 = vld [vmem:[#allocation62_spill] sm:$0xff]  ;;  %vm4639_vm5 = vcmask 785408  }
 0xb7b   : > { %4083 = vmax.xlane.f32.xlu1 %v10773_v39  ;;  %4081 = vmax.xlane.f32.xlu0 %v10777_v44  ;;  %v3986_v29 = vpop.f32.mrf.mxu0 }
 0xb7c   : > { %v4049_v52 = vmul.f32 0.17677669, %v3986_v29  ;;  %v10783_v4 = vsel %vm2156_vm7, -1e+09, %v4050_v12 }
 0xb7d   : > { %v7376_v59 = vpop.f32.mrf.mxu0 }
 0xb7e   : > { %v4052_v45 = vmul.f32 0.17677669, %v7376_v59  ;;  %v10787_v5 = vsel %vm2155_vm6, -1e+09, %v4049_v52 }
 0xb7f   : > { %4087 = vmax.xlane.f32.xlu1 %v10783_v4  ;;  %4085 = vmax.xlane.f32.xlu0 %v10787_v5  ;;  %v3996_v32 = vpop.f32.mrf.mxu0 }
 0xb80   : > { %v4051_v8 = vmul.f32 0.17677669, %v3996_v32  ;;  %v10793_v53 = vsel %vm2158_vm9, -1e+09, %v4052_v45 }
 0xb81   : > { %v7379_v42 = vpop.f32.mrf.mxu0 }
 0xb82   : > { %v4054_v30 = vmul.f32 0.17677669, %v7379_v42  ;;  %v10797_v11 = vsel %vm2157_vm8, -1e+09, %v4051_v8 }
 0xb83   : > { %4091 = vmax.xlane.f32.xlu1 %v10793_v53  ;;  %4089 = vmax.xlane.f32.xlu0 %v10797_v11  ;;  %v4006_v15 = vpop.f32.mrf.mxu0 }
 0xb84   : > { %v4053_v6 = vmul.f32 0.17677669, %v4006_v15  ;;  %v10803_v23 = vsel %vm12275_vm2, -1e+09, %v4054_v30 }
 0xb85   : > { %v7382_v9 = vpop.f32.mrf.mxu0 }
 0xb86   : > { %v4056_v43 = vmul.f32 0.17677669, %v7382_v9  ;;  %v10807_v25 = vsel %vm2159_vm10, -1e+09, %v4053_v6 }
 0xb87   : > { %4095 = vmax.xlane.f32.xlu1 %v10803_v23  ;;  %4093 = vmax.xlane.f32.xlu0 %v10807_v25  ;;  %v4016_v40 = vpop.f32.mrf.mxu0 }
 0xb88   : > { %v4055_v63 = vmul.f32 0.17677669, %v4016_v40  ;;  %v10813_v27 = vsel %vm2162_vm13, -1e+09, %v4056_v43 }
 0xb89   : > { %v7385_v37 = vpop.f32.mrf.mxu0 }
 0xb8a   : > { %v10817_v58 = vsel %vm12279_vm3, -1e+09, %v4055_v63  ;;  %v4058_v0 = vmul.f32 0.17677669, %v7385_v37 }
 0xb8b   : > { %4099 = vmax.xlane.f32.xlu1 %v10813_v27  ;;  %4097 = vmax.xlane.f32.xlu0 %v10817_v58  ;;  %v4026_v12 = vpop.f32.mrf.mxu0 }
 0xb8c   : > { %v4057_v29 = vmul.f32 0.17677669, %v4026_v12  ;;  %v10827_v45 = vsel %vm2164_vm15, -1e+09, %v4058_v0 }
 0xb8d   : > { %v7388_v35 = vpop.f32.mrf.mxu0 }
 0xb8e   : > { %v4060_v2 = vmul.f32 0.17677669, %v7388_v35  ;;  %v10831_v8 = vsel %vm2163_vm14, -1e+09, %v4057_v29 }
 0xb8f   : > { %v4036_v52 = vpop.f32.mrf.mxu0 }
 0xb90   : > { %v4059_v33 = vmul.f32 0.17677669, %v4036_v52  ;;  %v10837_v30 = vsel %vm2166_vm12, -1e+09, %v4060_v2 }
 0xb92   : > { %v10841_v26 = vsel %vm2165_vm0, -1e+09, %v4059_v33 }
 0xb9c   : > { %4227 = vrot.lane.b32.xlu1 %v12280_v24, %s8495_s18 }
 0xba1   : > { %4225 = vrot.lane.b32.xlu0 %v12281_v7, %s8495_s18 }
 0xbc0   : > { %4103 = vmax.xlane.f32.xlu1 %v10827_v45  ;;  %4101 = vmax.xlane.f32.xlu0 %v10831_v8 }
 0xbc4   : > { %4107 = vmax.xlane.f32.xlu1 %v10837_v30  ;;  %4105 = vmax.xlane.f32.xlu0 %v10841_v26 }
 0xbfe   : > { %v4080_v15 = vpop.xlane.xlu0 %4079 }
 0xbff   : > { %v4110_v6 = vsub.f32 %v10763_v56, %v4080_v15 }
 0xc00   : > { %v4078_v9 = vpop.xlane.xlu1 %4077 }
 0xc01   : > { %v4127_v43 = vmul.f32 1.442695, %v4110_v6  ;;  %v4109_v50 = vsub.f32 %v10768_v19, %v4078_v9 }
 0xc03   : > { %7987 = vpow2.f32 %v4127_v43  ;;  %v4125_v21 = vmul.f32 1.442695, %v4109_v50 }
 0xc04   : > { %v4084_v40 = vpop.xlane.xlu1 %4083  ;;  %v4082_v63 = vpop.xlane.xlu0 %4081 }
 0xc05   : > { %7989 = vpow2.f32 %v4125_v21  ;;  %v4112_v10 = vsub.f32 %v10773_v39, %v4084_v40  ;;  %v4111_v22 = vsub.f32 %v10777_v44, %v4082_v63  ;;  %v12286_v40 = vld [vmem:[#allocation65_spill] sm:$0xff]  ;;  %v12287_v63 = vld [vmem:[#allocation64_spill] sm:$0xff] }
 0xc07   : > { %v4131_v24 = vmul.f32 1.442695, %v4112_v10  ;;  %v4129_v7 = vmul.f32 1.442695, %v4111_v22 }
 0xc08   : > { %v4088_v37 = vpop.xlane.xlu1 %4087  ;;  %v4086_v12 = vpop.xlane.xlu0 %4085 }
 0xc09   : > { %7991 = vpow2.f32 %v4131_v24  ;;  %v4114_v56 = vsub.f32 %v10783_v4, %v4088_v37  ;;  %v4113_v35 = vsub.f32 %v10787_v5, %v4086_v12 }
 0xc0a   : > { %7993 = vpow2.f32 %v4129_v7 }
 0xc0b   : > { %v4135_v19 = vmul.f32 1.442695, %v4114_v56  ;;  %v4133_v0 = vmul.f32 1.442695, %v4113_v35 }
 0xc0c   : > { %v4092_v29 = vpop.xlane.xlu1 %4091  ;;  %v4090_v52 = vpop.xlane.xlu0 %4089 }
 0xc0d   : > { %7995 = vpow2.f32 %v4135_v19  ;;  %v4116_v59 = vsub.f32 %v10793_v53, %v4092_v29  ;;  %v4115_v39 = vsub.f32 %v10797_v11, %v4090_v52 }
 0xc0e   : > { %7997 = vpow2.f32 %v4133_v0 }
 0xc0f   : > { %v4139_v44 = vmul.f32 1.442695, %v4116_v59  ;;  %v4137_v2 = vmul.f32 1.442695, %v4115_v39 }
 0xc10   : > { %v10853_v33 = vpop.eup %7987  ;;  %v4096_v32 = vpop.xlane.xlu1 %4095 }
 0xc11   : > { %v4094_v42 = vpop.xlane.xlu0 %4093  ;;  %7999 = vpow2.f32 %v4139_v44  ;;  %4159 = vadd.xlane.f32.xlu0 %v10853_v33  ;;  %v4118_v10 = vsub.f32 %v10803_v23, %v4096_v32 }
 0xc12   : > { %v10856_v4 = vpop.eup %7989  ;;  %8001 = vpow2.f32 %v4137_v2  ;;  %v4117_v22 = vsub.f32 %v10807_v25, %v4094_v42 }
 0xc13   : > { %4157 = vadd.xlane.f32.xlu1 %v10856_v4  ;;  %v4143_v24 = vmul.f32 1.442695, %v4118_v10  ;;  %v12292_v10 = vld [vmem:[#allocation41_spill] sm:$0xff] }
 0xc14   : > { %v4100_v5 = vpop.xlane.xlu1 %4099  ;;  %v4141_v37 = vmul.f32 1.442695, %v4117_v22 }
 0xc15   : > { %v4098_v46 = vpop.xlane.xlu0 %4097  ;;  %v4120_v12 = vsub.f32 %v10813_v27, %v4100_v5  ;;  %8003 = vpow2.f32 %v4143_v24 }
 0xc16   : > { %v10859_v53 = vpop.eup %7991  ;;  %v4119_v7 = vsub.f32 %v10817_v58, %v4098_v46  ;;  %8005 = vpow2.f32 %v4141_v37 }
 0xc17   : > { %v10861_v11 = vpop.eup %7993  ;;  %4163 = vadd.xlane.f32.xlu0 %v10859_v53  ;;  %v4147_v35 = vmul.f32 1.442695, %v4120_v12 }
 0xc18   : > { %4161 = vadd.xlane.f32.xlu1 %v10861_v11  ;;  %v4228_v15 = vpop.permute.xlu1 %4227  ;;  %v4145_v56 = vmul.f32 1.442695, %v4119_v7 }
 0xc19   : > { %7413 = vmatprep.subr.mxu1 %v4228_v15  ;;  %v4226_v9 = vpop.permute.xlu0 %4225 }
 0xc1a   : > { %v10865_v6 = vpop.eup %7995  ;;  %7414 = vmatpush3.msra.mxu1 %v4228_v15  ;;  %8007 = vpow2.f32 %v4145_v56  ;;  %v12288_v15 = vld [vmem:[#allocation93_spill] sm:$0xff] }
 0xc1b   : > { %v10867_v43 = vpop.eup %7997  ;;  %4167 = vadd.xlane.f32.xlu0 %v10865_v6  ;;  %7415 = vmatprep.subr.mxu1 %v4226_v9  ;;  %8009 = vpow2.f32 %v4147_v35 }
 0xc1c   : > { %4165 = vadd.xlane.f32.xlu1 %v10867_v43  ;;  %7416 = vmatpush3.msra.mxu1 %v4226_v9  ;;  %v12289_v9 = vld [vmem:[#allocation52_spill] sm:$0xff] }
 0xc1e   : > { %v10871_v50 = vpop.eup %7999 }
 0xc1f   : > { %v10873_v21 = vpop.eup %8001  ;;  %4171 = vadd.xlane.f32.xlu0 %v10871_v50 }
 0xc20   : > { %4169 = vadd.xlane.f32.xlu1 %v10873_v21 }
 0xc22   : > { %v10889_v32 = vpop.eup %8003 }
 0xc31   : > { %4221 = vrot.lane.b32.xlu1 %v12286_v40, %s8495_s18  ;;  %v12290_v40 = vpack.i.bf16 %v12288_v15, %v12289_v9 }
 0xc35   : > { %4223 = vrot.lane.b32.xlu0 %v12287_v63, %s8495_s18  ;;  %v12291_v63 = vld [vmem:[#allocation94_spill] sm:$0xff] }
 0xc36   : > { %v12293_v22 = vpack.i.bf16 %v12291_v63, %v12292_v10 }
 0xc49   : > { %v4104_v19 = vpop.xlane.xlu1 %4103  ;;  %v4102_v0 = vpop.xlane.xlu0 %4101 }
 0xc4a   : > { %v4122_v29 = vsub.f32 %v10827_v45, %v4104_v19  ;;  %v4121_v52 = vsub.f32 %v10831_v8, %v4102_v0  ;;  %v10891_v45 = vpop.eup %8005 }
 0xc4b   : > { %v10895_v8 = vpop.eup %8007 }
 0xc4c   : > { %v4151_v23 = vmul.f32 1.442695, %v4122_v29  ;;  %v4149_v25 = vmul.f32 1.442695, %v4121_v52  ;;  %v10897_v42 = vpop.eup %8009 }
 0xc4d   : > { %v4108_v59 = vpop.xlane.xlu1 %4107  ;;  %v4106_v39 = vpop.xlane.xlu0 %4105 }
 0xc4e   : > { %8011 = vpow2.f32 %v4151_v23  ;;  %v4124_v58 = vsub.f32 %v10837_v30, %v4108_v59  ;;  %v4123_v27 = vsub.f32 %v10841_v26, %v4106_v39 }
 0xc4f   : > { %8013 = vpow2.f32 %v4149_v25 }
 0xc50   : > { %v4155_v44 = vmul.f32 1.442695, %v4124_v58  ;;  %v4153_v2 = vmul.f32 1.442695, %v4123_v27 }
 0xc52   : > { %8015 = vpow2.f32 %v4155_v44 }
 0xc53   : > { %8017 = vpow2.f32 %v4153_v2 }
 0xc54   : > { %4175 = vadd.xlane.f32.xlu0 %v10889_v32 }
 0xc55   : > { %4173 = vadd.xlane.f32.xlu1 %v10891_v45 }
 0xc58   : > { %4177 = vadd.xlane.f32.xlu0 %v10895_v8 }
 0xc59   : > { %4179 = vadd.xlane.f32.xlu1 %v10897_v42 }
 0xc5b   : > { %v10901_v30 = vpop.eup %8011 }
 0xc5c   : > { %v10903_v26 = vpop.eup %8013 }
 0xc5d   : > { %4183 = vadd.xlane.f32.xlu1 %v10901_v30  ;;  %4181 = vadd.xlane.f32.xlu0 %v10903_v26 }
 0xc5f   : > { %v10907_v5 = vpop.eup %8015 }
 0xc60   : > { %v10909_v46 = vpop.eup %8017 }
 0xc61   : > { %4187 = vadd.xlane.f32.xlu1 %v10907_v5  ;;  %4185 = vadd.xlane.f32.xlu0 %v10909_v46 }
 0xc72   : > { %7681 = vrot.lane.b32.xlu1 %v7680_v36, %s8494_s4 }
 0xc77   : > { %7676 = vrot.lane.b32.xlu0 %v12290_v40, %s8495_s18 }
 0xc7b   : > { %7691 = vrot.lane.b32.xlu0 %v12293_v22, %s8495_s18 }
 0xc9a   : > { %v4160_v24 = vpop.xlane.xlu0 %4159 }
 0xc9c   : > { %v4158_v7 = vpop.xlane.xlu1 %4157 }
 0xc9d   : > { %8019 = vrcp.f32 %v4158_v7 }
 0xc9e   : > { %8021 = vrcp.f32 %v4160_v24 }
 0xca0   : > { %v4164_v37 = vpop.xlane.xlu0 %4163 }
 0xca1   : > { %v4162_v12 = vpop.xlane.xlu1 %4161 }
 0xca2   : > { %8023 = vrcp.f32 %v4162_v12 }
 0xca3   : > { %8025 = vrcp.f32 %v4164_v37 }
 0xca4   : > { %v4168_v47 = vpop.xlane.xlu0 %4167 }
 0xca5   : > { %v4166_v51 = vpop.xlane.xlu1 %4165 }
 0xca6   : > { %8027 = vrcp.f32 %v4166_v51 }
 0xca7   : > { %8029 = vrcp.f32 %v4168_v47 }
 0xca8   : > { %v4172_v36 = vpop.xlane.xlu0 %4171 }
 0xca9   : > { %v4170_v56 = vpop.xlane.xlu1 %4169 }
 0xcaa   : > { %v8020_v35 = vpop.eup %8019  ;;  %8031 = vrcp.f32 %v4170_v56 }
 0xcab   : > { %8033 = vrcp.f32 %v4172_v36  ;;  %v4190_v19 = vmul.f32 %v8020_v35, %v10856_v4  ;;  %v8022_v0 = vpop.eup %8021 }
 0xcac   : > { %v4224_v29 = vpop.permute.xlu0 %4223  ;;  %v4192_v25 = vmul.f32 %v8022_v0, %v10853_v33 }
 0xcad   : > { %7417 = vmatprep.subr.mxu1 %v4224_v29  ;;  %7421 = vmatprep.mubr.f32.mxu1 %v4190_v19  ;;  %v4222_v52 = vpop.permute.xlu1 %4221 }
 0xcae   : > { %7418 = vmatpush3.msra.mxu1 %v4224_v29  ;;  %v4671_v29 = vld [vmem:[%s8941_s16 + $0x78] sm:$0xff] }
 0xcaf   : > { %v8024_v23 = vpop.eup %8023  ;;  %7419 = vmatprep.subr.mxu1 %v4222_v52 }
 0xcb0   : > { %v8026_v59 = vpop.eup %8025  ;;  %7420 = vmatpush3.msra.mxu1 %v4222_v52  ;;  %v4194_v39 = vmul.f32 %v8024_v23, %v10861_v11  ;;  %v4670_v52 = vld [vmem:[%s8941_s16 + $0x70] sm:$0xff]  ;;  %v4665_v23 = vld [vmem:[%s8941_s16 + $0x48] sm:$0xff] }
 0xcb1   : > { %7422 = vmatmul.mubr.f32.vlgmr.msra.gmra.mxu1 %v4192_v25  ;;  %v4196_v27 = vmul.f32 %v8026_v59, %v10859_v53  ;;  %7445 = vmatprep.subr.mxu1 %v4671_v29  ;;  %v4664_v25 = vld [vmem:[%s8941_s16 + $0x40] sm:$0xff]  ;;  %v4663_v59 = vld [vmem:[%s8941_s16 + $0x38] sm:$0xff] }
 0xcb2   : > { %7424 = vmatprep.mubr.f32.mxu1 %v4194_v39  ;;  %7446 = vmatpush3.msra.mxu1 %v4671_v29  ;;  %v4662_v39 = vld [vmem:[%s8941_s16 + $0x30] sm:$0xff] }
 0xcb3   : > { %v8028_v58 = vpop.eup %8027  ;;  %7447 = vmatprep.subr.mxu1 %v4670_v52 }
 0xcb4   : > { %v8030_v4 = vpop.eup %8029  ;;  %v4198_v44 = vmul.f32 %v8028_v58, %v10867_v43  ;;  %7448 = vmatpush3.msra.mxu1 %v4670_v52  ;;  %v4661_v58 = vld [vmem:[%s8941_s16 + $0x28] sm:$0xff] }
 0xcb5   : > { %7425 = vmatmul.mubr.f32.gmra.mxu1 %v4196_v27  ;;  %v4200_v15 = vmul.f32 %v8030_v4, %v10865_v6  ;;  %v4660_v27 = vld [vmem:[%s8941_s16 + $0x20] sm:$0xff]  ;;  %v4659_v4 = vld [vmem:[%s8941_s16 + $0x18] sm:$0xff] }
 0xcb6   : > { %7427 = vmatprep.mubr.f32.mxu1 %v4198_v44  ;;  %v4658_v44 = vld [vmem:[%s8941_s16 + $0x10] sm:$0xff] }
 0xcb7   : > { %v8032_v2 = vpop.eup %8031 }
 0xcb8   : > { %v8034_v9 = vpop.eup %8033  ;;  %v4202_v33 = vmul.f32 %v8032_v2, %v10873_v21  ;;  %v4657_v2 = vld [vmem:[%s8941_s16 + $0x8] sm:$0xff] }
 0xcb9   : > { %7428 = vmatmul.mubr.f32.gmra.mxu1 %v4200_v15  ;;  %v4204_v11 = vmul.f32 %v8034_v9, %v10871_v50  ;;  %v4656_v15 = vld [vmem:[%s8941_s16] sm:$0xff] }
 0xcba   : > { %7430 = vmatprep.mubr.f32.mxu1 %v4202_v33 }
 0xcbd   : > { %7431 = vmatmul.mubr.f32.gmra.mxu1 %v4204_v11 }
 0xcdd   : > { %v4176_v40 = vpop.xlane.xlu0 %4175 }
 0xcde   : > { %v4174_v63 = vpop.xlane.xlu1 %4173  ;;  %8035 = vrcp.f32 %v4176_v40 }
 0xcdf   : > { %8037 = vrcp.f32 %v4174_v63 }
 0xce1   : > { %v4178_v53 = vpop.xlane.xlu0 %4177 }
 0xce2   : > { %v4180_v10 = vpop.xlane.xlu1 %4179  ;;  %8039 = vrcp.f32 %v4178_v53 }
 0xce3   : > { %8041 = vrcp.f32 %v4180_v10 }
 0xce6   : > { %v4184_v43 = vpop.xlane.xlu1 %4183  ;;  %v4182_v22 = vpop.xlane.xlu0 %4181 }
 0xce7   : > { %8043 = vrcp.f32 %v4184_v43 }
 0xce8   : > { %8045 = vrcp.f32 %v4182_v22 }
 0xcea   : > { %v4188_v6 = vpop.xlane.xlu1 %4187  ;;  %v4186_v24 = vpop.xlane.xlu0 %4185 }
 0xceb   : > { %v8036_v21 = vpop.eup %8035  ;;  %8047 = vrcp.f32 %v4188_v6  ;;  %v12294_v6 = vld [vmem:[#allocation40_spill] sm:$0xff] }
 0xcec   : > { %v8038_v7 = vpop.eup %8037  ;;  %8049 = vrcp.f32 %v4186_v24  ;;  %v4208_v50 = vmul.f32 %v8036_v21, %v10889_v32  ;;  %v12295_v24 = vld [vmem:[#allocation38_spill] sm:$0xff] }
 0xced   : > { %v4206_v37 = vmul.f32 %v8038_v7, %v10891_v45  ;;  %v12296_v21 = vpack.i.bf16 %v12294_v6, %v12295_v24 }
 0xcee   : > { %v7677_v29 = vpop.permute.xlu0 %7676  ;;  %v7682_v48 = vpop.permute.xlu1 %7681 }
 0xcef   : > { %v8040_v12 = vpop.eup %8039  ;;  %7433 = vmatprep.mubr.f32.mxu1 %v4206_v37  ;;  %v12297_v37 = vld [vmem:[#allocation95_spill] sm:$0xff]  ;;  %v7679_v34 = vunpack.i.h.bf16 %v7677_v29  ;;  %v7684_v52 = vunpack.i.h.bf16 %v7682_v48 }
 0xcf0   : > { %v8042_v47 = vpop.eup %8041  ;;  %7434 = vmatmul.mubr.f32.gmra.mxu1 %v4208_v50  ;;  %v4210_v51 = vmul.f32 %v8040_v12, %v10895_v8  ;;  %v12299_v28 = vpack.i.bf16 %v12297_v37, %v12298_v62  ;;  %v12303_v12 = vld [vmem:[#allocation42_spill] sm:$0xff] }
 0xcf1   : > { %v4212_v36 = vmul.f32 %v8042_v47, %v10897_v42  ;;  %v12304_v47 = vld [vmem:[#allocation43_spill] sm:$0xff] }
 0xcf2   : > { %7436 = vmatprep.mubr.f32.mxu1 %v4210_v51  ;;  %v12305_v51 = vpack.i.bf16 %v12303_v12, %v12304_v47 }
 0xcf4   : > { %v8044_v56 = vpop.eup %8043  ;;  %7437 = vmatmul.mubr.f32.gmra.mxu1 %v4212_v36 }
 0xcf5   : > { %v8046_v35 = vpop.eup %8045  ;;  %v4216_v19 = vmul.f32 %v8044_v56, %v10901_v30  ;;  %v4669_v30 = vld [vmem:[%s8941_s16 + $0x68] sm:$0xff] }
 0xcf6   : > { %v4214_v32 = vmul.f32 %v8046_v35, %v10903_v26  ;;  %v4668_v26 = vld [vmem:[%s8941_s16 + $0x60] sm:$0xff]  ;;  %7449 = vmatprep.subr.mxu1 %v4669_v30 }
 0xcf7   : > { %7450 = vmatpush3.msra.mxu1 %v4669_v30  ;;  %v7683_v30 = vunpack.i.l.bf16 %v7682_v48 }
 0xcf8   : > { %v8048_v45 = vpop.eup %8047  ;;  %7439 = vmatprep.mubr.f32.mxu1 %v4214_v32  ;;  %7451 = vmatprep.subr.mxu1 %v4668_v26  ;;  %v12307_v32 = vld [vmem:[#allocation96_spill] sm:$0xff] }
 0xcf9   : > { %v8050_v0 = vpop.eup %8049  ;;  %7440 = vmatmul.mubr.f32.gmra.mxu1 %v4216_v19  ;;  %v4220_v8 = vmul.f32 %v8048_v45, %v10907_v5  ;;  %v4667_v5 = vld [vmem:[%s8941_s16 + $0x58] sm:$0xff] }
 0xcfa   : > { %v4218_v42 = vmul.f32 %v8050_v0, %v10909_v46  ;;  %7452 = vmatpush3.msra.mxu1 %v4668_v26  ;;  %v4666_v46 = vld [vmem:[%s8941_s16 + $0x50] sm:$0xff] }
 0xcfb   : > { %7453 = vmatprep.subr.mxu1 %v4667_v5  ;;  %v12312_v26 = vld [vmem:[#allocation89_spill] sm:$0xff] }
 0xcfc   : > { %7442 = vmatprep.mubr.f32.mxu1 %v4218_v42  ;;  %7454 = vmatpush3.msra.mxu1 %v4667_v5  ;;  %v12309_v42 = vld [vmem:[#allocation97_spill] sm:$0xff]  ;;  %v4607_v5 = vsel %vm1893_vm1, %v12312_v26, %v7679_v34 }
 0xcfd   : > { %7443 = vmatmul.mubr.f32.gmra.mxu1 %v4220_v8  ;;  %7455 = vmatprep.subr.mxu1 %v4666_v46  ;;  %v12311_v1 = vpack.i.bf16 %v12309_v42, %v12310_v13  ;;  %v12318_v42 = vld [vmem:[#allocation67_spill] sm:$0xff] }
 0xcfe   : > { %7456 = vmatpush3.msra.mxu1 %v4666_v46  ;;  %v7692_v46 = vpop.permute.xlu0 %7691 }
 0xcff   : > { %7457 = vmatprep.subr.mxu1 %v4665_v23 }
 0xd00   : > { %7458 = vmatpush3.msra.mxu1 %v4665_v23  ;;  %v12313_v23 = vld [vmem:[#allocation71_spill] sm:$0xff] }
 0xd01   : > { %7459 = vmatprep.subr.mxu1 %v4664_v25 }
 0xd02   : > { %7460 = vmatpush3.msra.mxu1 %v4664_v25 }
 0xd03   : > { %7461 = vmatprep.subr.mxu1 %v4663_v59 }
 0xd04   : > { %7462 = vmatpush3.msra.mxu1 %v4663_v59 }
 0xd05   : > { %7463 = vmatprep.subr.mxu1 %v4662_v39 }
 0xd06   : > { %7464 = vmatpush3.msra.mxu1 %v4662_v39  ;;  %v7693_v39 = vunpack.i.l.bf16 %v7692_v46 }
 0xd07   : > { %7465 = vmatprep.subr.mxu1 %v4661_v58 }
 0xd08   : > { %7466 = vmatpush3.msra.mxu1 %v4661_v58 }
 0xd09   : > { %7467 = vmatprep.subr.mxu1 %v4660_v27 }
 0xd0a   : > { %7468 = vmatpush3.msra.mxu1 %v4660_v27  ;;  %v4624_v27 = vsel %vm4622_vm4, %v4607_v5, %v7684_v52 }
 0xd0b   : > { %7469 = vmatprep.subr.mxu1 %v4659_v4 }
 0xd0c   : > { %7470 = vmatpush3.msra.mxu1 %v4659_v4 }
 0xd0d   : > { %7471 = vmatprep.subr.mxu1 %v4658_v44 }
 0xd0e   : > { %7472 = vmatpush3.msra.mxu1 %v4658_v44 }
 0xd0f   : > { %7473 = vmatprep.subr.mxu1 %v4657_v2 }
 0xd10   : > { %7474 = vmatpush3.msra.mxu1 %v4657_v2 }
 0xd11   : > { %7475 = vmatprep.subr.mxu1 %v4656_v15 }
 0xd12   : > { %7476 = vmatpush3.msra.mxu1 %v4656_v15 }
 0xd71   : > { %v7423_v9 = vpop.f32.mrf.mxu1 }
 0xd73   : > { %v4335_v33 = vpop.f32.mrf.mxu1 }
 0xd74   : > { %v7685_v11 = vpack.i.bf16 %v7423_v9, %v4335_v33 }
 0xd75   : > { %v7426_v40 = vpop.f32.mrf.mxu1 }
 0xd76   : > { %7686 = vrot.lane.b32.xlu1 %v7685_v11, %s8493_s14 }
 0xd77   : > { %v4345_v63 = vpop.f32.mrf.mxu1 }
 0xd78   : > { %v7700_v53 = vpack.i.bf16 %v7426_v40, %v4345_v63  ;;  %v12314_v63 = vld [vmem:[#allocation35_spill] sm:$0xff] }
 0xd79   : > { %v7429_v10 = vpop.f32.mrf.mxu1 }
 0xd7a   : > { %7696 = vrot.lane.b32.xlu1 %v7695_v18, %s8494_s4  ;;  %7701 = vrot.lane.b32.xlu0 %v7700_v53, %s8493_s14  ;;  %v4608_v53 = vsel %vm1893_vm1, %v12314_v63, %v7693_v39 }
 0xd7b   : > { %v4355_v43 = vpop.f32.mrf.mxu1 }
 0xd7c   : > { %v7715_v7 = vpack.i.bf16 %v7429_v10, %v4355_v43  ;;  %v12315_v10 = vld [vmem:[#allocation88_spill] sm:$0xff] }
 0xd7d   : > { %v7432_v22 = vpop.f32.mrf.mxu1 }
 0xd7e   : > { %7706 = vrot.lane.b32.xlu1 %v12296_v21, %s8495_s18  ;;  %7711 = vrot.lane.b32.xlu0 %v7710_v17, %s8494_s4  ;;  %v12302_v17 = vpack.i.bf16 %v12300_v38, %v12301_v3  ;;  %v12316_v38 = vld [vmem:[#allocation63_spill] sm:$0xff] }
 0xd7f   : > { %v4365_v50 = vpop.f32.mrf.mxu1 }
 0xd80   : > { %v7730_v18 = vpack.i.bf16 %v7432_v22, %v4365_v50 }
 0xd82   : > { %7721 = vrot.lane.b32.xlu0 %v12299_v28, %s8495_s18  ;;  %7716 = vrot.lane.b32.xlu1 %v7715_v7, %s8493_s14 }
 0xd86   : > { %7726 = vrot.lane.b32.xlu1 %v7725_v16, %s8494_s4  ;;  %7731 = vrot.lane.b32.xlu0 %v7730_v18, %s8493_s14 }
 0xd8a   : > { %7736 = vrot.lane.b32.xlu1 %v12302_v17, %s8495_s18  ;;  %7741 = vrot.lane.b32.xlu0 %v7740_v14, %s8494_s4  ;;  %v12306_v14 = vld [vmem:[#allocation44_spill] sm:$0xff] }
 0xd8b   : > { %v12308_v45 = vpack.i.bf16 %v12306_v14, %v12307_v32  ;;  %v12317_v17 = vld [vmem:[#allocation60_spill] sm:$0xff] }
 0xd8e   : > { %7751 = vrot.lane.b32.xlu0 %v12305_v51, %s8495_s18 }
 0xdb0   : > { %v7435_v36 = vpop.f32.mrf.mxu1 }
 0xdb2   : > { %v4375_v49 = vpop.f32.mrf.mxu1 }
 0xdb3   : > { %v7745_v57 = vpack.i.bf16 %v7435_v36, %v4375_v49 }
 0xdb4   : > { %v7438_v16 = vpop.f32.mrf.mxu1 }
 0xdb5   : > { %7746 = vrot.lane.b32.xlu1 %v7745_v57, %s8493_s14 }
 0xdb6   : > { %v4385_v56 = vpop.f32.mrf.mxu1 }
 0xdb7   : > { %v7760_v35 = vpack.i.bf16 %v7438_v16, %v4385_v56 }
 0xdb9   : > { %v7441_v19 = vpop.f32.mrf.mxu1  ;;  %7756 = vrot.lane.b32.xlu1 %v7755_v54, %s8494_s4  ;;  %7761 = vrot.lane.b32.xlu0 %v7760_v35, %s8493_s14 }
 0xdbb   : > { %v4395_v20 = vpop.f32.mrf.mxu1 }
 0xdbc   : > { %v7775_v0 = vpack.i.bf16 %v7441_v19, %v4395_v20 }
 0xdbd   : > { %v7444_v61 = vpop.f32.mrf.mxu1  ;;  %7766 = vrot.lane.b32.xlu1 %v12308_v45, %s8495_s18  ;;  %7771 = vrot.lane.b32.xlu0 %v7770_v31, %s8494_s4  ;;  %v7678_v31 = vunpack.i.l.bf16 %v7677_v29 }
 0xdbf   : > { %v4405_v8 = vpop.f32.mrf.mxu1  ;;  %v4606_v25 = vsel %vm1893_vm1, %v12313_v23, %v7678_v31 }
 0xdc0   : > { %v7790_v54 = vpack.i.bf16 %v7444_v61, %v4405_v8  ;;  %v4623_v58 = vsel %vm4622_vm4, %v4606_v25, %v7683_v30 }
 0xdc1   : > { %7781 = vrot.lane.b32.xlu0 %v12311_v1, %s8495_s18  ;;  %7776 = vrot.lane.b32.xlu1 %v7775_v0, %s8493_s14  ;;  %v12319_v1 = vld [vmem:[#allocation66_spill] sm:$0xff] }
 0xdc5   : > { %7786 = vrot.lane.b32.xlu1 %v7785_v55, %s8494_s4  ;;  %7791 = vrot.lane.b32.xlu0 %v7790_v54, %s8493_s14  ;;  %v7694_v55 = vunpack.i.h.bf16 %v7692_v46 }
 0xdc7   : > { %v4609_v43 = vsel %vm1893_vm1, %v12315_v10, %v7694_v55 }
 0xde8   : > { %v7687_v59 = vpop.permute.xlu1 %7686 }
 0xde9   : > { %v7689_v41 = vunpack.i.h.bf16 %v7687_v59  ;;  %v7688_v60 = vunpack.i.l.bf16 %v7687_v59  ;;  %v12320_v59 = vld [vmem:[#allocation69_spill] sm:$0xff] }
 0xdeb   : > { %v4640_v4 = vsel %vm4639_vm5, %v4623_v58, %v7688_v60  ;;  %v4641_v44 = vsel %vm4639_vm5, %v4624_v27, %v7689_v41  ;;  %v12321_v60 = vld [vmem:[#allocation68_spill] sm:$0xff] }
 0xdec   : > { %v7697_v2 = vpop.permute.xlu1 %7696  ;;  %v7702_v15 = vpop.permute.xlu0 %7701  ;;  %7477 = vmatprep.mubr.f32.mxu1 %v4640_v4 }
 0xded   : > { %v7699_v9 = vunpack.i.h.bf16 %v7697_v2  ;;  %v7698_v33 = vunpack.i.l.bf16 %v7697_v2  ;;  %v7704_v11 = vunpack.i.h.bf16 %v7702_v15  ;;  %v7703_v40 = vunpack.i.l.bf16 %v7702_v15  ;;  %7478 = vmatmul.mubr.f32.vlgmr.msra.gmra.mxu1 %v4641_v44 }
 0xdef   : > { %v4625_v22 = vsel %vm4622_vm4, %v4608_v53, %v7698_v33  ;;  %v4626_v6 = vsel %vm4622_vm4, %v4609_v43, %v7699_v9 }
 0xdf0   : > { %v7707_v24 = vpop.permute.xlu1 %7706  ;;  %v7712_v21 = vpop.permute.xlu0 %7711  ;;  %v4642_v7 = vsel %vm4639_vm5, %v4625_v22, %v7703_v40  ;;  %v4643_v50 = vsel %vm4639_vm5, %v4626_v6, %v7704_v11  ;;  %v12322_v22 = vld [vmem:[#allocation48_spill] sm:$0xff] }
 0xdf1   : > { %v7709_v37 = vunpack.i.h.bf16 %v7707_v24  ;;  %v7708_v62 = vunpack.i.l.bf16 %v7707_v24  ;;  %7480 = vmatprep.mubr.f32.mxu1 %v4642_v7  ;;  %v7714_v28 = vunpack.i.h.bf16 %v7712_v21  ;;  %v7713_v18 = vunpack.i.l.bf16 %v7712_v21  ;;  %v12323_v24 = vld [vmem:[#allocation70_spill] sm:$0xff] }
 0xdf2   : > { %7481 = vmatmul.mubr.f32.gmra.mxu1 %v4643_v50 }
 0xdf3   : > { %v4610_v3 = vsel %vm1893_vm1, %v12316_v38, %v7708_v62  ;;  %v4611_v12 = vsel %vm1893_vm1, %v12317_v17, %v7709_v37 }
 0xdf4   : > { %v7717_v47 = vpop.permute.xlu1 %7716  ;;  %v7722_v51 = vpop.permute.xlu0 %7721  ;;  %v4627_v56 = vsel %vm4622_vm4, %v4610_v3, %v7713_v18  ;;  %v4628_v35 = vsel %vm4622_vm4, %v4611_v12, %v7714_v28 }
 0xdf5   : > { %v7719_v36 = vunpack.i.h.bf16 %v7717_v47  ;;  %v7718_v49 = vunpack.i.l.bf16 %v7717_v47  ;;  %v7724_v57 = vunpack.i.h.bf16 %v7722_v51  ;;  %v7723_v16 = vunpack.i.l.bf16 %v7722_v51  ;;  %v12324_v47 = vld [vmem:[#allocation90_spill] sm:$0xff] }
 0xdf7   : > { %v4644_v19 = vsel %vm4639_vm5, %v4627_v56, %v7718_v49  ;;  %v4645_v20 = vsel %vm4639_vm5, %v4628_v35, %v7719_v36  ;;  %v4612_v13 = vsel %vm1893_vm1, %v12318_v42, %v7723_v16  ;;  %v4613_v54 = vsel %vm1893_vm1, %v12319_v1, %v7724_v57  ;;  %v12325_v36 = vld [vmem:[#allocation50_spill] sm:$0xff] }
 0xdf8   : > { %v7727_v61 = vpop.permute.xlu1 %7726  ;;  %v7732_v14 = vpop.permute.xlu0 %7731  ;;  %7483 = vmatprep.mubr.f32.mxu1 %v4644_v19 }
 0xdf9   : > { %v7729_v32 = vunpack.i.h.bf16 %v7727_v61  ;;  %v7728_v45 = vunpack.i.l.bf16 %v7727_v61  ;;  %v7734_v0 = vunpack.i.h.bf16 %v7732_v14  ;;  %v7733_v8 = vunpack.i.l.bf16 %v7732_v14  ;;  %7484 = vmatmul.mubr.f32.gmra.mxu1 %v4645_v20 }
 0xdfb   : > { %v4629_v29 = vsel %vm4622_vm4, %v4612_v13, %v7728_v45  ;;  %v4630_v48 = vsel %vm4622_vm4, %v4613_v54, %v7729_v32 }
 0xdfc   : > { %v4646_v34 = vsel %vm4639_vm5, %v4629_v29, %v7733_v8  ;;  %v4647_v31 = vsel %vm4639_vm5, %v4630_v48, %v7734_v0  ;;  %v7737_v52 = vpop.permute.xlu1 %7736  ;;  %v7742_v30 = vpop.permute.xlu0 %7741  ;;  %v12326_v29 = vld [vmem:[#allocation92_spill] sm:$0xff] }
 0xdfd   : > { %7486 = vmatprep.mubr.f32.mxu1 %v4646_v34  ;;  %v7739_v26 = vunpack.i.h.bf16 %v7737_v52  ;;  %v7738_v5 = vunpack.i.l.bf16 %v7737_v52  ;;  %v7744_v46 = vunpack.i.h.bf16 %v7742_v30  ;;  %v7743_v23 = vunpack.i.l.bf16 %v7742_v30  ;;  %v12327_v34 = vld [vmem:[#allocation91_spill] sm:$0xff] }
 0xdfe   : > { %7487 = vmatmul.mubr.f32.gmra.mxu1 %v4647_v31 }
 0xdff   : > { %v4614_v41 = vsel %vm1893_vm1, %v12320_v59, %v7738_v5  ;;  %v4615_v55 = vsel %vm1893_vm1, %v12321_v60, %v7739_v26 }
 0xe00   : > { %v7752_v25 = vpop.permute.xlu0 %7751  ;;  %v4631_v2 = vsel %vm4622_vm4, %v4614_v41, %v7743_v23  ;;  %v4632_v15 = vsel %vm4622_vm4, %v4615_v55, %v7744_v46  ;;  %v11086_v46 = vld [vmem:[%s12329_s29] ss:$0 sm:$0xff] }
 0xe01   : > { %v7754_v4 = vunpack.i.h.bf16 %v7752_v25  ;;  %v7753_v44 = vunpack.i.l.bf16 %v7752_v25  ;;  %v8115_v41 = vld [vmem:[#allocation2] sm:$0xff] }
 0xe03   : > { %v4616_v6 = vsel %vm1893_vm1, %v12322_v22, %v7753_v44  ;;  %v4617_v21 = vsel %vm1893_vm1, %v12323_v24, %v7754_v4 }
 0xe27   : > { %v7747_v39 = vpop.permute.xlu1 %7746 }
 0xe28   : > { %v7749_v58 = vunpack.i.h.bf16 %v7747_v39  ;;  %v7748_v27 = vunpack.i.l.bf16 %v7747_v39  ;;  %v8116_v39 = vld [vmem:[#allocation2 + $0x30] sm:$0xff] }
 0xe2a   : > { %v4648_v9 = vsel %vm4639_vm5, %v4631_v2, %v7748_v27  ;;  %v4649_v33 = vsel %vm4639_vm5, %v4632_v15, %v7749_v58  ;;  %v8117_v2 = vld [vmem:[#allocation2 + $0x18] sm:$0xff] }
 0xe2b   : > { %v7757_v11 = vpop.permute.xlu1 %7756  ;;  %v7762_v40 = vpop.permute.xlu0 %7761  ;;  %7489 = vmatprep.mubr.f32.mxu1 %v4648_v9 }
 0xe2c   : > { %v7759_v63 = vunpack.i.h.bf16 %v7757_v11  ;;  %v7758_v53 = vunpack.i.l.bf16 %v7757_v11  ;;  %v7764_v10 = vunpack.i.h.bf16 %v7762_v40  ;;  %v7763_v43 = vunpack.i.l.bf16 %v7762_v40  ;;  %7490 = vmatmul.mubr.f32.gmra.mxu1 %v4649_v33  ;;  %v8118_v33 = vld [vmem:[#allocation2 + $0x58] sm:$0xff] }
 0xe2e   : > { %v4633_v7 = vsel %vm4622_vm4, %v4616_v6, %v7758_v53  ;;  %v4634_v50 = vsel %vm4622_vm4, %v4617_v21, %v7759_v63  ;;  %v8120_v6 = vld [vmem:[#allocation2 + $0x50] sm:$0xff] }
 0xe2f   : > { %v7767_v37 = vpop.permute.xlu1 %7766  ;;  %v7772_v62 = vpop.permute.xlu0 %7771  ;;  %v4650_v28 = vsel %vm4639_vm5, %v4633_v7, %v7763_v43  ;;  %v4651_v18 = vsel %vm4639_vm5, %v4634_v50, %v7764_v10  ;;  %v8119_v10 = vld [vmem:[#allocation2 + $0x68] sm:$0xff] }
 0xe30   : > { %v7769_v38 = vunpack.i.h.bf16 %v7767_v37  ;;  %v7768_v3 = vunpack.i.l.bf16 %v7767_v37  ;;  %7492 = vmatprep.mubr.f32.mxu1 %v4650_v28  ;;  %v7774_v17 = vunpack.i.h.bf16 %v7772_v62  ;;  %v7773_v12 = vunpack.i.l.bf16 %v7772_v62  ;;  %v8121_v37 = vld [vmem:[#allocation2 + $0x48] sm:$0xff] }
 0xe31   : > { %7493 = vmatmul.mubr.f32.gmra.mxu1 %v4651_v18  ;;  %v8122_v18 = vld [vmem:[#allocation2 + $0x8] sm:$0xff] }
 0xe32   : > { %v4618_v51 = vsel %vm1893_vm1, %v12324_v47, %v7768_v3  ;;  %v4619_v49 = vsel %vm1893_vm1, %v12325_v36, %v7769_v38  ;;  %v8123_v47 = vld [vmem:[#allocation2 + $0x20] sm:$0xff] }
 0xe33   : > { %v7777_v57 = vpop.permute.xlu1 %7776  ;;  %v7782_v16 = vpop.permute.xlu0 %7781  ;;  %v4635_v61 = vsel %vm4622_vm4, %v4618_v51, %v7773_v12  ;;  %v4636_v14 = vsel %vm4622_vm4, %v4619_v49, %v7774_v17  ;;  %v8124_v49 = vld [vmem:[#allocation2 + $0x40] sm:$0xff] }
 0xe34   : > { %v7779_v56 = vunpack.i.h.bf16 %v7777_v57  ;;  %v7778_v35 = vunpack.i.l.bf16 %v7777_v57  ;;  %v7784_v19 = vunpack.i.h.bf16 %v7782_v16  ;;  %v7783_v20 = vunpack.i.l.bf16 %v7782_v16 }
 0xe36   : > { %v4652_v32 = vsel %vm4639_vm5, %v4635_v61, %v7778_v35  ;;  %v4653_v45 = vsel %vm4639_vm5, %v4636_v14, %v7779_v56  ;;  %v4620_v48 = vsel %vm1893_vm1, %v12326_v29, %v7783_v20  ;;  %v4621_v31 = vsel %vm1893_vm1, %v12327_v34, %v7784_v19  ;;  %v8125_v19 = vld [vmem:[#allocation2 + $0x38] sm:$0xff]  ;;  %v8126_v14 = vld [vmem:[#allocation2 + $0x10] sm:$0xff] }
 0xe37   : > { %v7787_v0 = vpop.permute.xlu1 %7786  ;;  %v7792_v8 = vpop.permute.xlu0 %7791  ;;  %7495 = vmatprep.mubr.f32.mxu1 %v4652_v32 }
 0xe38   : > { %v7789_v42 = vunpack.i.h.bf16 %v7787_v0  ;;  %v7788_v13 = vunpack.i.l.bf16 %v7787_v0  ;;  %v7794_v1 = vunpack.i.h.bf16 %v7792_v8  ;;  %v7793_v54 = vunpack.i.l.bf16 %v7792_v8  ;;  %7496 = vmatmul.mubr.f32.gmra.mxu1 %v4653_v45 }
 0xe3a   : > { %v4637_v52 = vsel %vm4622_vm4, %v4620_v48, %v7788_v13  ;;  %v4638_v30 = vsel %vm4622_vm4, %v4621_v31, %v7789_v42  ;;  %v8127_v42 = vld [vmem:[#allocation2 + $0x70] sm:$0xff] }
 0xe3b   : > { %v4654_v26 = vsel %vm4639_vm5, %v4637_v52, %v7793_v54  ;;  %v4655_v5 = vsel %vm4639_vm5, %v4638_v30, %v7794_v1  ;;  %v8128_v54 = vld [vmem:[#allocation2 + $0x60] sm:$0xff]  ;;  %v8129_v52 = vld [vmem:[#allocation2 + $0x28] sm:$0xff] }
 0xe3c   : > { %7498 = vmatprep.mubr.f32.mxu1 %v4654_v26 }
 0xe3d   : > { %7499 = vmatmul.mubr.f32.gmra.mxu1 %v4655_v5  ;;  %v8130_v5 = vld [vmem:[#allocation2 + $0x78] sm:$0xff] }
 0xead   : > { %v7479_v23 = vpop.f32.mrf.mxu1 }
 0xeae   : > { %v4751_v25 = vadd.f32 %v7479_v23, %v11086_v46 }
 0xeaf   : > { %v4745_v59 = vpop.f32.mrf.mxu1 }
 0xeb0   : > { %v11089_v60 = vadd.f32 %v8115_v41, %v4751_v25  ;;  %v4746_v55 = vadd.f32 %v11086_v46, %v4745_v59  ;;  %v5094_v25 = vld [vmem:[%s8943_s25 + $0xf8] sm:$0xff]  ;;  %v5093_v59 = vld [vmem:[%s8943_s25 + $0xf0] sm:$0xff]  ;;  %v5092_v41 = vld [vmem:[%s8943_s25 + $0xe8] sm:$0xff] }
 0xeb1   : > { %5107 = vmatprep.subr.mxu0 %v5094_v25  ;;  %v5070_v25 = vld [vmem:[%s8943_s25 + $0x38] sm:$0xff] }
 0xeb2   : > { %v11092_v58 = vadd.f32 %v8116_v39, %v4746_v55  ;;  %4844 = vadd.xlane.f32.xlu0 %v11089_v60  ;;  %v7482_v27 = vpop.f32.mrf.mxu1  ;;  %v5091_v55 = vld [vmem:[%s8943_s25 + $0xe0] sm:$0xff]  ;;  %5108 = vmatpush1.msra.mxu0 %v5093_v59  ;;  %v5090_v39 = vld [vmem:[%s8943_s25 + $0xd8] sm:$0xff]  ;;  %v5069_v59 = vld [vmem:[%s8943_s25 + $0x30] sm:$0xff] }
 0xeb3   : > { %v4761_v4 = vadd.f32 %v7482_v27, %v11086_v46  ;;  %5109 = vmatprep.subr.mxu0 %v5092_v41  ;;  %v5089_v27 = vld [vmem:[%s8943_s25 + $0xd0] sm:$0xff]  ;;  %v5068_v41 = vld [vmem:[%s8943_s25 + $0x28] sm:$0xff] }
 0xeb4   : > { %v4755_v44 = vpop.f32.mrf.mxu1  ;;  %4842 = vadd.xlane.f32.xlu1 %v11092_v58  ;;  %5110 = vmatpush1.msra.mxu0 %v5091_v55  ;;  %v5067_v55 = vld [vmem:[%s8943_s25 + $0x20] sm:$0xff] }
 0xeb5   : > { %v11097_v15 = vadd.f32 %v8117_v2, %v4761_v4  ;;  %v4756_v9 = vadd.f32 %v11086_v46, %v4755_v44  ;;  %5111 = vmatprep.subr.mxu0 %v5090_v39  ;;  %v5066_v39 = vld [vmem:[%s8943_s25 + $0x18] sm:$0xff] }
 0xeb6   : > { %5112 = vmatpush1.msra.mxu0 %v5089_v27  ;;  %v5065_v27 = vld [vmem:[%s8943_s25 + $0x10] sm:$0xff] }
 0xeb7   : > { %v11100_v11 = vadd.f32 %v8118_v33, %v4756_v9 }
 0xeb8   : > { %4848 = vadd.xlane.f32.xlu1 %v11097_v15 }
 0xeb9   : > { %v7485_v40 = vpop.f32.mrf.mxu1  ;;  %4846 = vadd.xlane.f32.xlu0 %v11100_v11 }
 0xeba   : > { %v4771_v63 = vadd.f32 %v7485_v40, %v11086_v46 }
 0xebb   : > { %v4765_v53 = vpop.f32.mrf.mxu1 }
 0xebc   : > { %v11105_v43 = vadd.f32 %v8119_v10, %v4771_v63  ;;  %v4766_v22 = vadd.f32 %v11086_v46, %v4765_v53 }
 0xebe   : > { %v11108_v24 = vadd.f32 %v8120_v6, %v4766_v22  ;;  %v7488_v21 = vpop.f32.mrf.mxu1  ;;  %4852 = vadd.xlane.f32.xlu1 %v11105_v43 }
 0xebf   : > { %v4781_v7 = vadd.f32 %v7488_v21, %v11086_v46 }
 0xec0   : > { %v4775_v50 = vpop.f32.mrf.mxu1  ;;  %4850 = vadd.xlane.f32.xlu0 %v11108_v24 }
 0xec1   : > { %v11113_v62 = vadd.f32 %v8121_v37, %v4781_v7  ;;  %v4776_v28 = vadd.f32 %v11086_v46, %v4775_v50 }
 0xec3   : > { %v11116_v38 = vadd.f32 %v8122_v18, %v4776_v28  ;;  %4856 = vadd.xlane.f32.xlu1 %v11113_v62 }
 0xec5   : > { %4854 = vadd.xlane.f32.xlu0 %v11116_v38 }
 0xeec   : > { %v7491_v3 = vpop.f32.mrf.mxu1 }
 0xeed   : > { %v4791_v17 = vadd.f32 %v7491_v3, %v11086_v46 }
 0xeee   : > { %v4785_v12 = vpop.f32.mrf.mxu1 }
 0xeef   : > { %v11121_v51 = vadd.f32 %v8123_v47, %v4791_v17  ;;  %v4786_v36 = vadd.f32 %v11086_v46, %v4785_v12  ;;  %v5088_v47 = vld [vmem:[%s8943_s25 + $0xc8] sm:$0xff] }
 0xef0   : > { %5113 = vmatprep.subr.mxu0 %v5088_v47 }
 0xef1   : > { %v11124_v57 = vadd.f32 %v8124_v49, %v4786_v36  ;;  %v7494_v16 = vpop.f32.mrf.mxu1  ;;  %4860 = vadd.xlane.f32.xlu1 %v11121_v51 }
 0xef2   : > { %v4801_v56 = vadd.f32 %v7494_v16, %v11086_v46 }
 0xef3   : > { %v4795_v35 = vpop.f32.mrf.mxu1  ;;  %4858 = vadd.xlane.f32.xlu0 %v11124_v57 }
 0xef4   : > { %v11129_v20 = vadd.f32 %v8125_v19, %v4801_v56  ;;  %v4796_v61 = vadd.f32 %v11086_v46, %v4795_v35  ;;  %v5086_v56 = vld [vmem:[%s8943_s25 + $0xb8] sm:$0xff]  ;;  %v5085_v35 = vld [vmem:[%s8943_s25 + $0xb0] sm:$0xff] }
 0xef6   : > { %v11132_v32 = vadd.f32 %v8126_v14, %v4796_v61  ;;  %4864 = vadd.xlane.f32.xlu1 %v11129_v20  ;;  %v5083_v14 = vld [vmem:[%s8943_s25 + $0xa0] sm:$0xff] }
 0xef8   : > { %v7497_v45 = vpop.f32.mrf.mxu1  ;;  %4862 = vadd.xlane.f32.xlu0 %v11132_v32 }
 0xef9   : > { %v4811_v0 = vadd.f32 %v7497_v45, %v11086_v46 }
 0xefa   : > { %v4805_v8 = vpop.f32.mrf.mxu1 }
 0xefb   : > { %v11137_v13 = vadd.f32 %v8127_v42, %v4811_v0  ;;  %v4806_v1 = vadd.f32 %v11086_v46, %v4805_v8  ;;  %v5082_v0 = vld [vmem:[%s8943_s25 + $0x98] sm:$0xff]  ;;  %v5080_v8 = vld [vmem:[%s8943_s25 + $0x88] sm:$0xff]  ;;  %v5079_v42 = vld [vmem:[%s8943_s25 + $0x80] sm:$0xff] }
 0xefd   : > { %v11140_v29 = vadd.f32 %v8128_v54, %v4806_v1  ;;  %v7500_v48 = vpop.f32.mrf.mxu1  ;;  %4868 = vadd.xlane.f32.xlu1 %v11137_v13  ;;  %v5078_v1 = vld [vmem:[%s8943_s25 + $0x78] sm:$0xff]  ;;  %v5077_v54 = vld [vmem:[%s8943_s25 + $0x70] sm:$0xff] }
 0xefe   : > { %v4821_v34 = vadd.f32 %v7500_v48, %v11086_v46  ;;  %v5076_v48 = vld [vmem:[%s8943_s25 + $0x68] sm:$0xff] }
 0xeff   : > { %v4815_v31 = vpop.f32.mrf.mxu1  ;;  %4866 = vadd.xlane.f32.xlu0 %v11140_v29 }
 0xf00   : > { %v11145_v30 = vadd.f32 %v8129_v52, %v4821_v34  ;;  %v4816_v26 = vadd.f32 %v11086_v46, %v4815_v31  ;;  %v5075_v34 = vld [vmem:[%s8943_s25 + $0x60] sm:$0xff]  ;;  %v5074_v31 = vld [vmem:[%s8943_s25 + $0x58] sm:$0xff]  ;;  %v5073_v52 = vld [vmem:[%s8943_s25 + $0x50] sm:$0xff] }
 0xf02   : > { %v11148_v23 = vadd.f32 %v8130_v5, %v4816_v26  ;;  %4872 = vadd.xlane.f32.xlu1 %v11145_v30  ;;  %v5072_v26 = vld [vmem:[%s8943_s25 + $0x48] sm:$0xff]  ;;  %v5071_v5 = vld [vmem:[%s8943_s25 + $0x40] sm:$0xff] }
 0xf04   : > { %4870 = vadd.xlane.f32.xlu0 %v11148_v23 }
 0xf3b   : > { %v4845_v46 = vpop.xlane.xlu0 %4844 }
 0xf3c   : > { %v4876_v4 = vmul.f32 0.0078125, %v4845_v46  ;;  %v5064_v46 = vld [vmem:[%s8943_s25 + $0x8] sm:$0xff] }
 0xf3d   : > { %v4843_v44 = vpop.xlane.xlu1 %4842 }
 0xf3e   : > { %v11159_v2 = vsub.f32 %v11089_v60, %v4876_v4  ;;  %v4875_v9 = vmul.f32 0.0078125, %v4843_v44  ;;  %v5063_v4 = vld [vmem:[%s8943_s25] sm:$0xff]  ;;  %v8496_v44 = vmov 0.0  }
 0xf3f   : > { %5171 = vmatprep.mubr.f32.mxu0 %v8496_v44 }
 0xf40   : > { %v11162_v33 = vsub.f32 %v11092_v58, %v4875_v9  ;;  %v4908_v40 = vmul.f32 %v11159_v2, %v11159_v2 }
 0xf41   : > { %v4849_v63 = vpop.xlane.xlu1 %4848 }
 0xf42   : > { %v4878_v53 = vmul.f32 0.0078125, %v4849_v63  ;;  %v4847_v10 = vpop.xlane.xlu0 %4846  ;;  %4925 = vadd.xlane.f32.xlu1 %v4908_v40  ;;  %v4907_v22 = vmul.f32 %v11162_v33, %v11162_v33 }
 0xf43   : > { %v4877_v6 = vmul.f32 0.0078125, %v4847_v10 }
 0xf44   : > { %v11169_v21 = vsub.f32 %v11097_v15, %v4878_v53  ;;  %4923 = vadd.xlane.f32.xlu0 %v4907_v22 }
 0xf45   : > { %v11172_v60 = vsub.f32 %v11100_v11, %v4877_v6 }
 0xf46   : > { %v4910_v58 = vmul.f32 %v11169_v21, %v11169_v21 }
 0xf47   : > { %v4853_v7 = vpop.xlane.xlu1 %4852  ;;  %v4909_v50 = vmul.f32 %v11172_v60, %v11172_v60 }
 0xf48   : > { %v4880_v37 = vmul.f32 0.0078125, %v4853_v7  ;;  %4929 = vadd.xlane.f32.xlu1 %v4910_v58 }
 0xf49   : > { %v4851_v28 = vpop.xlane.xlu0 %4850  ;;  %4927 = vadd.xlane.f32.xlu0 %v4909_v50 }
 0xf4a   : > { %v11179_v15 = vsub.f32 %v11105_v43, %v4880_v37  ;;  %v4879_v18 = vmul.f32 0.0078125, %v4851_v28  ;;  %v5087_v43 = vld [vmem:[%s8943_s25 + $0xc0] sm:$0xff] }
 0xf4b   : > { %5114 = vmatpush1.msra.mxu0 %v5087_v43 }
 0xf4c   : > { %v11182_v11 = vsub.f32 %v11108_v24, %v4879_v18  ;;  %v4857_v3 = vpop.xlane.xlu1 %4856  ;;  %v4912_v17 = vmul.f32 %v11179_v15, %v11179_v15  ;;  %5115 = vmatprep.subr.mxu0 %v5086_v56 }
 0xf4d   : > { %v4882_v12 = vmul.f32 0.0078125, %v4857_v3  ;;  %5116 = vmatpush1.msra.mxu0 %v5085_v35 }
 0xf4e   : > { %v4855_v36 = vpop.xlane.xlu0 %4854  ;;  %4933 = vadd.xlane.f32.xlu1 %v4912_v17  ;;  %v4911_v49 = vmul.f32 %v11182_v11, %v11182_v11 }
 0xf4f   : > { %v11191_v16 = vsub.f32 %v11113_v62, %v4882_v12  ;;  %v4881_v24 = vmul.f32 0.0078125, %v4855_v36  ;;  %v5084_v62 = vld [vmem:[%s8943_s25 + $0xa8] sm:$0xff] }
 0xf50   : > { %4931 = vadd.xlane.f32.xlu0 %v4911_v49  ;;  %5117 = vmatprep.subr.mxu0 %v5084_v62 }
 0xf51   : > { %v11196_v19 = vsub.f32 %v11116_v38, %v4881_v24  ;;  %v4914_v61 = vmul.f32 %v11191_v16, %v11191_v16  ;;  %5118 = vmatpush1.msra.mxu0 %v5083_v14  ;;  %v5081_v38 = vld [vmem:[%s8943_s25 + $0x90] sm:$0xff] }
 0xf52   : > { %5119 = vmatprep.subr.mxu0 %v5082_v0  ;;  %v5330_v0 = vld [vmem:[%s8945_s1 + $0xf0] sm:$0xff] }
 0xf53   : > { %4937 = vadd.xlane.f32.xlu1 %v4914_v61  ;;  %v4913_v45 = vmul.f32 %v11196_v19, %v11196_v19  ;;  %5120 = vmatpush1.msra.mxu0 %v5081_v38  ;;  %v5314_v38 = vld [vmem:[%s8945_s1 + $0x70] sm:$0xff] }
 0xf54   : > { %5121 = vmatprep.subr.mxu0 %v5080_v8  ;;  %v5313_v8 = vld [vmem:[%s8945_s1 + $0x68] sm:$0xff] }
 0xf55   : > { %4935 = vadd.xlane.f32.xlu0 %v4913_v45  ;;  %5122 = vmatpush1.msra.mxu0 %v5079_v42  ;;  %v5331_v45 = vld [vmem:[%s8945_s1 + $0xf8] sm:$0xff]  ;;  %v5328_v42 = vld [vmem:[%s8945_s1 + $0xe0] sm:$0xff] }
 0xf56   : > { %5123 = vmatprep.subr.mxu0 %v5078_v1  ;;  %6709 = vmatprep.subr.mxu1 %v5331_v45  ;;  %v5312_v1 = vld [vmem:[%s8945_s1 + $0x60] sm:$0xff] }
 0xf57   : > { %5124 = vmatpush1.msra.mxu0 %v5077_v54  ;;  %v5327_v54 = vld [vmem:[%s8945_s1 + $0xd8] sm:$0xff] }
 0xf58   : > { %5125 = vmatprep.subr.mxu0 %v5076_v48  ;;  %v5311_v48 = vld [vmem:[%s8945_s1 + $0x58] sm:$0xff] }
 0xf59   : > { %5126 = vmatpush1.msra.mxu0 %v5075_v34  ;;  %v5326_v34 = vld [vmem:[%s8945_s1 + $0xd0] sm:$0xff] }
 0xf5a   : > { %5127 = vmatprep.subr.mxu0 %v5074_v31  ;;  %v5310_v31 = vld [vmem:[%s8945_s1 + $0x50] sm:$0xff] }
 0xf5b   : > { %5128 = vmatpush1.msra.mxu0 %v5073_v52 }
 0xf5c   : > { %5129 = vmatprep.subr.mxu0 %v5072_v26  ;;  %v5325_v26 = vld [vmem:[%s8945_s1 + $0xc8] sm:$0xff] }
 0xf5d   : > { %5130 = vmatpush1.msra.mxu0 %v5071_v5 }
 0xf5e   : > { %5131 = vmatprep.subr.mxu0 %v5070_v25  ;;  %v5309_v25 = vld [vmem:[%s8945_s1 + $0x48] sm:$0xff] }
 0xf5f   : > { %5132 = vmatpush1.msra.mxu0 %v5069_v59 }
 0xf60   : > { %5133 = vmatprep.subr.mxu0 %v5068_v41  ;;  %v5324_v41 = vld [vmem:[%s8945_s1 + $0xc0] sm:$0xff] }
 0xf61   : > { %5134 = vmatpush1.msra.mxu0 %v5067_v55 }
 0xf62   : > { %5135 = vmatprep.subr.mxu0 %v5066_v39 }
 0xf63   : > { %5136 = vmatpush1.msra.mxu0 %v5065_v27  ;;  %v5308_v27 = vld [vmem:[%s8945_s1 + $0x40] sm:$0xff] }
 0xf64   : > { %5137 = vmatprep.subr.mxu0 %v5064_v46  ;;  %v5323_v46 = vld [vmem:[%s8945_s1 + $0xb8] sm:$0xff] }
 0xf65   : > { %5138 = vmatpush1.msra.mxu0 %v5063_v4 }
 0xf7a   : > { %v4861_v9 = vpop.xlane.xlu1 %4860 }
 0xf7b   : > { %v4884_v40 = vmul.f32 0.0078125, %v4861_v9  ;;  %v5307_v9 = vld [vmem:[%s8945_s1 + $0x38] sm:$0xff] }
 0xf7c   : > { %v4859_v63 = vpop.xlane.xlu0 %4858 }
 0xf7d   : > { %v11226_v53 = vsub.f32 %v11121_v51, %v4884_v40  ;;  %v4883_v10 = vmul.f32 0.0078125, %v4859_v63  ;;  %v5322_v63 = vld [vmem:[%s8945_s1 + $0xb0] sm:$0xff] }
 0xf7f   : > { %v11229_v22 = vsub.f32 %v11124_v57, %v4883_v10  ;;  %v4865_v6 = vpop.xlane.xlu1 %4864  ;;  %v4916_v58 = vmul.f32 %v11226_v53, %v11226_v53 }
 0xf80   : > { %v4886_v7 = vmul.f32 0.0078125, %v4865_v6 }
 0xf81   : > { %v4863_v50 = vpop.xlane.xlu0 %4862  ;;  %4941 = vadd.xlane.f32.xlu1 %v4916_v58  ;;  %v4915_v37 = vmul.f32 %v11229_v22, %v11229_v22  ;;  %v5306_v58 = vld [vmem:[%s8945_s1 + $0x30] sm:$0xff] }
 0xf82   : > { %v11236_v28 = vsub.f32 %v11129_v20, %v4886_v7  ;;  %v4885_v18 = vmul.f32 0.0078125, %v4863_v50  ;;  %v5321_v50 = vld [vmem:[%s8945_s1 + $0xa8] sm:$0xff] }
 0xf83   : > { %4939 = vadd.xlane.f32.xlu0 %v4915_v37 }
 0xf84   : > { %v11239_v51 = vsub.f32 %v11132_v32, %v4885_v18  ;;  %v4918_v57 = vmul.f32 %v11236_v28, %v11236_v28  ;;  %v5305_v18 = vld [vmem:[%s8945_s1 + $0x28] sm:$0xff] }
 0xf86   : > { %4945 = vadd.xlane.f32.xlu1 %v4918_v57  ;;  %v4869_v3 = vpop.xlane.xlu1 %4868  ;;  %v4917_v17 = vmul.f32 %v11239_v51, %v11239_v51 }
 0xf87   : > { %v4888_v12 = vmul.f32 0.0078125, %v4869_v3  ;;  %v5320_v3 = vld [vmem:[%s8945_s1 + $0xa0] sm:$0xff] }
 0xf88   : > { %v4867_v47 = vpop.xlane.xlu0 %4866  ;;  %4943 = vadd.xlane.f32.xlu0 %v4917_v17  ;;  %v5304_v17 = vld [vmem:[%s8945_s1 + $0x20] sm:$0xff] }
 0xf89   : > { %v11246_v36 = vsub.f32 %v11137_v13, %v4888_v12  ;;  %v4887_v20 = vmul.f32 0.0078125, %v4867_v47 }
 0xf8b   : > { %v11249_v49 = vsub.f32 %v11140_v29, %v4887_v20  ;;  %v4873_v32 = vpop.xlane.xlu1 %4872  ;;  %v4920_v43 = vmul.f32 %v11246_v36, %v11246_v36 }
 0xf8c   : > { %v4890_v24 = vmul.f32 0.0078125, %v4873_v32 }
 0xf8d   : > { %v4871_v56 = vpop.xlane.xlu0 %4870  ;;  %4949 = vadd.xlane.f32.xlu1 %v4920_v43  ;;  %v4919_v13 = vmul.f32 %v11249_v49, %v11249_v49 }
 0xf8e   : > { %v11256_v35 = vsub.f32 %v11145_v30, %v4890_v24  ;;  %v4889_v29 = vmul.f32 0.0078125, %v4871_v56  ;;  %v5315_v30 = vld [vmem:[%s8945_s1 + $0x78] sm:$0xff] }
 0xf8f   : > { %4947 = vadd.xlane.f32.xlu0 %v4919_v13  ;;  %6710 = vmatpush3.msra.mxu1 %v5315_v30 }
 0xf90   : > { %v11259_v61 = vsub.f32 %v11148_v23, %v4889_v29  ;;  %v4922_v62 = vmul.f32 %v11256_v35, %v11256_v35  ;;  %v5329_v23 = vld [vmem:[%s8945_s1 + $0xe8] sm:$0xff]  ;;  %6711 = vmatprep.subr.mxu1 %v5330_v0 }
 0xf91   : > { %6712 = vmatpush3.msra.mxu1 %v5314_v38 }
 0xf92   : > { %4953 = vadd.xlane.f32.xlu1 %v4922_v62  ;;  %v4921_v14 = vmul.f32 %v11259_v61, %v11259_v61  ;;  %6713 = vmatprep.subr.mxu1 %v5329_v23  ;;  %v11296_v23 = vld [vmem:[%s12331_s12] ss:$0 sm:$0xff] }
 0xf93   : > { %6714 = vmatpush3.msra.mxu1 %v5313_v8 }
 0xf94   : > { %4951 = vadd.xlane.f32.xlu0 %v4921_v14  ;;  %6715 = vmatprep.subr.mxu1 %v5328_v42  ;;  %v11304_v42 = vld [vmem:[%s1066_s20] ss:$0 sm:$0xff] }
 0xf95   : > { %6716 = vmatpush3.msra.mxu1 %v5312_v1 }
 0xf96   : > { %6717 = vmatprep.subr.mxu1 %v5327_v54 }
 0xf97   : > { %6718 = vmatpush3.msra.mxu1 %v5311_v48 }
 0xf98   : > { %6719 = vmatprep.subr.mxu1 %v5326_v34 }
 0xf99   : > { %6720 = vmatpush3.msra.mxu1 %v5310_v31 }
 0xf9a   : > { %6721 = vmatprep.subr.mxu1 %v5325_v26 }
 0xf9b   : > { %6722 = vmatpush3.msra.mxu1 %v5309_v25 }
 0xf9c   : > { %6723 = vmatprep.subr.mxu1 %v5324_v41 }
 0xf9d   : > { %6724 = vmatpush3.msra.mxu1 %v5308_v27 }
 0xf9e   : > { %6725 = vmatprep.subr.mxu1 %v5323_v46 }
 0xf9f   : > { %6726 = vmatpush3.msra.mxu1 %v5307_v9 }
 0xfa0   : > { %6727 = vmatprep.subr.mxu1 %v5322_v63 }
 0xfa1   : > { %6728 = vmatpush3.msra.mxu1 %v5306_v58 }
 0xfa2   : > { %6729 = vmatprep.subr.mxu1 %v5321_v50 }
 0xfa3   : > { %6730 = vmatpush3.msra.mxu1 %v5305_v18 }
 0xfa4   : > { %6731 = vmatprep.subr.mxu1 %v5320_v3 }
 0xfa5   : > { %6732 = vmatpush3.msra.mxu1 %v5304_v17 }
 0xfcb   : > { %v4926_v52 = vpop.xlane.xlu1 %4925 }
 0xfcc   : > { %v4956_v5 = vmul.f32 0.0078125, %v4926_v52 }
 0xfcd   : > { %v4924_v59 = vpop.xlane.xlu0 %4923 }
 0xfce   : > { %v4972_v55 = vadd.f32 1e-05, %v4956_v5  ;;  %v4955_v39 = vmul.f32 0.0078125, %v4924_v59 }
 0xfd0   : > { %8051 = vrsqrt.f32 %v4972_v55  ;;  %v4971_v4 = vadd.f32 1e-05, %v4955_v39 }
 0xfd1   : > { %v4930_v40 = vpop.xlane.xlu1 %4929 }
 0xfd2   : > { %8053 = vrsqrt.f32 %v4971_v4  ;;  %v4958_v10 = vmul.f32 0.0078125, %v4930_v40  ;;  %v4928_v6 = vpop.xlane.xlu0 %4927 }
 0xfd3   : > { %v4957_v7 = vmul.f32 0.0078125, %v4928_v6 }
 0xfd4   : > { %v4974_v37 = vadd.f32 1e-05, %v4958_v10 }
 0xfd5   : > { %v4973_v57 = vadd.f32 1e-05, %v4957_v7 }
 0xfd7   : > { %8055 = vrsqrt.f32 %v4973_v57  ;;  %v4934_v12 = vpop.xlane.xlu1 %4933 }
 0xfd8   : > { %8057 = vrsqrt.f32 %v4974_v37  ;;  %v4960_v47 = vmul.f32 0.0078125, %v4934_v12 }
 0xfd9   : > { %v4932_v20 = vpop.xlane.xlu0 %4931 }
 0xfda   : > { %v4959_v32 = vmul.f32 0.0078125, %v4932_v20  ;;  %v4976_v43 = vadd.f32 1e-05, %v4960_v47 }
 0xfdc   : > { %v4975_v24 = vadd.f32 1e-05, %v4959_v32  ;;  %v4938_v13 = vpop.xlane.xlu1 %4937 }
 0xfdd   : > { %v8052_v56 = vpop.eup %8051  ;;  %v4962_v30 = vmul.f32 0.0078125, %v4938_v13 }
 0xfde   : > { %8059 = vrsqrt.f32 %v4975_v24  ;;  %v4936_v29 = vpop.xlane.xlu0 %4935  ;;  %v5004_v0 = vmul.f32 %v8052_v56, %v11159_v2 }
 0xfdf   : > { %v8054_v62 = vpop.eup %8053  ;;  %v4961_v14 = vmul.f32 0.0078125, %v4936_v29  ;;  %8061 = vrsqrt.f32 %v4976_v43  ;;  %v4978_v1 = vadd.f32 1e-05, %v4962_v30 }
 0xfe0   : > { %v5003_v45 = vmul.f32 %v8054_v62, %v11162_v33  ;;  %v5026_v54 = vmul.f32 %v11296_v23, %v5004_v0 }
 0xfe1   : > { %v4977_v38 = vadd.f32 1e-05, %v4961_v14 }
 0xfe2   : > { %v5025_v8 = vmul.f32 %v11296_v23, %v5003_v45  ;;  %v11314_v31 = vadd.f32 %v11304_v42, %v5026_v54 }
 0xfe3   : > { %8063 = vrsqrt.f32 %v4977_v38 }
 0xfe4   : > { %v8056_v33 = vpop.eup %8055  ;;  %v11307_v2 = vadd.f32 %v11304_v42, %v5025_v8  ;;  %8065 = vrsqrt.f32 %v4978_v1 }
 0xfe5   : > { %v8058_v48 = vpop.eup %8057  ;;  %v5005_v34 = vmul.f32 %v8056_v33, %v11172_v60 }
 0xfe6   : > { %5172 = vmatmul.mubr.f32.vlgmr.msra.gmra.mxu0 %v11307_v2  ;;  %v5006_v26 = vmul.f32 %v8058_v48, %v11169_v21 }
 0xfe7   : > { %5177 = vmatprep.mubr.f32.mxu0 %v8496_v44  ;;  %v5027_v52 = vmul.f32 %v11296_v23, %v5005_v34 }
 0xfe8   : > { %v5028_v60 = vmul.f32 %v11296_v23, %v5006_v26 }
 0xfe9   : > { %v11321_v25 = vadd.f32 %v11304_v42, %v5027_v52 }
 0xfea   : > { %5178 = vmatmul.mubr.f32.gmra.mxu0 %v11314_v31  ;;  %v11328_v55 = vadd.f32 %v11304_v42, %v5028_v60 }
 0xfeb   : > { %v8060_v5 = vpop.eup %8059  ;;  %5183 = vmatprep.mubr.f32.mxu0 %v8496_v44 }
 0xfec   : > { %v5007_v59 = vmul.f32 %v8060_v5, %v11182_v11  ;;  %v8062_v41 = vpop.eup %8061 }
 0xfed   : > { %v5008_v39 = vmul.f32 %v8062_v41, %v11179_v15  ;;  %v5319_v41 = vld [vmem:[%s8945_s1 + $0x98] sm:$0xff] }
 0xfee   : > { %5184 = vmatmul.mubr.f32.gmra.mxu0 %v11321_v25  ;;  %v5029_v21 = vmul.f32 %v11296_v23, %v5007_v59  ;;  %6733 = vmatprep.subr.mxu1 %v5319_v41 }
 0xfef   : > { %5189 = vmatprep.mubr.f32.mxu0 %v8496_v44  ;;  %v5030_v11 = vmul.f32 %v11296_v23, %v5008_v39 }
 0xff0   : > { %v8064_v27 = vpop.eup %8063  ;;  %v11335_v46 = vadd.f32 %v11304_v42, %v5029_v21  ;;  %v5303_v21 = vld [vmem:[%s8945_s1 + $0x18] sm:$0xff] }
 0xff1   : > { %v5009_v4 = vmul.f32 %v8064_v27, %v11196_v19  ;;  %v8066_v9 = vpop.eup %8065  ;;  %v11342_v40 = vadd.f32 %v11304_v42, %v5030_v11  ;;  %6734 = vmatpush3.msra.mxu1 %v5303_v21  ;;  %v5302_v27 = vld [vmem:[%s8945_s1 + $0x10] sm:$0xff] }
 0xff2   : > { %5190 = vmatmul.mubr.f32.gmra.mxu0 %v11328_v55  ;;  %v5010_v63 = vmul.f32 %v8066_v9, %v11191_v16  ;;  %v5317_v9 = vld [vmem:[%s8945_s1 + $0x88] sm:$0xff] }
 0xff3   : > { %5195 = vmatprep.mubr.f32.mxu0 %v8496_v44  ;;  %v5031_v15 = vmul.f32 %v11296_v23, %v5009_v4 }
 0xff4   : > { %v5032_v19 = vmul.f32 %v11296_v23, %v5010_v63  ;;  %v5301_v63 = vld [vmem:[%s8945_s1 + $0x8] sm:$0xff] }
 0xff5   : > { %v11349_v10 = vadd.f32 %v11304_v42, %v5031_v15 }
 0xff6   : > { %5196 = vmatmul.mubr.f32.gmra.mxu0 %v11335_v46  ;;  %v11355_v6 = vadd.f32 %v11304_v42, %v5032_v19  ;;  %v5316_v19 = vld [vmem:[%s8945_s1 + $0x80] sm:$0xff] }
 0xff7   : > { %5201 = vmatprep.mubr.f32.mxu0 %v8496_v44 }
 0xffa   : > { %5202 = vmatmul.mubr.f32.gmra.mxu0 %v11342_v40 }
 0xffb   : > { %5207 = vmatprep.mubr.f32.mxu0 %v8496_v44 }
 0xffe   : > { %5208 = vmatmul.mubr.f32.gmra.mxu0 %v11349_v10 }
 0xfff   : > { %5213 = vmatprep.mubr.f32.mxu0 %v8496_v44 }
0x1002   : > { %5214 = vmatmul.mubr.f32.gmra.mxu0 %v11355_v6 }
0x1003   : > { %5219 = vmatprep.mubr.f32.mxu0 %v8496_v44 }
0x100a   : > { %v4942_v16 = vpop.xlane.xlu1 %4941 }
0x100b   : > { %v4964_v58 = vmul.f32 0.0078125, %v4942_v16  ;;  %v5300_v16 = vld [vmem:[%s8945_s1] sm:$0xff] }
0x100c   : > { %v4940_v7 = vpop.xlane.xlu0 %4939 }
0x100d   : > { %v4980_v50 = vadd.f32 1e-05, %v4964_v58  ;;  %v4963_v37 = vmul.f32 0.0078125, %v4940_v7 }
0x100f   : > { %8067 = vrsqrt.f32 %v4980_v50  ;;  %v4979_v18 = vadd.f32 1e-05, %v4963_v37  ;;  %v4946_v57 = vpop.xlane.xlu1 %4945 }
0x1010   : > { %v4966_v3 = vmul.f32 0.0078125, %v4946_v57 }
0x1011   : > { %8069 = vrsqrt.f32 %v4979_v18  ;;  %v4944_v17 = vpop.xlane.xlu0 %4943 }
0x1012   : > { %v4965_v12 = vmul.f32 0.0078125, %v4944_v17  ;;  %v4982_v47 = vadd.f32 1e-05, %v4966_v3 }
0x1014   : > { %v4981_v20 = vadd.f32 1e-05, %v4965_v12 }
0x1016   : > { %8071 = vrsqrt.f32 %v4981_v20  ;;  %v4950_v32 = vpop.xlane.xlu1 %4949 }
0x1017   : > { %8073 = vrsqrt.f32 %v4982_v47  ;;  %v4968_v43 = vmul.f32 0.0078125, %v4950_v32  ;;  %v5097_v32 = vlaneseq }
0x1018   : > { %v4948_v24 = vpop.xlane.xlu0 %4947 }
0x1019   : > { %v4967_v56 = vmul.f32 0.0078125, %v4948_v24  ;;  %v4984_v13 = vadd.f32 1e-05, %v4968_v43  ;;  %v5095_v24 = vld [vmem:[%s8927_s2] sm:$0x3] }
0x101b   : > { %v4983_v29 = vadd.f32 1e-05, %v4967_v56  ;;  %v4954_v14 = vpop.xlane.xlu1 %4953 }
0x101c   : > { %v8068_v62 = vpop.eup %8067  ;;  %v4970_v38 = vmul.f32 0.0078125, %v4954_v14 }
0x101d   : > { %8075 = vrsqrt.f32 %v4983_v29  ;;  %v4952_v45 = vpop.xlane.xlu0 %4951  ;;  %v5012_v33 = vmul.f32 %v8068_v62, %v11226_v53 }
0x101e   : > { %v8070_v30 = vpop.eup %8069  ;;  %v4969_v0 = vmul.f32 0.0078125, %v4952_v45  ;;  %8077 = vrsqrt.f32 %v4984_v13  ;;  %v4986_v34 = vadd.f32 1e-05, %v4970_v38 }
0x101f   : > { %v5011_v8 = vmul.f32 %v8070_v30, %v11229_v22  ;;  %v5034_v26 = vmul.f32 %v11296_v23, %v5012_v33 }
0x1020   : > { %v4985_v1 = vadd.f32 1e-05, %v4969_v0 }
0x1021   : > { %v5033_v54 = vmul.f32 %v11296_v23, %v5011_v8  ;;  %v11370_v53 = vadd.f32 %v11304_v42, %v5034_v26 }
0x1022   : > { %8079 = vrsqrt.f32 %v4985_v1 }
0x1023   : > { %v8072_v48 = vpop.eup %8071  ;;  %v11363_v52 = vadd.f32 %v11304_v42, %v5033_v54  ;;  %8081 = vrsqrt.f32 %v4986_v34 }
0x1024   : > { %v8074_v5 = vpop.eup %8073  ;;  %v5013_v60 = vmul.f32 %v8072_v48, %v11239_v51  ;;  %v5318_v51 = vld [vmem:[%s8945_s1 + $0x90] sm:$0xff] }
0x1025   : > { %5220 = vmatmul.mubr.f32.gmra.mxu0 %v11363_v52  ;;  %v5014_v59 = vmul.f32 %v8074_v5, %v11236_v28  ;;  %6735 = vmatprep.subr.mxu1 %v5318_v51 }
0x1026   : > { %5225 = vmatprep.mubr.f32.mxu0 %v8496_v44  ;;  %v5035_v22 = vmul.f32 %v11296_v23, %v5013_v60  ;;  %6736 = vmatpush3.msra.mxu1 %v5302_v27 }
0x1027   : > { %v5036_v28 = vmul.f32 %v11296_v23, %v5014_v59  ;;  %6737 = vmatprep.subr.mxu1 %v5317_v9 }
0x1028   : > { %v11381_v11 = vadd.f32 %v11304_v42, %v5035_v22  ;;  %6738 = vmatpush3.msra.mxu1 %v5301_v63 }
0x1029   : > { %5226 = vmatmul.mubr.f32.gmra.mxu0 %v11370_v53  ;;  %6739 = vmatprep.subr.mxu1 %v5316_v19  ;;  %v11392_v58 = vadd.f32 %v11304_v42, %v5036_v28 }
0x102a   : > { %v8076_v39 = vpop.eup %8075  ;;  %5231 = vmatprep.mubr.f32.mxu0 %v8496_v44  ;;  %6740 = vmatpush3.msra.mxu1 %v5300_v16 }
0x102b   : > { %v5015_v4 = vmul.f32 %v8076_v39, %v11249_v49  ;;  %v8078_v15 = vpop.eup %8077 }
0x102c   : > { %v5016_v49 = vmul.f32 %v8078_v15, %v11246_v36 }
0x102d   : > { %5232 = vmatmul.mubr.f32.gmra.mxu0 %v11381_v11  ;;  %v5037_v7 = vmul.f32 %v11296_v23, %v5015_v4 }
0x102e   : > { %5237 = vmatprep.mubr.f32.mxu0 %v8496_v44  ;;  %v5038_v18 = vmul.f32 %v11296_v23, %v5016_v49 }
0x102f   : > { %v8080_v50 = vpop.eup %8079  ;;  %v11399_v37 = vadd.f32 %v11304_v42, %v5037_v7 }
0x1030   : > { %v5017_v57 = vmul.f32 %v8080_v50, %v11259_v61  ;;  %v8082_v3 = vpop.eup %8081  ;;  %v11406_v36 = vadd.f32 %v11304_v42, %v5038_v18 }
0x1031   : > { %5238 = vmatmul.mubr.f32.gmra.mxu0 %v11392_v58  ;;  %v5018_v12 = vmul.f32 %v8082_v3, %v11256_v35  ;;  %v5098_v35 = vshrl.u32 %v5097_v32, 7 }
0x1032   : > { %5243 = vmatprep.mubr.f32.mxu0 %v8496_v44  ;;  %v5039_v17 = vmul.f32 %v11296_v23, %v5017_v57 }
0x1033   : > { %v5040_v61 = vmul.f32 %v11296_v23, %v5018_v12  ;;  %v5099_v43 = vsub.s32 0, %v5098_v35  ;;  %v5103_v56 = vsub.s32 1, %v5098_v35 }
0x1034   : > { %v11413_v47 = vadd.f32 %v11304_v42, %v5039_v17 }
0x1035   : > { %5244 = vmatmul.mubr.f32.gmra.mxu0 %v11399_v37  ;;  %v11419_v20 = vadd.f32 %v11304_v42, %v5040_v61  ;;  %v11423_v13 = vrot.slane %v5095_v24, %v5099_v43  ;;  %v11425_v29 = vrot.slane %v5095_v24, %v5103_v56 }
0x1036   : > { %5249 = vmatprep.mubr.f32.mxu0 %v8496_v44 }
0x1039   : > { %5250 = vmatmul.mubr.f32.gmra.mxu0 %v11406_v36 }
0x103a   : > { %5255 = vmatprep.mubr.f32.mxu0 %v8496_v44 }
0x103d   : > { %5256 = vmatmul.mubr.f32.gmra.mxu0 %v11413_v47 }
0x103e   : > { %5261 = vmatprep.mubr.f32.mxu0 %v8496_v44 }
0x1041   : > { %5262 = vmatmul.mubr.f32.gmra.mxu0 %v11419_v20 }
0x10a6   : > { %v5173_v62 = vpop.f32.mrf.mxu0 }
0x10a7   : > { %v5174_v23 = vadd.f32 %v5173_v62, %v11423_v13 }
0x10a8   : > { %v5175_v14 = vpop.f32.mrf.mxu0 }
0x10a9   : > { %v5176_v44 = vadd.f32 %v5175_v14, %v11425_v29  ;;  %v5268_v30 = vmax.f32 %v5174_v23, 0.0 }
0x10aa   : > { %v5179_v45 = vpop.f32.mrf.mxu0 }
0x10ab   : > { %v5269_v42 = vmax.f32 %v5176_v44, 0.0  ;;  %v5180_v0 = vadd.f32 %v5179_v45, %v11423_v13 }
0x10ac   : > { %v5181_v38 = vpop.f32.mrf.mxu0 }
0x10ad   : > { %v5182_v8 = vadd.f32 %v5181_v38, %v11425_v29  ;;  %5403 = vmatprep.mubr.f32.mxu1 %v5269_v42  ;;  %v5270_v54 = vmax.f32 %v5180_v0, 0.0 }
0x10ae   : > { %v5185_v33 = vpop.f32.mrf.mxu0  ;;  %5404 = vmatmul.mubr.f32.vlgmr.msra.gmra.mxu1 %v5268_v30 }
0x10af   : > { %v5271_v1 = vmax.f32 %v5182_v8, 0.0  ;;  %v5186_v48 = vadd.f32 %v5185_v33, %v11423_v13 }
0x10b0   : > { %v5187_v34 = vpop.f32.mrf.mxu0 }
0x10b1   : > { %v5188_v26 = vadd.f32 %v5187_v34, %v11425_v29  ;;  %5408 = vmatprep.mubr.f32.mxu1 %v5271_v1  ;;  %v5272_v22 = vmax.f32 %v5186_v48, 0.0 }
0x10b2   : > { %v5191_v5 = vpop.f32.mrf.mxu0  ;;  %5409 = vmatmul.mubr.f32.gmra.mxu1 %v5270_v54 }
0x10b3   : > { %v5273_v60 = vmax.f32 %v5188_v26, 0.0  ;;  %v5192_v59 = vadd.f32 %v5191_v5, %v11423_v13 }
0x10b4   : > { %v5193_v41 = vpop.f32.mrf.mxu0 }
0x10b5   : > { %v5194_v21 = vadd.f32 %v5193_v41, %v11425_v29  ;;  %5413 = vmatprep.mubr.f32.mxu1 %v5273_v60  ;;  %v5274_v27 = vmax.f32 %v5192_v59, 0.0 }
0x10b6   : > { %v5197_v51 = vpop.f32.mrf.mxu0  ;;  %5414 = vmatmul.mubr.f32.gmra.mxu1 %v5272_v22 }
0x10b7   : > { %v5275_v39 = vmax.f32 %v5194_v21, 0.0  ;;  %v5198_v28 = vadd.f32 %v5197_v51, %v11423_v13 }
0x10b8   : > { %v5199_v4 = vpop.f32.mrf.mxu0 }
0x10b9   : > { %v5200_v9 = vadd.f32 %v5199_v4, %v11425_v29  ;;  %5418 = vmatprep.mubr.f32.mxu1 %v5275_v39  ;;  %v5276_v19 = vmax.f32 %v5198_v28, 0.0 }
0x10ba   : > { %v5203_v15 = vpop.f32.mrf.mxu0  ;;  %5419 = vmatmul.mubr.f32.gmra.mxu1 %v5274_v27 }
0x10bb   : > { %v5277_v63 = vmax.f32 %v5200_v9, 0.0  ;;  %v5204_v16 = vadd.f32 %v5203_v15, %v11423_v13 }
0x10bc   : > { %v5205_v7 = vpop.f32.mrf.mxu0 }
0x10bd   : > { %v5206_v49 = vadd.f32 %v5205_v7, %v11425_v29  ;;  %5423 = vmatprep.mubr.f32.mxu1 %v5277_v63  ;;  %v5278_v57 = vmax.f32 %v5204_v16, 0.0 }
0x10be   : > { %v5209_v50 = vpop.f32.mrf.mxu0  ;;  %5424 = vmatmul.mubr.f32.gmra.mxu1 %v5276_v19 }
0x10bf   : > { %v5279_v18 = vmax.f32 %v5206_v49, 0.0  ;;  %v5210_v3 = vadd.f32 %v5209_v50, %v11423_v13 }
0x10c0   : > { %v5211_v17 = vpop.f32.mrf.mxu0 }
0x10c1   : > { %v5212_v12 = vadd.f32 %v5211_v17, %v11425_v29  ;;  %5428 = vmatprep.mubr.f32.mxu1 %v5279_v18  ;;  %v5280_v35 = vmax.f32 %v5210_v3, 0.0 }
0x10c2   : > { %v5215_v61 = vpop.f32.mrf.mxu0  ;;  %5429 = vmatmul.mubr.f32.gmra.mxu1 %v5278_v57 }
0x10c3   : > { %v5281_v32 = vmax.f32 %v5212_v12, 0.0  ;;  %v5216_v43 = vadd.f32 %v5215_v61, %v11423_v13 }
0x10c4   : > { %v5217_v24 = vpop.f32.mrf.mxu0 }
0x10c5   : > { %v5218_v56 = vadd.f32 %v5217_v24, %v11425_v29  ;;  %5433 = vmatprep.mubr.f32.mxu1 %v5281_v32  ;;  %v5282_v23 = vmax.f32 %v5216_v43, 0.0 }
0x10c6   : > { %5434 = vmatmul.mubr.f32.gmra.mxu1 %v5280_v35 }
0x10c7   : > { %v5283_v62 = vmax.f32 %v5218_v56, 0.0 }
0x10c9   : > { %5438 = vmatprep.mubr.f32.mxu1 %v5283_v62 }
0x10ca   : > { %5439 = vmatmul.mubr.f32.gmra.mxu1 %v5282_v23 }
0x10e5   : > { %v5221_v14 = vpop.f32.mrf.mxu0 }
0x10e6   : > { %v5222_v44 = vadd.f32 %v5221_v14, %v11423_v13 }
0x10e7   : > { %v5223_v45 = vpop.f32.mrf.mxu0 }
0x10e8   : > { %v5224_v42 = vadd.f32 %v5223_v45, %v11425_v29  ;;  %v5284_v38 = vmax.f32 %v5222_v44, 0.0 }
0x10e9   : > { %v5227_v30 = vpop.f32.mrf.mxu0 }
0x10ea   : > { %v5285_v0 = vmax.f32 %v5224_v42, 0.0  ;;  %v5228_v8 = vadd.f32 %v5227_v30, %v11423_v13  ;;  %v11464_v42 = vld [vmem:[%s1073_s0] ss:$0 sm:$0xff] }
0x10eb   : > { %v5229_v33 = vpop.f32.mrf.mxu0 }
0x10ec   : > { %v5230_v1 = vadd.f32 %v5229_v33, %v11425_v29  ;;  %5443 = vmatprep.mubr.f32.mxu1 %v5285_v0  ;;  %v5286_v34 = vmax.f32 %v5228_v8, 0.0 }
0x10ed   : > { %v5233_v54 = vpop.f32.mrf.mxu0  ;;  %5444 = vmatmul.mubr.f32.gmra.mxu1 %v5284_v38 }
0x10ee   : > { %v5287_v48 = vmax.f32 %v5230_v1, 0.0  ;;  %v5234_v26 = vadd.f32 %v5233_v54, %v11423_v13 }
0x10ef   : > { %v5235_v5 = vpop.f32.mrf.mxu0 }
0x10f0   : > { %v5236_v60 = vadd.f32 %v5235_v5, %v11425_v29  ;;  %5448 = vmatprep.mubr.f32.mxu1 %v5287_v48  ;;  %v5288_v41 = vmax.f32 %v5234_v26, 0.0 }
0x10f1   : > { %v5239_v22 = vpop.f32.mrf.mxu0  ;;  %5449 = vmatmul.mubr.f32.gmra.mxu1 %v5286_v34 }
0x10f2   : > { %v5289_v59 = vmax.f32 %v5236_v60, 0.0  ;;  %v5240_v21 = vadd.f32 %v5239_v22, %v11423_v13 }
0x10f3   : > { %v5241_v51 = vpop.f32.mrf.mxu0 }
0x10f4   : > { %v5242_v39 = vadd.f32 %v5241_v51, %v11425_v29  ;;  %5453 = vmatprep.mubr.f32.mxu1 %v5289_v59  ;;  %v5290_v4 = vmax.f32 %v5240_v21, 0.0 }
0x10f5   : > { %v5245_v27 = vpop.f32.mrf.mxu0  ;;  %5454 = vmatmul.mubr.f32.gmra.mxu1 %v5288_v41 }
0x10f6   : > { %v5291_v28 = vmax.f32 %v5242_v39, 0.0  ;;  %v5246_v9 = vadd.f32 %v5245_v27, %v11423_v13 }
0x10f7   : > { %v5247_v15 = vpop.f32.mrf.mxu0 }
0x10f8   : > { %v5248_v63 = vadd.f32 %v5247_v15, %v11425_v29  ;;  %5458 = vmatprep.mubr.f32.mxu1 %v5291_v28  ;;  %v5292_v7 = vmax.f32 %v5246_v9, 0.0 }
0x10f9   : > { %v5251_v19 = vpop.f32.mrf.mxu0  ;;  %5459 = vmatmul.mubr.f32.gmra.mxu1 %v5290_v4 }
0x10fa   : > { %v5293_v16 = vmax.f32 %v5248_v63, 0.0  ;;  %v5252_v49 = vadd.f32 %v5251_v19, %v11423_v13 }
0x10fb   : > { %v5253_v50 = vpop.f32.mrf.mxu0 }
0x10fc   : > { %v5254_v18 = vadd.f32 %v5253_v50, %v11425_v29  ;;  %5463 = vmatprep.mubr.f32.mxu1 %v5293_v16  ;;  %v5294_v17 = vmax.f32 %v5252_v49, 0.0 }
0x10fd   : > { %v5257_v57 = vpop.f32.mrf.mxu0  ;;  %5464 = vmatmul.mubr.f32.gmra.mxu1 %v5292_v7 }
0x10fe   : > { %v5295_v3 = vmax.f32 %v5254_v18, 0.0  ;;  %v5258_v12 = vadd.f32 %v5257_v57, %v11423_v13 }
0x10ff   : > { %v5259_v61 = vpop.f32.mrf.mxu0 }
0x1100   : > { %v5260_v32 = vadd.f32 %v5259_v61, %v11425_v29  ;;  %5468 = vmatprep.mubr.f32.mxu1 %v5295_v3  ;;  %v5296_v24 = vmax.f32 %v5258_v12, 0.0 }
0x1101   : > { %v5263_v35 = vpop.f32.mrf.mxu0  ;;  %5469 = vmatmul.mubr.f32.gmra.mxu1 %v5294_v17 }
0x1102   : > { %v5297_v43 = vmax.f32 %v5260_v32, 0.0  ;;  %v5264_v56 = vadd.f32 %v5263_v35, %v11423_v13 }
0x1103   : > { %v5265_v62 = vpop.f32.mrf.mxu0 }
0x1104   : > { %v5266_v23 = vadd.f32 %v5265_v62, %v11425_v29  ;;  %5473 = vmatprep.mubr.f32.mxu1 %v5297_v43  ;;  %v5298_v44 = vmax.f32 %v5264_v56, 0.0 }
0x1105   : > { %5474 = vmatmul.mubr.f32.gmra.mxu1 %v5296_v24 }
0x1106   : > { %v5299_v14 = vmax.f32 %v5266_v23, 0.0 }
0x1108   : > { %5478 = vmatprep.mubr.f32.mxu1 %v5299_v14 }
0x1109   : > { %5479 = vmatmul.mubr.f32.gmra.mxu1 %v5298_v44 }
0x116e   : > { %v6741_v45 = vpop.f32.mrf.mxu1 }
0x1170   : > { %v6742_v30 = vpop.f32.mrf.mxu1 }
0x1171   : > { %v6743_v0 = vadd.f32 %v6742_v30, %v6741_v45 }
0x1172   : > { %v6744_v38 = vpop.f32.mrf.mxu1 }
0x1173   : > { %v5406_v13 = vadd.f32 %v6743_v0, %v11464_v42 }
0x1174   : > { %v6745_v8 = vpop.f32.mrf.mxu1 }
0x1175   : > { %v6746_v29 = vadd.f32 %v6745_v8, %v6744_v38  ;;  %v11468_v33 = vadd.f32 %v5406_v13, %v11307_v2 }
0x1176   : > { %v6747_v1 = vpop.f32.mrf.mxu1 }
0x1177   : > { %v5411_v54 = vadd.f32 %v6746_v29, %v11464_v42  ;;  %5502 = vadd.xlane.f32.xlu0 %v11468_v33 }
0x1178   : > { %v6748_v48 = vpop.f32.mrf.mxu1 }
0x1179   : > { %v6749_v34 = vadd.f32 %v6748_v48, %v6747_v1  ;;  %v11473_v26 = vadd.f32 %v5411_v54, %v11314_v31 }
0x117a   : > { %v6750_v5 = vpop.f32.mrf.mxu1 }
0x117b   : > { %v5416_v60 = vadd.f32 %v6749_v34, %v11464_v42  ;;  %5504 = vadd.xlane.f32.xlu1 %v11473_v26 }
0x117c   : > { %v6751_v22 = vpop.f32.mrf.mxu1 }
0x117d   : > { %v6752_v59 = vadd.f32 %v6751_v22, %v6750_v5  ;;  %v11478_v2 = vadd.f32 %v5416_v60, %v11321_v25 }
0x117e   : > { %v6753_v41 = vpop.f32.mrf.mxu1 }
0x117f   : > { %v5421_v21 = vadd.f32 %v6752_v59, %v11464_v42  ;;  %5506 = vadd.xlane.f32.xlu0 %v11478_v2 }
0x1180   : > { %v6754_v51 = vpop.f32.mrf.mxu1 }
0x1181   : > { %v6755_v39 = vadd.f32 %v6754_v51, %v6753_v41  ;;  %v11483_v31 = vadd.f32 %v5421_v21, %v11328_v55 }
0x1182   : > { %v6756_v27 = vpop.f32.mrf.mxu1 }
0x1183   : > { %v5426_v28 = vadd.f32 %v6755_v39, %v11464_v42  ;;  %5508 = vadd.xlane.f32.xlu1 %v11483_v31 }
0x1184   : > { %v6757_v4 = vpop.f32.mrf.mxu1 }
0x1185   : > { %v6758_v9 = vadd.f32 %v6757_v4, %v6756_v27  ;;  %v11488_v25 = vadd.f32 %v5426_v28, %v11335_v46 }
0x1186   : > { %v6759_v15 = vpop.f32.mrf.mxu1 }
0x1187   : > { %v5431_v63 = vadd.f32 %v6758_v9, %v11464_v42  ;;  %5510 = vadd.xlane.f32.xlu0 %v11488_v25 }
0x1188   : > { %v6760_v19 = vpop.f32.mrf.mxu1 }
0x1189   : > { %v6761_v16 = vadd.f32 %v6760_v19, %v6759_v15  ;;  %v11493_v55 = vadd.f32 %v5431_v63, %v11342_v40 }
0x118a   : > { %v6762_v7 = vpop.f32.mrf.mxu1 }
0x118b   : > { %v5436_v49 = vadd.f32 %v6761_v16, %v11464_v42  ;;  %5512 = vadd.xlane.f32.xlu1 %v11493_v55 }
0x118c   : > { %v6763_v50 = vpop.f32.mrf.mxu1 }
0x118d   : > { %v6764_v18 = vadd.f32 %v6763_v50, %v6762_v7  ;;  %v11498_v46 = vadd.f32 %v5436_v49, %v11349_v10 }
0x118f   : > { %v5441_v57 = vadd.f32 %v6764_v18, %v11464_v42  ;;  %5514 = vadd.xlane.f32.xlu0 %v11498_v46 }
0x1191   : > { %v11503_v3 = vadd.f32 %v5441_v57, %v11355_v6 }
0x1193   : > { %5516 = vadd.xlane.f32.xlu1 %v11503_v3 }
0x11ad   : > { %v6765_v40 = vpop.f32.mrf.mxu1 }
0x11af   : > { %v6766_v17 = vpop.f32.mrf.mxu1 }
0x11b0   : > { %v6767_v12 = vadd.f32 %v6766_v17, %v6765_v40 }
0x11b1   : > { %v6768_v61 = vpop.f32.mrf.mxu1 }
0x11b2   : > { %v5446_v32 = vadd.f32 %v6767_v12, %v11464_v42 }
0x11b3   : > { %v6769_v35 = vpop.f32.mrf.mxu1 }
0x11b4   : > { %v6770_v43 = vadd.f32 %v6769_v35, %v6768_v61  ;;  %v11508_v10 = vadd.f32 %v5446_v32, %v11363_v52 }
0x11b5   : > { %v6771_v24 = vpop.f32.mrf.mxu1 }
0x11b6   : > { %v5451_v56 = vadd.f32 %v6770_v43, %v11464_v42  ;;  %5518 = vadd.xlane.f32.xlu0 %v11508_v10 }
0x11b7   : > { %v6772_v6 = vpop.f32.mrf.mxu1 }
0x11b8   : > { %v6773_v62 = vadd.f32 %v6772_v6, %v6771_v24  ;;  %v11513_v23 = vadd.f32 %v5451_v56, %v11370_v53 }
0x11b9   : > { %v6774_v14 = vpop.f32.mrf.mxu1 }
0x11ba   : > { %v5456_v44 = vadd.f32 %v6773_v62, %v11464_v42  ;;  %5520 = vadd.xlane.f32.xlu1 %v11513_v23 }
0x11bb   : > { %v6775_v45 = vpop.f32.mrf.mxu1 }
0x11bc   : > { %v6776_v30 = vadd.f32 %v6775_v45, %v6774_v14  ;;  %v11518_v52 = vadd.f32 %v5456_v44, %v11381_v11 }
0x11bd   : > { %v6777_v0 = vpop.f32.mrf.mxu1 }
0x11be   : > { %v5461_v38 = vadd.f32 %v6776_v30, %v11464_v42  ;;  %5522 = vadd.xlane.f32.xlu0 %v11518_v52 }
0x11bf   : > { %v6778_v13 = vpop.f32.mrf.mxu1 }
0x11c0   : > { %v6779_v8 = vadd.f32 %v6778_v13, %v6777_v0  ;;  %v11523_v53 = vadd.f32 %v5461_v38, %v11392_v58 }
0x11c1   : > { %v6780_v29 = vpop.f32.mrf.mxu1 }
0x11c2   : > { %v5466_v1 = vadd.f32 %v6779_v8, %v11464_v42  ;;  %5524 = vadd.xlane.f32.xlu1 %v11523_v53 }
0x11c3   : > { %v6781_v54 = vpop.f32.mrf.mxu1 }
0x11c4   : > { %v6782_v48 = vadd.f32 %v6781_v54, %v6780_v29  ;;  %v11528_v11 = vadd.f32 %v5466_v1, %v11399_v37 }
0x11c5   : > { %v6783_v34 = vpop.f32.mrf.mxu1 }
0x11c6   : > { %v5471_v5 = vadd.f32 %v6782_v48, %v11464_v42  ;;  %5526 = vadd.xlane.f32.xlu0 %v11528_v11 }
0x11c7   : > { %v6784_v60 = vpop.f32.mrf.mxu1 }
0x11c8   : > { %v6785_v22 = vadd.f32 %v6784_v60, %v6783_v34  ;;  %v11533_v58 = vadd.f32 %v5471_v5, %v11406_v36 }
0x11c9   : > { %v6786_v59 = vpop.f32.mrf.mxu1 }
0x11ca   : > { %v5476_v41 = vadd.f32 %v6785_v22, %v11464_v42  ;;  %5528 = vadd.xlane.f32.xlu1 %v11533_v58 }
0x11cb   : > { %v6787_v21 = vpop.f32.mrf.mxu1 }
0x11cc   : > { %v6788_v51 = vadd.f32 %v6787_v21, %v6786_v59  ;;  %v11538_v37 = vadd.f32 %v5476_v41, %v11413_v47 }
0x11ce   : > { %v5481_v39 = vadd.f32 %v6788_v51, %v11464_v42  ;;  %5530 = vadd.xlane.f32.xlu0 %v11538_v37 }
0x11d0   : > { %v11543_v27 = vadd.f32 %v5481_v39, %v11419_v20 }
0x11d2   : > { %5532 = vadd.xlane.f32.xlu1 %v11543_v27 }
0x1200   : > { %v5503_v36 = vpop.xlane.xlu0 %5502 }
0x1201   : > { %v5534_v28 = vmul.f32 0.0078125, %v5503_v36 }
0x1203   : > { %v11547_v4 = vsub.f32 %v11468_v33, %v5534_v28 }
0x1204   : > { %v5505_v9 = vpop.xlane.xlu1 %5504 }
0x1205   : > { %v5535_v15 = vmul.f32 0.0078125, %v5505_v9  ;;  %v5566_v47 = vmul.f32 %v11547_v4, %v11547_v4 }
0x1207   : > { %v11552_v63 = vsub.f32 %v11473_v26, %v5535_v15  ;;  %5582 = vadd.xlane.f32.xlu0 %v5566_v47 }
0x1208   : > { %v5507_v42 = vpop.xlane.xlu0 %5506 }
0x1209   : > { %v5536_v19 = vmul.f32 0.0078125, %v5507_v42  ;;  %v5567_v20 = vmul.f32 %v11552_v63, %v11552_v63 }
0x120b   : > { %v11557_v16 = vsub.f32 %v11478_v2, %v5536_v19  ;;  %5584 = vadd.xlane.f32.xlu1 %v5567_v20 }
0x120c   : > { %v5509_v33 = vpop.xlane.xlu1 %5508 }
0x120d   : > { %v5537_v7 = vmul.f32 0.0078125, %v5509_v33  ;;  %v5568_v49 = vmul.f32 %v11557_v16, %v11557_v16 }
0x120f   : > { %v11562_v50 = vsub.f32 %v11483_v31, %v5537_v7  ;;  %5586 = vadd.xlane.f32.xlu0 %v5568_v49 }
0x1210   : > { %v5511_v26 = vpop.xlane.xlu0 %5510 }
0x1211   : > { %v5538_v18 = vmul.f32 0.0078125, %v5511_v26  ;;  %v5569_v57 = vmul.f32 %v11562_v50, %v11562_v50 }
0x1213   : > { %v11567_v40 = vsub.f32 %v11488_v25, %v5538_v18  ;;  %5588 = vadd.xlane.f32.xlu1 %v5569_v57 }
0x1214   : > { %v5513_v2 = vpop.xlane.xlu1 %5512 }
0x1215   : > { %v5539_v17 = vmul.f32 0.0078125, %v5513_v2  ;;  %v5570_v12 = vmul.f32 %v11567_v40, %v11567_v40 }
0x1217   : > { %v11572_v61 = vsub.f32 %v11493_v55, %v5539_v17  ;;  %5590 = vadd.xlane.f32.xlu0 %v5570_v12  ;;  %v11631_v17 = vld [vmem:[%s1076_s28] ss:$0 sm:$0xff]  ;;  %s12336_s28 = sld [smem:[#allocation23_spill]] }
0x1218   : > { %v5515_v31 = vpop.xlane.xlu0 %5514 }
0x1219   : > { %v5540_v32 = vmul.f32 0.0078125, %v5515_v31  ;;  %v5571_v35 = vmul.f32 %v11572_v61, %v11572_v61 }
0x121b   : > { %v11577_v43 = vsub.f32 %v11498_v46, %v5540_v32  ;;  %5592 = vadd.xlane.f32.xlu1 %v5571_v35  ;;  %v11639_v32 = vld [vmem:[%s1079_s13] ss:$0 sm:$0xff] }
0x121c   : > { %v5517_v25 = vpop.xlane.xlu1 %5516 }
0x121d   : > { %v5541_v24 = vmul.f32 0.0078125, %v5517_v25  ;;  %v5572_v56 = vmul.f32 %v11577_v43, %v11577_v43  ;;  %p6286_p8 = scmp.ne.s32.totalorder %s12336_s28, 1 }
0x121f   : > { %v11582_v6 = vsub.f32 %v11503_v3, %v5541_v24  ;;  %5594 = vadd.xlane.f32.xlu0 %v5572_v56 }
0x1221   : > { %v5573_v55 = vmul.f32 %v11582_v6, %v11582_v6 }
0x1223   : > { %5596 = vadd.xlane.f32.xlu1 %v5573_v55 }
0x123f   : > { %v5519_v62 = vpop.xlane.xlu0 %5518 }
0x1240   : > { %v5542_v14 = vmul.f32 0.0078125, %v5519_v62 }
0x1242   : > { %v11587_v44 = vsub.f32 %v11508_v10, %v5542_v14 }
0x1243   : > { %v5521_v46 = vpop.xlane.xlu1 %5520 }
0x1244   : > { %v5543_v45 = vmul.f32 0.0078125, %v5521_v46  ;;  %v5574_v30 = vmul.f32 %v11587_v44, %v11587_v44 }
0x1246   : > { %v11592_v0 = vsub.f32 %v11513_v23, %v5543_v45  ;;  %5598 = vadd.xlane.f32.xlu0 %v5574_v30 }
0x1247   : > { %v5523_v3 = vpop.xlane.xlu0 %5522 }
0x1248   : > { %v5544_v38 = vmul.f32 0.0078125, %v5523_v3  ;;  %v5575_v13 = vmul.f32 %v11592_v0, %v11592_v0 }
0x124a   : > { %v11597_v8 = vsub.f32 %v11518_v52, %v5544_v38  ;;  %5600 = vadd.xlane.f32.xlu1 %v5575_v13 }
0x124b   : > { %v5525_v10 = vpop.xlane.xlu1 %5524 }
0x124c   : > { %v5545_v29 = vmul.f32 0.0078125, %v5525_v10  ;;  %v5576_v1 = vmul.f32 %v11597_v8, %v11597_v8 }
0x124e   : > { %v11602_v54 = vsub.f32 %v11523_v53, %v5545_v29  ;;  %5602 = vadd.xlane.f32.xlu0 %v5576_v1 }
0x124f   : > { %v5527_v23 = vpop.xlane.xlu0 %5526 }
0x1250   : > { %v5546_v48 = vmul.f32 0.0078125, %v5527_v23  ;;  %v5577_v34 = vmul.f32 %v11602_v54, %v11602_v54 }
0x1252   : > { %v11607_v5 = vsub.f32 %v11528_v11, %v5546_v48  ;;  %5604 = vadd.xlane.f32.xlu1 %v5577_v34 }
0x1253   : > { %v5529_v52 = vpop.xlane.xlu1 %5528 }
0x1254   : > { %v5547_v60 = vmul.f32 0.0078125, %v5529_v52  ;;  %v5578_v22 = vmul.f32 %v11607_v5, %v11607_v5 }
0x1256   : > { %v11612_v59 = vsub.f32 %v11533_v58, %v5547_v60  ;;  %5606 = vadd.xlane.f32.xlu0 %v5578_v22 }
0x1257   : > { %v5531_v53 = vpop.xlane.xlu0 %5530 }
0x1258   : > { %v5548_v41 = vmul.f32 0.0078125, %v5531_v53  ;;  %v5579_v21 = vmul.f32 %v11612_v59, %v11612_v59 }
0x125a   : > { %v11617_v51 = vsub.f32 %v11538_v37, %v5548_v41  ;;  %5608 = vadd.xlane.f32.xlu1 %v5579_v21 }
0x125b   : > { %v5533_v11 = vpop.xlane.xlu1 %5532 }
0x125c   : > { %v5549_v39 = vmul.f32 0.0078125, %v5533_v11  ;;  %v5580_v36 = vmul.f32 %v11617_v51, %v11617_v51 }
0x125e   : > { %v11622_v28 = vsub.f32 %v11543_v27, %v5549_v39  ;;  %5610 = vadd.xlane.f32.xlu0 %v5580_v36 }
0x1260   : > { %v5581_v58 = vmul.f32 %v11622_v28, %v11622_v28 }
0x1262   : > { %5612 = vadd.xlane.f32.xlu1 %v5581_v58 }
0x1290   : > { %v5583_v9 = vpop.xlane.xlu0 %5582 }
0x1291   : > { %v5614_v15 = vmul.f32 0.0078125, %v5583_v9 }
0x1293   : > { %v5630_v47 = vadd.f32 1e-05, %v5614_v15 }
0x1294   : > { %v5585_v42 = vpop.xlane.xlu1 %5584 }
0x1295   : > { %8083 = vrsqrt.f32 %v5630_v47  ;;  %v5615_v37 = vmul.f32 0.0078125, %v5585_v42 }
0x1297   : > { %v5631_v19 = vadd.f32 1e-05, %v5615_v37 }
0x1298   : > { %v5587_v20 = vpop.xlane.xlu0 %5586 }
0x1299   : > { %8085 = vrsqrt.f32 %v5631_v19  ;;  %v5616_v33 = vmul.f32 0.0078125, %v5587_v20 }
0x129b   : > { %v5632_v7 = vadd.f32 1e-05, %v5616_v33 }
0x129c   : > { %v5589_v27 = vpop.xlane.xlu1 %5588 }
0x129d   : > { %8087 = vrsqrt.f32 %v5632_v7  ;;  %v5617_v49 = vmul.f32 0.0078125, %v5589_v27 }
0x129f   : > { %v5633_v26 = vadd.f32 1e-05, %v5617_v49 }
0x12a0   : > { %v5591_v18 = vpop.xlane.xlu0 %5590 }
0x12a1   : > { %8089 = vrsqrt.f32 %v5633_v26  ;;  %v5618_v57 = vmul.f32 0.0078125, %v5591_v18 }
0x12a2   : > { %v8084_v2 = vpop.eup %8083 }
0x12a3   : > { %v5662_v12 = vmul.f32 %v8084_v2, %v11547_v4  ;;  %v5634_v31 = vadd.f32 1e-05, %v5618_v57 }
0x12a4   : > { %v5593_v35 = vpop.xlane.xlu1 %5592 }
0x12a5   : > { %v5684_v25 = vmul.f32 %v11631_v17, %v5662_v12  ;;  %8091 = vrsqrt.f32 %v5634_v31  ;;  %v5619_v24 = vmul.f32 0.0078125, %v5593_v35 }
0x12a6   : > { %v8086_v56 = vpop.eup %8085 }
0x12a7   : > { %v11643_v55 = vadd.f32 %v11639_v32, %v5684_v25  ;;  %v5663_v62 = vmul.f32 %v8086_v56, %v11552_v63  ;;  %v5635_v14 = vadd.f32 1e-05, %v5619_v24 }
0x12a8   : > { %v5595_v4 = vpop.xlane.xlu0 %5594 }
0x12a9   : > { %5722 = vst [vmem:[#allocation2 + $0x30] sm:$0xff] %v11643_v55  ;;  %v5685_v46 = vmul.f32 %v11631_v17, %v5663_v62  ;;  %8093 = vrsqrt.f32 %v5635_v14  ;;  %v5620_v45 = vmul.f32 0.0078125, %v5595_v4 }
0x12aa   : > { %v8088_v30 = vpop.eup %8087 }
0x12ab   : > { %v11649_v3 = vadd.f32 %v11639_v32, %v5685_v46  ;;  %v5664_v38 = vmul.f32 %v8088_v30, %v11557_v16  ;;  %v5636_v13 = vadd.f32 1e-05, %v5620_v45 }
0x12ac   : > { %v5597_v10 = vpop.xlane.xlu1 %5596 }
0x12ad   : > { %5723 = vst [vmem:[#allocation2] sm:$0xff] %v11649_v3  ;;  %v5686_v63 = vmul.f32 %v11631_v17, %v5664_v38  ;;  %8095 = vrsqrt.f32 %v5636_v13  ;;  %v5621_v29 = vmul.f32 0.0078125, %v5597_v10 }
0x12ae   : > { %v8090_v1 = vpop.eup %8089 }
0x12af   : > { %v11655_v23 = vadd.f32 %v11639_v32, %v5686_v63  ;;  %v5665_v48 = vmul.f32 %v8090_v1, %v11562_v50  ;;  %v5637_v34 = vadd.f32 1e-05, %v5621_v29 }
0x12b1   : > { %5724 = vst [vmem:[#allocation2 + $0x58] sm:$0xff] %v11655_v23  ;;  %v5687_v52 = vmul.f32 %v11631_v17, %v5665_v48  ;;  %8097 = vrsqrt.f32 %v5637_v34 }
0x12b2   : > { %v8092_v16 = vpop.eup %8091 }
0x12b3   : > { %v11661_v60 = vadd.f32 %v11639_v32, %v5687_v52  ;;  %v5666_v22 = vmul.f32 %v8092_v16, %v11567_v40 }
0x12b5   : > { %5725 = vst [vmem:[#allocation2 + $0x18] sm:$0xff] %v11661_v60  ;;  %v5688_v53 = vmul.f32 %v11631_v17, %v5666_v22 }
0x12b6   : > { %v8094_v41 = vpop.eup %8093 }
0x12b7   : > { %v11667_v21 = vadd.f32 %v11639_v32, %v5688_v53  ;;  %v5667_v50 = vmul.f32 %v8094_v41, %v11572_v61 }
0x12b9   : > { %5726 = vst [vmem:[#allocation2 + $0x50] sm:$0xff] %v11667_v21  ;;  %v5689_v11 = vmul.f32 %v11631_v17, %v5667_v50 }
0x12ba   : > { %v8096_v39 = vpop.eup %8095 }
0x12bb   : > { %v11673_v36 = vadd.f32 %v11639_v32, %v5689_v11  ;;  %v5668_v40 = vmul.f32 %v8096_v39, %v11577_v43 }
0x12bd   : > { %5727 = vst [vmem:[#allocation2 + $0x68] sm:$0xff] %v11673_v36  ;;  %v5690_v58 = vmul.f32 %v11631_v17, %v5668_v40 }
0x12be   : > { %v8098_v9 = vpop.eup %8097 }
0x12bf   : > { %v11679_v15 = vadd.f32 %v11639_v32, %v5690_v58  ;;  %v5669_v61 = vmul.f32 %v8098_v9, %v11582_v6 }
0x12c1   : > { %5728 = vst [vmem:[#allocation2 + $0x8] sm:$0xff] %v11679_v15  ;;  %v5691_v47 = vmul.f32 %v11631_v17, %v5669_v61 }
0x12c3   : > { %v11685_v42 = vadd.f32 %v11639_v32, %v5691_v47 }
0x12c5   : > { %5729 = vst [vmem:[#allocation2 + $0x48] sm:$0xff] %v11685_v42 }
0x12cf   : > { %v5599_v43 = vpop.xlane.xlu0 %5598 }
0x12d0   : > { %v5622_v37 = vmul.f32 0.0078125, %v5599_v43 }
0x12d2   : > { %v5638_v19 = vadd.f32 1e-05, %v5622_v37 }
0x12d3   : > { %v5601_v20 = vpop.xlane.xlu1 %5600 }
0x12d4   : > { %8099 = vrsqrt.f32 %v5638_v19  ;;  %v5623_v33 = vmul.f32 0.0078125, %v5601_v20 }
0x12d6   : > { %v5639_v7 = vadd.f32 1e-05, %v5623_v33 }
0x12d7   : > { %v5603_v27 = vpop.xlane.xlu0 %5602 }
0x12d8   : > { %8101 = vrsqrt.f32 %v5639_v7  ;;  %v5624_v49 = vmul.f32 0.0078125, %v5603_v27 }
0x12da   : > { %v5640_v6 = vadd.f32 1e-05, %v5624_v49 }
0x12db   : > { %v5605_v26 = vpop.xlane.xlu1 %5604 }
0x12dc   : > { %8103 = vrsqrt.f32 %v5640_v6  ;;  %v5625_v18 = vmul.f32 0.0078125, %v5605_v26 }
0x12de   : > { %v5641_v57 = vadd.f32 1e-05, %v5625_v18 }
0x12df   : > { %v5607_v2 = vpop.xlane.xlu0 %5606 }
0x12e0   : > { %8105 = vrsqrt.f32 %v5641_v57  ;;  %v5626_v12 = vmul.f32 0.0078125, %v5607_v2 }
0x12e1   : > { %v8100_v31 = vpop.eup %8099 }
0x12e2   : > { %v5670_v35 = vmul.f32 %v8100_v31, %v11587_v44  ;;  %v5642_v25 = vadd.f32 1e-05, %v5626_v12 }
0x12e3   : > { %v5609_v24 = vpop.xlane.xlu1 %5608 }
0x12e4   : > { %v5692_v56 = vmul.f32 %v11631_v17, %v5670_v35  ;;  %8107 = vrsqrt.f32 %v5642_v25  ;;  %v5627_v62 = vmul.f32 0.0078125, %v5609_v24 }
0x12e5   : > { %v8102_v14 = vpop.eup %8101 }
0x12e6   : > { %v5714_v4 = vadd.f32 %v11639_v32, %v5692_v56  ;;  %v5671_v46 = vmul.f32 %v8102_v14, %v11592_v0  ;;  %v5643_v45 = vadd.f32 1e-05, %v5627_v62 }
0x12e7   : > { %v5611_v30 = vpop.xlane.xlu0 %5610 }
0x12e8   : > { %5730 = vst [vmem:[#allocation2 + $0x40] sm:$0xff] %v5714_v4  ;;  %v5693_v38 = vmul.f32 %v11631_v17, %v5671_v46  ;;  %8109 = vrsqrt.f32 %v5643_v45  ;;  %v5628_v13 = vmul.f32 0.0078125, %v5611_v30 }
0x12e9   : > { %v8104_v10 = vpop.eup %8103 }
0x12ea   : > { %v5715_v44 = vadd.f32 %v11639_v32, %v5693_v38  ;;  %v5672_v63 = vmul.f32 %v8104_v10, %v11597_v8  ;;  %v5644_v29 = vadd.f32 1e-05, %v5628_v13 }
0x12eb   : > { %v5613_v1 = vpop.xlane.xlu1 %5612 }
0x12ec   : > { %5731 = vst [vmem:[#allocation2 + $0x20] sm:$0xff] %v5715_v44  ;;  %v5694_v48 = vmul.f32 %v11631_v17, %v5672_v63  ;;  %8111 = vrsqrt.f32 %v5644_v29  ;;  %v5629_v34 = vmul.f32 0.0078125, %v5613_v1 }
0x12ed   : > { %v8106_v0 = vpop.eup %8105 }
0x12ee   : > { %v5716_v52 = vadd.f32 %v11639_v32, %v5694_v48  ;;  %v5673_v16 = vmul.f32 %v8106_v0, %v11602_v54  ;;  %v5645_v22 = vadd.f32 1e-05, %v5629_v34 }
0x12f0   : > { %5732 = vst [vmem:[#allocation2 + $0x10] sm:$0xff] %v5716_v52  ;;  %v5695_v53 = vmul.f32 %v11631_v17, %v5673_v16  ;;  %8113 = vrsqrt.f32 %v5645_v22 }
0x12f1   : > { %v8108_v41 = vpop.eup %8107 }
0x12f2   : > { %v5717_v8 = vadd.f32 %v11639_v32, %v5695_v53  ;;  %v5674_v50 = vmul.f32 %v8108_v41, %v11607_v5 }
0x12f4   : > { %5733 = vst [vmem:[#allocation2 + $0x38] sm:$0xff] %v5717_v8  ;;  %v5696_v11 = vmul.f32 %v11631_v17, %v5674_v50 }
0x12f5   : > { %v8110_v39 = vpop.eup %8109 }
0x12f6   : > { %v5718_v40 = vadd.f32 %v11639_v32, %v5696_v11  ;;  %v5675_v58 = vmul.f32 %v8110_v39, %v11612_v59 }
0x12f8   : > { %5734 = vst [vmem:[#allocation2 + $0x60] sm:$0xff] %v5718_v40  ;;  %v5697_v54 = vmul.f32 %v11631_v17, %v5675_v58 }
0x12f9   : > { %v8112_v9 = vpop.eup %8111 }
0x12fa   : > { %v5719_v61 = vadd.f32 %v11639_v32, %v5697_v54  ;;  %v5676_v47 = vmul.f32 %v8112_v9, %v11617_v51 }
0x12fc   : > { %5735 = vst [vmem:[#allocation2 + $0x70] sm:$0xff] %v5719_v61  ;;  %v5698_v43 = vmul.f32 %v11631_v17, %v5676_v47 }
0x12fd   : > { %v8114_v5 = vpop.eup %8113 }
0x12fe   : > { %v5720_v37 = vadd.f32 %v11639_v32, %v5698_v43  ;;  %v5677_v19 = vmul.f32 %v8114_v5, %v11622_v28 }
0x1300   : > { %5736 = vst [vmem:[#allocation2 + $0x78] sm:$0xff] %v5720_v37  ;;  %v5699_v20 = vmul.f32 %v11631_v17, %v5677_v19  ;;  %5741 = sbr.rel (%p6286_p8) target bundleno = 4877 (0x130d), region = 144 }
0x1302   : > { %v5721_v59 = vadd.f32 %v11639_v32, %v5699_v20 }
0x1304   : > { %5737 = vst [vmem:[#allocation2 + $0x28] sm:$0xff] %v5721_v59 }
0x1305   : > { %5742 = vst [vmem:[%s8947_s11] sm:$0xff] %v11643_v55  ;;  %5743 = vst [vmem:[%s8947_s11 + $0x8] sm:$0xff] %v11649_v3 }
0x1306   : > { %5744 = vst [vmem:[%s8947_s11 + $0x10] sm:$0xff] %v11655_v23  ;;  %5745 = vst [vmem:[%s8947_s11 + $0x18] sm:$0xff] %v11661_v60 }
0x1307   : > { %5746 = vst [vmem:[%s8947_s11 + $0x20] sm:$0xff] %v11667_v21  ;;  %5747 = vst [vmem:[%s8947_s11 + $0x28] sm:$0xff] %v11673_v36 }
0x1308   : > { %5748 = vst [vmem:[%s8947_s11 + $0x30] sm:$0xff] %v11679_v15  ;;  %5749 = vst [vmem:[%s8947_s11 + $0x38] sm:$0xff] %v11685_v42 }
0x1309   : > { %5750 = vst [vmem:[%s8947_s11 + $0x40] sm:$0xff] %v5714_v4  ;;  %5751 = vst [vmem:[%s8947_s11 + $0x48] sm:$0xff] %v5715_v44 }
0x130a   : > { %5752 = vst [vmem:[%s8947_s11 + $0x50] sm:$0xff] %v5716_v52  ;;  %5753 = vst [vmem:[%s8947_s11 + $0x58] sm:$0xff] %v5717_v8 }
0x130b   : > { %5754 = vst [vmem:[%s8947_s11 + $0x60] sm:$0xff] %v5718_v40  ;;  %5755 = vst [vmem:[%s8947_s11 + $0x68] sm:$0xff] %v5719_v61 }
0x130c   : > { %5756 = vst [vmem:[%s8947_s11 + $0x70] sm:$0xff] %v5720_v37  ;;  %5757 = vst [vmem:[%s8947_s11 + $0x78] sm:$0xff] %v5721_v59 }
0x130d PF: > { %s12337_s19 = sld [smem:[#allocation24_spill]]  ;;  %s5772_s23 = sshll.u32 %s8947_s11, 4  ;;  %s11744_s23 = int_to_ptr.vmem [resolvable:$true] %s5772_s23 }
0x130e   : > { %s12338_s13 = sld [smem:[#allocation20_spill]]  ;;  %s8351_s25 = scalar_lea.vmem %s11744_s23, 2048 }
0x130f   : > { %s12339_s3 = sld [smem:[#allocation29_spill]]  ;;  %p8352_p13 = scmp.ne.s32.totalorder %s11744_s23, %s8351_s25 }
0x1310   : > { %s12340_s18 = sld [smem:[#allocation120_spill]]  ;;  %s8497_s24 = smov [#allocation14]  }
0x1311   : > { %s8355_s7 = sshll.u32 %s8497_s24, 4  ;;  %s8356_s7 = int_to_ptr.vmem [resolvable:$false] %s8355_s7 }
0x1312   : > { %s8357_s12 = scalar_lea.vmem %s8356_s7, 4096  ;;  %p8358_p10 = scmp.lt.s32.totalorder %s11744_s23, %s8356_s7 }
0x1313   : > { %s6300_s27 = sshll.u32 %s12337_s19, 11  ;;  %p8359_p12 = scmp.lt.s32.totalorder %s8357_s12, %s8351_s25 }
0x1314   : > { %s12341_s10 = sand.u32 1, %s12338_s13  }
0x1315   : > { %s11748_s29 = scalar_lea.sflag [#allocation5], %s12341_s10  ;;  %p12342_p1 = scmp.ne.s32.totalorder %s12339_s3, 0 }
0x1316   : > { %s11741_s16 = scalar_lea.hbm %s12340_s18, %s6300_s27  ;;  %p8360_p5 = por %p8359_p12, %p8358_p10 }
0x1317   : > { %p8353_p3 = pnand %p8352_p13, %p12342_p1 }
0x1319   : > { %p8354_p4 = pneg %p8353_p3 }
0x131b   : > { %p8361_p2 = pnand %p8360_p5, %p8354_p4 }
0x131d   : > { %8364 = shalt.err (!%p8361_p2)
}
0x131e   : > { %s8365_s11 = scalar_lea.hbm %s11741_s16, 2048  ;;  %s8369_s6 = scalar_lea.hbm %s12340_s18, 4096 }
0x131f   : > { %p8366_p9 = scmp.ne.s32.totalorder %s11741_s16, %s8365_s11  ;;  %p8370_p7 = scmp.lt.s32.totalorder %s11741_s16, %s12340_s18 }
0x1320   : > { %p8371_p6 = scmp.lt.s32.totalorder %s8369_s6, %s8365_s11 }
0x1321   : > { %p8367_p11 = pnand %p8366_p9, %p12342_p1 }
0x1322   : > { %p8372_p8 = por %p8371_p6, %p8370_p7 }
0x1323   : > { %p8368_p0 = pneg %p8367_p11 }
0x1325   : > { %p8373_p13 = pnand %p8372_p8, %p8368_p0 }
0x1327   : > { %8376 = shalt.err (!%p8373_p13)
}
0x1328   : > { %s8498_s1 = smov 128   ;;  %s8499_s0 = smov 8  }
0x1329   : > { %7537 = dma.vmem_to_hbm [thread:$0]  (%p12342_p1), %s11744_s23, 2048, %s11741_s16, %s11748_s29, %s8498_s1, %s8498_s1, %s8499_s0  }
0x132a PF: > { %s12343_s15 = sld [smem:[#allocation27_spill]] }
0x132b   : > { %s12344_s17 = sld [smem:[#allocation19_spill]] }
0x132c   : > { %s12345_s30 = sld [smem:[#allocation30_spill]] }
0x1330   : > { %p7574_p3 = scmp.ge.s32.totalorder %s12343_s15, 2 }
0x1331   : > { %s5787_s9 = sand.u32 1, %s12344_s17  }
0x1332   : > { %p12346_p4 = scmp.ne.s32.totalorder %s12345_s30, 0  ;;  %s5788_s14 = scalar_lea.sflag [#allocation5], %s5787_s9 }
0x1334   : > { %p7566_p10 = pnand %p7574_p3, %p12346_p4 }
0x1336   : > { %p7567_p12 = pneg %p7566_p10 }
0x1338   : > { %8434 = dma.done.wait (%p7567_p12), %s5788_s14, 2048  }
0x1339   : > { %8436 = vsyncadd (%p7567_p12), %s5788_s14, 4294965248  ;;  %s36_s5 = sadd.s32 1, %s12343_s15   ;;  %s12347_s2 = sld [smem:[#allocation20_spill]] }
0x133a   : > { %p33_p5 = scmp.ge.s32.totalorder %s36_s5, 6   ;;  %s12348_s28 = sld [smem:[#allocation34_spill]] }
0x133b   : > { %s12349_s27 = sld [smem:[#allocation21_spill]]  ;;  %s12356_s25 = smov %s8447_s26 }
0x133c   : > { %s12350_s3 = sld [smem:[#allocation22_spill]] }
0x133d   : > { %s12351_s19 = sld [smem:[#allocation33_spill]] }
0x133e   : > { %s12352_s29 = sld [smem:[#allocation25_spill]] }
0x133f   : > { %s12353_s0 = sld [smem:[#allocation26_spill]]  ;;  %35 = sbr.rel (!%p33_p5) target bundleno = 32 (0x20), region = 255 }
0x1340   : > { %s12354_s4 = sld [smem:[#allocation31_spill]]  ;;  %s12357_s26 = smov %s12348_s28 }
0x1341   : > { %s12355_s30 = sld [smem:[#allocation32_spill]] }
0x1343   : > { %s12358_s28 = smov %s12351_s19 }
0x1344   :  { %5793 = vsyncpa [#allocation4], 1 }
0x1345   :  { %5795 = vsyncpa [#allocation4 + $0x1], 1 }
0x1346   :  { %5796 = vsyncpa [#allocation7], 1 }
0x1347   :  { %5797 = vsyncpa [#allocation5], 1 }
0x1348   :  { %5799 = vsyncpa [#allocation5 + $0x1], 1 }

</bundles_post_ra>
